<compile_context>
chip_gen: v5e
topology: v5e:2x2
jax: 0.10.0
libtpu: 0.0.40
codegen_flags: <defaults>
</compile_context>

<pallas_src>
import numpy as np
import jax
import jax.numpy as jnp
from jax.experimental import pallas as pl
from jax.experimental.pallas import tpu as pltpu

EPS = 1e-5  # PyTorch BatchNorm2d default eps

# tap pairing used for the K=256 conv dots (pair 4 is the lone 9th tap)
TAP_PAIRS = ((0, 1), (2, 3), (4, 5), (6, 7), (8,))


# ------------------------------ static geometry ------------------------------

def conv_geom(B, hin, win, stride):
    """Geometry for a 3x3, pad=1 conv whose input is (B, hin, win, C)."""
    hp, wp = hin + 2, win + 2
    L = B * hp * wp                       # rows of the zero-padded flat input
    lsl = L - (2 * wp + 2)                # rows of the "full" stride-1 tap slice
    ho = (hin + 2 - 3) // stride + 1
    wo = (win + 2 - 3) // stride + 1
    return dict(hp=hp, wp=wp, L=L, lsl=lsl, ho=ho, wo=wo, stride=stride)


def build_scatter(B, g_in, g_out):
    """0/1 matrix: dense layer-1 output rows (b, ho, wo) -> next layer's
    zero-padded flat activation rows (re-padding only, stride already applied
    by the wrapper-side im2col)."""
    sel = np.zeros((g_out['L'], B * g_in['ho'] * g_in['wo']), np.float32)
    for b in range(B):
        for ho in range(g_in['ho']):
            for wo in range(g_in['wo']):
                row = b * g_out['hp'] * g_out['wp'] + (ho + 1) * g_out['wp'] + (wo + 1)
                col = (b * g_in['ho'] + ho) * g_in['wo'] + wo
                sel[row, col] = 1.0
    return sel


def build_selector(B, g_in, g_out):
    """0/1 matrix: full stride-1 conv rows (g_in.lsl) -> next layer's
    zero-padded flat rows (g_out.L), applying the stride and dropping garbage
    rows (windows that straddle padding / batch edges)."""
    sel = np.zeros((g_out['L'], g_in['lsl']), np.float32)
    s = g_in['stride']
    for b in range(B):
        for ho in range(g_in['ho']):
            for wo in range(g_in['wo']):
                row = b * g_out['hp'] * g_out['wp'] + (ho + 1) * g_out['wp'] + (wo + 1)
                col = b * g_in['hp'] * g_in['wp'] + (s * ho) * g_in['wp'] + (s * wo)
                sel[row, col] = 1.0
    return sel


def build_pool(B, g):
    """0/1 global sum-pool matrix over the encoder's stride-1 output rows.
    (The 1/(ho*wo) mean scale is folded into hw1 so this is exact in bf16.)"""
    pool = np.zeros((B, g['lsl']), np.float32)
    for b in range(B):
        for ho in range(g['ho']):
            for wo in range(g['wo']):
                pool[b, b * g['hp'] * g['wp'] + ho * g['wp'] + wo] = 1.0
    return pool


def build_plan(B, C, H, W):
    g1 = conv_geom(B, H, W, 2)
    g2 = conv_geom(B, g1['ho'], g1['wo'], 2)
    g3 = conv_geom(B, g2['ho'], g2['wo'], 2)
    ge = conv_geom(B, g3['ho'], g3['wo'], 1)
    return dict(B=B, C=C, geoms=(g1, g2, g3, ge),
                sel1=build_scatter(B, g1, g2),
                sel2=build_selector(B, g2, g3),
                sel3=build_selector(B, g3, ge),
                pool=build_pool(B, ge))


# ------------------------------- Pallas kernel --------------------------------

def make_kernel(plan):
    g1, g2, g3, ge = plan['geoms']

    def conv3x3(src_ref, w_ref, shift_ref, g):
        # src_ref: (L, 128) bf16 zero-padded flat activation in VMEM.
        # Taps paired along K (lane concat) -> 4 K=256 dots + 1 K=128 dot.
        wp, lsl = g['wp'], g['lsl']
        offs = tuple(kh * wp + kw for kh in range(3) for kw in range(3))

        def tap(t):
            return src_ref[offs[t]:offs[t] + lsl, :]

        acc = None
        for p in range(4):
            lhs = jnp.concatenate([tap(2 * p), tap(2 * p + 1)], axis=1)   # (lsl, 256)
            d = jnp.dot(lhs, w_ref[p], preferred_element_type=jnp.float32)
            acc = d if acc is None else acc + d
        acc = acc + jnp.dot(tap(8), w_ref[4][:128, :],
                            preferred_element_type=jnp.float32)
        # BN scale already folded into w; only f32 shift + ReLU here.
        return jnp.maximum(acc + shift_ref[...], 0.0).astype(jnp.bfloat16)

    def kernel(xcols_ref, w1_ref, s1_ref, sel1_ref,
               w2_ref, s2_ref, sel2_ref,
               s3_ref, sel3_ref, se_ref, pool_ref,
               hb1_ref, hw2_ref, hb2_ref,
               w3_hbm, we_hbm, hw1_hbm,
               out_ref,
               a1_ref, a2_ref, a3_ref,
               w3_vmem, we_vmem, hw1_vmem, dma_sem):
        # Stream the late-use constants (~1.2 MB) while layers 1/2 compute.
        cp_w3 = pltpu.make_async_copy(w3_hbm, w3_vmem, dma_sem.at[0])
        cp_we = pltpu.make_async_copy(we_hbm, we_vmem, dma_sem.at[1])
        cp_hw = pltpu.make_async_copy(hw1_hbm, hw1_vmem, dma_sem.at[2])
        cp_w3.start(); cp_we.start(); cp_hw.start()

        # Layer 1: one K = 9*Cin matmul over the wrapper-built stride-2 im2col.
        h1 = jnp.dot(xcols_ref[...], w1_ref[...], preferred_element_type=jnp.float32)
        h1 = jnp.maximum(h1 + s1_ref[...], 0.0).astype(jnp.bfloat16)     # (B*ho*wo, 128)
        # Scatter into layer-2's zero-padded flat layout (small 0/1 matmul).
        a1_ref[...] = jnp.dot(sel1_ref[...], h1,
                              preferred_element_type=jnp.float32).astype(jnp.bfloat16)

        # Layer 2 (stride 2)
        h2 = conv3x3(a1_ref, w2_ref, s2_ref, g2)
        cp_w3.wait()
        a2_ref[...] = jnp.dot(sel2_ref[...], h2,
                              preferred_element_type=jnp.float32).astype(jnp.bfloat16)

        # Layer 3 (stride 2)
        h3 = conv3x3(a2_ref, w3_vmem, s3_ref, g3)
        cp_we.wait()
        a3_ref[...] = jnp.dot(sel3_ref[...], h3,
                              preferred_element_type=jnp.float32).astype(jnp.bfloat16)

        # Fused block|ball encoder conv (Cout = 128 + 128 = 256), stride 1.
        he = conv3x3(a3_ref, we_vmem, se_ref, ge)

        # Global sum-pool (0/1 matmul); 1/(ho*wo) mean scale is folded into hw1.
        pooled = jnp.dot(pool_ref[...], he, preferred_element_type=jnp.float32)

        cp_hw.wait()
        # Fused heads: block-diagonal (256,512) and (512,4) matmuls.
        hid = jnp.maximum(
            jnp.dot(pooled.astype(jnp.bfloat16), hw1_vmem[...],
                    preferred_element_type=jnp.float32) + hb1_ref[...], 0.0)
        # Dropout(0.3) = identity in eval mode.
        logits = jnp.dot(hid.astype(jnp.bfloat16), hw2_ref[...],
                         preferred_element_type=jnp.float32) + hb2_ref[...]
        out_ref[...] = 1.0 / (1.0 + jnp.exp(-logits))   # exact sigmoid

    return kernel


def make_cost(plan):
    g1, g2, g3, ge = plan['geoms']
    B, C = plan['B'], plan['C']
    m1 = B * g1['ho'] * g1['wo']
    flops = 2 * m1 * (9 * C) * 128                 # layer-1 im2col matmul
    flops += 2 * g2['L'] * m1 * 128                # sel1 scatter
    flops += 2 * 9 * g2['lsl'] * 128 * 128         # layer-2 conv
    flops += 2 * g3['L'] * g2['lsl'] * 128         # sel2
    flops += 2 * 9 * g3['lsl'] * 128 * 128         # layer-3 conv
    flops += 2 * ge['L'] * g3['lsl'] * 128         # sel3
    flops += 2 * 9 * ge['lsl'] * 128 * 256         # fused encoder conv
    flops += 2 * B * ge['lsl'] * 256               # pool
    flops += 2 * B * (256 * 512 + 512 * 4)         # heads
    bytes_bf16 = (m1 * 9 * C + 9 * C * 128 + g2['L'] * m1
                  + 2 * (5 * 256 * 128) + 5 * 256 * 256
                  + g3['L'] * g2['lsl'] + ge['L'] * g3['lsl']
                  + B * ge['lsl'] + 256 * 512 + 512 * 4)
    bytes_f32 = 3 * 128 + 256 + 512 + 4 + B * 4
    return pl.CostEstimate(flops=int(flops), transcendentals=int(4 * B),
                           bytes_accessed=int(2 * bytes_bf16 + 4 * bytes_f32))


def make_forward(plan):
    g1, g2, g3, ge = plan['geoms']
    B, C = plan['B'], plan['C']
    ho1, wo1 = g1['ho'], g1['wo']
    kernel = make_kernel(plan)
    cost = make_cost(plan)

    vspec = pl.BlockSpec(memory_space=pltpu.MemorySpace.VMEM)
    aspec = pl.BlockSpec(memory_space=pl.ANY)
    vmem_order = ('w1', 's1', 'sel1', 'w2', 's2', 'sel2', 's3', 'sel3',
                  'se', 'pool', 'hb1', 'hw2', 'hb2')
    any_order = ('w3', 'we', 'hw1')

    @jax.jit
    def fwd(x_nchw, params):
        x = jnp.transpose(x_nchw, (0, 2, 3, 1)).astype(jnp.float32)   # NCHW -> NHWC
        xp = jnp.pad(x, ((0, 0), (1, 1), (1, 1), (0, 0)))
        # Wrapper-side stride-2 im2col for layer 1 (tap-major, channel-minor K).
        cols = jnp.concatenate(
            [xp[:, kh:kh + 2 * ho1 - 1:2, kw:kw + 2 * wo1 - 1:2, :]
             for kh in range(3) for kw in range(3)], axis=-1)
        xcols = cols.reshape(B * ho1 * wo1, 9 * C).astype(jnp.bfloat16)

        args = ((xcols,) + tuple(params[k] for k in vmem_order)
                + tuple(params[k] for k in any_order))
        sig = pl.pallas_call(
            kernel,
            out_shape=jax.ShapeDtypeStruct((B, 4), jnp.float32),
            in_specs=[vspec] * (1 + len(vmem_order)) + [aspec] * len(any_order),
            out_specs=vspec,
            scratch_shapes=[
                pltpu.VMEM((g2['L'], 128), jnp.bfloat16),    # layer-2 padded act
                pltpu.VMEM((g3['L'], 128), jnp.bfloat16),    # layer-3 padded act
                pltpu.VMEM((ge['L'], 128), jnp.bfloat16),    # encoder padded act
                pltpu.VMEM((5, 256, 128), jnp.bfloat16),     # w3 (streamed)
                pltpu.VMEM((5, 256, 256), jnp.bfloat16),     # we (streamed)
                pltpu.VMEM((256, 512), jnp.bfloat16),        # hw1 (streamed)
                pltpu.SemaphoreType.DMA((3,)),
            ],
            cost_estimate=cost,
        )(*args)
        # cols 0..2 = block sigmoid, 2 zero placeholders, col 3 = ball sigmoid
        return jnp.concatenate(
            [sig[:, :3], jnp.zeros((B, 2), jnp.float32), sig[:, 3:]], axis=1)

    return fwd


# ------------------------------ parameter setup -------------------------------

def make_conv_bn(key, cin, cout):
    k1, k2, k3, k4, k5, k6 = jax.random.split(key, 6)
    return dict(
        w=jax.random.normal(k1, (cout, cin, 3, 3), jnp.float32) * 0.05,   # PyTorch OIHW
        b=jax.random.normal(k2, (cout,), jnp.float32) * 0.05,
        gamma=1.0 + 0.1 * jax.random.normal(k3, (cout,), jnp.float32),
        beta=0.1 * jax.random.normal(k4, (cout,), jnp.float32),
        mean=0.1 * jax.random.normal(k5, (cout,), jnp.float32),
        var=1.0 + 0.1 * jax.random.uniform(k6, (cout,), jnp.float32),
    )


def make_linear(key, din, dout, bias_const=None):
    k1, k2 = jax.random.split(key)
    w = jax.random.normal(k1, (dout, din), jnp.float32) * (1.0 / np.sqrt(din))  # (out, in)
    b = (jax.random.normal(k2, (dout,), jnp.float32) * 0.05 if bias_const is None
         else jnp.full((dout,), bias_const, jnp.float32))
    return dict(w=w, b=b)


def init_raw_params(key, num_channels):
    keys = jax.random.split(key, 9)
    return dict(
        features=[make_conv_bn(keys[0], num_channels, 32),
                  make_conv_bn(keys[1], 32, 64),
                  make_conv_bn(keys[2], 64, 128)],
        block_enc=make_conv_bn(keys[3], 128, 128),
        ball_enc=make_conv_bn(keys[4], 128, 128),
        block_l1=make_linear(keys[5], 128, 256),
        block_l2=make_linear(keys[6], 256, 3, bias_const=0.5),   # nn.init.constant_(bias, 0.5)
        ball_l1=make_linear(keys[7], 128, 256),
        ball_l2=make_linear(keys[8], 256, 1, bias_const=0.0),    # nn.init.constant_(bias, 0)
    )


def fold_conv_taps(p, cin_pad, cout_pad):
    """Fold eval BN + conv bias: scale into the per-tap weights, f32 shift kept
    separate. Pad Cin/Cout with zeros for lane-dense 128-wide layouts."""
    cout, cin = p['w'].shape[0], p['w'].shape[1]
    scale = p['gamma'] / jnp.sqrt(p['var'] + EPS)
    w = jnp.transpose(p['w'], (2, 3, 1, 0)).reshape(9, cin, cout) * scale[None, None, :]
    shift = (p['b'] - p['mean']) * scale + p['beta']
    w_pad = jnp.zeros((9, cin_pad, cout_pad), jnp.float32).at[:, :cin, :cout].set(w)
    s_pad = jnp.zeros((1, cout_pad), jnp.float32).at[0, :cout].set(shift)
    return w_pad, s_pad


def pair_taps(w9):
    """(9, 128, cout) -> (5, 256, cout) bf16: taps paired along K; the lone 9th
    tap occupies rows 0:128 of pair 4 (rows 128:256 zero, never read)."""
    pairs = []
    for p in TAP_PAIRS:
        if len(p) == 2:
            pairs.append(jnp.concatenate([w9[p[0]], w9[p[1]]], axis=0))
        else:
            pairs.append(jnp.concatenate([w9[p[0]], jnp.zeros_like(w9[p[0]])], axis=0))
    return jnp.stack(pairs).astype(jnp.bfloat16)


def prepare_params(raw, plan):
    g1, g2, g3, ge = plan['geoms']
    C = plan['C']
    bf16 = jnp.bfloat16

    w1, s1 = fold_conv_taps(raw['features'][0], C, 128)        # (9, C, 128)
    w2, s2 = fold_conv_taps(raw['features'][1], 128, 128)
    w3, s3 = fold_conv_taps(raw['features'][2], 128, 128)
    web, seb = fold_conv_taps(raw['block_enc'], 128, 128)
    wel, sel_ = fold_conv_taps(raw['ball_enc'], 128, 128)
    we = jnp.concatenate([web, wel], axis=-1)                  # (9, 128, 256) fused encoders
    se = jnp.concatenate([seb, sel_], axis=-1)                 # (1, 256)

    # layer-1 taps flattened to match the wrapper im2col (tap-major, ch-minor K)
    w1_flat = w1.reshape(9 * C, 128).astype(bf16)

    # fused heads (block-diagonal); fold global-average scale into hw1
    inv_hw = 1.0 / float(ge['ho'] * ge['wo'])
    hw1 = jnp.zeros((256, 512), jnp.float32)
    hw1 = hw1.at[:128, :256].set(raw['block_l1']['w'].T)
    hw1 = hw1.at[128:, 256:].set(raw['ball_l1']['w'].T)
    hw1 = (hw1 * inv_hw).astype(bf16)
    hb1 = jnp.concatenate([raw['block_l1']['b'], raw['ball_l1']['b']]).reshape(1, 512)
    hw2 = jnp.zeros((512, 4), jnp.float32)
    hw2 = hw2.at[:256, :3].set(raw['block_l2']['w'].T)
    hw2 = hw2.at[256:, 3:].set(raw['ball_l2']['w'].T)
    hw2 = hw2.astype(bf16)
    hb2 = jnp.concatenate([raw['block_l2']['b'], raw['ball_l2']['b']]).reshape(1, 4)

    return dict(
        w1=w1_flat, s1=s1, sel1=jnp.asarray(plan['sel1'], bf16),
        w2=pair_taps(w2), s2=s2, sel2=jnp.asarray(plan['sel2'], bf16),
        w3=pair_taps(w3), s3=s3, sel3=jnp.asarray(plan['sel3'], bf16),
        we=pair_taps(we), se=se, pool=jnp.asarray(plan['pool'], bf16),
        hw1=hw1, hb1=hb1, hw2=hw2, hb2=hb2)


# ---------------------------- pure-JAX f32 reference ---------------------------

def forward_reference(x_nchw, raw):
    x = jnp.transpose(x_nchw, (0, 2, 3, 1)).astype(jnp.float32)

    def conv_bn_relu_ref(x, p, stride):
        w_hwio = jnp.transpose(p['w'], (2, 3, 1, 0))
        y = jax.lax.conv_general_dilated(
            x, w_hwio, (stride, stride), ((1, 1), (1, 1)),
            dimension_numbers=('NHWC', 'HWIO', 'NHWC')) + p['b']
        s = p['gamma'] / jnp.sqrt(p['var'] + EPS)
        return jnp.maximum((y - p['mean']) * s + p['beta'], 0.0)

    feats = x
    for p in raw['features']:
        feats = conv_bn_relu_ref(feats, p, 2)

    def branch(enc, l1, l2):
        f = conv_bn_relu_ref(feats, enc, 1)
        pooled = jnp.mean(f, axis=(1, 2))
        h = jnp.maximum(pooled @ l1['w'].T + l1['b'], 0.0)
        return jax.nn.sigmoid(h @ l2['w'].T + l2['b'])

    block = branch(raw['block_enc'], raw['block_l1'], raw['block_l2'])
    ball = branch(raw['ball_enc'], raw['ball_l1'], raw['ball_l2'])
    B = x.shape[0]
    return jnp.concatenate([block, jnp.zeros((B, 2), jnp.float32), ball], axis=1)


# ----------------------------------- main --------------------------------------

if __name__ == "__main__":
    key = jax.random.PRNGKey(0)
    k_x, k_p = jax.random.split(key)

    B, C, H, W = 2, 4, 16, 16
    x = jax.random.normal(k_x, (B, C, H, W), jnp.float32)   # PyTorch-style NCHW input

    raw = init_raw_params(k_p, C)
    plan = build_plan(B, C, H, W)
    fused = prepare_params(raw, plan)
    fwd = make_forward(plan)

    out = jax.block_until_ready(fwd(x, fused))
    ref = jax.block_until_ready(forward_reference(x, raw))

    # Kernel runs the matmul chain in bf16 (f32 accumulation); the reference is
    # pure f32, so the tolerance is set for bf16 operand rounding through
    # 6 stacked matmuls (sigmoid outputs; observed error << 1e-2).
    np.testing.assert_allclose(np.asarray(out), np.asarray(ref), rtol=2e-2, atol=1e-2)
    assert out.shape == (B, 6)

    print("KERNEL_OK")
</pallas_src>

<mosaic_0001>
module attributes {stable_mosaic.version = 11 : i64} {
  func.func @kernel(%arg0: memref<128x36xbf16, #tpu.memory_space<vmem>>, %arg1: memref<36x128xbf16, #tpu.memory_space<vmem>>, %arg2: memref<1x128xf32, #tpu.memory_space<vmem>>, %arg3: memref<200x128xbf16, #tpu.memory_space<vmem>>, %arg4: memref<5x256x128xbf16, #tpu.memory_space<vmem>>, %arg5: memref<1x128xf32, #tpu.memory_space<vmem>>, %arg6: memref<72x178xbf16, #tpu.memory_space<vmem>>, %arg7: memref<1x128xf32, #tpu.memory_space<vmem>>, %arg8: memref<32x58xbf16, #tpu.memory_space<vmem>>, %arg9: memref<1x256xf32, #tpu.memory_space<vmem>>, %arg10: memref<2x22xbf16, #tpu.memory_space<vmem>>, %arg11: memref<1x512xf32, #tpu.memory_space<vmem>>, %arg12: memref<512x4xbf16, #tpu.memory_space<vmem>>, %arg13: memref<1x4xf32, #tpu.memory_space<vmem>>, %arg14: memref<5x256x128xbf16, #tpu.memory_space<any>>, %arg15: memref<5x256x256xbf16, #tpu.memory_space<any>>, %arg16: memref<256x512xbf16, #tpu.memory_space<any>>, %arg17: memref<2x4xf32, #tpu.memory_space<vmem>>, %arg18: memref<200x128xbf16, #tpu.memory_space<vmem>>, %arg19: memref<72x128xbf16, #tpu.memory_space<vmem>>, %arg20: memref<32x128xbf16, #tpu.memory_space<vmem>>, %arg21: memref<5x256x128xbf16, #tpu.memory_space<vmem>>, %arg22: memref<5x256x256xbf16, #tpu.memory_space<vmem>>, %arg23: memref<256x512xbf16, #tpu.memory_space<vmem>>, %arg24: memref<3x!tpu.dma_semaphore, #tpu.memory_space<semaphore_mem>>) attributes {dimension_semantics = [], scalar_prefetch = 0 : i64, scratch_operands = 7 : i64, tpu.core_type = #tpu.core_type<tc>} {
    %c0_i32 = arith.constant 0 : i32
    %0 = tpu.memref_slice %arg24[%c0_i32] : memref<3x!tpu.dma_semaphore, #tpu.memory_space<semaphore_mem>> -> memref<1x!tpu.dma_semaphore, #tpu.memory_space<semaphore_mem>>
    %1 = tpu.memref_squeeze %0 : memref<1x!tpu.dma_semaphore, #tpu.memory_space<semaphore_mem>> -> memref<!tpu.dma_semaphore, #tpu.memory_space<semaphore_mem>>
    tpu.enqueue_dma source(%arg14 : memref<5x256x128xbf16, #tpu.memory_space<any>>) target(%arg21 : memref<5x256x128xbf16, #tpu.memory_space<vmem>>) target_semaphore(%1 : memref<!tpu.dma_semaphore, #tpu.memory_space<semaphore_mem>>)
    %c1_i32 = arith.constant 1 : i32
    %2 = tpu.memref_slice %arg24[%c1_i32] : memref<3x!tpu.dma_semaphore, #tpu.memory_space<semaphore_mem>> -> memref<1x!tpu.dma_semaphore, #tpu.memory_space<semaphore_mem>>
    %3 = tpu.memref_squeeze %2 : memref<1x!tpu.dma_semaphore, #tpu.memory_space<semaphore_mem>> -> memref<!tpu.dma_semaphore, #tpu.memory_space<semaphore_mem>>
    tpu.enqueue_dma source(%arg15 : memref<5x256x256xbf16, #tpu.memory_space<any>>) target(%arg22 : memref<5x256x256xbf16, #tpu.memory_space<vmem>>) target_semaphore(%3 : memref<!tpu.dma_semaphore, #tpu.memory_space<semaphore_mem>>)
    %c2_i32 = arith.constant 2 : i32
    %4 = tpu.memref_slice %arg24[%c2_i32] : memref<3x!tpu.dma_semaphore, #tpu.memory_space<semaphore_mem>> -> memref<1x!tpu.dma_semaphore, #tpu.memory_space<semaphore_mem>>
    %5 = tpu.memref_squeeze %4 : memref<1x!tpu.dma_semaphore, #tpu.memory_space<semaphore_mem>> -> memref<!tpu.dma_semaphore, #tpu.memory_space<semaphore_mem>>
    tpu.enqueue_dma source(%arg16 : memref<256x512xbf16, #tpu.memory_space<any>>) target(%arg23 : memref<256x512xbf16, #tpu.memory_space<vmem>>) target_semaphore(%5 : memref<!tpu.dma_semaphore, #tpu.memory_space<semaphore_mem>>)
    %c0 = arith.constant 0 : index
    %c0_0 = arith.constant 0 : index
    %6 = vector.load %arg0[%c0, %c0_0] : memref<128x36xbf16, #tpu.memory_space<vmem>>, vector<128x36xbf16>
    %c0_1 = arith.constant 0 : index
    %c0_2 = arith.constant 0 : index
    %7 = vector.load %arg1[%c0_1, %c0_2] : memref<36x128xbf16, #tpu.memory_space<vmem>>, vector<36x128xbf16>
    %cst = arith.constant dense<0.000000e+00> : vector<128x128xf32>
    %8 = tpu.matmul %6, %7, %cst {dimension_numbers = #tpu.dot_dimension_numbers<[1], [0], [0], [1], [0, 0, 1, 1], [], []>} : vector<128x36xbf16>, vector<36x128xbf16>, vector<128x128xf32> -> vector<128x128xf32>
    %c0_3 = arith.constant 0 : index
    %c0_4 = arith.constant 0 : index
    %9 = vector.load %arg2[%c0_3, %c0_4] : memref<1x128xf32, #tpu.memory_space<vmem>>, vector<1x128xf32>
    %10 = vector.broadcast %9 : vector<1x128xf32> to vector<128x128xf32>
    %11 = arith.addf %8, %10 : vector<128x128xf32>
    %cst_5 = arith.constant 0.000000e+00 : f32
    %12 = vector.broadcast %cst_5 : f32 to vector<128x128xf32>
    %13 = arith.maximumf %11, %12 : vector<128x128xf32>
    %14 = arith.truncf %13 : vector<128x128xf32> to vector<128x128xbf16>
    %c0_6 = arith.constant 0 : index
    %c0_7 = arith.constant 0 : index
    %15 = vector.load %arg3[%c0_6, %c0_7] : memref<200x128xbf16, #tpu.memory_space<vmem>>, vector<200x128xbf16>
    %cst_8 = arith.constant dense<0.000000e+00> : vector<200x128xf32>
    %16 = tpu.matmul %15, %14, %cst_8 {dimension_numbers = #tpu.dot_dimension_numbers<[1], [0], [0], [1], [0, 0, 1, 1], [], []>} : vector<200x128xbf16>, vector<128x128xbf16>, vector<200x128xf32> -> vector<200x128xf32>
    %17 = arith.truncf %16 : vector<200x128xf32> to vector<200x128xbf16>
    %c0_9 = arith.constant 0 : index
    %c0_10 = arith.constant 0 : index
    %18 = vector.load %arg18[%c0_9, %c0_10] : memref<200x128xbf16, #tpu.memory_space<vmem>>, vector<200x128xbf16>
    tpu.vector_store %arg18[%c0_9, %c0_10], %17 {strides = array<i32>} : memref<200x128xbf16, #tpu.memory_space<vmem>>, vector<200x128xbf16>,
    %c0_11 = arith.constant 0 : index
    %c0_12 = arith.constant 0 : index
    %19 = vector.load %arg18[%c0_11, %c0_12] : memref<200x128xbf16, #tpu.memory_space<vmem>>, vector<178x128xbf16>
    %c1 = arith.constant 1 : index
    %c0_13 = arith.constant 0 : index
    %20 = vector.load %arg18[%c1, %c0_13] : memref<200x128xbf16, #tpu.memory_space<vmem>>, vector<178x128xbf16>
    %21 = tpu.concatenate %19, %20 in 1 : vector<178x128xbf16>, vector<178x128xbf16> -> vector<178x256xbf16>
    %c0_14 = arith.constant 0 : index
    %c0_15 = arith.constant 0 : index
    %c0_16 = arith.constant 0 : index
    %22 = vector.load %arg4[%c0_14, %c0_15, %c0_16] : memref<5x256x128xbf16, #tpu.memory_space<vmem>>, vector<1x256x128xbf16>
    %23 = vector.shape_cast %22 : vector<1x256x128xbf16> to vector<256x128xbf16>
    %cst_17 = arith.constant dense<0.000000e+00> : vector<178x128xf32>
    %24 = tpu.matmul %21, %23, %cst_17 {dimension_numbers = #tpu.dot_dimension_numbers<[1], [0], [0], [1], [0, 0, 1, 1], [], []>} : vector<178x256xbf16>, vector<256x128xbf16>, vector<178x128xf32> -> vector<178x128xf32>
    %c2 = arith.constant 2 : index
    %c0_18 = arith.constant 0 : index
    %25 = vector.load %arg18[%c2, %c0_18] : memref<200x128xbf16, #tpu.memory_space<vmem>>, vector<178x128xbf16>
    %c10 = arith.constant 10 : index
    %c0_19 = arith.constant 0 : index
    %26 = vector.load %arg18[%c10, %c0_19] : memref<200x128xbf16, #tpu.memory_space<vmem>>, vector<178x128xbf16>
    %27 = tpu.concatenate %25, %26 in 1 : vector<178x128xbf16>, vector<178x128xbf16> -> vector<178x256xbf16>
    %c1_20 = arith.constant 1 : index
    %c0_21 = arith.constant 0 : index
    %c0_22 = arith.constant 0 : index
    %28 = vector.load %arg4[%c1_20, %c0_21, %c0_22] : memref<5x256x128xbf16, #tpu.memory_space<vmem>>, vector<1x256x128xbf16>
    %29 = vector.shape_cast %28 : vector<1x256x128xbf16> to vector<256x128xbf16>
    %cst_23 = arith.constant dense<0.000000e+00> : vector<178x128xf32>
    %30 = tpu.matmul %27, %29, %cst_23 {dimension_numbers = #tpu.dot_dimension_numbers<[1], [0], [0], [1], [0, 0, 1, 1], [], []>} : vector<178x256xbf16>, vector<256x128xbf16>, vector<178x128xf32> -> vector<178x128xf32>
    %31 = arith.addf %24, %30 : vector<178x128xf32>
    %c11 = arith.constant 11 : index
    %c0_24 = arith.constant 0 : index
    %32 = vector.load %arg18[%c11, %c0_24] : memref<200x128xbf16, #tpu.memory_space<vmem>>, vector<178x128xbf16>
    %c12 = arith.constant 12 : index
    %c0_25 = arith.constant 0 : index
    %33 = vector.load %arg18[%c12, %c0_25] : memref<200x128xbf16, #tpu.memory_space<vmem>>, vector<178x128xbf16>
    %34 = tpu.concatenate %32, %33 in 1 : vector<178x128xbf16>, vector<178x128xbf16> -> vector<178x256xbf16>
    %c2_26 = arith.constant 2 : index
    %c0_27 = arith.constant 0 : index
    %c0_28 = arith.constant 0 : index
    %35 = vector.load %arg4[%c2_26, %c0_27, %c0_28] : memref<5x256x128xbf16, #tpu.memory_space<vmem>>, vector<1x256x128xbf16>
    %36 = vector.shape_cast %35 : vector<1x256x128xbf16> to vector<256x128xbf16>
    %cst_29 = arith.constant dense<0.000000e+00> : vector<178x128xf32>
    %37 = tpu.matmul %34, %36, %cst_29 {dimension_numbers = #tpu.dot_dimension_numbers<[1], [0], [0], [1], [0, 0, 1, 1], [], []>} : vector<178x256xbf16>, vector<256x128xbf16>, vector<178x128xf32> -> vector<178x128xf32>
    %38 = arith.addf %31, %37 : vector<178x128xf32>
    %c20 = arith.constant 20 : index
    %c0_30 = arith.constant 0 : index
    %39 = vector.load %arg18[%c20, %c0_30] : memref<200x128xbf16, #tpu.memory_space<vmem>>, vector<178x128xbf16>
    %c21 = arith.constant 21 : index
    %c0_31 = arith.constant 0 : index
    %40 = vector.load %arg18[%c21, %c0_31] : memref<200x128xbf16, #tpu.memory_space<vmem>>, vector<178x128xbf16>
    %41 = tpu.concatenate %39, %40 in 1 : vector<178x128xbf16>, vector<178x128xbf16> -> vector<178x256xbf16>
    %c3 = arith.constant 3 : index
    %c0_32 = arith.constant 0 : index
    %c0_33 = arith.constant 0 : index
    %42 = vector.load %arg4[%c3, %c0_32, %c0_33] : memref<5x256x128xbf16, #tpu.memory_space<vmem>>, vector<1x256x128xbf16>
    %43 = vector.shape_cast %42 : vector<1x256x128xbf16> to vector<256x128xbf16>
    %cst_34 = arith.constant dense<0.000000e+00> : vector<178x128xf32>
    %44 = tpu.matmul %41, %43, %cst_34 {dimension_numbers = #tpu.dot_dimension_numbers<[1], [0], [0], [1], [0, 0, 1, 1], [], []>} : vector<178x256xbf16>, vector<256x128xbf16>, vector<178x128xf32> -> vector<178x128xf32>
    %45 = arith.addf %38, %44 : vector<178x128xf32>
    %c22 = arith.constant 22 : index
    %c0_35 = arith.constant 0 : index
    %46 = vector.load %arg18[%c22, %c0_35] : memref<200x128xbf16, #tpu.memory_space<vmem>>, vector<178x128xbf16>
    %c4 = arith.constant 4 : index
    %c0_36 = arith.constant 0 : index
    %c0_37 = arith.constant 0 : index
    %47 = vector.load %arg4[%c4, %c0_36, %c0_37] : memref<5x256x128xbf16, #tpu.memory_space<vmem>>, vector<1x256x128xbf16>
    %48 = vector.shape_cast %47 : vector<1x256x128xbf16> to vector<256x128xbf16>
    %49 = vector.extract_strided_slice %48 {offsets = [0, 0], sizes = [128, 128], strides = [1, 1]} : vector<256x128xbf16> to vector<128x128xbf16>
    %cst_38 = arith.constant dense<0.000000e+00> : vector<178x128xf32>
    %50 = tpu.matmul %46, %49, %cst_38 {dimension_numbers = #tpu.dot_dimension_numbers<[1], [0], [0], [1], [0, 0, 1, 1], [], []>} : vector<178x128xbf16>, vector<128x128xbf16>, vector<178x128xf32> -> vector<178x128xf32>
    %51 = arith.addf %45, %50 : vector<178x128xf32>
    %c0_39 = arith.constant 0 : index
    %c0_40 = arith.constant 0 : index
    %52 = vector.load %arg5[%c0_39, %c0_40] : memref<1x128xf32, #tpu.memory_space<vmem>>, vector<1x128xf32>
    %53 = vector.broadcast %52 : vector<1x128xf32> to vector<178x128xf32>
    %54 = arith.addf %51, %53 : vector<178x128xf32>
    %cst_41 = arith.constant 0.000000e+00 : f32
    %55 = vector.broadcast %cst_41 : f32 to vector<178x128xf32>
    %56 = arith.maximumf %54, %55 : vector<178x128xf32>
    %57 = arith.truncf %56 : vector<178x128xf32> to vector<178x128xbf16>
    %c0_i32_42 = arith.constant 0 : i32
    %58 = tpu.memref_slice %arg24[%c0_i32_42] : memref<3x!tpu.dma_semaphore, #tpu.memory_space<semaphore_mem>> -> memref<1x!tpu.dma_semaphore, #tpu.memory_space<semaphore_mem>>
    %59 = tpu.memref_squeeze %58 : memref<1x!tpu.dma_semaphore, #tpu.memory_space<semaphore_mem>> -> memref<!tpu.dma_semaphore, #tpu.memory_space<semaphore_mem>>
    tpu.wait_dma2 semaphore(%59 : memref<!tpu.dma_semaphore, #tpu.memory_space<semaphore_mem>>) src(%arg14 : memref<5x256x128xbf16, #tpu.memory_space<any>>) dst(%arg21 : memref<5x256x128xbf16, #tpu.memory_space<vmem>>)
    %c0_43 = arith.constant 0 : index
    %c0_44 = arith.constant 0 : index
    %60 = vector.load %arg6[%c0_43, %c0_44] : memref<72x178xbf16, #tpu.memory_space<vmem>>, vector<72x178xbf16>
    %cst_45 = arith.constant dense<0.000000e+00> : vector<72x128xf32>
    %61 = tpu.matmul %60, %57, %cst_45 {dimension_numbers = #tpu.dot_dimension_numbers<[1], [0], [0], [1], [0, 0, 1, 1], [], []>} : vector<72x178xbf16>, vector<178x128xbf16>, vector<72x128xf32> -> vector<72x128xf32>
    %62 = arith.truncf %61 : vector<72x128xf32> to vector<72x128xbf16>
    %c0_46 = arith.constant 0 : index
    %c0_47 = arith.constant 0 : index
    %63 = vector.load %arg19[%c0_46, %c0_47] : memref<72x128xbf16, #tpu.memory_space<vmem>>, vector<72x128xbf16>
    tpu.vector_store %arg19[%c0_46, %c0_47], %62 {strides = array<i32>} : memref<72x128xbf16, #tpu.memory_space<vmem>>, vector<72x128xbf16>,
    %c0_48 = arith.constant 0 : index
    %c0_49 = arith.constant 0 : index
    %64 = vector.load %arg19[%c0_48, %c0_49] : memref<72x128xbf16, #tpu.memory_space<vmem>>, vector<58x128xbf16>
    %c1_50 = arith.constant 1 : index
    %c0_51 = arith.constant 0 : index
    %65 = vector.load %arg19[%c1_50, %c0_51] : memref<72x128xbf16, #tpu.memory_space<vmem>>, vector<58x128xbf16>
    %66 = tpu.concatenate %64, %65 in 1 : vector<58x128xbf16>, vector<58x128xbf16> -> vector<58x256xbf16>
    %c0_52 = arith.constant 0 : index
    %c0_53 = arith.constant 0 : index
    %c0_54 = arith.constant 0 : index
    %67 = vector.load %arg21[%c0_52, %c0_53, %c0_54] : memref<5x256x128xbf16, #tpu.memory_space<vmem>>, vector<1x256x128xbf16>
    %68 = vector.shape_cast %67 : vector<1x256x128xbf16> to vector<256x128xbf16>
    %cst_55 = arith.constant dense<0.000000e+00> : vector<58x128xf32>
    %69 = tpu.matmul %66, %68, %cst_55 {dimension_numbers = #tpu.dot_dimension_numbers<[1], [0], [0], [1], [0, 0, 1, 1], [], []>} : vector<58x256xbf16>, vector<256x128xbf16>, vector<58x128xf32> -> vector<58x128xf32>
    %c2_56 = arith.constant 2 : index
    %c0_57 = arith.constant 0 : index
    %70 = vector.load %arg19[%c2_56, %c0_57] : memref<72x128xbf16, #tpu.memory_space<vmem>>, vector<58x128xbf16>
    %c6 = arith.constant 6 : index
    %c0_58 = arith.constant 0 : index
    %71 = vector.load %arg19[%c6, %c0_58] : memref<72x128xbf16, #tpu.memory_space<vmem>>, vector<58x128xbf16>
    %72 = tpu.concatenate %70, %71 in 1 : vector<58x128xbf16>, vector<58x128xbf16> -> vector<58x256xbf16>
    %c1_59 = arith.constant 1 : index
    %c0_60 = arith.constant 0 : index
    %c0_61 = arith.constant 0 : index
    %73 = vector.load %arg21[%c1_59, %c0_60, %c0_61] : memref<5x256x128xbf16, #tpu.memory_space<vmem>>, vector<1x256x128xbf16>
    %74 = vector.shape_cast %73 : vector<1x256x128xbf16> to vector<256x128xbf16>
    %cst_62 = arith.constant dense<0.000000e+00> : vector<58x128xf32>
    %75 = tpu.matmul %72, %74, %cst_62 {dimension_numbers = #tpu.dot_dimension_numbers<[1], [0], [0], [1], [0, 0, 1, 1], [], []>} : vector<58x256xbf16>, vector<256x128xbf16>, vector<58x128xf32> -> vector<58x128xf32>
    %76 = arith.addf %69, %75 : vector<58x128xf32>
    %c7 = arith.constant 7 : index
    %c0_63 = arith.constant 0 : index
    %77 = vector.load %arg19[%c7, %c0_63] : memref<72x128xbf16, #tpu.memory_space<vmem>>, vector<58x128xbf16>
    %c8 = arith.constant 8 : index
    %c0_64 = arith.constant 0 : index
    %78 = vector.load %arg19[%c8, %c0_64] : memref<72x128xbf16, #tpu.memory_space<vmem>>, vector<58x128xbf16>
    %79 = tpu.concatenate %77, %78 in 1 : vector<58x128xbf16>, vector<58x128xbf16> -> vector<58x256xbf16>
    %c2_65 = arith.constant 2 : index
    %c0_66 = arith.constant 0 : index
    %c0_67 = arith.constant 0 : index
    %80 = vector.load %arg21[%c2_65, %c0_66, %c0_67] : memref<5x256x128xbf16, #tpu.memory_space<vmem>>, vector<1x256x128xbf16>
    %81 = vector.shape_cast %80 : vector<1x256x128xbf16> to vector<256x128xbf16>
    %cst_68 = arith.constant dense<0.000000e+00> : vector<58x128xf32>
    %82 = tpu.matmul %79, %81, %cst_68 {dimension_numbers = #tpu.dot_dimension_numbers<[1], [0], [0], [1], [0, 0, 1, 1], [], []>} : vector<58x256xbf16>, vector<256x128xbf16>, vector<58x128xf32> -> vector<58x128xf32>
    %83 = arith.addf %76, %82 : vector<58x128xf32>
    %c12_69 = arith.constant 12 : index
    %c0_70 = arith.constant 0 : index
    %84 = vector.load %arg19[%c12_69, %c0_70] : memref<72x128xbf16, #tpu.memory_space<vmem>>, vector<58x128xbf16>
    %c13 = arith.constant 13 : index
    %c0_71 = arith.constant 0 : index
    %85 = vector.load %arg19[%c13, %c0_71] : memref<72x128xbf16, #tpu.memory_space<vmem>>, vector<58x128xbf16>
    %86 = tpu.concatenate %84, %85 in 1 : vector<58x128xbf16>, vector<58x128xbf16> -> vector<58x256xbf16>
    %c3_72 = arith.constant 3 : index
    %c0_73 = arith.constant 0 : index
    %c0_74 = arith.constant 0 : index
    %87 = vector.load %arg21[%c3_72, %c0_73, %c0_74] : memref<5x256x128xbf16, #tpu.memory_space<vmem>>, vector<1x256x128xbf16>
    %88 = vector.shape_cast %87 : vector<1x256x128xbf16> to vector<256x128xbf16>
    %cst_75 = arith.constant dense<0.000000e+00> : vector<58x128xf32>
    %89 = tpu.matmul %86, %88, %cst_75 {dimension_numbers = #tpu.dot_dimension_numbers<[1], [0], [0], [1], [0, 0, 1, 1], [], []>} : vector<58x256xbf16>, vector<256x128xbf16>, vector<58x128xf32> -> vector<58x128xf32>
    %90 = arith.addf %83, %89 : vector<58x128xf32>
    %c14 = arith.constant 14 : index
    %c0_76 = arith.constant 0 : index
    %91 = vector.load %arg19[%c14, %c0_76] : memref<72x128xbf16, #tpu.memory_space<vmem>>, vector<58x128xbf16>
    %c4_77 = arith.constant 4 : index
    %c0_78 = arith.constant 0 : index
    %c0_79 = arith.constant 0 : index
    %92 = vector.load %arg21[%c4_77, %c0_78, %c0_79] : memref<5x256x128xbf16, #tpu.memory_space<vmem>>, vector<1x256x128xbf16>
    %93 = vector.shape_cast %92 : vector<1x256x128xbf16> to vector<256x128xbf16>
    %94 = vector.extract_strided_slice %93 {offsets = [0, 0], sizes = [128, 128], strides = [1, 1]} : vector<256x128xbf16> to vector<128x128xbf16>
    %cst_80 = arith.constant dense<0.000000e+00> : vector<58x128xf32>
    %95 = tpu.matmul %91, %94, %cst_80 {dimension_numbers = #tpu.dot_dimension_numbers<[1], [0], [0], [1], [0, 0, 1, 1], [], []>} : vector<58x128xbf16>, vector<128x128xbf16>, vector<58x128xf32> -> vector<58x128xf32>
    %96 = arith.addf %90, %95 : vector<58x128xf32>
    %c0_81 = arith.constant 0 : index
    %c0_82 = arith.constant 0 : index
    %97 = vector.load %arg7[%c0_81, %c0_82] : memref<1x128xf32, #tpu.memory_space<vmem>>, vector<1x128xf32>
    %98 = vector.broadcast %97 : vector<1x128xf32> to vector<58x128xf32>
    %99 = arith.addf %96, %98 : vector<58x128xf32>
    %cst_83 = arith.constant 0.000000e+00 : f32
    %100 = vector.broadcast %cst_83 : f32 to vector<58x128xf32>
    %101 = arith.maximumf %99, %100 : vector<58x128xf32>
    %102 = arith.truncf %101 : vector<58x128xf32> to vector<58x128xbf16>
    %c1_i32_84 = arith.constant 1 : i32
    %103 = tpu.memref_slice %arg24[%c1_i32_84] : memref<3x!tpu.dma_semaphore, #tpu.memory_space<semaphore_mem>> -> memref<1x!tpu.dma_semaphore, #tpu.memory_space<semaphore_mem>>
    %104 = tpu.memref_squeeze %103 : memref<1x!tpu.dma_semaphore, #tpu.memory_space<semaphore_mem>> -> memref<!tpu.dma_semaphore, #tpu.memory_space<semaphore_mem>>
    tpu.wait_dma2 semaphore(%104 : memref<!tpu.dma_semaphore, #tpu.memory_space<semaphore_mem>>) src(%arg15 : memref<5x256x256xbf16, #tpu.memory_space<any>>) dst(%arg22 : memref<5x256x256xbf16, #tpu.memory_space<vmem>>)
    %c0_85 = arith.constant 0 : index
    %c0_86 = arith.constant 0 : index
    %105 = vector.load %arg8[%c0_85, %c0_86] : memref<32x58xbf16, #tpu.memory_space<vmem>>, vector<32x58xbf16>
    %cst_87 = arith.constant dense<0.000000e+00> : vector<32x128xf32>
    %106 = tpu.matmul %105, %102, %cst_87 {dimension_numbers = #tpu.dot_dimension_numbers<[1], [0], [0], [1], [0, 0, 1, 1], [], []>} : vector<32x58xbf16>, vector<58x128xbf16>, vector<32x128xf32> -> vector<32x128xf32>
    %107 = arith.truncf %106 : vector<32x128xf32> to vector<32x128xbf16>
    %c0_88 = arith.constant 0 : index
    %c0_89 = arith.constant 0 : index
    %108 = vector.load %arg20[%c0_88, %c0_89] : memref<32x128xbf16, #tpu.memory_space<vmem>>, vector<32x128xbf16>
    tpu.vector_store %arg20[%c0_88, %c0_89], %107 {strides = array<i32>} : memref<32x128xbf16, #tpu.memory_space<vmem>>, vector<32x128xbf16>,
    %c0_90 = arith.constant 0 : index
    %c0_91 = arith.constant 0 : index
    %109 = vector.load %arg20[%c0_90, %c0_91] : memref<32x128xbf16, #tpu.memory_space<vmem>>, vector<22x128xbf16>
    %c1_92 = arith.constant 1 : index
    %c0_93 = arith.constant 0 : index
    %110 = vector.load %arg20[%c1_92, %c0_93] : memref<32x128xbf16, #tpu.memory_space<vmem>>, vector<22x128xbf16>
    %111 = tpu.concatenate %109, %110 in 1 : vector<22x128xbf16>, vector<22x128xbf16> -> vector<22x256xbf16>
    %c0_94 = arith.constant 0 : index
    %c0_95 = arith.constant 0 : index
    %c0_96 = arith.constant 0 : index
    %112 = vector.load %arg22[%c0_94, %c0_95, %c0_96] : memref<5x256x256xbf16, #tpu.memory_space<vmem>>, vector<1x256x256xbf16>
    %113 = vector.shape_cast %112 : vector<1x256x256xbf16> to vector<256x256xbf16>
    %cst_97 = arith.constant dense<0.000000e+00> : vector<22x256xf32>
    %114 = tpu.matmul %111, %113, %cst_97 {dimension_numbers = #tpu.dot_dimension_numbers<[1], [0], [0], [1], [0, 0, 1, 1], [], []>} : vector<22x256xbf16>, vector<256x256xbf16>, vector<22x256xf32> -> vector<22x256xf32>
    %c2_98 = arith.constant 2 : index
    %c0_99 = arith.constant 0 : index
    %115 = vector.load %arg20[%c2_98, %c0_99] : memref<32x128xbf16, #tpu.memory_space<vmem>>, vector<22x128xbf16>
    %c4_100 = arith.constant 4 : index
    %c0_101 = arith.constant 0 : index
    %116 = vector.load %arg20[%c4_100, %c0_101] : memref<32x128xbf16, #tpu.memory_space<vmem>>, vector<22x128xbf16>
    %117 = tpu.concatenate %115, %116 in 1 : vector<22x128xbf16>, vector<22x128xbf16> -> vector<22x256xbf16>
    %c1_102 = arith.constant 1 : index
    %c0_103 = arith.constant 0 : index
    %c0_104 = arith.constant 0 : index
    %118 = vector.load %arg22[%c1_102, %c0_103, %c0_104] : memref<5x256x256xbf16, #tpu.memory_space<vmem>>, vector<1x256x256xbf16>
    %119 = vector.shape_cast %118 : vector<1x256x256xbf16> to vector<256x256xbf16>
    %cst_105 = arith.constant dense<0.000000e+00> : vector<22x256xf32>
    %120 = tpu.matmul %117, %119, %cst_105 {dimension_numbers = #tpu.dot_dimension_numbers<[1], [0], [0], [1], [0, 0, 1, 1], [], []>} : vector<22x256xbf16>, vector<256x256xbf16>, vector<22x256xf32> -> vector<22x256xf32>
    %121 = arith.addf %114, %120 : vector<22x256xf32>
    %c5 = arith.constant 5 : index
    %c0_106 = arith.constant 0 : index
    %122 = vector.load %arg20[%c5, %c0_106] : memref<32x128xbf16, #tpu.memory_space<vmem>>, vector<22x128xbf16>
    %c6_107 = arith.constant 6 : index
    %c0_108 = arith.constant 0 : index
    %123 = vector.load %arg20[%c6_107, %c0_108] : memref<32x128xbf16, #tpu.memory_space<vmem>>, vector<22x128xbf16>
    %124 = tpu.concatenate %122, %123 in 1 : vector<22x128xbf16>, vector<22x128xbf16> -> vector<22x256xbf16>
    %c2_109 = arith.constant 2 : index
    %c0_110 = arith.constant 0 : index
    %c0_111 = arith.constant 0 : index
    %125 = vector.load %arg22[%c2_109, %c0_110, %c0_111] : memref<5x256x256xbf16, #tpu.memory_space<vmem>>, vector<1x256x256xbf16>
    %126 = vector.shape_cast %125 : vector<1x256x256xbf16> to vector<256x256xbf16>
    %cst_112 = arith.constant dense<0.000000e+00> : vector<22x256xf32>
    %127 = tpu.matmul %124, %126, %cst_112 {dimension_numbers = #tpu.dot_dimension_numbers<[1], [0], [0], [1], [0, 0, 1, 1], [], []>} : vector<22x256xbf16>, vector<256x256xbf16>, vector<22x256xf32> -> vector<22x256xf32>
    %128 = arith.addf %121, %127 : vector<22x256xf32>
    %c8_113 = arith.constant 8 : index
    %c0_114 = arith.constant 0 : index
    %129 = vector.load %arg20[%c8_113, %c0_114] : memref<32x128xbf16, #tpu.memory_space<vmem>>, vector<22x128xbf16>
    %c9 = arith.constant 9 : index
    %c0_115 = arith.constant 0 : index
    %130 = vector.load %arg20[%c9, %c0_115] : memref<32x128xbf16, #tpu.memory_space<vmem>>, vector<22x128xbf16>
    %131 = tpu.concatenate %129, %130 in 1 : vector<22x128xbf16>, vector<22x128xbf16> -> vector<22x256xbf16>
    %c3_116 = arith.constant 3 : index
    %c0_117 = arith.constant 0 : index
    %c0_118 = arith.constant 0 : index
    %132 = vector.load %arg22[%c3_116, %c0_117, %c0_118] : memref<5x256x256xbf16, #tpu.memory_space<vmem>>, vector<1x256x256xbf16>
    %133 = vector.shape_cast %132 : vector<1x256x256xbf16> to vector<256x256xbf16>
    %cst_119 = arith.constant dense<0.000000e+00> : vector<22x256xf32>
    %134 = tpu.matmul %131, %133, %cst_119 {dimension_numbers = #tpu.dot_dimension_numbers<[1], [0], [0], [1], [0, 0, 1, 1], [], []>} : vector<22x256xbf16>, vector<256x256xbf16>, vector<22x256xf32> -> vector<22x256xf32>
    %135 = arith.addf %128, %134 : vector<22x256xf32>
    %c10_120 = arith.constant 10 : index
    %c0_121 = arith.constant 0 : index
    %136 = vector.load %arg20[%c10_120, %c0_121] : memref<32x128xbf16, #tpu.memory_space<vmem>>, vector<22x128xbf16>
    %c4_122 = arith.constant 4 : index
    %c0_123 = arith.constant 0 : index
    %c0_124 = arith.constant 0 : index
    %137 = vector.load %arg22[%c4_122, %c0_123, %c0_124] : memref<5x256x256xbf16, #tpu.memory_space<vmem>>, vector<1x256x256xbf16>
    %138 = vector.shape_cast %137 : vector<1x256x256xbf16> to vector<256x256xbf16>
    %139 = vector.extract_strided_slice %138 {offsets = [0, 0], sizes = [128, 256], strides = [1, 1]} : vector<256x256xbf16> to vector<128x256xbf16>
    %cst_125 = arith.constant dense<0.000000e+00> : vector<22x256xf32>
    %140 = tpu.matmul %136, %139, %cst_125 {dimension_numbers = #tpu.dot_dimension_numbers<[1], [0], [0], [1], [0, 0, 1, 1], [], []>} : vector<22x128xbf16>, vector<128x256xbf16>, vector<22x256xf32> -> vector<22x256xf32>
    %141 = arith.addf %135, %140 : vector<22x256xf32>
    %c0_126 = arith.constant 0 : index
    %c0_127 = arith.constant 0 : index
    %142 = vector.load %arg9[%c0_126, %c0_127] : memref<1x256xf32, #tpu.memory_space<vmem>>, vector<1x256xf32>
    %143 = vector.broadcast %142 : vector<1x256xf32> to vector<22x256xf32>
    %144 = arith.addf %141, %143 : vector<22x256xf32>
    %cst_128 = arith.constant 0.000000e+00 : f32
    %145 = vector.broadcast %cst_128 : f32 to vector<22x256xf32>
    %146 = arith.maximumf %144, %145 : vector<22x256xf32>
    %147 = arith.truncf %146 : vector<22x256xf32> to vector<22x256xbf16>
    %c0_129 = arith.constant 0 : index
    %c0_130 = arith.constant 0 : index
    %148 = vector.load %arg10[%c0_129, %c0_130] : memref<2x22xbf16, #tpu.memory_space<vmem>>, vector<2x22xbf16>
    %cst_131 = arith.constant dense<0.000000e+00> : vector<2x256xf32>
    %149 = tpu.matmul %148, %147, %cst_131 {dimension_numbers = #tpu.dot_dimension_numbers<[1], [0], [0], [1], [0, 0, 1, 1], [], []>} : vector<2x22xbf16>, vector<22x256xbf16>, vector<2x256xf32> -> vector<2x256xf32>
    %c2_i32_132 = arith.constant 2 : i32
    %150 = tpu.memref_slice %arg24[%c2_i32_132] : memref<3x!tpu.dma_semaphore, #tpu.memory_space<semaphore_mem>> -> memref<1x!tpu.dma_semaphore, #tpu.memory_space<semaphore_mem>>
    %151 = tpu.memref_squeeze %150 : memref<1x!tpu.dma_semaphore, #tpu.memory_space<semaphore_mem>> -> memref<!tpu.dma_semaphore, #tpu.memory_space<semaphore_mem>>
    tpu.wait_dma2 semaphore(%151 : memref<!tpu.dma_semaphore, #tpu.memory_space<semaphore_mem>>) src(%arg16 : memref<256x512xbf16, #tpu.memory_space<any>>) dst(%arg23 : memref<256x512xbf16, #tpu.memory_space<vmem>>)
    %152 = arith.truncf %149 : vector<2x256xf32> to vector<2x256xbf16>
    %c0_133 = arith.constant 0 : index
    %c0_134 = arith.constant 0 : index
    %153 = vector.load %arg23[%c0_133, %c0_134] : memref<256x512xbf16, #tpu.memory_space<vmem>>, vector<256x512xbf16>
    %cst_135 = arith.constant dense<0.000000e+00> : vector<2x512xf32>
    %154 = tpu.matmul %152, %153, %cst_135 {dimension_numbers = #tpu.dot_dimension_numbers<[1], [0], [0], [1], [0, 0, 1, 1], [], []>} : vector<2x256xbf16>, vector<256x512xbf16>, vector<2x512xf32> -> vector<2x512xf32>
    %c0_136 = arith.constant 0 : index
    %c0_137 = arith.constant 0 : index
    %155 = vector.load %arg11[%c0_136, %c0_137] : memref<1x512xf32, #tpu.memory_space<vmem>>, vector<1x512xf32>
    %156 = vector.broadcast %155 : vector<1x512xf32> to vector<2x512xf32>
    %157 = arith.addf %154, %156 : vector<2x512xf32>
    %cst_138 = arith.constant 0.000000e+00 : f32
    %158 = vector.broadcast %cst_138 : f32 to vector<2x512xf32>
    %159 = arith.maximumf %157, %158 : vector<2x512xf32>
    %160 = arith.truncf %159 : vector<2x512xf32> to vector<2x512xbf16>
    %c0_139 = arith.constant 0 : index
    %c0_140 = arith.constant 0 : index
    %161 = vector.load %arg12[%c0_139, %c0_140] : memref<512x4xbf16, #tpu.memory_space<vmem>>, vector<512x4xbf16>
    %cst_141 = arith.constant dense<0.000000e+00> : vector<2x4xf32>
    %162 = tpu.matmul %160, %161, %cst_141 {dimension_numbers = #tpu.dot_dimension_numbers<[1], [0], [0], [1], [0, 0, 1, 1], [], []>} : vector<2x512xbf16>, vector<512x4xbf16>, vector<2x4xf32> -> vector<2x4xf32>
    %c0_142 = arith.constant 0 : index
    %c0_143 = arith.constant 0 : index
    %163 = vector.load %arg13[%c0_142, %c0_143] : memref<1x4xf32, #tpu.memory_space<vmem>>, vector<1x4xf32>
    %164 = vector.broadcast %163 : vector<1x4xf32> to vector<2x4xf32>
    %165 = arith.addf %162, %164 : vector<2x4xf32>
    %cst_144 = arith.constant 0.000000e+00 : f32
    %166 = vector.broadcast %cst_144 : f32 to vector<2x4xf32>
    %167 = arith.subf %166, %165 : vector<2x4xf32>
    %168 = math.exp %167 : vector<2x4xf32>
    %cst_145 = arith.constant 1.000000e+00 : f32
    %169 = vector.broadcast %cst_145 : f32 to vector<2x4xf32>
    %170 = arith.addf %169, %168 : vector<2x4xf32>
    %cst_146 = arith.constant 1.000000e+00 : f32
    %171 = vector.broadcast %cst_146 : f32 to vector<2x4xf32>
    %172 = arith.divf %171, %170 : vector<2x4xf32>
    %c0_147 = arith.constant 0 : index
    %c0_148 = arith.constant 0 : index
    %173 = vector.load %arg17[%c0_147, %c0_148] : memref<2x4xf32, #tpu.memory_space<vmem>>, vector<2x4xf32>
    tpu.vector_store %arg17[%c0_147, %c0_148], %172 {strides = array<i32>} : memref<2x4xf32, #tpu.memory_space<vmem>>, vector<2x4xf32>,
    return
  }
}

</mosaic_0001>

<bundles_post_ra>
// kernel: fwd.1
= control target key start
LH: loop header
LB: loop body
LE: loop exit
PB: predicated region body
PF: predicated region fallthrough
CT: control target
= control target key end

     0   :  { %s12380_s0 = inlined_call_operand.vmem [shape: bf16[128,36], index: 0, kind: input, shape index: {}]   ;;  %s12381_s1 = inlined_call_operand.vmem [shape: bf16[36,128], index: 1, kind: input, shape index: {}]   ;;  %s12382_s2 = inlined_call_operand.vmem [shape: f32[1,128], index: 2, kind: input, shape index: {}]   ;;  %s12383_s3 = inlined_call_operand.hbm [shape: bf16[200,128], index: 3, kind: input, shape index: {}]   ;;  %s12384_s4 = inlined_call_operand.vmem [shape: bf16[5,256,128], index: 4, kind: input, shape index: {}]   ;;  %s12385_s5 = inlined_call_operand.vmem [shape: f32[1,128], index: 5, kind: input, shape index: {}]   ;;  %s12386_s6 = inlined_call_operand.hbm [shape: bf16[72,178], index: 6, kind: input, shape index: {}]   ;;  %s12387_s7 = inlined_call_operand.vmem [shape: f32[1,128], index: 7, kind: input, shape index: {}]   ;;  %s12388_s8 = inlined_call_operand.vmem [shape: bf16[32,58], index: 8, kind: input, shape index: {}]   ;;  %s12389_s9 = inlined_call_operand.vmem [shape: f32[1,256], index: 9, kind: input, shape index: {}]   ;;  %s12390_s10 = inlined_call_operand.vmem [shape: bf16[2,22], index: 10, kind: input, shape index: {}]   ;;  %s12391_s11 = inlined_call_operand.vmem [shape: f32[1,512], index: 11, kind: input, shape index: {}]   ;;  %s12392_s12 = inlined_call_operand.vmem [shape: bf16[512,4], index: 12, kind: input, shape index: {}]   ;;  %s12393_s13 = inlined_call_operand.vmem [shape: f32[1,4], index: 13, kind: input, shape index: {}]   ;;  %s12394_s14 = inlined_call_operand.vmem [shape: bf16[5,256,128], index: 14, kind: input, shape index: {}]   ;;  %s12395_s15 = inlined_call_operand.vmem [shape: bf16[5,256,256], index: 15, kind: input, shape index: {}]   ;;  %s12396_s16 = inlined_call_operand.vmem [shape: bf16[256,512], index: 16, kind: input, shape index: {}]   ;;  %s12397_s17 = inlined_call_operand.vmem [shape: f32[2,4], index: 17, kind: output, shape index: {}]  }
   0x1   :  { %12421 = sst [smem:[#allocation54_spill]] %s12380_s0 }
   0x2   :  { %12422 = sst [smem:[#allocation55_spill]] %s12381_s1 }
   0x3   :  { %22 = vsyncpa [#allocation10], 0  ;;  %s34_s26 = sshll.u32 %s12383_s3, 4  ;;  %s35_s26 = int_to_ptr.hbm [resolvable:$true] %s34_s26 }
   0x4   :  { %23 = vsyncpa [#allocation12], 0  ;;  %s9725_s27 = smov [#allocation9]   ;;  %s51_s30 = sshll.u32 %s12386_s6, 4  ;;  %s52_s30 = int_to_ptr.hbm [resolvable:$true] %s51_s30 }
   0x5   :  { %s36_s28 = sshll.u32 %s9725_s27, 4  ;;  %s9726_s18 = smov 64   ;;  %s37_s28 = int_to_ptr.vmem [resolvable:$true] %s36_s28 }
   0x6   :  { %s9727_s19 = smov 4   ;;  %s9728_s1 = smov [#allocation11]  }
   0x7   :  { %42 = dma.hbm_to_vmem [thread:$0]  %s35_s26, 1600, %s37_s28, [#allocation10], %s9726_s18, %s9726_s18, %s9727_s19  }
   0x8   :  { %s53_s20 = sshll.u32 %s9728_s1, 4  ;;  %s9729_s21 = smov 128   ;;  %s54_s20 = int_to_ptr.vmem [resolvable:$true] %s53_s20 }
   0x9   :  { %s9730_s22 = smov 8  }
   0xa   :  { %59 = dma.hbm_to_vmem [thread:$0]  %s52_s30, 1152, %s54_s20, [#allocation12], %s9729_s21, %s9729_s21, %s9730_s22  }
   0xb   :  { %9715 = dma.done.wait [#allocation10], 1600  }
   0xc   :  { %9716 = vsyncadd [#allocation10], 4294965696 }
   0xd   :  { %9717 = dma.done.wait [#allocation12], 1152  }
   0xe   :  { %9718 = vsyncadd [#allocation12], 4294966144  ;;  %v93_v0 = vld [vmem:[%s12394_s14] sm:$0xff]  ;;  %v95_v1 = vld [vmem:[%s12394_s14 + $0x8] sm:$0xff] }
   0xf   :  { %v97_v2 = vld [vmem:[%s12394_s14 + $0x10] sm:$0xff]  ;;  %94 = vst [vmem:[#allocation5 + $0xc8] sm:$0xff] %v93_v0  ;;  %v99_v3 = vld [vmem:[%s12394_s14 + $0x18] sm:$0xff]  ;;  %v101_v4 = vld [vmem:[%s12394_s14 + $0x20] sm:$0xff] }
  0x10   :  { %96 = vst [vmem:[#allocation5 + $0x8] sm:$0xff] %v95_v1  ;;  %v103_v5 = vld [vmem:[%s12394_s14 + $0x28] sm:$0xff]  ;;  %v105_v6 = vld [vmem:[%s12394_s14 + $0x30] sm:$0xff]  ;;  %v107_v7 = vld [vmem:[%s12394_s14 + $0x38] sm:$0xff] }
  0x11   :  { %98 = vst [vmem:[#allocation5 + $0x40] sm:$0xff] %v97_v2  ;;  %v109_v8 = vld [vmem:[%s12394_s14 + $0x40] sm:$0xff]  ;;  %v111_v9 = vld [vmem:[%s12394_s14 + $0x48] sm:$0xff]  ;;  %v113_v10 = vld [vmem:[%s12394_s14 + $0x50] sm:$0xff] }
  0x12   :  { %100 = vst [vmem:[#allocation5 + $0x28] sm:$0xff] %v99_v3  ;;  %v115_v11 = vld [vmem:[%s12394_s14 + $0x58] sm:$0xff]  ;;  %v117_v12 = vld [vmem:[%s12394_s14 + $0x60] sm:$0xff]  ;;  %v119_v13 = vld [vmem:[%s12394_s14 + $0x68] sm:$0xff] }
  0x13   :  { %102 = vst [vmem:[#allocation5 + $0xe8] sm:$0xff] %v101_v4  ;;  %v121_v14 = vld [vmem:[%s12394_s14 + $0x70] sm:$0xff]  ;;  %v123_v15 = vld [vmem:[%s12394_s14 + $0x78] sm:$0xff]  ;;  %v125_v16 = vld [vmem:[%s12394_s14 + $0x80] sm:$0xff] }
  0x14   :  { %104 = vst [vmem:[#allocation5 + $0xf0] sm:$0xff] %v103_v5  ;;  %v127_v17 = vld [vmem:[%s12394_s14 + $0x88] sm:$0xff]  ;;  %v129_v18 = vld [vmem:[%s12394_s14 + $0x90] sm:$0xff]  ;;  %v131_v19 = vld [vmem:[%s12394_s14 + $0x98] sm:$0xff] }
  0x15   :  { %106 = vst [vmem:[#allocation5 + $0x70] sm:$0xff] %v105_v6  ;;  %v133_v20 = vld [vmem:[%s12394_s14 + $0xa0] sm:$0xff]  ;;  %v135_v21 = vld [vmem:[%s12394_s14 + $0xa8] sm:$0xff]  ;;  %v137_v22 = vld [vmem:[%s12394_s14 + $0xb0] sm:$0xff] }
  0x16   :  { %108 = vst [vmem:[#allocation5 + $0x120] sm:$0xff] %v107_v7  ;;  %v139_v23 = vld [vmem:[%s12394_s14 + $0xb8] sm:$0xff]  ;;  %v141_v24 = vld [vmem:[%s12394_s14 + $0xc0] sm:$0xff]  ;;  %v143_v25 = vld [vmem:[%s12394_s14 + $0xc8] sm:$0xff] }
  0x17   :  { %110 = vst [vmem:[#allocation5 + $0xd8] sm:$0xff] %v109_v8  ;;  %v145_v26 = vld [vmem:[%s12394_s14 + $0xd0] sm:$0xff]  ;;  %v147_v27 = vld [vmem:[%s12394_s14 + $0xd8] sm:$0xff]  ;;  %v149_v28 = vld [vmem:[%s12394_s14 + $0xe0] sm:$0xff] }
  0x18   :  { %112 = vst [vmem:[#allocation5 + $0x148] sm:$0xff] %v111_v9  ;;  %v151_v29 = vld [vmem:[%s12394_s14 + $0xe8] sm:$0xff]  ;;  %v153_v30 = vld [vmem:[%s12394_s14 + $0xf0] sm:$0xff]  ;;  %v155_v31 = vld [vmem:[%s12394_s14 + $0xf8] sm:$0xff] }
  0x19   :  { %114 = vst [vmem:[#allocation5 + $0x158] sm:$0xff] %v113_v10  ;;  %v157_v32 = vld [vmem:[%s12394_s14 + $0x100] sm:$0xff]  ;;  %v159_v33 = vld [vmem:[%s12394_s14 + $0x108] sm:$0xff]  ;;  %v161_v34 = vld [vmem:[%s12394_s14 + $0x110] sm:$0xff] }
  0x1a   :  { %116 = vst [vmem:[#allocation5 + $0x108] sm:$0xff] %v115_v11  ;;  %v163_v35 = vld [vmem:[%s12394_s14 + $0x118] sm:$0xff]  ;;  %v165_v36 = vld [vmem:[%s12394_s14 + $0x120] sm:$0xff]  ;;  %v167_v37 = vld [vmem:[%s12394_s14 + $0x128] sm:$0xff] }
  0x1b   :  { %118 = vst [vmem:[#allocation5 + $0x220] sm:$0xff] %v117_v12  ;;  %v169_v38 = vld [vmem:[%s12394_s14 + $0x130] sm:$0xff]  ;;  %v171_v39 = vld [vmem:[%s12394_s14 + $0x138] sm:$0xff]  ;;  %v173_v40 = vld [vmem:[%s12394_s14 + $0x140] sm:$0xff] }
  0x1c   :  { %120 = vst [vmem:[#allocation5 + $0xc0] sm:$0xff] %v119_v13  ;;  %v175_v41 = vld [vmem:[%s12394_s14 + $0x148] sm:$0xff]  ;;  %v177_v42 = vld [vmem:[%s12394_s14 + $0x150] sm:$0xff]  ;;  %v179_v43 = vld [vmem:[%s12394_s14 + $0x158] sm:$0xff] }
  0x1d   :  { %122 = vst [vmem:[#allocation5 + $0x140] sm:$0xff] %v121_v14  ;;  %v181_v44 = vld [vmem:[%s12394_s14 + $0x160] sm:$0xff]  ;;  %v183_v45 = vld [vmem:[%s12394_s14 + $0x168] sm:$0xff]  ;;  %v185_v46 = vld [vmem:[%s12394_s14 + $0x170] sm:$0xff] }
  0x1e   :  { %124 = vst [vmem:[#allocation5 + $0x200] sm:$0xff] %v123_v15  ;;  %v187_v47 = vld [vmem:[%s12394_s14 + $0x178] sm:$0xff]  ;;  %v189_v48 = vld [vmem:[%s12394_s14 + $0x180] sm:$0xff]  ;;  %v191_v49 = vld [vmem:[%s12394_s14 + $0x188] sm:$0xff] }
  0x1f   :  { %126 = vst [vmem:[#allocation5 + $0x80] sm:$0xff] %v125_v16  ;;  %v193_v50 = vld [vmem:[%s12394_s14 + $0x190] sm:$0xff]  ;;  %v195_v51 = vld [vmem:[%s12394_s14 + $0x198] sm:$0xff]  ;;  %v197_v52 = vld [vmem:[%s12394_s14 + $0x1a0] sm:$0xff] }
  0x20   :  { %128 = vst [vmem:[#allocation5 + $0x30] sm:$0xff] %v127_v17  ;;  %v199_v53 = vld [vmem:[%s12394_s14 + $0x1a8] sm:$0xff]  ;;  %v201_v54 = vld [vmem:[%s12394_s14 + $0x1b0] sm:$0xff]  ;;  %v203_v55 = vld [vmem:[%s12394_s14 + $0x1b8] sm:$0xff] }
  0x21   :  { %130 = vst [vmem:[#allocation5 + $0x10] sm:$0xff] %v129_v18  ;;  %v205_v56 = vld [vmem:[%s12394_s14 + $0x1c0] sm:$0xff]  ;;  %v207_v57 = vld [vmem:[%s12394_s14 + $0x1c8] sm:$0xff]  ;;  %v209_v58 = vld [vmem:[%s12394_s14 + $0x1d0] sm:$0xff] }
  0x22   :  { %132 = vst [vmem:[#allocation5 + $0x160] sm:$0xff] %v131_v19  ;;  %v211_v59 = vld [vmem:[%s12394_s14 + $0x1d8] sm:$0xff]  ;;  %v213_v60 = vld [vmem:[%s12394_s14 + $0x1e0] sm:$0xff]  ;;  %v215_v61 = vld [vmem:[%s12394_s14 + $0x1e8] sm:$0xff] }
  0x23   :  { %134 = vst [vmem:[#allocation5 + $0x1d8] sm:$0xff] %v133_v20  ;;  %v217_v62 = vld [vmem:[%s12394_s14 + $0x1f0] sm:$0xff]  ;;  %v219_v63 = vld [vmem:[%s12394_s14 + $0x1f8] sm:$0xff]  ;;  %v221_v0 = vld [vmem:[%s12394_s14 + $0x200] sm:$0xff] }
  0x24   :  { %136 = vst [vmem:[#allocation5 + $0x1a0] sm:$0xff] %v135_v21  ;;  %v223_v1 = vld [vmem:[%s12394_s14 + $0x208] sm:$0xff]  ;;  %v225_v2 = vld [vmem:[%s12394_s14 + $0x210] sm:$0xff]  ;;  %v227_v3 = vld [vmem:[%s12394_s14 + $0x218] sm:$0xff] }
  0x25   :  { %138 = vst [vmem:[#allocation5 + $0x248] sm:$0xff] %v137_v22  ;;  %v229_v4 = vld [vmem:[%s12394_s14 + $0x220] sm:$0xff]  ;;  %v231_v5 = vld [vmem:[%s12394_s14 + $0x228] sm:$0xff]  ;;  %v233_v6 = vld [vmem:[%s12394_s14 + $0x230] sm:$0xff] }
  0x26   :  { %140 = vst [vmem:[#allocation5 + $0x218] sm:$0xff] %v139_v23  ;;  %v235_v7 = vld [vmem:[%s12394_s14 + $0x238] sm:$0xff] }
  0x27   :  { %142 = vst [vmem:[#allocation5 + $0x190] sm:$0xff] %v141_v24 }
  0x28   :  { %144 = vst [vmem:[#allocation5 + $0x48] sm:$0xff] %v143_v25 }
  0x29   :  { %146 = vst [vmem:[#allocation5 + $0x68] sm:$0xff] %v145_v26 }
  0x2a   :  { %148 = vst [vmem:[#allocation5 + $0x238] sm:$0xff] %v147_v27 }
  0x2b   :  { %150 = vst [vmem:[#allocation5 + $0x188] sm:$0xff] %v149_v28 }
  0x2c   :  { %152 = vst [vmem:[#allocation5 + $0x250] sm:$0xff] %v151_v29 }
  0x2d   :  { %154 = vst [vmem:[#allocation5 + $0xb8] sm:$0xff] %v153_v30 }
  0x2e   :  { %156 = vst [vmem:[#allocation5 + $0x268] sm:$0xff] %v155_v31 }
  0x2f   :  { %158 = vst [vmem:[#allocation5 + $0xf8] sm:$0xff] %v157_v32 }
  0x30   :  { %160 = vst [vmem:[#allocation5 + $0x98] sm:$0xff] %v159_v33 }
  0x31   :  { %162 = vst [vmem:[#allocation5 + $0xe0] sm:$0xff] %v161_v34 }
  0x32   :  { %164 = vst [vmem:[#allocation5 + $0x198] sm:$0xff] %v163_v35 }
  0x33   :  { %166 = vst [vmem:[#allocation5 + $0x1d0] sm:$0xff] %v165_v36 }
  0x34   :  { %168 = vst [vmem:[#allocation5 + $0x1e0] sm:$0xff] %v167_v37 }
  0x35   :  { %170 = vst [vmem:[#allocation5 + $0x1a8] sm:$0xff] %v169_v38 }
  0x36   :  { %172 = vst [vmem:[#allocation5 + $0x228] sm:$0xff] %v171_v39 }
  0x37   :  { %174 = vst [vmem:[#allocation5] sm:$0xff] %v173_v40 }
  0x38   :  { %176 = vst [vmem:[#allocation5 + $0x1b0] sm:$0xff] %v175_v41 }
  0x39   :  { %178 = vst [vmem:[#allocation5 + $0x90] sm:$0xff] %v177_v42 }
  0x3a   :  { %180 = vst [vmem:[#allocation5 + $0x270] sm:$0xff] %v179_v43 }
  0x3b   :  { %182 = vst [vmem:[#allocation5 + $0x1e8] sm:$0xff] %v181_v44 }
  0x3c   :  { %184 = vst [vmem:[#allocation5 + $0x38] sm:$0xff] %v183_v45 }
  0x3d   :  { %186 = vst [vmem:[#allocation5 + $0x1c8] sm:$0xff] %v185_v46 }
  0x3e   :  { %188 = vst [vmem:[#allocation5 + $0x18] sm:$0xff] %v187_v47 }
  0x3f   :  { %190 = vst [vmem:[#allocation5 + $0x78] sm:$0xff] %v189_v48 }
  0x40   :  { %192 = vst [vmem:[#allocation5 + $0x1f0] sm:$0xff] %v191_v49 }
  0x41   :  { %194 = vst [vmem:[#allocation5 + $0xa0] sm:$0xff] %v193_v50 }
  0x42   :  { %196 = vst [vmem:[#allocation5 + $0x1f8] sm:$0xff] %v195_v51 }
  0x43   :  { %198 = vst [vmem:[#allocation5 + $0x58] sm:$0xff] %v197_v52 }
  0x44   :  { %200 = vst [vmem:[#allocation5 + $0x258] sm:$0xff] %v199_v53 }
  0x45   :  { %202 = vst [vmem:[#allocation5 + $0x260] sm:$0xff] %v201_v54 }
  0x46   :  { %204 = vst [vmem:[#allocation5 + $0x100] sm:$0xff] %v203_v55 }
  0x47   :  { %206 = vst [vmem:[#allocation5 + $0x1b8] sm:$0xff] %v205_v56 }
  0x48   :  { %208 = vst [vmem:[#allocation5 + $0x168] sm:$0xff] %v207_v57 }
  0x49   :  { %210 = vst [vmem:[#allocation5 + $0xd0] sm:$0xff] %v209_v58 }
  0x4a   :  { %212 = vst [vmem:[#allocation5 + $0x278] sm:$0xff] %v211_v59 }
  0x4b   :  { %214 = vst [vmem:[#allocation5 + $0x210] sm:$0xff] %v213_v60 }
  0x4c   :  { %216 = vst [vmem:[#allocation5 + $0x180] sm:$0xff] %v215_v61 }
  0x4d   :  { %218 = vst [vmem:[#allocation5 + $0x130] sm:$0xff] %v217_v62 }
  0x4e   :  { %220 = vst [vmem:[#allocation5 + $0x110] sm:$0xff] %v219_v63 }
  0x4f   :  { %222 = vst [vmem:[#allocation5 + $0xa8] sm:$0xff] %v221_v0 }
  0x50   :  { %224 = vst [vmem:[#allocation5 + $0x60] sm:$0xff] %v223_v1 }
  0x51   :  { %226 = vst [vmem:[#allocation5 + $0x138] sm:$0xff] %v225_v2 }
  0x52   :  { %228 = vst [vmem:[#allocation5 + $0x208] sm:$0xff] %v227_v3 }
  0x53   :  { %230 = vst [vmem:[#allocation5 + $0x240] sm:$0xff] %v229_v4 }
  0x54   :  { %232 = vst [vmem:[#allocation5 + $0x88] sm:$0xff] %v231_v5 }
  0x55   :  { %234 = vst [vmem:[#allocation5 + $0x118] sm:$0xff] %v233_v6 }
  0x56   :  { %236 = vst [vmem:[#allocation5 + $0x128] sm:$0xff] %v235_v7 }
  0x57   :  { %258 = vsyncadd [#allocation8], 10240  ;;  %v270_v8 = vld [vmem:[%s12395_s15] sm:$0xff]  ;;  %v272_v9 = vld [vmem:[%s12395_s15 + $0x8] sm:$0xff] }
  0x58   :  { %271 = vst [vmem:[#allocation6] sm:$0xff] %v270_v8  ;;  %v274_v10 = vld [vmem:[%s12395_s15 + $0x10] sm:$0xff]  ;;  %v276_v11 = vld [vmem:[%s12395_s15 + $0x18] sm:$0xff]  ;;  %v278_v12 = vld [vmem:[%s12395_s15 + $0x20] sm:$0xff] }
  0x59   :  { %273 = vst [vmem:[#allocation6 + $0x8] sm:$0xff] %v272_v9  ;;  %v280_v13 = vld [vmem:[%s12395_s15 + $0x28] sm:$0xff]  ;;  %v282_v14 = vld [vmem:[%s12395_s15 + $0x30] sm:$0xff]  ;;  %v284_v15 = vld [vmem:[%s12395_s15 + $0x38] sm:$0xff] }
  0x5a   :  { %275 = vst [vmem:[#allocation6 + $0x10] sm:$0xff] %v274_v10  ;;  %v286_v16 = vld [vmem:[%s12395_s15 + $0x40] sm:$0xff]  ;;  %v288_v17 = vld [vmem:[%s12395_s15 + $0x48] sm:$0xff]  ;;  %v290_v18 = vld [vmem:[%s12395_s15 + $0x50] sm:$0xff] }
  0x5b   :  { %277 = vst [vmem:[#allocation6 + $0x18] sm:$0xff] %v276_v11  ;;  %v292_v19 = vld [vmem:[%s12395_s15 + $0x58] sm:$0xff]  ;;  %v294_v20 = vld [vmem:[%s12395_s15 + $0x60] sm:$0xff]  ;;  %v296_v21 = vld [vmem:[%s12395_s15 + $0x68] sm:$0xff] }
  0x5c   :  { %279 = vst [vmem:[#allocation6 + $0x20] sm:$0xff] %v278_v12  ;;  %v298_v22 = vld [vmem:[%s12395_s15 + $0x70] sm:$0xff]  ;;  %v300_v23 = vld [vmem:[%s12395_s15 + $0x78] sm:$0xff]  ;;  %v302_v24 = vld [vmem:[%s12395_s15 + $0x80] sm:$0xff] }
  0x5d   :  { %281 = vst [vmem:[#allocation6 + $0x28] sm:$0xff] %v280_v13  ;;  %v304_v25 = vld [vmem:[%s12395_s15 + $0x88] sm:$0xff]  ;;  %v306_v26 = vld [vmem:[%s12395_s15 + $0x90] sm:$0xff]  ;;  %v308_v27 = vld [vmem:[%s12395_s15 + $0x98] sm:$0xff] }
  0x5e   :  { %283 = vst [vmem:[#allocation6 + $0x30] sm:$0xff] %v282_v14  ;;  %v310_v28 = vld [vmem:[%s12395_s15 + $0xa0] sm:$0xff]  ;;  %v312_v29 = vld [vmem:[%s12395_s15 + $0xa8] sm:$0xff]  ;;  %v314_v30 = vld [vmem:[%s12395_s15 + $0xb0] sm:$0xff] }
  0x5f   :  { %285 = vst [vmem:[#allocation6 + $0x38] sm:$0xff] %v284_v15  ;;  %v316_v31 = vld [vmem:[%s12395_s15 + $0xb8] sm:$0xff]  ;;  %v318_v32 = vld [vmem:[%s12395_s15 + $0xc0] sm:$0xff]  ;;  %v320_v33 = vld [vmem:[%s12395_s15 + $0xc8] sm:$0xff] }
  0x60   :  { %287 = vst [vmem:[#allocation6 + $0x40] sm:$0xff] %v286_v16  ;;  %v322_v34 = vld [vmem:[%s12395_s15 + $0xd0] sm:$0xff]  ;;  %v324_v35 = vld [vmem:[%s12395_s15 + $0xd8] sm:$0xff]  ;;  %v326_v36 = vld [vmem:[%s12395_s15 + $0xe0] sm:$0xff] }
  0x61   :  { %289 = vst [vmem:[#allocation6 + $0x48] sm:$0xff] %v288_v17  ;;  %v328_v37 = vld [vmem:[%s12395_s15 + $0xe8] sm:$0xff]  ;;  %v330_v38 = vld [vmem:[%s12395_s15 + $0xf0] sm:$0xff]  ;;  %v332_v39 = vld [vmem:[%s12395_s15 + $0xf8] sm:$0xff] }
  0x62   :  { %291 = vst [vmem:[#allocation6 + $0x50] sm:$0xff] %v290_v18  ;;  %v334_v40 = vld [vmem:[%s12395_s15 + $0x100] sm:$0xff]  ;;  %v336_v41 = vld [vmem:[%s12395_s15 + $0x108] sm:$0xff]  ;;  %v338_v42 = vld [vmem:[%s12395_s15 + $0x110] sm:$0xff] }
  0x63   :  { %293 = vst [vmem:[#allocation6 + $0x58] sm:$0xff] %v292_v19  ;;  %v340_v43 = vld [vmem:[%s12395_s15 + $0x118] sm:$0xff]  ;;  %v342_v44 = vld [vmem:[%s12395_s15 + $0x120] sm:$0xff]  ;;  %v344_v45 = vld [vmem:[%s12395_s15 + $0x128] sm:$0xff] }
  0x64   :  { %295 = vst [vmem:[#allocation6 + $0x60] sm:$0xff] %v294_v20  ;;  %v346_v46 = vld [vmem:[%s12395_s15 + $0x130] sm:$0xff]  ;;  %v348_v47 = vld [vmem:[%s12395_s15 + $0x138] sm:$0xff]  ;;  %v350_v48 = vld [vmem:[%s12395_s15 + $0x140] sm:$0xff] }
  0x65   :  { %297 = vst [vmem:[#allocation6 + $0x68] sm:$0xff] %v296_v21  ;;  %v352_v49 = vld [vmem:[%s12395_s15 + $0x148] sm:$0xff]  ;;  %v354_v50 = vld [vmem:[%s12395_s15 + $0x150] sm:$0xff]  ;;  %v356_v51 = vld [vmem:[%s12395_s15 + $0x158] sm:$0xff] }
  0x66   :  { %299 = vst [vmem:[#allocation6 + $0x70] sm:$0xff] %v298_v22  ;;  %v358_v52 = vld [vmem:[%s12395_s15 + $0x160] sm:$0xff]  ;;  %v360_v53 = vld [vmem:[%s12395_s15 + $0x168] sm:$0xff]  ;;  %v362_v54 = vld [vmem:[%s12395_s15 + $0x170] sm:$0xff] }
  0x67   :  { %301 = vst [vmem:[#allocation6 + $0x78] sm:$0xff] %v300_v23  ;;  %v364_v55 = vld [vmem:[%s12395_s15 + $0x178] sm:$0xff]  ;;  %v366_v56 = vld [vmem:[%s12395_s15 + $0x180] sm:$0xff]  ;;  %v368_v57 = vld [vmem:[%s12395_s15 + $0x188] sm:$0xff] }
  0x68   :  { %303 = vst [vmem:[#allocation6 + $0x80] sm:$0xff] %v302_v24  ;;  %v370_v58 = vld [vmem:[%s12395_s15 + $0x190] sm:$0xff]  ;;  %v372_v59 = vld [vmem:[%s12395_s15 + $0x198] sm:$0xff]  ;;  %v374_v60 = vld [vmem:[%s12395_s15 + $0x1a0] sm:$0xff] }
  0x69   :  { %305 = vst [vmem:[#allocation6 + $0x88] sm:$0xff] %v304_v25  ;;  %v376_v61 = vld [vmem:[%s12395_s15 + $0x1a8] sm:$0xff]  ;;  %v378_v62 = vld [vmem:[%s12395_s15 + $0x1b0] sm:$0xff]  ;;  %v380_v63 = vld [vmem:[%s12395_s15 + $0x1b8] sm:$0xff] }
  0x6a   :  { %307 = vst [vmem:[#allocation6 + $0x90] sm:$0xff] %v306_v26  ;;  %v382_v0 = vld [vmem:[%s12395_s15 + $0x1c0] sm:$0xff]  ;;  %v384_v1 = vld [vmem:[%s12395_s15 + $0x1c8] sm:$0xff]  ;;  %v386_v2 = vld [vmem:[%s12395_s15 + $0x1d0] sm:$0xff] }
  0x6b   :  { %309 = vst [vmem:[#allocation6 + $0x98] sm:$0xff] %v308_v27  ;;  %v388_v3 = vld [vmem:[%s12395_s15 + $0x1d8] sm:$0xff]  ;;  %v390_v4 = vld [vmem:[%s12395_s15 + $0x1e0] sm:$0xff]  ;;  %v392_v5 = vld [vmem:[%s12395_s15 + $0x1e8] sm:$0xff] }
  0x6c   :  { %311 = vst [vmem:[#allocation6 + $0xa0] sm:$0xff] %v310_v28  ;;  %v394_v6 = vld [vmem:[%s12395_s15 + $0x1f0] sm:$0xff]  ;;  %v396_v7 = vld [vmem:[%s12395_s15 + $0x1f8] sm:$0xff]  ;;  %v398_v8 = vld [vmem:[%s12395_s15 + $0x200] sm:$0xff] }
  0x6d   :  { %313 = vst [vmem:[#allocation6 + $0xa8] sm:$0xff] %v312_v29  ;;  %v400_v9 = vld [vmem:[%s12395_s15 + $0x208] sm:$0xff]  ;;  %v402_v10 = vld [vmem:[%s12395_s15 + $0x210] sm:$0xff]  ;;  %v404_v11 = vld [vmem:[%s12395_s15 + $0x218] sm:$0xff] }
  0x6e   :  { %315 = vst [vmem:[#allocation6 + $0xb0] sm:$0xff] %v314_v30  ;;  %v406_v12 = vld [vmem:[%s12395_s15 + $0x220] sm:$0xff]  ;;  %v408_v13 = vld [vmem:[%s12395_s15 + $0x228] sm:$0xff]  ;;  %v410_v14 = vld [vmem:[%s12395_s15 + $0x230] sm:$0xff] }
  0x6f   :  { %317 = vst [vmem:[#allocation6 + $0xb8] sm:$0xff] %v316_v31  ;;  %v412_v15 = vld [vmem:[%s12395_s15 + $0x238] sm:$0xff]  ;;  %v414_v16 = vld [vmem:[%s12395_s15 + $0x240] sm:$0xff]  ;;  %v416_v17 = vld [vmem:[%s12395_s15 + $0x248] sm:$0xff] }
  0x70   :  { %319 = vst [vmem:[#allocation6 + $0xc0] sm:$0xff] %v318_v32  ;;  %v418_v18 = vld [vmem:[%s12395_s15 + $0x250] sm:$0xff]  ;;  %v420_v19 = vld [vmem:[%s12395_s15 + $0x258] sm:$0xff]  ;;  %v422_v20 = vld [vmem:[%s12395_s15 + $0x260] sm:$0xff] }
  0x71   :  { %321 = vst [vmem:[#allocation6 + $0xc8] sm:$0xff] %v320_v33  ;;  %v424_v21 = vld [vmem:[%s12395_s15 + $0x268] sm:$0xff]  ;;  %v426_v22 = vld [vmem:[%s12395_s15 + $0x270] sm:$0xff]  ;;  %v428_v23 = vld [vmem:[%s12395_s15 + $0x278] sm:$0xff] }
  0x72   :  { %323 = vst [vmem:[#allocation6 + $0xd0] sm:$0xff] %v322_v34  ;;  %v430_v24 = vld [vmem:[%s12395_s15 + $0x280] sm:$0xff]  ;;  %v432_v25 = vld [vmem:[%s12395_s15 + $0x288] sm:$0xff]  ;;  %v434_v26 = vld [vmem:[%s12395_s15 + $0x290] sm:$0xff] }
  0x73   :  { %325 = vst [vmem:[#allocation6 + $0xd8] sm:$0xff] %v324_v35  ;;  %v436_v27 = vld [vmem:[%s12395_s15 + $0x298] sm:$0xff]  ;;  %v438_v28 = vld [vmem:[%s12395_s15 + $0x2a0] sm:$0xff]  ;;  %v440_v29 = vld [vmem:[%s12395_s15 + $0x2a8] sm:$0xff] }
  0x74   :  { %327 = vst [vmem:[#allocation6 + $0xe0] sm:$0xff] %v326_v36  ;;  %v442_v30 = vld [vmem:[%s12395_s15 + $0x2b0] sm:$0xff]  ;;  %v444_v31 = vld [vmem:[%s12395_s15 + $0x2b8] sm:$0xff]  ;;  %v446_v32 = vld [vmem:[%s12395_s15 + $0x2c0] sm:$0xff] }
  0x75   :  { %329 = vst [vmem:[#allocation6 + $0xe8] sm:$0xff] %v328_v37  ;;  %v448_v33 = vld [vmem:[%s12395_s15 + $0x2c8] sm:$0xff]  ;;  %v450_v34 = vld [vmem:[%s12395_s15 + $0x2d0] sm:$0xff]  ;;  %v452_v35 = vld [vmem:[%s12395_s15 + $0x2d8] sm:$0xff] }
  0x76   :  { %331 = vst [vmem:[#allocation6 + $0xf0] sm:$0xff] %v330_v38  ;;  %v454_v36 = vld [vmem:[%s12395_s15 + $0x2e0] sm:$0xff]  ;;  %v456_v37 = vld [vmem:[%s12395_s15 + $0x2e8] sm:$0xff]  ;;  %v458_v38 = vld [vmem:[%s12395_s15 + $0x2f0] sm:$0xff] }
  0x77   :  { %333 = vst [vmem:[#allocation6 + $0xf8] sm:$0xff] %v332_v39  ;;  %v460_v39 = vld [vmem:[%s12395_s15 + $0x2f8] sm:$0xff] }
  0x78   :  { %335 = vst [vmem:[#allocation6 + $0x100] sm:$0xff] %v334_v40  ;;  %v462_v40 = vld [vmem:[%s12395_s15 + $0x300] sm:$0xff] }
  0x79   :  { %337 = vst [vmem:[#allocation6 + $0x108] sm:$0xff] %v336_v41  ;;  %v464_v41 = vld [vmem:[%s12395_s15 + $0x308] sm:$0xff] }
  0x7a   :  { %339 = vst [vmem:[#allocation6 + $0x110] sm:$0xff] %v338_v42  ;;  %v466_v42 = vld [vmem:[%s12395_s15 + $0x310] sm:$0xff] }
  0x7b   :  { %341 = vst [vmem:[#allocation6 + $0x118] sm:$0xff] %v340_v43  ;;  %v468_v43 = vld [vmem:[%s12395_s15 + $0x318] sm:$0xff] }
  0x7c   :  { %343 = vst [vmem:[#allocation6 + $0x120] sm:$0xff] %v342_v44  ;;  %v470_v44 = vld [vmem:[%s12395_s15 + $0x320] sm:$0xff] }
  0x7d   :  { %345 = vst [vmem:[#allocation6 + $0x128] sm:$0xff] %v344_v45  ;;  %v472_v45 = vld [vmem:[%s12395_s15 + $0x328] sm:$0xff] }
  0x7e   :  { %347 = vst [vmem:[#allocation6 + $0x130] sm:$0xff] %v346_v46  ;;  %v474_v46 = vld [vmem:[%s12395_s15 + $0x330] sm:$0xff] }
  0x7f   :  { %349 = vst [vmem:[#allocation6 + $0x138] sm:$0xff] %v348_v47  ;;  %v476_v47 = vld [vmem:[%s12395_s15 + $0x338] sm:$0xff] }
  0x80   :  { %351 = vst [vmem:[#allocation6 + $0x140] sm:$0xff] %v350_v48  ;;  %v478_v48 = vld [vmem:[%s12395_s15 + $0x340] sm:$0xff] }
  0x81   :  { %353 = vst [vmem:[#allocation6 + $0x148] sm:$0xff] %v352_v49  ;;  %v480_v49 = vld [vmem:[%s12395_s15 + $0x348] sm:$0xff] }
  0x82   :  { %355 = vst [vmem:[#allocation6 + $0x150] sm:$0xff] %v354_v50  ;;  %v482_v50 = vld [vmem:[%s12395_s15 + $0x350] sm:$0xff] }
  0x83   :  { %357 = vst [vmem:[#allocation6 + $0x158] sm:$0xff] %v356_v51  ;;  %v484_v51 = vld [vmem:[%s12395_s15 + $0x358] sm:$0xff] }
  0x84   :  { %359 = vst [vmem:[#allocation6 + $0x160] sm:$0xff] %v358_v52  ;;  %v486_v52 = vld [vmem:[%s12395_s15 + $0x360] sm:$0xff] }
  0x85   :  { %361 = vst [vmem:[#allocation6 + $0x168] sm:$0xff] %v360_v53  ;;  %v488_v53 = vld [vmem:[%s12395_s15 + $0x368] sm:$0xff] }
  0x86   :  { %363 = vst [vmem:[#allocation6 + $0x170] sm:$0xff] %v362_v54  ;;  %v490_v54 = vld [vmem:[%s12395_s15 + $0x370] sm:$0xff] }
  0x87   :  { %365 = vst [vmem:[#allocation6 + $0x178] sm:$0xff] %v364_v55  ;;  %v492_v55 = vld [vmem:[%s12395_s15 + $0x378] sm:$0xff] }
  0x88   :  { %367 = vst [vmem:[#allocation6 + $0x180] sm:$0xff] %v366_v56  ;;  %v494_v56 = vld [vmem:[%s12395_s15 + $0x380] sm:$0xff] }
  0x89   :  { %369 = vst [vmem:[#allocation6 + $0x188] sm:$0xff] %v368_v57  ;;  %v496_v57 = vld [vmem:[%s12395_s15 + $0x388] sm:$0xff] }
  0x8a   :  { %371 = vst [vmem:[#allocation6 + $0x190] sm:$0xff] %v370_v58  ;;  %v498_v58 = vld [vmem:[%s12395_s15 + $0x390] sm:$0xff] }
  0x8b   :  { %373 = vst [vmem:[#allocation6 + $0x198] sm:$0xff] %v372_v59  ;;  %v500_v59 = vld [vmem:[%s12395_s15 + $0x398] sm:$0xff] }
  0x8c   :  { %375 = vst [vmem:[#allocation6 + $0x1a0] sm:$0xff] %v374_v60  ;;  %v502_v60 = vld [vmem:[%s12395_s15 + $0x3a0] sm:$0xff] }
  0x8d   :  { %377 = vst [vmem:[#allocation6 + $0x1a8] sm:$0xff] %v376_v61  ;;  %v504_v61 = vld [vmem:[%s12395_s15 + $0x3a8] sm:$0xff] }
  0x8e   :  { %379 = vst [vmem:[#allocation6 + $0x1b0] sm:$0xff] %v378_v62  ;;  %v506_v62 = vld [vmem:[%s12395_s15 + $0x3b0] sm:$0xff] }
  0x8f   :  { %381 = vst [vmem:[#allocation6 + $0x1b8] sm:$0xff] %v380_v63  ;;  %v508_v63 = vld [vmem:[%s12395_s15 + $0x3b8] sm:$0xff] }
  0x90   :  { %383 = vst [vmem:[#allocation6 + $0x1c0] sm:$0xff] %v382_v0  ;;  %v510_v0 = vld [vmem:[%s12395_s15 + $0x3c0] sm:$0xff] }
  0x91   :  { %385 = vst [vmem:[#allocation6 + $0x1c8] sm:$0xff] %v384_v1  ;;  %v512_v1 = vld [vmem:[%s12395_s15 + $0x3c8] sm:$0xff] }
  0x92   :  { %387 = vst [vmem:[#allocation6 + $0x1d0] sm:$0xff] %v386_v2  ;;  %v514_v2 = vld [vmem:[%s12395_s15 + $0x3d0] sm:$0xff] }
  0x93   :  { %389 = vst [vmem:[#allocation6 + $0x1d8] sm:$0xff] %v388_v3  ;;  %v516_v3 = vld [vmem:[%s12395_s15 + $0x3d8] sm:$0xff] }
  0x94   :  { %391 = vst [vmem:[#allocation6 + $0x1e0] sm:$0xff] %v390_v4  ;;  %v518_v4 = vld [vmem:[%s12395_s15 + $0x3e0] sm:$0xff] }
  0x95   :  { %393 = vst [vmem:[#allocation6 + $0x1e8] sm:$0xff] %v392_v5  ;;  %v520_v5 = vld [vmem:[%s12395_s15 + $0x3e8] sm:$0xff] }
  0x96   :  { %395 = vst [vmem:[#allocation6 + $0x1f0] sm:$0xff] %v394_v6  ;;  %v522_v6 = vld [vmem:[%s12395_s15 + $0x3f0] sm:$0xff] }
  0x97   :  { %397 = vst [vmem:[#allocation6 + $0x1f8] sm:$0xff] %v396_v7  ;;  %v524_v7 = vld [vmem:[%s12395_s15 + $0x3f8] sm:$0xff] }
  0x98   :  { %399 = vst [vmem:[#allocation6 + $0x200] sm:$0xff] %v398_v8  ;;  %v526_v8 = vld [vmem:[%s12395_s15 + $0x400] sm:$0xff] }
  0x99   :  { %401 = vst [vmem:[#allocation6 + $0x208] sm:$0xff] %v400_v9  ;;  %v528_v9 = vld [vmem:[%s12395_s15 + $0x408] sm:$0xff] }
  0x9a   :  { %403 = vst [vmem:[#allocation6 + $0x210] sm:$0xff] %v402_v10  ;;  %v530_v10 = vld [vmem:[%s12395_s15 + $0x410] sm:$0xff] }
  0x9b   :  { %405 = vst [vmem:[#allocation6 + $0x218] sm:$0xff] %v404_v11  ;;  %v532_v11 = vld [vmem:[%s12395_s15 + $0x418] sm:$0xff] }
  0x9c   :  { %407 = vst [vmem:[#allocation6 + $0x220] sm:$0xff] %v406_v12  ;;  %v534_v12 = vld [vmem:[%s12395_s15 + $0x420] sm:$0xff] }
  0x9d   :  { %409 = vst [vmem:[#allocation6 + $0x228] sm:$0xff] %v408_v13  ;;  %v536_v13 = vld [vmem:[%s12395_s15 + $0x428] sm:$0xff] }
  0x9e   :  { %411 = vst [vmem:[#allocation6 + $0x230] sm:$0xff] %v410_v14  ;;  %v538_v14 = vld [vmem:[%s12395_s15 + $0x430] sm:$0xff] }
  0x9f   :  { %413 = vst [vmem:[#allocation6 + $0x238] sm:$0xff] %v412_v15  ;;  %v540_v15 = vld [vmem:[%s12395_s15 + $0x438] sm:$0xff] }
  0xa0   :  { %415 = vst [vmem:[#allocation6 + $0x240] sm:$0xff] %v414_v16  ;;  %v542_v16 = vld [vmem:[%s12395_s15 + $0x440] sm:$0xff] }
  0xa1   :  { %417 = vst [vmem:[#allocation6 + $0x248] sm:$0xff] %v416_v17  ;;  %v544_v17 = vld [vmem:[%s12395_s15 + $0x448] sm:$0xff] }
  0xa2   :  { %419 = vst [vmem:[#allocation6 + $0x250] sm:$0xff] %v418_v18  ;;  %v546_v18 = vld [vmem:[%s12395_s15 + $0x450] sm:$0xff] }
  0xa3   :  { %421 = vst [vmem:[#allocation6 + $0x258] sm:$0xff] %v420_v19  ;;  %v548_v19 = vld [vmem:[%s12395_s15 + $0x458] sm:$0xff] }
  0xa4   :  { %423 = vst [vmem:[#allocation6 + $0x260] sm:$0xff] %v422_v20  ;;  %v550_v20 = vld [vmem:[%s12395_s15 + $0x460] sm:$0xff] }
  0xa5   :  { %425 = vst [vmem:[#allocation6 + $0x268] sm:$0xff] %v424_v21  ;;  %v552_v21 = vld [vmem:[%s12395_s15 + $0x468] sm:$0xff] }
  0xa6   :  { %427 = vst [vmem:[#allocation6 + $0x270] sm:$0xff] %v426_v22  ;;  %v554_v22 = vld [vmem:[%s12395_s15 + $0x470] sm:$0xff] }
  0xa7   :  { %429 = vst [vmem:[#allocation6 + $0x278] sm:$0xff] %v428_v23  ;;  %v556_v23 = vld [vmem:[%s12395_s15 + $0x478] sm:$0xff] }
  0xa8   :  { %431 = vst [vmem:[#allocation6 + $0x280] sm:$0xff] %v430_v24 }
  0xa9   :  { %433 = vst [vmem:[#allocation6 + $0x288] sm:$0xff] %v432_v25 }
  0xaa   :  { %435 = vst [vmem:[#allocation6 + $0x290] sm:$0xff] %v434_v26 }
  0xab   :  { %437 = vst [vmem:[#allocation6 + $0x298] sm:$0xff] %v436_v27 }
  0xac   :  { %439 = vst [vmem:[#allocation6 + $0x2a0] sm:$0xff] %v438_v28 }
  0xad   :  { %441 = vst [vmem:[#allocation6 + $0x2a8] sm:$0xff] %v440_v29 }
  0xae   :  { %443 = vst [vmem:[#allocation6 + $0x2b0] sm:$0xff] %v442_v30 }
  0xaf   :  { %445 = vst [vmem:[#allocation6 + $0x2b8] sm:$0xff] %v444_v31 }
  0xb0   :  { %447 = vst [vmem:[#allocation6 + $0x2c0] sm:$0xff] %v446_v32 }
  0xb1   :  { %449 = vst [vmem:[#allocation6 + $0x2c8] sm:$0xff] %v448_v33 }
  0xb2   :  { %451 = vst [vmem:[#allocation6 + $0x2d0] sm:$0xff] %v450_v34 }
  0xb3   :  { %453 = vst [vmem:[#allocation6 + $0x2d8] sm:$0xff] %v452_v35 }
  0xb4   :  { %455 = vst [vmem:[#allocation6 + $0x2e0] sm:$0xff] %v454_v36 }
  0xb5   :  { %457 = vst [vmem:[#allocation6 + $0x2e8] sm:$0xff] %v456_v37 }
  0xb6   :  { %459 = vst [vmem:[#allocation6 + $0x2f0] sm:$0xff] %v458_v38 }
  0xb7   :  { %461 = vst [vmem:[#allocation6 + $0x2f8] sm:$0xff] %v460_v39 }
  0xb8   :  { %463 = vst [vmem:[#allocation6 + $0x300] sm:$0xff] %v462_v40 }
  0xb9   :  { %465 = vst [vmem:[#allocation6 + $0x308] sm:$0xff] %v464_v41 }
  0xba   :  { %467 = vst [vmem:[#allocation6 + $0x310] sm:$0xff] %v466_v42 }
  0xbb   :  { %469 = vst [vmem:[#allocation6 + $0x318] sm:$0xff] %v468_v43 }
  0xbc   :  { %471 = vst [vmem:[#allocation6 + $0x320] sm:$0xff] %v470_v44 }
  0xbd   :  { %473 = vst [vmem:[#allocation6 + $0x328] sm:$0xff] %v472_v45 }
  0xbe   :  { %475 = vst [vmem:[#allocation6 + $0x330] sm:$0xff] %v474_v46 }
  0xbf   :  { %477 = vst [vmem:[#allocation6 + $0x338] sm:$0xff] %v476_v47 }
  0xc0   :  { %479 = vst [vmem:[#allocation6 + $0x340] sm:$0xff] %v478_v48 }
  0xc1   :  { %481 = vst [vmem:[#allocation6 + $0x348] sm:$0xff] %v480_v49 }
  0xc2   :  { %483 = vst [vmem:[#allocation6 + $0x350] sm:$0xff] %v482_v50 }
  0xc3   :  { %485 = vst [vmem:[#allocation6 + $0x358] sm:$0xff] %v484_v51 }
  0xc4   :  { %487 = vst [vmem:[#allocation6 + $0x360] sm:$0xff] %v486_v52 }
  0xc5   :  { %489 = vst [vmem:[#allocation6 + $0x368] sm:$0xff] %v488_v53 }
  0xc6   :  { %491 = vst [vmem:[#allocation6 + $0x370] sm:$0xff] %v490_v54 }
  0xc7   :  { %493 = vst [vmem:[#allocation6 + $0x378] sm:$0xff] %v492_v55 }
  0xc8   :  { %495 = vst [vmem:[#allocation6 + $0x380] sm:$0xff] %v494_v56 }
  0xc9   :  { %497 = vst [vmem:[#allocation6 + $0x388] sm:$0xff] %v496_v57 }
  0xca   :  { %499 = vst [vmem:[#allocation6 + $0x390] sm:$0xff] %v498_v58 }
  0xcb   :  { %501 = vst [vmem:[#allocation6 + $0x398] sm:$0xff] %v500_v59 }
  0xcc   :  { %503 = vst [vmem:[#allocation6 + $0x3a0] sm:$0xff] %v502_v60 }
  0xcd   :  { %505 = vst [vmem:[#allocation6 + $0x3a8] sm:$0xff] %v504_v61 }
  0xce   :  { %507 = vst [vmem:[#allocation6 + $0x3b0] sm:$0xff] %v506_v62 }
  0xcf   :  { %509 = vst [vmem:[#allocation6 + $0x3b8] sm:$0xff] %v508_v63 }
  0xd0   :  { %511 = vst [vmem:[#allocation6 + $0x3c0] sm:$0xff] %v510_v0 }
  0xd1   :  { %513 = vst [vmem:[#allocation6 + $0x3c8] sm:$0xff] %v512_v1 }
  0xd2   :  { %515 = vst [vmem:[#allocation6 + $0x3d0] sm:$0xff] %v514_v2 }
  0xd3   :  { %517 = vst [vmem:[#allocation6 + $0x3d8] sm:$0xff] %v516_v3 }
  0xd4   :  { %519 = vst [vmem:[#allocation6 + $0x3e0] sm:$0xff] %v518_v4 }
  0xd5   :  { %521 = vst [vmem:[#allocation6 + $0x3e8] sm:$0xff] %v520_v5 }
  0xd6   :  { %523 = vst [vmem:[#allocation6 + $0x3f0] sm:$0xff] %v522_v6 }
  0xd7   :  { %525 = vst [vmem:[#allocation6 + $0x3f8] sm:$0xff] %v524_v7 }
  0xd8   :  { %527 = vst [vmem:[#allocation6 + $0x400] sm:$0xff] %v526_v8 }
  0xd9   :  { %529 = vst [vmem:[#allocation6 + $0x408] sm:$0xff] %v528_v9 }
  0xda   :  { %531 = vst [vmem:[#allocation6 + $0x410] sm:$0xff] %v530_v10 }
  0xdb   :  { %533 = vst [vmem:[#allocation6 + $0x418] sm:$0xff] %v532_v11 }
  0xdc   :  { %535 = vst [vmem:[#allocation6 + $0x420] sm:$0xff] %v534_v12 }
  0xdd   :  { %537 = vst [vmem:[#allocation6 + $0x428] sm:$0xff] %v536_v13 }
  0xde   :  { %539 = vst [vmem:[#allocation6 + $0x430] sm:$0xff] %v538_v14 }
  0xdf   :  { %541 = vst [vmem:[#allocation6 + $0x438] sm:$0xff] %v540_v15 }
  0xe0   :  { %543 = vst [vmem:[#allocation6 + $0x440] sm:$0xff] %v542_v16 }
  0xe1   :  { %545 = vst [vmem:[#allocation6 + $0x448] sm:$0xff] %v544_v17 }
  0xe2   :  { %547 = vst [vmem:[#allocation6 + $0x450] sm:$0xff] %v546_v18 }
  0xe3   :  { %549 = vst [vmem:[#allocation6 + $0x458] sm:$0xff] %v548_v19 }
  0xe4   :  { %551 = vst [vmem:[#allocation6 + $0x460] sm:$0xff] %v550_v20 }
  0xe5   :  { %553 = vst [vmem:[#allocation6 + $0x468] sm:$0xff] %v552_v21 }
  0xe6   :  { %555 = vst [vmem:[#allocation6 + $0x470] sm:$0xff] %v554_v22 }
  0xe7   :  { %557 = vst [vmem:[#allocation6 + $0x478] sm:$0xff] %v556_v23 }
  0xe8   :  { %595 = vsyncadd [#allocation8 + $0x1], 20480  ;;  %v607_v24 = vld [vmem:[%s12396_s16] sm:$0xff]  ;;  %v609_v25 = vld [vmem:[%s12396_s16 + $0x8] sm:$0xff] }
  0xe9   :  { %608 = vst [vmem:[#allocation7] sm:$0xff] %v607_v24  ;;  %v611_v26 = vld [vmem:[%s12396_s16 + $0x10] sm:$0xff]  ;;  %v613_v27 = vld [vmem:[%s12396_s16 + $0x18] sm:$0xff]  ;;  %v615_v28 = vld [vmem:[%s12396_s16 + $0x20] sm:$0xff] }
  0xea   :  { %610 = vst [vmem:[#allocation7 + $0x8] sm:$0xff] %v609_v25  ;;  %v617_v29 = vld [vmem:[%s12396_s16 + $0x28] sm:$0xff]  ;;  %v619_v30 = vld [vmem:[%s12396_s16 + $0x30] sm:$0xff]  ;;  %v621_v31 = vld [vmem:[%s12396_s16 + $0x38] sm:$0xff] }
  0xeb   :  { %612 = vst [vmem:[#allocation7 + $0x10] sm:$0xff] %v611_v26  ;;  %v623_v32 = vld [vmem:[%s12396_s16 + $0x40] sm:$0xff]  ;;  %v625_v33 = vld [vmem:[%s12396_s16 + $0x48] sm:$0xff]  ;;  %v627_v34 = vld [vmem:[%s12396_s16 + $0x50] sm:$0xff] }
  0xec   :  { %614 = vst [vmem:[#allocation7 + $0x18] sm:$0xff] %v613_v27  ;;  %v629_v35 = vld [vmem:[%s12396_s16 + $0x58] sm:$0xff]  ;;  %v631_v36 = vld [vmem:[%s12396_s16 + $0x60] sm:$0xff]  ;;  %v633_v37 = vld [vmem:[%s12396_s16 + $0x68] sm:$0xff] }
  0xed   :  { %616 = vst [vmem:[#allocation7 + $0x20] sm:$0xff] %v615_v28  ;;  %v635_v38 = vld [vmem:[%s12396_s16 + $0x70] sm:$0xff]  ;;  %v637_v39 = vld [vmem:[%s12396_s16 + $0x78] sm:$0xff]  ;;  %v639_v40 = vld [vmem:[%s12396_s16 + $0x80] sm:$0xff] }
  0xee   :  { %618 = vst [vmem:[#allocation7 + $0x28] sm:$0xff] %v617_v29  ;;  %v641_v41 = vld [vmem:[%s12396_s16 + $0x88] sm:$0xff]  ;;  %v643_v42 = vld [vmem:[%s12396_s16 + $0x90] sm:$0xff]  ;;  %v645_v43 = vld [vmem:[%s12396_s16 + $0x98] sm:$0xff] }
  0xef   :  { %620 = vst [vmem:[#allocation7 + $0x30] sm:$0xff] %v619_v30  ;;  %v647_v44 = vld [vmem:[%s12396_s16 + $0xa0] sm:$0xff]  ;;  %v649_v45 = vld [vmem:[%s12396_s16 + $0xa8] sm:$0xff]  ;;  %v651_v46 = vld [vmem:[%s12396_s16 + $0xb0] sm:$0xff] }
  0xf0   :  { %622 = vst [vmem:[#allocation7 + $0x38] sm:$0xff] %v621_v31  ;;  %v653_v47 = vld [vmem:[%s12396_s16 + $0xb8] sm:$0xff]  ;;  %v655_v48 = vld [vmem:[%s12396_s16 + $0xc0] sm:$0xff]  ;;  %v657_v49 = vld [vmem:[%s12396_s16 + $0xc8] sm:$0xff] }
  0xf1   :  { %624 = vst [vmem:[#allocation7 + $0x40] sm:$0xff] %v623_v32  ;;  %v659_v50 = vld [vmem:[%s12396_s16 + $0xd0] sm:$0xff]  ;;  %v661_v51 = vld [vmem:[%s12396_s16 + $0xd8] sm:$0xff]  ;;  %v663_v52 = vld [vmem:[%s12396_s16 + $0xe0] sm:$0xff] }
  0xf2   :  { %626 = vst [vmem:[#allocation7 + $0x48] sm:$0xff] %v625_v33  ;;  %v665_v53 = vld [vmem:[%s12396_s16 + $0xe8] sm:$0xff]  ;;  %v667_v54 = vld [vmem:[%s12396_s16 + $0xf0] sm:$0xff]  ;;  %v669_v55 = vld [vmem:[%s12396_s16 + $0xf8] sm:$0xff] }
  0xf3   :  { %628 = vst [vmem:[#allocation7 + $0x50] sm:$0xff] %v627_v34  ;;  %v671_v56 = vld [vmem:[%s12396_s16 + $0x100] sm:$0xff]  ;;  %v673_v57 = vld [vmem:[%s12396_s16 + $0x108] sm:$0xff]  ;;  %v675_v58 = vld [vmem:[%s12396_s16 + $0x110] sm:$0xff] }
  0xf4   :  { %630 = vst [vmem:[#allocation7 + $0x58] sm:$0xff] %v629_v35  ;;  %v677_v59 = vld [vmem:[%s12396_s16 + $0x118] sm:$0xff]  ;;  %v679_v60 = vld [vmem:[%s12396_s16 + $0x120] sm:$0xff]  ;;  %v681_v61 = vld [vmem:[%s12396_s16 + $0x128] sm:$0xff] }
  0xf5   :  { %632 = vst [vmem:[#allocation7 + $0x60] sm:$0xff] %v631_v36  ;;  %v683_v62 = vld [vmem:[%s12396_s16 + $0x130] sm:$0xff]  ;;  %v685_v63 = vld [vmem:[%s12396_s16 + $0x138] sm:$0xff]  ;;  %v687_v0 = vld [vmem:[%s12396_s16 + $0x140] sm:$0xff] }
  0xf6   :  { %634 = vst [vmem:[#allocation7 + $0x68] sm:$0xff] %v633_v37  ;;  %v689_v1 = vld [vmem:[%s12396_s16 + $0x148] sm:$0xff]  ;;  %v691_v2 = vld [vmem:[%s12396_s16 + $0x150] sm:$0xff]  ;;  %v693_v3 = vld [vmem:[%s12396_s16 + $0x158] sm:$0xff] }
  0xf7   :  { %636 = vst [vmem:[#allocation7 + $0x70] sm:$0xff] %v635_v38  ;;  %v695_v4 = vld [vmem:[%s12396_s16 + $0x160] sm:$0xff]  ;;  %v697_v5 = vld [vmem:[%s12396_s16 + $0x168] sm:$0xff]  ;;  %v699_v6 = vld [vmem:[%s12396_s16 + $0x170] sm:$0xff] }
  0xf8   :  { %638 = vst [vmem:[#allocation7 + $0x78] sm:$0xff] %v637_v39  ;;  %v701_v7 = vld [vmem:[%s12396_s16 + $0x178] sm:$0xff]  ;;  %v703_v8 = vld [vmem:[%s12396_s16 + $0x180] sm:$0xff]  ;;  %v705_v9 = vld [vmem:[%s12396_s16 + $0x188] sm:$0xff] }
  0xf9   :  { %640 = vst [vmem:[#allocation7 + $0x80] sm:$0xff] %v639_v40  ;;  %v707_v10 = vld [vmem:[%s12396_s16 + $0x190] sm:$0xff]  ;;  %v709_v11 = vld [vmem:[%s12396_s16 + $0x198] sm:$0xff]  ;;  %v711_v12 = vld [vmem:[%s12396_s16 + $0x1a0] sm:$0xff] }
  0xfa   :  { %642 = vst [vmem:[#allocation7 + $0x88] sm:$0xff] %v641_v41  ;;  %v713_v13 = vld [vmem:[%s12396_s16 + $0x1a8] sm:$0xff]  ;;  %v715_v14 = vld [vmem:[%s12396_s16 + $0x1b0] sm:$0xff]  ;;  %v717_v15 = vld [vmem:[%s12396_s16 + $0x1b8] sm:$0xff] }
  0xfb   :  { %644 = vst [vmem:[#allocation7 + $0x90] sm:$0xff] %v643_v42  ;;  %v719_v16 = vld [vmem:[%s12396_s16 + $0x1c0] sm:$0xff]  ;;  %v721_v17 = vld [vmem:[%s12396_s16 + $0x1c8] sm:$0xff]  ;;  %v723_v18 = vld [vmem:[%s12396_s16 + $0x1d0] sm:$0xff] }
  0xfc   :  { %646 = vst [vmem:[#allocation7 + $0x98] sm:$0xff] %v645_v43  ;;  %v725_v19 = vld [vmem:[%s12396_s16 + $0x1d8] sm:$0xff]  ;;  %v727_v20 = vld [vmem:[%s12396_s16 + $0x1e0] sm:$0xff]  ;;  %v729_v21 = vld [vmem:[%s12396_s16 + $0x1e8] sm:$0xff] }
  0xfd   :  { %648 = vst [vmem:[#allocation7 + $0xa0] sm:$0xff] %v647_v44  ;;  %v731_v22 = vld [vmem:[%s12396_s16 + $0x1f0] sm:$0xff]  ;;  %v733_v23 = vld [vmem:[%s12396_s16 + $0x1f8] sm:$0xff] }
  0xfe   :  { %650 = vst [vmem:[#allocation7 + $0xa8] sm:$0xff] %v649_v45 }
  0xff   :  { %652 = vst [vmem:[#allocation7 + $0xb0] sm:$0xff] %v651_v46 }
 0x100   :  { %654 = vst [vmem:[#allocation7 + $0xb8] sm:$0xff] %v653_v47 }
 0x101   :  { %656 = vst [vmem:[#allocation7 + $0xc0] sm:$0xff] %v655_v48 }
 0x102   :  { %658 = vst [vmem:[#allocation7 + $0xc8] sm:$0xff] %v657_v49 }
 0x103   :  { %660 = vst [vmem:[#allocation7 + $0xd0] sm:$0xff] %v659_v50 }
 0x104   :  { %662 = vst [vmem:[#allocation7 + $0xd8] sm:$0xff] %v661_v51 }
 0x105   :  { %664 = vst [vmem:[#allocation7 + $0xe0] sm:$0xff] %v663_v52 }
 0x106   :  { %666 = vst [vmem:[#allocation7 + $0xe8] sm:$0xff] %v665_v53 }
 0x107   :  { %668 = vst [vmem:[#allocation7 + $0xf0] sm:$0xff] %v667_v54 }
 0x108   :  { %670 = vst [vmem:[#allocation7 + $0xf8] sm:$0xff] %v669_v55 }
 0x109   :  { %672 = vst [vmem:[#allocation7 + $0x100] sm:$0xff] %v671_v56 }
 0x10a   :  { %674 = vst [vmem:[#allocation7 + $0x108] sm:$0xff] %v673_v57 }
 0x10b   :  { %676 = vst [vmem:[#allocation7 + $0x110] sm:$0xff] %v675_v58 }
 0x10c   :  { %678 = vst [vmem:[#allocation7 + $0x118] sm:$0xff] %v677_v59 }
 0x10d   :  { %680 = vst [vmem:[#allocation7 + $0x120] sm:$0xff] %v679_v60 }
 0x10e   :  { %682 = vst [vmem:[#allocation7 + $0x128] sm:$0xff] %v681_v61 }
 0x10f   :  { %684 = vst [vmem:[#allocation7 + $0x130] sm:$0xff] %v683_v62 }
 0x110   :  { %686 = vst [vmem:[#allocation7 + $0x138] sm:$0xff] %v685_v63 }
 0x111   :  { %688 = vst [vmem:[#allocation7 + $0x140] sm:$0xff] %v687_v0 }
 0x112   :  { %690 = vst [vmem:[#allocation7 + $0x148] sm:$0xff] %v689_v1 }
 0x113   :  { %692 = vst [vmem:[#allocation7 + $0x150] sm:$0xff] %v691_v2 }
 0x114   :  { %694 = vst [vmem:[#allocation7 + $0x158] sm:$0xff] %v693_v3 }
 0x115   :  { %696 = vst [vmem:[#allocation7 + $0x160] sm:$0xff] %v695_v4 }
 0x116   :  { %698 = vst [vmem:[#allocation7 + $0x168] sm:$0xff] %v697_v5 }
 0x117   :  { %700 = vst [vmem:[#allocation7 + $0x170] sm:$0xff] %v699_v6 }
 0x118   :  { %702 = vst [vmem:[#allocation7 + $0x178] sm:$0xff] %v701_v7 }
 0x119   :  { %704 = vst [vmem:[#allocation7 + $0x180] sm:$0xff] %v703_v8 }
 0x11a   :  { %706 = vst [vmem:[#allocation7 + $0x188] sm:$0xff] %v705_v9 }
 0x11b   :  { %708 = vst [vmem:[#allocation7 + $0x190] sm:$0xff] %v707_v10 }
 0x11c   :  { %710 = vst [vmem:[#allocation7 + $0x198] sm:$0xff] %v709_v11 }
 0x11d   :  { %712 = vst [vmem:[#allocation7 + $0x1a0] sm:$0xff] %v711_v12 }
 0x11e   :  { %714 = vst [vmem:[#allocation7 + $0x1a8] sm:$0xff] %v713_v13 }
 0x11f   :  { %716 = vst [vmem:[#allocation7 + $0x1b0] sm:$0xff] %v715_v14 }
 0x120   :  { %718 = vst [vmem:[#allocation7 + $0x1b8] sm:$0xff] %v717_v15 }
 0x121   :  { %720 = vst [vmem:[#allocation7 + $0x1c0] sm:$0xff] %v719_v16 }
 0x122   :  { %722 = vst [vmem:[#allocation7 + $0x1c8] sm:$0xff] %v721_v17 }
 0x123   :  { %724 = vst [vmem:[#allocation7 + $0x1d0] sm:$0xff] %v723_v18 }
 0x124   :  { %726 = vst [vmem:[#allocation7 + $0x1d8] sm:$0xff] %v725_v19 }
 0x125   :  { %728 = vst [vmem:[#allocation7 + $0x1e0] sm:$0xff] %v727_v20 }
 0x126   :  { %730 = vst [vmem:[#allocation7 + $0x1e8] sm:$0xff] %v729_v21 }
 0x127   :  { %732 = vst [vmem:[#allocation7 + $0x1f0] sm:$0xff] %v731_v22 }
 0x128   :  { %734 = vst [vmem:[#allocation7 + $0x1f8] sm:$0xff] %v733_v23 }
 0x129   :  { %740 = vsyncadd [#allocation8 + $0x2], 8192  ;;  %s12423_s26 = sld [smem:[#allocation55_spill]]  ;;  %vm846_vm0 = vcmask 1041408   ;;  %vm821_vm1 = vcmask 293888   ;;  %vm1442_vm2 = vcmask 1046528  }
 0x12a   :  { %s12424_s18 = sld [smem:[#allocation54_spill]]  ;;  %v9658_v53 = vld [vmem:[%s12382_s2] ss:$0 sm:$0xff]  ;;  %vm1244_vm3 = vsmask.f32 7424  ;;  %vm3112_vm4 = vcmask 1044480  }
 0x12b   :  { %vm2113_vm5 = vsmask.f32 6400  ;;  %vm2765_vm6 = vcmask 1045504  }
 0x12f   :  { %v761_v24 = vld [vmem:[%s12423_s26 + $0x10] sm:$0x3]  ;;  %v8961_v28 = vld [vmem:[%s12423_s26 + $0x8] sm:$0xff]  ;;  %v8960_v29 = vld [vmem:[%s12423_s26] sm:$0xff] }
 0x130   :  { %v815_v25 = vunpack.c.l.b16 %v761_v24  ;;  %v8952_v30 = vld [vmem:[%s12424_s18] sm:$0xff]  ;;  %v8953_v31 = vld [vmem:[%s12424_s18 + $0x8] sm:$0xff]  ;;  %v8954_v32 = vld [vmem:[%s12424_s18 + $0x10] sm:$0xff] }
 0x131   :  { %v8955_v33 = vld [vmem:[%s12424_s18 + $0x18] sm:$0xff]  ;;  %v8956_v34 = vld [vmem:[%s12424_s18 + $0x20] sm:$0xff]  ;;  %v8957_v35 = vld [vmem:[%s12424_s18 + $0x28] sm:$0xff] }
 0x132   :  { %v818_v26 = vpack.c.b16 %v815_v25, %v815_v25  ;;  %v8958_v36 = vld [vmem:[%s12424_s18 + $0x30] sm:$0xff]  ;;  %v8959_v37 = vld [vmem:[%s12424_s18 + $0x38] sm:$0xff] }
 0x134   :  { %v848_v27 = vsel %vm846_vm0, %v818_v26, 0 }
 0x135   :  { %855 = vmatpush.bf16.msra.mxu0 %v848_v27 }
 0x139   :  { %856 = vmatpush.bf16.msra.mxu0 %v8961_v28 }
 0x13d   :  { %857 = vmatpush.bf16.msra.mxu0 %v8960_v29 }
 0x140   :  { %7148 = vmatmul.msk.bf16.vlgmr.msra.gmra.mxu0 %vm821_vm1, %v8952_v30 }
 0x150   :  { %7149 = vmatmul.msk.bf16.gmra.mxu0 %vm821_vm1, %v8953_v31  ;;  %v8962_v31 = vld [vmem:[#allocation9] sm:$0xff] }
 0x160   :  { %7150 = vmatmul.msk.bf16.gmra.mxu0 %vm821_vm1, %v8954_v32  ;;  %v8963_v32 = vld [vmem:[#allocation9 + $0x8] sm:$0xff] }
 0x170   :  { %7151 = vmatmul.msk.bf16.gmra.mxu0 %vm821_vm1, %v8955_v33  ;;  %v8964_v33 = vld [vmem:[#allocation9 + $0x10] sm:$0xff] }
 0x180   :  { %7152 = vmatmul.msk.bf16.gmra.mxu0 %vm821_vm1, %v8956_v34  ;;  %v8965_v34 = vld [vmem:[#allocation9 + $0x18] sm:$0xff] }
 0x190   :  { %7153 = vmatmul.msk.bf16.gmra.mxu0 %vm821_vm1, %v8957_v35  ;;  %v8966_v35 = vld [vmem:[#allocation9 + $0x20] sm:$0xff] }
 0x1a0   :  { %7154 = vmatmul.msk.bf16.gmra.mxu0 %vm821_vm1, %v8958_v36  ;;  %v8981_v36 = vld [vmem:[%s12384_s4 + $0x38] sm:$0xff] }
 0x1a1   :  { %1841 = vmatpush.bf16.msrb.mxu0 %v8981_v36 }
 0x1b0   :  { %7155 = vmatmul.msk.bf16.gmra.mxu0 %vm821_vm1, %v8959_v37  ;;  %v8980_v37 = vld [vmem:[%s12384_s4 + $0x30] sm:$0xff] }
 0x1b1   :  { %1842 = vmatpush.bf16.msrb.mxu0 %v8980_v37 }
 0x1bd   :  { %v859_v38 = vpop.f32.mrf.mxu0 }
 0x1be   :  { %v860_v25 = vadd.f32 %v9658_v53, %v859_v38  ;;  %v8967_v38 = vld [vmem:[#allocation9 + $0x28] sm:$0xff] }
 0x1c0   :  { %v899_v29 = vmax.f32 %v860_v25, 0.0 }
 0x1c5   :  { %v861_v39 = vpop.f32.mrf.mxu0 }
 0x1c6   :  { %v862_v22 = vadd.f32 %v9658_v53, %v861_v39  ;;  %v8979_v39 = vld [vmem:[%s12384_s4 + $0x28] sm:$0xff] }
 0x1c7   :  { %1843 = vmatpush.bf16.msrb.mxu0 %v8979_v39 }
 0x1c8   :  { %v900_v27 = vmax.f32 %v862_v22, 0.0 }
 0x1ca   :  { %v915_v30 = vpack.c.bf16 %v900_v27, %v899_v29 }
 0x1cd   :  { %v864_v40 = vpop.f32.mrf.mxu0 }
 0x1ce   :  { %v865_v20 = vadd.f32 %v9658_v53, %v864_v40  ;;  %v8978_v40 = vld [vmem:[%s12384_s4 + $0x20] sm:$0xff] }
 0x1cf   :  { %1844 = vmatpush.bf16.msrb.mxu0 %v8978_v40 }
 0x1d0   :  { %v901_v26 = vmax.f32 %v865_v20, 0.0 }
 0x1d5   :  { %v866_v41 = vpop.f32.mrf.mxu0 }
 0x1d6   :  { %v867_v17 = vadd.f32 %v9658_v53, %v866_v41  ;;  %v8977_v41 = vld [vmem:[%s12384_s4 + $0x18] sm:$0xff] }
 0x1d7   :  { %1845 = vmatpush.bf16.msrb.mxu0 %v8977_v41  ;;  %v9015_v41 = vld [vmem:[%s12384_s4 + $0x148] sm:$0xff] }
 0x1d8   :  { %v902_v23 = vmax.f32 %v867_v17, 0.0  ;;  %v9013_v17 = vld [vmem:[%s12384_s4 + $0x138] sm:$0xff] }
 0x1da   :  { %v916_v28 = vpack.c.bf16 %v902_v23, %v901_v26  ;;  %v9018_v26 = vld [vmem:[%s12384_s4 + $0x160] sm:$0xff] }
 0x1dd   :  { %v869_v42 = vpop.f32.mrf.mxu0 }
 0x1de   :  { %v870_v15 = vadd.f32 %v9658_v53, %v869_v42  ;;  %v8997_v42 = vld [vmem:[%s12384_s4 + $0xb8] sm:$0xff] }
 0x1df   :  { %1609 = vmatpush.bf16.msra.mxu2 %v8997_v42  ;;  %v8988_v42 = vld [vmem:[%s12384_s4 + $0x70] sm:$0xff] }
 0x1e0   :  { %v903_v21 = vmax.f32 %v870_v15, 0.0 }
 0x1e5   :  { %v871_v43 = vpop.f32.mrf.mxu0 }
 0x1e6   :  { %v872_v12 = vadd.f32 %v9658_v53, %v871_v43  ;;  %v8976_v43 = vld [vmem:[%s12384_s4 + $0x10] sm:$0xff] }
 0x1e7   :  { %1846 = vmatpush.bf16.msrb.mxu0 %v8976_v43 }
 0x1e8   :  { %v904_v18 = vmax.f32 %v872_v12, 0.0  ;;  %v9020_v12 = vld [vmem:[%s12384_s4 + $0x170] sm:$0xff] }
 0x1ea   :  { %v917_v24 = vpack.c.bf16 %v904_v18, %v903_v21  ;;  %v9019_v18 = vld [vmem:[%s12384_s4 + $0x168] sm:$0xff] }
 0x1ed   :  { %v874_v44 = vpop.f32.mrf.mxu0 }
 0x1ee   :  { %v875_v10 = vadd.f32 %v9658_v53, %v874_v44  ;;  %v8968_v44 = vld [vmem:[#allocation9 + $0x30] sm:$0xff] }
 0x1f0   :  { %v905_v16 = vmax.f32 %v875_v10, 0.0 }
 0x1f5   :  { %v876_v45 = vpop.f32.mrf.mxu0 }
 0x1f6   :  { %v877_v7 = vadd.f32 %v9658_v53, %v876_v45  ;;  %v8996_v45 = vld [vmem:[%s12384_s4 + $0xb0] sm:$0xff] }
 0x1f7   :  { %1610 = vmatpush.bf16.msra.mxu2 %v8996_v45 }
 0x1f8   :  { %v906_v13 = vmax.f32 %v877_v7, 0.0 }
 0x1fa   :  { %v918_v19 = vpack.c.bf16 %v906_v13, %v905_v16 }
 0x1fd   :  { %v879_v46 = vpop.f32.mrf.mxu0 }
 0x1fe   :  { %v880_v5 = vadd.f32 %v9658_v53, %v879_v46  ;;  %v8975_v46 = vld [vmem:[%s12384_s4 + $0x8] sm:$0xff] }
 0x1ff   :  { %1847 = vmatpush.bf16.msrb.mxu0 %v8975_v46 }
 0x200   :  { %v907_v11 = vmax.f32 %v880_v5, 0.0  ;;  %v8998_v5 = vld [vmem:[%s12384_s4 + $0xc0] sm:$0xff] }
 0x205   :  { %v881_v47 = vpop.f32.mrf.mxu0 }
 0x206   :  { %v882_v2 = vadd.f32 %v9658_v53, %v881_v47  ;;  %v8995_v47 = vld [vmem:[%s12384_s4 + $0xa8] sm:$0xff] }
 0x207   :  { %1611 = vmatpush.bf16.msra.mxu2 %v8995_v47 }
 0x208   :  { %v908_v8 = vmax.f32 %v882_v2, 0.0  ;;  %v8971_v2 = vld [vmem:[#allocation9 + $0x48] sm:$0xff] }
 0x20a   :  { %v919_v14 = vpack.c.bf16 %v908_v8, %v907_v11 }
 0x20d   :  { %v884_v48 = vpop.f32.mrf.mxu0 }
 0x20e   :  { %v885_v0 = vadd.f32 %v9658_v53, %v884_v48  ;;  %v8974_v48 = vld [vmem:[%s12384_s4] sm:$0xff] }
 0x20f   :  { %1848 = vmatpush.bf16.msrb.mxu0 %v8974_v48 }
 0x210   :  { %v909_v6 = vmax.f32 %v885_v0, 0.0  ;;  %v9000_v0 = vld [vmem:[%s12384_s4 + $0xd0] sm:$0xff] }
 0x215   :  { %v886_v49 = vpop.f32.mrf.mxu0 }
 0x216   :  { %v887_v61 = vadd.f32 %v9658_v53, %v886_v49  ;;  %v8994_v49 = vld [vmem:[%s12384_s4 + $0xa0] sm:$0xff] }
 0x217   :  { %1612 = vmatpush.bf16.msra.mxu2 %v8994_v49 }
 0x218   :  { %v910_v3 = vmax.f32 %v887_v61, 0.0  ;;  %v9001_v61 = vld [vmem:[%s12384_s4 + $0xd8] sm:$0xff] }
 0x21a   :  { %v920_v9 = vpack.c.bf16 %v910_v3, %v909_v6  ;;  %v8989_v6 = vld [vmem:[%s12384_s4 + $0x78] sm:$0xff] }
 0x21d   :  { %v889_v50 = vpop.f32.mrf.mxu0 }
 0x21e   :  { %v890_v58 = vadd.f32 %v9658_v53, %v889_v50  ;;  %v8993_v50 = vld [vmem:[%s12384_s4 + $0x98] sm:$0xff] }
 0x21f   :  { %1613 = vmatpush.bf16.msra.mxu2 %v8993_v50 }
 0x220   :  { %v911_v1 = vmax.f32 %v890_v58, 0.0  ;;  %v8970_v58 = vld [vmem:[#allocation9 + $0x40] sm:$0xff] }
 0x225   :  { %v891_v51 = vpop.f32.mrf.mxu0 }
 0x226   :  { %v892_v56 = vadd.f32 %v9658_v53, %v891_v51  ;;  %v8969_v51 = vld [vmem:[#allocation9 + $0x38] sm:$0xff] }
 0x228   :  { %v912_v62 = vmax.f32 %v892_v56, 0.0  ;;  %v9004_v56 = vld [vmem:[%s12384_s4 + $0xf0] sm:$0xff] }
 0x22a   :  { %v921_v4 = vpack.c.bf16 %v912_v62, %v911_v1  ;;  %v8999_v1 = vld [vmem:[%s12384_s4 + $0xc8] sm:$0xff] }
 0x22d   :  { %v894_v52 = vpop.f32.mrf.mxu0 }
 0x22e   :  { %v895_v54 = vadd.f32 %v9658_v53, %v894_v52  ;;  %v8992_v52 = vld [vmem:[%s12384_s4 + $0x90] sm:$0xff] }
 0x22f   :  { %1614 = vmatpush.bf16.msra.mxu2 %v8992_v52  ;;  %v8973_v52 = vld [vmem:[#allocation9 + $0x58] sm:$0xff] }
 0x230   :  { %v913_v59 = vmax.f32 %v895_v54, 0.0  ;;  %v9005_v54 = vld [vmem:[%s12384_s4 + $0xf8] sm:$0xff] }
 0x231   :  { %1677 = vmatpush.bf16.msra.mxu3 %v9005_v54 }
 0x235   :  { %v896_v55 = vpop.f32.mrf.mxu0  ;;  %1678 = vmatpush.bf16.msra.mxu3 %v9004_v56  ;;  %v9014_v56 = vld [vmem:[%s12384_s4 + $0x140] sm:$0xff] }
 0x236   :  { %v897_v57 = vadd.f32 %v9658_v53, %v896_v55  ;;  %v8991_v53 = vld [vmem:[%s12384_s4 + $0x88] sm:$0xff]  ;;  %v8990_v55 = vld [vmem:[%s12384_s4 + $0x80] sm:$0xff] }
 0x237   :  { %1615 = vmatpush.bf16.msra.mxu2 %v8991_v53 }
 0x238   :  { %v914_v60 = vmax.f32 %v897_v57, 0.0  ;;  %v9003_v57 = vld [vmem:[%s12384_s4 + $0xe8] sm:$0xff] }
 0x239   :  { %1679 = vmatpush.bf16.msra.mxu3 %v9003_v57 }
 0x23a   :  { %v922_v63 = vpack.c.bf16 %v914_v60, %v913_v59  ;;  %v9002_v60 = vld [vmem:[%s12384_s4 + $0xe0] sm:$0xff] }
 0x23b   :  { %1616 = vmatpush.bf16.msra.mxu2 %v8990_v55  ;;  %v9012_v55 = vld [vmem:[%s12384_s4 + $0x130] sm:$0xff] }
 0x23c   :  { %1024 = vmatpush.bf16.msra.mxu1 %v922_v63 }
 0x23d   :  { %1680 = vmatpush.bf16.msra.mxu3 %v9002_v60 }
 0x23f   :  { %1909 = vmatpush.bf16.msrb.mxu2 %v8989_v6 }
 0x240   :  { %1025 = vmatpush.bf16.msra.mxu1 %v921_v4  ;;  %v9021_v4 = vld [vmem:[%s12384_s4 + $0x178] sm:$0xff] }
 0x241   :  { %1681 = vmatpush.bf16.msra.mxu3 %v9001_v61 }
 0x243   :  { %1910 = vmatpush.bf16.msrb.mxu2 %v8988_v42 }
 0x244   :  { %1026 = vmatpush.bf16.msra.mxu1 %v920_v9 }
 0x245   :  { %1682 = vmatpush.bf16.msra.mxu3 %v9000_v0 }
 0x248   :  { %1027 = vmatpush.bf16.msra.mxu1 %v919_v14 }
 0x249   :  { %1683 = vmatpush.bf16.msra.mxu3 %v8999_v1 }
 0x24c   :  { %1028 = vmatpush.bf16.msra.mxu1 %v918_v19 }
 0x24d   :  { %1684 = vmatpush.bf16.msra.mxu3 %v8998_v5 }
 0x250   :  { %1029 = vmatpush.bf16.msra.mxu1 %v917_v24  ;;  %v8972_v24 = vld [vmem:[#allocation9 + $0x50] sm:$0xff] }
 0x251   :  { %2393 = vmatpush.bf16.msrb.mxu3 %v9013_v17 }
 0x254   :  { %1030 = vmatpush.bf16.msra.mxu1 %v916_v28  ;;  %v9017_v28 = vld [vmem:[%s12384_s4 + $0x158] sm:$0xff] }
 0x255   :  { %2394 = vmatpush.bf16.msrb.mxu3 %v9012_v55 }
 0x258   :  { %1031 = vmatpush.bf16.msra.mxu1 %v915_v30 }
 0x25b   :  { %1032 = vmatmul.bf16.vlgmr.msra.gmra.mxu1 %v8962_v31 }
 0x25c   :  { %2461 = vmatpush.bf16.msrb.mxu1 %v9021_v4 }
 0x260   :  { %2462 = vmatpush.bf16.msrb.mxu1 %v9020_v12 }
 0x264   :  { %2463 = vmatpush.bf16.msrb.mxu1 %v9019_v18  ;;  %v947_v18 = vld [vmem:[#allocation9 + $0x60] sm:$0xf] }
 0x268   :  { %2464 = vmatpush.bf16.msrb.mxu1 %v9018_v26 }
 0x26b   :  { %1037 = vmatmul.bf16.gmra.mxu1 %v8963_v32 }
 0x26c   :  { %2465 = vmatpush.bf16.msrb.mxu1 %v9017_v28 }
 0x27b   :  { %1042 = vmatmul.bf16.gmra.mxu1 %v8964_v33 }
 0x28b   :  { %1047 = vmatmul.bf16.gmra.mxu1 %v8965_v34  ;;  %v9016_v34 = vld [vmem:[%s12384_s4 + $0x150] sm:$0xff] }
 0x28c   :  { %2466 = vmatpush.bf16.msrb.mxu1 %v9016_v34 }
 0x290   :  { %2467 = vmatpush.bf16.msrb.mxu1 %v9015_v41 }
 0x294   :  { %2468 = vmatpush.bf16.msrb.mxu1 %v9014_v56 }
 0x29b   :  { %1052 = vmatmul.bf16.gmra.mxu1 %v8966_v35 }
 0x2ab   :  { %1057 = vmatmul.bf16.gmra.mxu1 %v8967_v38 }
 0x2bb   :  { %1062 = vmatmul.bf16.gmra.mxu1 %v8968_v44 }
 0x2cb   :  { %1067 = vmatmul.bf16.gmra.mxu1 %v8969_v51 }
 0x2d8   :  { %v1033_v59 = vpop.f32.mrf.mxu1 }
 0x2db   :  { %1072 = vmatmul.bf16.gmra.mxu1 %v8970_v58 }
 0x2e0   :  { %v1035_v62 = vpop.f32.mrf.mxu1 }
 0x2e1   :  { %v9383_v63 = vpack.c.bf16 %v1035_v62, %v1033_v59 }
 0x2e3   :  { %9384 = vst [vmem:[#allocation2] sm:$0xff] %v9383_v63   ;;  %1849 = vmatmul.bf16.vlgmr.msrb.gmra.mxu0 %v9383_v63  ;;  %v1248_v9 = vshll.u32 %v9383_v63, 16  ;;  %v1246_v19 = vshrl.u32 %v9383_v63, 16 }
 0x2e5   :  { %v1250_v14 = vrot.slane %v1248_v9, 1 }
 0x2e7   :  { %v1251_v22 = vor.u32 %v1250_v14, %v1246_v19 }
 0x2e8   :  { %v1038_v3 = vpop.f32.mrf.mxu1 }
 0x2ea   :  { %v9555_v7 = vld [vmem:[#allocation2] sm:$0xf0]  ;;  %v9556_v8 = vld [vmem:[#allocation2] sm:$0xe] }
 0x2eb   :  { %1077 = vmatmul.bf16.gmra.mxu1 %v8971_v2  ;;  %v9557_v10 = vor.u32 %v9556_v8, %v9555_v7  ;;  %v1385_v31 = vld [vmem:[#allocation2 + $0x4] sm:$0xe] }
 0x2ec   :  { %v1394_v38 = vunpack.c.l.b16 %v1385_v31  ;;  %v1978_v51 = vld [vmem:[#allocation2 + $0x4] sm:$0xc] }
 0x2ed   :  { %v1443_v15 = vrot.slane %v9557_v10, 1  ;;  %v1983_v58 = vunpack.c.l.b16 %v1978_v51 }
 0x2f0   :  { %v1040_v11 = vpop.f32.mrf.mxu1 }
 0x2f1   :  { %v10784_v13 = vpack.c.bf16 %v1040_v11, %v1038_v3 }
 0x2f3   :  { %9534 = vst [vmem:[#allocation2 + $0x8] sm:$0xff] %v10784_v13   ;;  %1854 = vmatmul.bf16.gmra.mxu0 %v10784_v13  ;;  %v1444_v16 = vrot.slane %v10784_v13, 1  ;;  %v1253_v20 = vshll.u32 %v10784_v13, 16  ;;  %v9446_v33 = vunpack.c.l.b16 %v10784_v13  ;;  %v1257_v43 = vshrl.u32 %v10784_v13, 16 }
 0x2f5   :  { %v1445_v21 = vsel %vm1442_vm2, %v1443_v15, %v1444_v16  ;;  %v1255_v23 = vrot.slane %v1253_v20, 1  ;;  %v1397_v45 = vpack.c.b16 %v9446_v33, %v1394_v38  ;;  %v1984_v1 = vpack.c.b16 %v9446_v33, %v1983_v58 }
 0x2f6   :  { %1617 = vmatmul.bf16.vlgmr.msra.gmra.mxu2 %v1445_v21 }
 0x2f7   :  { %v10801_v27 = vsel %vm1244_vm3, %v1251_v22, %v1255_v23  ;;  %v1259_v48 = vor.u32 %v1257_v43, %v1255_v23  ;;  %v2115_v59 = vshrl.u32 %v1397_v45, 16  ;;  %v2118_v63 = vshll.u32 %v1397_v45, 16 }
 0x2f8   :  { %v1043_v25 = vpop.f32.mrf.mxu1  ;;  %v1446_v0 = vrot.slane %v1397_v45, 1  ;;  %v1988_v21 = vshll.u32 %v1984_v1, 16 }
 0x2f9   :  { %v2117_v6 = vrot.slane %v2115_v59, 1  ;;  %v2120_v11 = vrot.slane %v2118_v63, 2 }
 0x2fa   :  { %v2552_v29 = vld [vmem:[#allocation2 + $0x8] sm:$0xc]  ;;  %v2553_v30 = vld [vmem:[#allocation2 + $0xc] sm:$0xf]  ;;  %v1990_v31 = vrot.slane %v1988_v21, 1 }
 0x2fb   :  { %1082 = vmatmul.bf16.gmra.mxu1 %v8972_v24  ;;  %v2599_v35 = vunpack.c.l.b16 %v2552_v29  ;;  %v2600_v36 = vunpack.c.l.b16 %v2553_v30  ;;  %v3091_v39 = vld [vmem:[#allocation2 + $0x8] sm:$0x8]  ;;  %v2121_v23 = vor.u32 %v2120_v11, %v2117_v6 }
 0x2fc   :  { %v3110_v50 = vunpack.c.l.b16 %v3091_v39 }
 0x2fd   :  { %v10823_v46 = vpack.c.b16 %v2600_v36, %v2599_v35  ;;  %v1986_v35 = vshrl.u32 %v1984_v1, 16 }
 0x2fe   :  { %v3111_v60 = vpack.c.b16 %v2600_v36, %v3110_v50 }
 0x2ff   :  { %v2640_v57 = vshll.u32 %v10823_v46, 16  ;;  %v2638_v13 = vshrl.u32 %v10823_v46, 16  ;;  %v1991_v42 = vor.u32 %v1990_v31, %v1986_v35 }
 0x300   :  { %v1045_v32 = vpop.f32.mrf.mxu1  ;;  %v3113_v8 = vrot.slane %v3111_v60, 3 }
 0x301   :  { %v10810_v37 = vpack.c.bf16 %v1045_v32, %v1043_v25  ;;  %v2642_v5 = vrot.slane %v2640_v57, 1  ;;  %v997_v25 = vunpack.c.l.b16 %v947_v18 }
 0x303   :  { %9535 = vst [vmem:[#allocation2 + $0x10] sm:$0xff] %v10810_v37   ;;  %1859 = vmatmul.bf16.gmra.mxu0 %v10810_v37  ;;  %v1449_v40 = vrot.slane %v10810_v37, 1  ;;  %v1261_v44 = vshll.u32 %v10810_v37, 16  ;;  %v2643_v19 = vor.u32 %v2642_v5, %v2638_v13  ;;  %v1265_v28 = vshrl.u32 %v10810_v37, 16  ;;  %v9011_v13 = vld [vmem:[%s12384_s4 + $0x128] sm:$0xff] }
 0x304   :  { %v1010_v36 = vpack.c.b16 %v997_v25, %v997_v25  ;;  %2395 = vmatpush.bf16.msrb.mxu3 %v9011_v13 }
 0x305   :  { %v1450_v47 = vsel %vm1442_vm2, %v1444_v16, %v1449_v40  ;;  %v1263_v49 = vrot.slane %v1261_v44, 1 }
 0x306   :  { %1622 = vmatmul.bf16.gmra.mxu2 %v1450_v47 }
 0x307   :  { %v10829_v53 = vsel %vm1244_vm3, %v1259_v48, %v1263_v49  ;;  %v1267_v33 = vor.u32 %v1265_v28, %v1263_v49 }
 0x308   :  { %v1048_v54 = vpop.f32.mrf.mxu1 }
 0x30a   :  { %v10838_v61 = vld [vmem:[#allocation2 + $0xc] sm:$0xff]  }
 0x30b   :  { %v10840_v62 = vld [vmem:[#allocation2 + $0x10] sm:$0xff]  ;;  %1087 = vmatmul.bf16.gmra.mxu1 %v8973_v52  ;;  %v1447_v2 = vrot.slane %v10838_v61, 1  ;;  %v1993_v3 = vshll.u32 %v10838_v61, 16  ;;  %v1997_v4 = vshrl.u32 %v10838_v61, 16 }
 0x30c   :  { %v2645_v7 = vshll.u32 %v10840_v62, 16  ;;  %v3114_v9 = vrot.slane %v10840_v62, 3  ;;  %v2649_v50 = vshrl.u32 %v10840_v62, 16 }
 0x30d   :  { %v1448_v10 = vsel %vm1442_vm2, %v1446_v0, %v1447_v2  ;;  %v2122_v12 = vrot.slane %v1997_v4, 1  ;;  %v2123_v14 = vrot.slane %v1993_v3, 2  ;;  %v1995_v38 = vrot.slane %v1993_v3, 1 }
 0x30e   :  { %1685 = vmatmul.bf16.vlgmr.msra.gmra.mxu3 %v1448_v10  ;;  %v2647_v15 = vrot.slane %v2645_v7, 1  ;;  %v10850_v16 = vsel %vm3112_vm4, %v3113_v8, %v3114_v9 }
 0x30f   :  { %12425 = vst [vmem:[#allocation21_spill] sm:$0xff] %v10850_v16  ;;  %v2124_v22 = vor.u32 %v2123_v14, %v2122_v12  ;;  %v1996_v37 = vsel %vm1244_vm3, %v1991_v42, %v1995_v38  ;;  %v1999_v49 = vor.u32 %v1997_v4, %v1995_v38 }
 0x310   :  { %v1050_v17 = vpop.f32.mrf.mxu1  ;;  %v10855_v24 = vsel %vm1244_vm3, %v2643_v19, %v2647_v15  ;;  %v2127_v56 = vshrl.u32 %v1996_v37, 16  ;;  %v2130_v58 = vshll.u32 %v1996_v37, 16  ;;  %v2651_v1 = vor.u32 %v2649_v50, %v2647_v15 }
 0x311   :  { %v10852_v20 = vpack.c.bf16 %v1050_v17, %v1048_v54  ;;  %v10862_v29 = vsel %vm2113_vm5, %v2121_v23, %v2124_v22  ;;  %v2769_v17 = vrot.slane %v10855_v24, 2 }
 0x312   :  { %v2129_v7 = vrot.slane %v2127_v56, 1 }
 0x313   :  { %9536 = vst [vmem:[#allocation2 + $0x18] sm:$0xff] %v10852_v20   ;;  %1864 = vmatmul.bf16.gmra.mxu0 %v10852_v20  ;;  %v1453_v26 = vrot.slane %v10852_v20, 1  ;;  %v1269_v30 = vshll.u32 %v10852_v20, 16 }
 0x315   :  { %v1454_v32 = vsel %vm1442_vm2, %v1449_v40, %v1453_v26  ;;  %v1271_v34 = vrot.slane %v1269_v30, 1  ;;  %v8987_v40 = vld [vmem:[%s12384_s4 + $0x68] sm:$0xff] }
 0x316   :  { %1627 = vmatmul.bf16.gmra.mxu2 %v1454_v32 }
 0x317   :  { %v10869_v41 = vsel %vm1244_vm3, %v1267_v33, %v1271_v34  ;;  %1911 = vmatpush.bf16.msrb.mxu2 %v8987_v40 }
 0x318   :  { %v1053_v39 = vpop.f32.mrf.mxu1 }
 0x31a   :  { %v10871_v43 = vld [vmem:[#allocation2 + $0x14] sm:$0xff]  }
 0x31b   :  { %v10873_v44 = vld [vmem:[#allocation2 + $0x18] sm:$0xff]  ;;  %1092 = vmatmul.bf16.gmra.mxu1 %v1010_v36  ;;  %v1451_v45 = vrot.slane %v10871_v43, 1  ;;  %v2001_v47 = vshll.u32 %v10871_v43, 16  ;;  %v2005_v48 = vshrl.u32 %v10871_v43, 16 }
 0x31c   :  { %v2653_v51 = vshll.u32 %v10873_v44, 16  ;;  %v3116_v52 = vrot.slane %v10873_v44, 3 }
 0x31d   :  { %v1452_v54 = vsel %vm1442_vm2, %v1447_v2, %v1451_v45  ;;  %v2003_v55 = vrot.slane %v2001_v47, 1  ;;  %v2143_v57 = vrot.slane %v2005_v48, 1  ;;  %v2144_v59 = vrot.slane %v2001_v47, 2 }
 0x31e   :  { %1690 = vmatmul.bf16.gmra.mxu3 %v1452_v54  ;;  %v2655_v60 = vrot.slane %v2653_v51, 1  ;;  %v10887_v61 = vsel %vm3112_vm4, %v3114_v9, %v3116_v52  ;;  %v1273_v2 = vshrl.u32 %v10852_v20, 16  ;;  %v2132_v9 = vrot.slane %v2130_v58, 2 }
 0x31f   :  { %12426 = vst [vmem:[#allocation22_spill] sm:$0xff] %v10887_v61  ;;  %v2004_v0 = vsel %vm1244_vm3, %v1999_v49, %v2003_v55  ;;  %v2145_v6 = vor.u32 %v2144_v59, %v2143_v57  ;;  %v2007_v42 = vor.u32 %v2005_v48, %v2003_v55  ;;  %v8986_v59 = vld [vmem:[%s12384_s4 + $0x60] sm:$0xff] }
 0x320   :  { %v1055_v63 = vpop.f32.mrf.mxu1  ;;  %v2135_v4 = vshrl.u32 %v2004_v0, 16  ;;  %v2138_v5 = vshll.u32 %v2004_v0, 16  ;;  %v10894_v8 = vsel %vm1244_vm3, %v2651_v1, %v2655_v60  ;;  %v1275_v21 = vor.u32 %v1273_v2, %v1271_v34  ;;  %1912 = vmatpush.bf16.msrb.mxu2 %v8986_v59 }
 0x321   :  { %v10890_v3 = vpack.c.bf16 %v1055_v63, %v1053_v39  ;;  %v10903_v14 = vsel %vm2113_vm5, %v2124_v22, %v2145_v6  ;;  %v2770_v18 = vrot.slane %v10894_v8, 2  ;;  %v2133_v22 = vor.u32 %v2132_v9, %v2129_v7 }
 0x322   :  { %v2137_v10 = vrot.slane %v2135_v4, 1  ;;  %v2140_v11 = vrot.slane %v2138_v5, 2  ;;  %v2657_v34 = vshrl.u32 %v10873_v44, 16 }
 0x323   :  { %9537 = vst [vmem:[#allocation2 + $0x20] sm:$0xff] %v10890_v3   ;;  %1869 = vmatmul.bf16.gmra.mxu0 %v10890_v3  ;;  %v1457_v12 = vrot.slane %v10890_v3, 1  ;;  %v1277_v15 = vshll.u32 %v10890_v3, 16  ;;  %v10910_v25 = vsel %vm2765_vm6, %v2769_v17, %v2770_v18 }
 0x324   :  { %v2141_v20 = vor.u32 %v2140_v11, %v2137_v10  ;;  %12427 = vst [vmem:[#allocation23_spill] sm:$0xff] %v10910_v25  ;;  %v2659_v54 = vor.u32 %v2657_v34, %v2655_v60  ;;  %v1281_v60 = vshrl.u32 %v10890_v3, 16  ;;  %v9010_v3 = vld [vmem:[%s12384_s4 + $0x120] sm:$0xff] }
 0x325   :  { %v1458_v19 = vsel %vm1442_vm2, %v1453_v26, %v1457_v12  ;;  %v1279_v23 = vrot.slane %v1277_v15, 1  ;;  %2396 = vmatpush.bf16.msrb.mxu3 %v9010_v3 }
 0x326   :  { %1632 = vmatmul.bf16.gmra.mxu2 %v1458_v19  ;;  %v2142_v24 = vsel %vm2113_vm5, %v2133_v22, %v2141_v20 }
 0x327   :  { %v10913_v30 = vsel %vm1244_vm3, %v1275_v21, %v1279_v23  ;;  %v1283_v2 = vor.u32 %v1281_v60, %v1279_v23 }
 0x328   :  { %v1058_v28 = vpop.f32.mrf.mxu1 }
 0x32a   :  { %v9634_v31 = vld [vmem:[#allocation2 + $0x1c] sm:$0xff]  }
 0x32b   :  { %v10916_v32 = vld [vmem:[#allocation2 + $0x20] sm:$0xff]  ;;  %2469 = vmatmul.bf16.vlgmr.msrb.gmra.mxu1 %v2142_v24  ;;  %v1455_v26 = vrot.slane %v9634_v31, 1  ;;  %v2009_v33 = vshll.u32 %v9634_v31, 16  ;;  %v2013_v35 = vshrl.u32 %v9634_v31, 16 }
 0x32c   :  { %v2661_v36 = vshll.u32 %v10916_v32, 16  ;;  %v3118_v38 = vrot.slane %v10916_v32, 3 }
 0x32d   :  { %v1456_v39 = vsel %vm1442_vm2, %v1451_v45, %v1455_v26  ;;  %v2011_v43 = vrot.slane %v2009_v33, 1  ;;  %v2156_v37 = vrot.slane %v2013_v35, 1  ;;  %v2157_v40 = vrot.slane %v2009_v33, 2 }
 0x32e   :  { %1695 = vmatmul.bf16.gmra.mxu3 %v1456_v39  ;;  %v2663_v47 = vrot.slane %v2661_v36, 1  ;;  %v10923_v49 = vsel %vm3112_vm4, %v3116_v52, %v3118_v38 }
 0x32f   :  { %12428 = vst [vmem:[#allocation24_spill] sm:$0xff] %v10923_v49  ;;  %v2012_v51 = vsel %vm1244_vm3, %v2007_v42, %v2011_v43  ;;  %v2158_v58 = vor.u32 %v2157_v40, %v2156_v37 }
 0x330   :  { %v1060_v50 = vpop.f32.mrf.mxu1  ;;  %v2148_v56 = vshrl.u32 %v2012_v51, 16  ;;  %v2151_v57 = vshll.u32 %v2012_v51, 16  ;;  %v10929_v45 = vsel %vm1244_vm3, %v2659_v54, %v2663_v47 }
 0x331   :  { %v10926_v44 = vpack.c.bf16 %v1060_v50, %v1058_v28  ;;  %v10939_v63 = vsel %vm2113_vm5, %v2145_v6, %v2158_v58  ;;  %v2774_v1 = vrot.slane %v10929_v45, 2  ;;  %v2015_v28 = vor.u32 %v2013_v35, %v2011_v43 }
 0x332   :  { %v2150_v48 = vrot.slane %v2148_v56, 1  ;;  %v2153_v55 = vrot.slane %v2151_v57, 2 }
 0x333   :  { %9538 = vst [vmem:[#allocation2 + $0x28] sm:$0xff] %v10926_v44   ;;  %1874 = vmatmul.bf16.gmra.mxu0 %v10926_v44  ;;  %v1461_v52 = vrot.slane %v10926_v44, 1  ;;  %v1285_v0 = vshll.u32 %v10926_v44, 16  ;;  %v10945_v8 = vsel %vm2765_vm6, %v2770_v18, %v2774_v1  ;;  %v2665_v18 = vshrl.u32 %v10916_v32, 16 }
 0x334   :  { %v2154_v5 = vor.u32 %v2153_v55, %v2150_v48  ;;  %12429 = vst [vmem:[#allocation25_spill] sm:$0xff] %v10945_v8  ;;  %v1289_v51 = vshrl.u32 %v10926_v44, 16 }
 0x335   :  { %v1462_v4 = vsel %vm1442_vm2, %v1457_v12, %v1461_v52  ;;  %v1287_v7 = vrot.slane %v1285_v0, 1  ;;  %v2667_v39 = vor.u32 %v2665_v18, %v2663_v47 }
 0x336   :  { %1637 = vmatmul.bf16.gmra.mxu2 %v1462_v4  ;;  %v2155_v10 = vsel %vm2113_vm5, %v2141_v20, %v2154_v5 }
 0x337   :  { %v10951_v6 = vsel %vm1244_vm3, %v1283_v2, %v1287_v7  ;;  %v1291_v48 = vor.u32 %v1289_v51, %v1287_v7 }
 0x338   :  { %v1063_v9 = vpop.f32.mrf.mxu1 }
 0x33a   :  { %v9636_v11 = vld [vmem:[#allocation2 + $0x24] sm:$0xff]  }
 0x33b   :  { %v10954_v12 = vld [vmem:[#allocation2 + $0x28] sm:$0xff]  ;;  %2474 = vmatmul.bf16.gmra.mxu1 %v2155_v10  ;;  %v1459_v13 = vrot.slane %v9636_v11, 1  ;;  %v2017_v15 = vshll.u32 %v9636_v11, 16  ;;  %v2021_v17 = vshrl.u32 %v9636_v11, 16 }
 0x33c   :  { %v2669_v19 = vshll.u32 %v10954_v12, 16  ;;  %v3120_v21 = vrot.slane %v10954_v12, 3 }
 0x33d   :  { %v1460_v23 = vsel %vm1442_vm2, %v1455_v26, %v1459_v13  ;;  %v2019_v22 = vrot.slane %v2017_v15, 1  ;;  %v2169_v24 = vrot.slane %v2021_v17, 1  ;;  %v2170_v20 = vrot.slane %v2017_v15, 2 }
 0x33e   :  { %1700 = vmatmul.bf16.gmra.mxu3 %v1460_v23  ;;  %v2671_v31 = vrot.slane %v2669_v19, 1  ;;  %v10961_v33 = vsel %vm3112_vm4, %v3118_v38, %v3120_v21 }
 0x33f   :  { %12430 = vst [vmem:[#allocation26_spill] sm:$0xff] %v10961_v33  ;;  %v2020_v36 = vsel %vm1244_vm3, %v2015_v28, %v2019_v22  ;;  %v2171_v50 = vor.u32 %v2170_v20, %v2169_v24  ;;  %v2023_v11 = vor.u32 %v2021_v17, %v2019_v22 }
 0x340   :  { %v1065_v34 = vpop.f32.mrf.mxu1  ;;  %v2161_v37 = vshrl.u32 %v2020_v36, 16  ;;  %v2164_v40 = vshll.u32 %v2020_v36, 16  ;;  %v10967_v26 = vsel %vm1244_vm3, %v2667_v39, %v2671_v31 }
 0x341   :  { %v10964_v42 = vpack.c.bf16 %v1065_v34, %v1063_v9  ;;  %v10974_v47 = vsel %vm2113_vm5, %v2158_v58, %v2171_v50  ;;  %v2778_v56 = vrot.slane %v10967_v26, 2 }
 0x342   :  { %v2163_v35 = vrot.slane %v2161_v37, 1  ;;  %v2166_v43 = vrot.slane %v2164_v40, 2 }
 0x343   :  { %9539 = vst [vmem:[#allocation2 + $0x30] sm:$0xff] %v10964_v42   ;;  %1879 = vmatmul.bf16.gmra.mxu0 %v10964_v42  ;;  %v1465_v38 = vrot.slane %v10964_v42, 1  ;;  %v1293_v54 = vshll.u32 %v10964_v42, 16  ;;  %v10980_v59 = vsel %vm2765_vm6, %v2774_v1, %v2778_v56  ;;  %v2673_v1 = vshrl.u32 %v10954_v12, 16 }
 0x344   :  { %v2167_v45 = vor.u32 %v2166_v43, %v2163_v35  ;;  %12431 = vst [vmem:[#allocation27_spill] sm:$0xff] %v10980_v59  ;;  %v1297_v26 = vshrl.u32 %v10964_v42, 16 }
 0x345   :  { %v1466_v57 = vsel %vm1442_vm2, %v1461_v52, %v1465_v38  ;;  %v1295_v55 = vrot.slane %v1293_v54, 1  ;;  %v8985_v52 = vld [vmem:[%s12384_s4 + $0x58] sm:$0xff]  ;;  %v2675_v34 = vor.u32 %v2673_v1, %v2671_v31 }
 0x346   :  { %1642 = vmatmul.bf16.gmra.mxu2 %v1466_v57  ;;  %v2168_v44 = vsel %vm2113_vm5, %v2154_v5, %v2167_v45  ;;  %v9009_v31 = vld [vmem:[%s12384_s4 + $0x118] sm:$0xff] }
 0x347   :  { %v10983_v0 = vsel %vm1244_vm3, %v1291_v48, %v1295_v55  ;;  %1913 = vmatpush.bf16.msrb.mxu2 %v8985_v52  ;;  %2397 = vmatpush.bf16.msrb.mxu3 %v9009_v31  ;;  %v1299_v48 = vor.u32 %v1297_v26, %v1295_v55 }
 0x348   :  { %v1068_v60 = vpop.f32.mrf.mxu1 }
 0x34a   :  { %v9638_v58 = vld [vmem:[#allocation2 + $0x2c] sm:$0xff]  }
 0x34b   :  { %v10986_v4 = vld [vmem:[#allocation2 + $0x30] sm:$0xff]  ;;  %2479 = vmatmul.bf16.gmra.mxu1 %v2168_v44  ;;  %v1463_v2 = vrot.slane %v9638_v58, 1  ;;  %v2025_v7 = vshll.u32 %v9638_v58, 16  ;;  %v2029_v9 = vshrl.u32 %v9638_v58, 16 }
 0x34c   :  { %v2677_v3 = vshll.u32 %v10986_v4, 16  ;;  %v3122_v10 = vrot.slane %v10986_v4, 3 }
 0x34d   :  { %v1464_v5 = vsel %vm1442_vm2, %v1459_v13, %v1463_v2  ;;  %v2027_v15 = vrot.slane %v2025_v7, 1  ;;  %v2182_v18 = vrot.slane %v2029_v9, 1  ;;  %v2183_v19 = vrot.slane %v2025_v7, 2 }
 0x34e   :  { %1705 = vmatmul.bf16.gmra.mxu3 %v1464_v5  ;;  %v2679_v23 = vrot.slane %v2677_v3, 1  ;;  %v10996_v28 = vsel %vm3112_vm4, %v3120_v21, %v3122_v10  ;;  %v2681_v5 = vshrl.u32 %v10986_v4, 16 }
 0x34f   :  { %12432 = vst [vmem:[#allocation28_spill] sm:$0xff] %v10996_v28  ;;  %v2028_v20 = vsel %vm1244_vm3, %v2023_v11, %v2027_v15  ;;  %v2184_v40 = vor.u32 %v2183_v19, %v2182_v18  ;;  %v2031_v18 = vor.u32 %v2029_v9, %v2027_v15 }
 0x350   :  { %v1070_v24 = vpop.f32.mrf.mxu1  ;;  %v2174_v39 = vshrl.u32 %v2028_v20, 16  ;;  %v2177_v37 = vshll.u32 %v2028_v20, 16  ;;  %v11002_v13 = vsel %vm1244_vm3, %v2675_v34, %v2679_v23 }
 0x351   :  { %v10999_v36 = vpack.c.bf16 %v1070_v24, %v1068_v60  ;;  %v11012_v35 = vsel %vm2113_vm5, %v2171_v50, %v2184_v40  ;;  %v2782_v51 = vrot.slane %v11002_v13, 2 }
 0x352   :  { %v2176_v17 = vrot.slane %v2174_v39, 1  ;;  %v2179_v22 = vrot.slane %v2177_v37, 2 }
 0x353   :  { %9540 = vst [vmem:[#allocation2 + $0x38] sm:$0xff] %v10999_v36   ;;  %1884 = vmatmul.bf16.gmra.mxu0 %v10999_v36  ;;  %v1469_v21 = vrot.slane %v10999_v36, 1  ;;  %v1301_v43 = vshll.u32 %v10999_v36, 16  ;;  %v11018_v44 = vsel %vm2765_vm6, %v2778_v56, %v2782_v51 }
 0x354   :  { %v2180_v57 = vor.u32 %v2179_v22, %v2176_v17  ;;  %12433 = vst [vmem:[#allocation29_spill] sm:$0xff] %v11018_v44  ;;  %v2683_v17 = vor.u32 %v2681_v5, %v2679_v23  ;;  %v8984_v23 = vld [vmem:[%s12384_s4 + $0x50] sm:$0xff] }
 0x355   :  { %v1470_v54 = vsel %vm1442_vm2, %v1465_v38, %v1469_v21  ;;  %v1303_v60 = vrot.slane %v1301_v43, 1  ;;  %1914 = vmatpush.bf16.msrb.mxu2 %v8984_v23 }
 0x356   :  { %1647 = vmatmul.bf16.gmra.mxu2 %v1470_v54  ;;  %v2181_v50 = vsel %vm2113_vm5, %v2167_v45, %v2180_v57  ;;  %v1305_v54 = vshrl.u32 %v10999_v36, 16  ;;  %v9008_v36 = vld [vmem:[%s12384_s4 + $0x110] sm:$0xff] }
 0x357   :  { %v11021_v42 = vsel %vm1244_vm3, %v1299_v48, %v1303_v60  ;;  %2398 = vmatpush.bf16.msrb.mxu3 %v9008_v36 }
 0x358   :  { %v1073_v58 = vpop.f32.mrf.mxu1  ;;  %v1307_v5 = vor.u32 %v1305_v54, %v1303_v60 }
 0x35a   :  { %v9640_v52 = vld [vmem:[#allocation2 + $0x34] sm:$0xff]  }
 0x35b   :  { %v11024_v7 = vld [vmem:[#allocation2 + $0x38] sm:$0xff]  ;;  %2484 = vmatmul.bf16.gmra.mxu1 %v2181_v50  ;;  %v1467_v1 = vrot.slane %v9640_v52, 1  ;;  %v2033_v38 = vshll.u32 %v9640_v52, 16  ;;  %v2037_v3 = vshrl.u32 %v9640_v52, 16 }
 0x35c   :  { %v2685_v55 = vshll.u32 %v11024_v7, 16  ;;  %v3124_v56 = vrot.slane %v11024_v7, 3 }
 0x35d   :  { %v1468_v11 = vsel %vm1442_vm2, %v1463_v2, %v1467_v1  ;;  %v2035_v19 = vrot.slane %v2033_v38, 1  ;;  %v2195_v24 = vrot.slane %v2037_v3, 1  ;;  %v2196_v45 = vrot.slane %v2033_v38, 2 }
 0x35e   :  { %1710 = vmatmul.bf16.gmra.mxu3 %v1468_v11  ;;  %v2687_v20 = vrot.slane %v2685_v55, 1  ;;  %v11031_v34 = vsel %vm3112_vm4, %v3122_v10, %v3124_v56 }
 0x35f   :  { %12434 = vst [vmem:[#allocation30_spill] sm:$0xff] %v11031_v34  ;;  %v2036_v13 = vsel %vm1244_vm3, %v2031_v18, %v2035_v19  ;;  %v2197_v2 = vor.u32 %v2196_v45, %v2195_v24 }
 0x360   :  { %v1075_v39 = vpop.f32.mrf.mxu1  ;;  %v11033_v37 = vpop.f32.mrf.mxu0  ;;  %v2187_v31 = vshrl.u32 %v2036_v13, 16  ;;  %v2190_v26 = vshll.u32 %v2036_v13, 16  ;;  %v11039_v9 = vsel %vm1244_vm3, %v2683_v17, %v2687_v20  ;;  %v2689_v17 = vshrl.u32 %v11024_v7, 16 }
 0x361   :  { %v11036_v22 = vpack.c.bf16 %v1075_v39, %v1073_v58  ;;  %v11049_v48 = vsel %vm2113_vm5, %v2184_v40, %v2197_v2  ;;  %v2786_v50 = vrot.slane %v11039_v9, 2  ;;  %v2039_v9 = vor.u32 %v2037_v3, %v2035_v19 }
 0x362   :  { %v2189_v10 = vrot.slane %v2187_v31, 1  ;;  %v2192_v15 = vrot.slane %v2190_v26, 2  ;;  %v2691_v3 = vor.u32 %v2689_v17, %v2687_v20  ;;  %v9038_v20 = vld [vmem:[%s12384_s4 + $0x1b0] sm:$0xff] }
 0x363   :  { %9541 = vst [vmem:[#allocation2 + $0x40] sm:$0xff] %v11036_v22   ;;  %1889 = vmatmul.bf16.gmra.mxu0 %v11036_v22  ;;  %v1473_v43 = vrot.slane %v11036_v22, 1  ;;  %v1309_v58 = vshll.u32 %v11036_v22, 16  ;;  %v11055_v11 = vsel %vm2765_vm6, %v2782_v51, %v2786_v50 }
 0x364   :  { %v2193_v38 = vor.u32 %v2192_v15, %v2189_v10  ;;  %12435 = vst [vmem:[#allocation31_spill] sm:$0xff] %v11055_v11 }
 0x365   :  { %v1474_v52 = vsel %vm1442_vm2, %v1469_v21, %v1473_v43  ;;  %v1311_v55 = vrot.slane %v1309_v58, 1 }
 0x366   :  { %1652 = vmatmul.bf16.gmra.mxu2 %v1474_v52  ;;  %v2194_v21 = vsel %vm2113_vm5, %v2180_v57, %v2193_v38 }
 0x367   :  { %v11063_v40 = vsel %vm1244_vm3, %v1307_v5, %v1311_v55 }
 0x368   :  { %v1078_v18 = vpop.f32.mrf.mxu1  ;;  %v11057_v24 = vpop.f32.mrf.mxu0 }
 0x36a   :  { %v11066_v45 = vld [vmem:[#allocation2 + $0x3c] sm:$0xff]  }
 0x36b   :  { %v11068_v60 = vld [vmem:[#allocation2 + $0x40] sm:$0xff]  ;;  %2489 = vmatmul.bf16.gmra.mxu1 %v2194_v21  ;;  %v1471_v51 = vrot.slane %v11066_v45, 1  ;;  %v2041_v39 = vshll.u32 %v11066_v45, 16  ;;  %v2045_v13 = vshrl.u32 %v11066_v45, 16 }
 0x36c   :  { %v2693_v31 = vshll.u32 %v11068_v60, 16  ;;  %v12402_v26 = vrot.slane %v11068_v60, 3 }
 0x36d   :  { %v1472_v57 = vsel %vm1442_vm2, %v1467_v1, %v1471_v51  ;;  %v2043_v10 = vrot.slane %v2041_v39, 1  ;;  %v2208_v15 = vrot.slane %v2045_v13, 1  ;;  %v2209_v23 = vrot.slane %v2041_v39, 2  ;;  %v9039_v1 = vld [vmem:[%s12384_s4 + $0x1b8] sm:$0xff] }
 0x36e   :  { %1715 = vmatmul.bf16.gmra.mxu3 %v1472_v57  ;;  %v11077_v54 = vrot.slane %v2693_v31, 1  ;;  %v11082_v58 = vsel %vm3112_vm4, %v3124_v56, %v12402_v26  ;;  %2932 = vmatpush.bf16.msra.mxu0 %v9039_v1 }
 0x36f   :  { %12436 = vst [vmem:[#allocation32_spill] sm:$0xff] %v11082_v58  ;;  %v2044_v36 = vsel %vm1244_vm3, %v2039_v9, %v2043_v10  ;;  %v11092_v39 = vor.u32 %v2209_v23, %v2208_v15 }
 0x370   :  { %v1080_v52 = vpop.f32.mrf.mxu1  ;;  %v11084_v5 = vpop.f32.mrf.mxu0  ;;  %v2200_v21 = vshrl.u32 %v2044_v36, 16  ;;  %v2203_v45 = vshll.u32 %v2044_v36, 16  ;;  %v11096_v56 = vsel %vm1244_vm3, %v2691_v3, %v11077_v54 }
 0x371   :  { %v11090_v19 = vpack.c.bf16 %v1080_v52, %v1078_v18  ;;  %v1313_v18 = vshrl.u32 %v11036_v22, 16  ;;  %v11107_v17 = vsel %vm2113_vm5, %v2197_v2, %v11092_v39  ;;  %v12400_v23 = vrot.slane %v11096_v56, 2 }
 0x372   :  { %v2202_v31 = vrot.slane %v2200_v21, 1  ;;  %v2205_v57 = vrot.slane %v2203_v45, 2  ;;  %2933 = vmatpush.bf16.msra.mxu0 %v9038_v20  ;;  %v9037_v45 = vld [vmem:[%s12384_s4 + $0x1a8] sm:$0xff]  ;;  %v9036_v20 = vld [vmem:[%s12384_s4 + $0x1a0] sm:$0xff] }
 0x373   :  { %9542 = vst [vmem:[#allocation2 + $0x48] sm:$0xff] %v11090_v19   ;;  %1894 = vmatmul.bf16.gmra.mxu0 %v11090_v19  ;;  %v12401_v9 = vrot.slane %v11090_v19, 1  ;;  %v1317_v15 = vshll.u32 %v11090_v19, 16  ;;  %v1315_v1 = vor.u32 %v1313_v18, %v1311_v55  ;;  %v11119_v22 = vsel %vm2765_vm6, %v2786_v50, %v12400_v23  ;;  %v8983_v18 = vld [vmem:[%s12384_s4 + $0x48] sm:$0xff] }
 0x374   :  { %v11114_v36 = vor.u32 %v2205_v57, %v2202_v31  ;;  %12437 = vst [vmem:[#allocation33_spill] sm:$0xff] %v11119_v22  ;;  %1915 = vmatpush.bf16.msrb.mxu2 %v8983_v18  ;;  %v12439_v18 = vrot.slane %v11068_v60, 3 }
 0x375   :  { %v1478_v52 = vsel %vm1442_vm2, %v1473_v43, %v12401_v9  ;;  %v1319_v3 = vrot.slane %v1317_v15, 1  ;;  %v2047_v9 = vor.u32 %v2045_v13, %v2043_v10  ;;  %v9007_v13 = vld [vmem:[%s12384_s4 + $0x108] sm:$0xff]  ;;  %v9035_v10 = vld [vmem:[%s12384_s4 + $0x198] sm:$0xff] }
 0x376   :  { %1657 = vmatmul.bf16.gmra.mxu2 %v1478_v52  ;;  %v2207_v55 = vsel %vm2113_vm5, %v2193_v38, %v11114_v36  ;;  %2934 = vmatpush.bf16.msra.mxu0 %v9037_v45 }
 0x377   :  { %v11127_v43 = vsel %vm1244_vm3, %v1315_v1, %v1319_v3  ;;  %v2697_v1 = vshrl.u32 %v11068_v60, 16  ;;  %2399 = vmatpush.bf16.msrb.mxu3 %v9007_v13  ;;  %v12442_v13 = vrot.slane %v11090_v19, 1 }
 0x378   :  { %v1083_v2 = vpop.f32.mrf.mxu1  ;;  %v11121_v21 = vpop.f32.mrf.mxu0  ;;  %12438 = vst [vmem:[#allocation34_spill] sm:$0xff] %v11127_v43 }
 0x379   :  { %v11129_v31 = vpop.f32.mrf.mxu2 }
 0x37a   :  { %v11133_v57 = vld [vmem:[#allocation2 + $0x44] sm:$0xff]   ;;  %2935 = vmatpush.bf16.msra.mxu0 %v9036_v20 }
 0x37b   :  { %v11135_v50 = vld [vmem:[#allocation2 + $0x48] sm:$0xff]  ;;  %2494 = vmatmul.bf16.gmra.mxu1 %v2207_v55  ;;  %v12405_v15 = vrot.slane %v11133_v57, 1  ;;  %v2049_v52 = vshll.u32 %v11133_v57, 16  ;;  %v12404_v38 = vshrl.u32 %v11133_v57, 16 }
 0x37c   :  { %v2701_v45 = vshll.u32 %v11135_v50, 16  ;;  %v12403_v55 = vrot.slane %v11135_v50, 3  ;;  %v12448_v8 = vrot.slane %v11135_v50, 3 }
 0x37d   :  { %v1476_v23 = vsel %vm1442_vm2, %v1471_v51, %v12405_v15  ;;  %v2051_v26 = vrot.slane %v2049_v52, 1  ;;  %v2221_v58 = vrot.slane %v12404_v38, 1  ;;  %v2222_v34 = vrot.slane %v2049_v52, 2 }
 0x37e   :  { %1720 = vmatmul.bf16.gmra.mxu3 %v1476_v23  ;;  %v11154_v22 = vrot.slane %v2701_v45, 1  ;;  %v11161_v28 = vsel %vm3112_vm4, %v12439_v18, %v12403_v55  ;;  %v2699_v23 = vor.u32 %v2697_v1, %v11077_v54  ;;  %2936 = vmatpush.bf16.msra.mxu0 %v9035_v10  ;;  %v12443_v15 = vrot.slane %v11096_v56, 2 }
 0x37f   :  { %12440 = vst [vmem:[#allocation35_spill] sm:$0xff] %v11161_v28  ;;  %v2052_v51 = vsel %vm1244_vm3, %v2047_v9, %v2051_v26  ;;  %v11177_v55 = vor.u32 %v2222_v34, %v2221_v58  ;;  %v1321_v34 = vshrl.u32 %v11090_v19, 16  ;;  %v9033_v19 = vld [vmem:[%s12384_s4 + $0x188] sm:$0xff] }
 0x380   :  { %v1085_v11 = vpop.f32.mrf.mxu1  ;;  %v11163_v33 = vpop.f32.mrf.mxu0  ;;  %v2213_v45 = vshrl.u32 %v2052_v51, 16  ;;  %v2216_v18 = vshll.u32 %v2052_v51, 16  ;;  %v11181_v9 = vsel %vm1244_vm3, %v2699_v23, %v11154_v22 }
 0x381   :  { %v11173_v20 = vpack.c.bf16 %v1085_v11, %v1083_v2  ;;  %v11175_v52 = vpop.f32.mrf.mxu2  ;;  %v9034_v2 = vld [vmem:[%s12384_s4 + $0x190] sm:$0xff]  ;;  %v11193_v58 = vsel %vm2113_vm5, %v11092_v39, %v11177_v55  ;;  %v2794_v51 = vrot.slane %v11181_v9, 2 }
 0x382   :  { %v2215_v38 = vrot.slane %v2213_v45, 1  ;;  %v2218_v54 = vrot.slane %v2216_v18, 2  ;;  %12441 = vst [vmem:[#allocation36_spill] sm:$0xff] %v11193_v58  ;;  %2937 = vmatpush.bf16.msra.mxu0 %v9034_v2  ;;  %v1323_v45 = vor.u32 %v1321_v34, %v1319_v3 }
 0x383   :  { %9543 = vst [vmem:[#allocation2 + $0x50] sm:$0xff] %v11173_v20   ;;  %1899 = vmatmul.bf16.gmra.mxu0 %v11173_v20  ;;  %v12406_v11 = vrot.slane %v11173_v20, 1  ;;  %v1325_v1 = vshll.u32 %v11173_v20, 16  ;;  %v11207_v39 = vsel %vm2765_vm6, %v12443_v15, %v2794_v51 }
 0x384   :  { %v2219_v23 = vor.u32 %v2218_v54, %v2215_v38  ;;  %12444 = vst [vmem:[#allocation37_spill] sm:$0xff] %v11207_v39  ;;  %v9032_v54 = vld [vmem:[%s12384_s4 + $0x180] sm:$0xff] }
 0x385   :  { %v1482_v10 = vsel %vm1442_vm2, %v12442_v13, %v12406_v11  ;;  %v11202_v18 = vrot.slane %v1325_v1, 1  ;;  %v2705_v13 = vshrl.u32 %v11135_v50, 16 }
 0x386   :  { %1662 = vmatmul.bf16.gmra.mxu2 %v1482_v10  ;;  %v2220_v3 = vsel %vm2113_vm5, %v11114_v36, %v2219_v23  ;;  %2938 = vmatpush.bf16.msra.mxu0 %v9033_v19 }
 0x387   :  { %v11216_v38 = vsel %vm1244_vm3, %v1323_v45, %v11202_v18  ;;  %v12446_v45 = vrot.slane %v11133_v57, 1 }
 0x388   :  { %v1088_v28 = vpop.f32.mrf.mxu1  ;;  %v11209_v44 = vpop.f32.mrf.mxu0  ;;  %12445 = vst [vmem:[#allocation38_spill] sm:$0xff] %v11216_v38 }
 0x389   :  { %v11218_v9 = vpop.f32.mrf.mxu2 }
 0x38a   :  { %v11222_v56 = vld [vmem:[#allocation2 + $0x4c] sm:$0xff]   ;;  %2939 = vmatpush.bf16.msra.mxu0 %v9032_v54 }
 0x38b   :  { %v11224_v15 = vld [vmem:[#allocation2 + $0x50] sm:$0xff]  ;;  %2499 = vmatmul.bf16.gmra.mxu1 %v2220_v3  ;;  %v12407_v2 = vrot.slane %v11222_v56, 1  ;;  %v2057_v34 = vshll.u32 %v11222_v56, 16  ;;  %v2061_v1 = vshrl.u32 %v11222_v56, 16  ;;  %v12447_v3 = vshrl.u32 %v11133_v57, 16 }
 0x38c   :  { %v2709_v36 = vshll.u32 %v11224_v15, 16  ;;  %v12408_v10 = vrot.slane %v11224_v15, 3 }
 0x38d   :  { %v1480_v19 = vsel %vm1442_vm2, %v12446_v45, %v12407_v2  ;;  %v2055_v11 = vor.u32 %v12447_v3, %v2051_v26  ;;  %v2059_v39 = vrot.slane %v2057_v34, 1  ;;  %v2234_v49 = vrot.slane %v2061_v1, 1 }
 0x38e   :  { %1725 = vmatmul.bf16.gmra.mxu3 %v1480_v19  ;;  %v2235_v59 = vrot.slane %v2057_v34, 2  ;;  %v11242_v61 = vrot.slane %v2709_v36, 1  ;;  %v11249_v16 = vsel %vm3112_vm4, %v12448_v8, %v12408_v10  ;;  %v2707_v26 = vor.u32 %v2705_v13, %v11154_v22 }
 0x38f   :  { %12449 = vst [vmem:[#allocation39_spill] sm:$0xff] %v11249_v16  ;;  %v2060_v57 = vsel %vm1244_vm3, %v2055_v11, %v2059_v39 }
 0x390   :  { %v1090_v25 = vpop.f32.mrf.mxu1  ;;  %v11251_v38 = vpop.f32.mrf.mxu0  ;;  %v2226_v34 = vshrl.u32 %v2060_v57, 16  ;;  %v2229_v36 = vshll.u32 %v2060_v57, 16  ;;  %v11257_v19 = vor.u32 %v2235_v59, %v2234_v49  ;;  %v11261_v2 = vsel %vm1244_vm3, %v2707_v26, %v11242_v61 }
 0x391   :  { %v9438_v54 = vpack.c.bf16 %v1090_v25, %v1088_v28  ;;  %v11255_v45 = vpop.f32.mrf.mxu2  ;;  %v1686_v3 = vpop.f32.mrf.mxu3  ;;  %v8982_v25 = vld [vmem:[%s12384_s4 + $0x40] sm:$0xff]  ;;  %v12409_v59 = vrot.slane %v11261_v2, 2 }
 0x392   :  { %v1687_v8 = vadd.f32 %v1686_v3, %v11129_v31  ;;  %v2228_v10 = vrot.slane %v2226_v34, 1  ;;  %v2231_v16 = vrot.slane %v2229_v36, 2  ;;  %v9006_v28 = vld [vmem:[%s12384_s4 + $0x100] sm:$0xff]  ;;  %v11273_v49 = vsel %vm2113_vm5, %v11177_v55, %v11257_v19  ;;  %1916 = vmatpush.bf16.msrb.mxu2 %v8982_v25 }
 0x393   :  { %9544 = vst [vmem:[#allocation2 + $0x58] sm:$0xff] %v9438_v54   ;;  %2400 = vmatpush.bf16.msrb.mxu3 %v9006_v28  ;;  %v11284_v11 = vsel %vm2765_vm6, %v2794_v51, %v12409_v59 }
 0x394   :  { %12450 = vst [vmem:[#allocation40_spill] sm:$0xff] %v11273_v49  ;;  %v11277_v22 = vadd.f32 %v11033_v37, %v1687_v8  ;;  %v11279_v31 = vor.u32 %v2231_v16, %v2228_v10 }
 0x395   :  { %12452 = vst [vmem:[#allocation42_spill] sm:$0xff] %v11284_v11 }
 0x396   :  { %12451 = vst [vmem:[#allocation41_spill] sm:$0xff] %v11277_v22  ;;  %v2233_v34 = vsel %vm2113_vm5, %v2219_v23, %v11279_v31 }
 0x398   :  { %v1093_v13 = vpop.f32.mrf.mxu1  ;;  %v11286_v57 = vpop.f32.mrf.mxu0 }
 0x399   :  { %v1121_v26 = vpack.c.bf16 %v1093_v13, %v1093_v13  ;;  %v11288_v55 = vpop.f32.mrf.mxu2  ;;  %v1688_v54 = vpop.f32.mrf.mxu3 }
 0x39a   :  { %v1169_v36 = vld [vmem:[#allocation2 + $0x58] sm:$0x1]  ;;  %v1689_v10 = vadd.f32 %v1688_v54, %v11175_v52  ;;  %v1977_v8 = vld [vmem:[#allocation2 + $0x5c] sm:$0x7]  ;;  %v12454_v52 = vrot.slane %v11222_v56, 1  ;;  %v2063_v54 = vor.u32 %v2061_v1, %v2059_v39  ;;  %v1329_v56 = vshrl.u32 %v11173_v20, 16 }
 0x39b   :  { %v11292_v37 = vld [vmem:[#allocation2 + $0x54] sm:$0xff]  ;;  %1146 = vst [vmem:[#allocation2 + $0x60] sm:$0xf] %v1121_v26  ;;  %2504 = vmatmul.bf16.gmra.mxu1 %v2233_v34  ;;  %v1216_v51 = vunpack.c.l.b16 %v1169_v36  ;;  %v1387_v23 = vld [vmem:[#allocation2 + $0x5c] sm:$0x3]  ;;  %v1980_v49 = vunpack.c.l.b16 %v1977_v8  ;;  %v12455_v39 = vrot.slane %v11173_v20, 1 }
 0x39c   :  { %v1170_v16 = vld [vmem:[#allocation2 + $0x58] sm:$0x3]  ;;  %v12410_v25 = vrot.slane %v11292_v37, 1  ;;  %v2065_v28 = vshll.u32 %v11292_v37, 16  ;;  %v2069_v13 = vshrl.u32 %v11292_v37, 16  ;;  %v11301_v22 = vadd.f32 %v11057_v24, %v1689_v10 }
 0x39d   :  { %v1242_v3 = vunpack.c.l.b16 %v1170_v16  ;;  %v1228_v59 = vpack.c.b16 %v1216_v51, %v1216_v51  ;;  %v11309_v16 = vpack.c.b16 %v1980_v49, %v1980_v49  ;;  %v1396_v10 = vunpack.c.l.b16 %v1387_v23 }
 0x39e   :  { %12453 = vst [vmem:[#allocation43_spill] sm:$0xff] %v11301_v22  ;;  %v1484_v26 = vsel %vm1442_vm2, %v12454_v52, %v12410_v25  ;;  %v2067_v34 = vrot.slane %v2065_v28, 1  ;;  %v2247_v51 = vrot.slane %v2069_v13, 1 }
 0x39f   :  { %v11298_v11 = vpack.c.b16 %v1242_v3, %v1242_v3  ;;  %1904 = vmatmul.bf16.gmra.mxu0 %v1228_v59  ;;  %1730 = vmatmul.bf16.gmra.mxu3 %v1484_v26  ;;  %v2248_v3 = vrot.slane %v2065_v28, 2  ;;  %v2073_v26 = vshll.u32 %v11309_v16, 16  ;;  %v11326_v20 = vpack.c.b16 %v1396_v10, %v1396_v10 }
 0x3a0   :  { %v1095_v8 = vpop.f32.mrf.mxu1  ;;  %v11311_v43 = vpop.f32.mrf.mxu0  ;;  %v2068_v24 = vsel %vm1244_vm3, %v2063_v54, %v2067_v34  ;;  %v2071_v10 = vor.u32 %v2069_v13, %v2067_v34 }
 0x3a1   :  { %v12411_v36 = vrot.slane %v11298_v11, 1  ;;  %v11320_v59 = vpop.f32.mrf.mxu2  ;;  %v2239_v49 = vshrl.u32 %v2068_v24, 16  ;;  %v2242_v52 = vshll.u32 %v2068_v24, 16  ;;  %v1691_v28 = vpop.f32.mrf.mxu3  ;;  %v12412_v8 = vshrl.u32 %v11309_v16, 16 }
 0x3a2   :  { %v2249_v54 = vor.u32 %v2248_v3, %v2247_v51  ;;  %v1333_v23 = vshll.u32 %v11298_v11, 16  ;;  %v1692_v25 = vadd.f32 %v1691_v28, %v11218_v9  ;;  %v1331_v24 = vor.u32 %v1329_v56, %v11202_v18  ;;  %v2575_v56 = vld [vmem:[#allocation2 + $0x60] sm:$0xf] }
 0x3a3   :  { %v1486_v1 = vsel %vm1442_vm2, %v12455_v39, %v12411_v36  ;;  %v2241_v22 = vrot.slane %v2239_v49, 1  ;;  %v2244_v58 = vrot.slane %v2242_v52, 2  ;;  %v11335_v36 = vld [vmem:[#allocation2 + $0x58] sm:$0xff]  ;;  %v2260_v9 = vrot.slane %v12412_v8, 1 }
 0x3a4   :  { %1667 = vmatmul.bf16.gmra.mxu2 %v1486_v1  ;;  %v11330_v39 = vsel %vm2113_vm5, %v11257_v19, %v2249_v54  ;;  %v11333_v1 = vrot.slane %v1333_v23, 1  ;;  %12458 = vst [vmem:[#allocation46_spill] sm:$0xff] %v11335_v36  ;;  %v11338_v51 = vadd.f32 %v11084_v5, %v1692_v25  ;;  %v11344_v49 = vrot.slane %v2073_v26, 1 }
 0x3a5   :  { %12456 = vst [vmem:[#allocation44_spill] sm:$0xff] %v11330_v39  ;;  %v11342_v3 = vor.u32 %v2244_v58, %v2241_v22  ;;  %v2261_v18 = vrot.slane %v2073_v26, 2  ;;  %v2713_v22 = vshrl.u32 %v11224_v15, 16  ;;  %v2717_v13 = vshll.u32 %v11335_v36, 16 }
 0x3a6   :  { %12457 = vst [vmem:[#allocation45_spill] sm:$0xff] %v11333_v1  ;;  %v11348_v19 = vsel %vm1244_vm3, %v1331_v24, %v11333_v1  ;;  %v2766_v24 = vrot.slane %v10823_v46, 2  ;;  %v2076_v8 = vsel %vm1244_vm3, %v2071_v10, %v11344_v49  ;;  %v2635_v5 = vunpack.c.l.b16 %v2575_v56 }
 0x3a7   :  { %12459 = vst [vmem:[#allocation47_spill] sm:$0xff] %v11348_v19  ;;  %v11358_v58 = vor.u32 %v2261_v18, %v2260_v9  ;;  %v2246_v26 = vsel %vm2113_vm5, %v11279_v31, %v11342_v3  ;;  %v9047_v9 = vld [vmem:[%s12384_s4 + $0x1f8] sm:$0xff]  ;;  %v2715_v1 = vor.u32 %v2713_v22, %v11242_v61  ;;  %v2719_v31 = vrot.slane %v2717_v13, 1 }
 0x3a8   :  { %v11350_v52 = vpop.f32.mrf.mxu1  ;;  %v11354_v25 = vpop.f32.mrf.mxu0  ;;  %v12460_v46 = vrot.slane %v10840_v62, 2  ;;  %v12461_v10 = vrot.slane %v11326_v20, 1  ;;  %v2252_v39 = vshrl.u32 %v2076_v8, 16  ;;  %3000 = vmatpush.bf16.msra.mxu2 %v9047_v9 }
 0x3a9   :  { %v11356_v23 = vpop.f32.mrf.mxu2  ;;  %v1693_v34 = vpop.f32.mrf.mxu3  ;;  %v11374_v18 = vsel %vm2113_vm5, %v2249_v54, %v11358_v58  ;;  %v2255_v54 = vshll.u32 %v2076_v8, 16  ;;  %v2720_v22 = vsel %vm1244_vm3, %v2715_v1, %v2719_v31  ;;  %v9055_v1 = vld [vmem:[%s12384_s4 + $0x238] sm:$0xff] }
 0x3aa   :  { %v1694_v28 = vadd.f32 %v1693_v34, %v11255_v45  ;;  %v2768_v19 = vsel %vm2765_vm6, %v2766_v24, %v12460_v46  ;;  %v12462_v45 = vrot.slane %v11292_v37, 1  ;;  %v11385_v34 = vpack.c.b16 %v2635_v5, %v2635_v5  ;;  %3196 = vmatpush.bf16.msra.mxu3 %v9055_v1 }
 0x3ab   :  { %2509 = vmatmul.bf16.gmra.mxu1 %v2246_v26  ;;  %v12414_v26 = vrot.slane %v11335_v36, 3  ;;  %v2802_v13 = vrot.slane %v2720_v22, 2  ;;  %v2721_v24 = vshrl.u32 %v11335_v36, 16  ;;  %v12464_v37 = vrot.slane %v11224_v15, 3 }
 0x3ac   :  { %v1488_v56 = vsel %vm1442_vm2, %v12462_v45, %v12461_v10  ;;  %12463 = vst [vmem:[#allocation48_spill] sm:$0xff] %v11385_v34  ;;  %v11389_v61 = vadd.f32 %v11121_v21, %v1694_v28  ;;  %v2725_v46 = vshll.u32 %v11385_v34, 16  ;;  %v12466_v28 = vrot.slane %v11261_v2, 2  ;;  %v12478_v34 = vld [vmem:[#allocation43_spill] sm:$0xff] }
 0x3ad   :  { %v11399_v5 = vsel %vm3112_vm4, %v12464_v37, %v12414_v26  ;;  %v2723_v10 = vor.u32 %v2721_v24, %v2719_v31  ;;  %v2254_v37 = vrot.slane %v2252_v39, 1  ;;  %v2257_v26 = vrot.slane %v2255_v54, 2 }
 0x3ae   :  { %12465 = vst [vmem:[#allocation49_spill] sm:$0xff] %v11399_v5  ;;  %v11411_v9 = vsel %vm2765_vm6, %v12466_v28, %v2802_v13  ;;  %v11413_v45 = vrot.slane %v2725_v46, 1 }
 0x3af   :  { %2940 = vmatmul.bf16.vlgmr.msra.gmra.mxu0 %v2768_v19  ;;  %1735 = vmatmul.bf16.gmra.mxu3 %v1488_v56  ;;  %12467 = vst [vmem:[#allocation50_spill] sm:$0xff] %v11411_v9  ;;  %v12469_v19 = vrot.slane %v11298_v11, 1  ;;  %v2258_v46 = vor.u32 %v2257_v26, %v2254_v37 }
 0x3b0   :  { %v11401_v8 = vpop.f32.mrf.mxu1  ;;  %v11403_v21 = vpop.f32.mrf.mxu0  ;;  %12468 = vst [vmem:[#allocation51_spill] sm:$0xff] %v11413_v45  ;;  %v11419_v5 = vsel %vm1244_vm3, %v2723_v10, %v11413_v45 }
 0x3b1   :  { %v1635_v22 = vpop.f32.mrf.mxu2  ;;  %v1696_v56 = vpop.f32.mrf.mxu3  ;;  %12470 = vst [vmem:[#allocation52_spill] sm:$0xff] %v11419_v5  ;;  %v12416_v28 = vrot.slane %v11419_v5, 2 }
 0x3b2   :  { %v1697_v2 = vadd.f32 %v1696_v56, %v11288_v55  ;;  %v2259_v55 = vsel %vm2113_vm5, %v11342_v3, %v2258_v46  ;;  %v12474_v3 = vrot.slane %v11326_v20, 1 }
 0x3b3   :  { %v11429_v24 = vsel %vm2765_vm6, %v2802_v13, %v12416_v28  ;;  %v12473_v13 = vrot.slane %v10840_v62, 2 }
 0x3b4   :  { %1672 = vmatmul.bf16.gmra.mxu2 %v12469_v19  ;;  %v11424_v31 = vadd.f32 %v11163_v33, %v1697_v2  ;;  %12471 = vst [vmem:[#allocation53_spill] sm:$0xff] %v11429_v24  ;;  %v9660_v19 = vld [vmem:[#allocation2 + $0x18] sm:$0xff]  ;;  %v12472_v33 = vshrl.u32 %v11309_v16, 16 }
 0x3b5   :  { %v2772_v56 = vrot.slane %v9660_v19, 2 }
 0x3b6   :  { %v2079_v2 = vor.u32 %v12472_v33, %v11344_v49 }
 0x3b7   :  { %v2773_v37 = vsel %vm2765_vm6, %v12473_v13, %v2772_v56  ;;  %v2776_v13 = vrot.slane %v10916_v32, 2 }
 0x3b8   :  { %v11431_v39 = vpop.f32.mrf.mxu1  ;;  %v11433_v54 = vpop.f32.mrf.mxu0  ;;  %v2265_v28 = vshrl.u32 %v2079_v2, 16  ;;  %v2268_v45 = vshll.u32 %v2079_v2, 16 }
 0x3b9   :  { %v1638_v1 = vpop.f32.mrf.mxu2  ;;  %v1698_v10 = vpop.f32.mrf.mxu3 }
 0x3ba   :  { %v1699_v5 = vadd.f32 %v1698_v10, %v11320_v59  ;;  %v9046_v10 = vld [vmem:[%s12384_s4 + $0x1f0] sm:$0xff] }
 0x3bb   :  { %2514 = vmatmul.bf16.gmra.mxu1 %v2259_v55  ;;  %3001 = vmatpush.bf16.msra.mxu2 %v9046_v10 }
 0x3bc   :  { %v11442_v26 = vadd.f32 %v11209_v44, %v1699_v5  ;;  %v2267_v44 = vrot.slane %v2265_v28, 1  ;;  %v2270_v5 = vrot.slane %v2268_v45, 2 }
 0x3be   :  { %v2271_v55 = vor.u32 %v2270_v5, %v2267_v44 }
 0x3bf   :  { %2945 = vmatmul.bf16.gmra.mxu0 %v2773_v37  ;;  %1740 = vmatmul.bf16.gmra.mxu3 %v12474_v3  ;;  %v2777_v3 = vsel %vm2765_vm6, %v2772_v56, %v2776_v13 }
 0x3c0   :  { %v11449_v19 = vpop.f32.mrf.mxu1  ;;  %v11451_v16 = vpop.f32.mrf.mxu0 }
 0x3c1   :  { %v1640_v49 = vpop.f32.mrf.mxu2  ;;  %v1701_v59 = vpop.f32.mrf.mxu3 }
 0x3c2   :  { %v1702_v62 = vadd.f32 %v1701_v59, %v11356_v23  ;;  %v2272_v23 = vsel %vm2113_vm5, %v2258_v46, %v2271_v55 }
 0x3c4   :  { %1917 = vmatmul.bf16.vlgmr.msrb.gmra.mxu2 %v10801_v27  ;;  %v11459_v20 = vadd.f32 %v11251_v38, %v1702_v62  ;;  %v9054_v27 = vld [vmem:[%s12384_s4 + $0x230] sm:$0xff] }
 0x3c5   :  { %3197 = vmatpush.bf16.msra.mxu3 %v9054_v27 }
 0x3c8   :  { %v11461_v33 = vpop.f32.mrf.mxu1  ;;  %v11463_v2 = vpop.f32.mrf.mxu0 }
 0x3c9   :  { %v1643_v45 = vpop.f32.mrf.mxu2  ;;  %v1703_v28 = vpop.f32.mrf.mxu3 }
 0x3ca   :  { %v1704_v37 = vadd.f32 %v1703_v28, %v1635_v22  ;;  %v9045_v28 = vld [vmem:[%s12384_s4 + $0x1e8] sm:$0xff] }
 0x3cb   :  { %2519 = vmatmul.bf16.gmra.mxu1 %v2272_v23  ;;  %3002 = vmatpush.bf16.msra.mxu2 %v9045_v28 }
 0x3cc   :  { %v11471_v38 = vadd.f32 %v11286_v57, %v1704_v37 }
 0x3cf   :  { %2950 = vmatmul.bf16.gmra.mxu0 %v2777_v3  ;;  %2401 = vmatmul.bf16.vlgmr.msrb.gmra.mxu3 %v10862_v29  ;;  %v2780_v29 = vrot.slane %v10954_v12, 2  ;;  %v9053_v12 = vld [vmem:[%s12384_s4 + $0x228] sm:$0xff] }
 0x3d0   :  { %v11475_v59 = vpop.f32.mrf.mxu1  ;;  %v11477_v44 = vpop.f32.mrf.mxu0  ;;  %3198 = vmatpush.bf16.msra.mxu3 %v9053_v12 }
 0x3d1   :  { %v1645_v5 = vpop.f32.mrf.mxu2  ;;  %v1706_v46 = vpop.f32.mrf.mxu3 }
 0x3d2   :  { %v1707_v32 = vadd.f32 %v1706_v46, %v1638_v1 }
 0x3d4   :  { %1922 = vmatmul.bf16.gmra.mxu2 %v10829_v53  ;;  %v11481_v22 = vadd.f32 %v11311_v43, %v1707_v32  ;;  %v2781_v43 = vsel %vm2765_vm6, %v2776_v13, %v2780_v29 }
 0x3d8   :  { %v11483_v62 = vpop.f32.mrf.mxu1  ;;  %v11485_v57 = vpop.f32.mrf.mxu0 }
 0x3d9   :  { %v1648_v56 = vpop.f32.mrf.mxu2  ;;  %v1708_v10 = vpop.f32.mrf.mxu3 }
 0x3da   :  { %v1709_v27 = vadd.f32 %v1708_v10, %v1640_v49 }
 0x3db   :  { %2524 = vmatmul.bf16.gmra.mxu1 %v2271_v55 }
 0x3dc   :  { %v11492_v53 = vadd.f32 %v11354_v25, %v1709_v27 }
 0x3df   :  { %2955 = vmatmul.bf16.gmra.mxu0 %v2781_v43  ;;  %2406 = vmatmul.bf16.gmra.mxu3 %v10903_v14  ;;  %v2784_v14 = vrot.slane %v10986_v4, 2  ;;  %v9044_v4 = vld [vmem:[%s12384_s4 + $0x1e0] sm:$0xff] }
 0x3e0   :  { %v11496_v1 = vpop.f32.mrf.mxu1  ;;  %v1890_v23 = vpop.f32.mrf.mxu0  ;;  %3003 = vmatpush.bf16.msra.mxu2 %v9044_v4 }
 0x3e1   :  { %v1650_v49 = vpop.f32.mrf.mxu2  ;;  %v1711_v55 = vpop.f32.mrf.mxu3 }
 0x3e2   :  { %v1712_v37 = vadd.f32 %v1711_v55, %v1643_v45 }
 0x3e4   :  { %1927 = vmatmul.bf16.gmra.mxu2 %v10869_v41  ;;  %v11503_v25 = vadd.f32 %v11403_v21, %v1712_v37  ;;  %v2785_v41 = vsel %vm2765_vm6, %v2780_v29, %v2784_v14 }
 0x3e8   :  { %v11505_v13 = vpop.f32.mrf.mxu1  ;;  %v1892_v10 = vpop.f32.mrf.mxu0 }
 0x3e9   :  { %v1713_v3 = vpop.f32.mrf.mxu3  ;;  %v1653_v32 = vpop.f32.mrf.mxu2 }
 0x3ea   :  { %v1714_v46 = vadd.f32 %v1713_v3, %v1645_v5 }
 0x3ec   :  { %v11509_v27 = vadd.f32 %v11433_v54, %v1714_v46 }
 0x3ef   :  { %2960 = vmatmul.bf16.gmra.mxu0 %v2785_v41  ;;  %2411 = vmatmul.bf16.gmra.mxu3 %v10939_v63  ;;  %v9052_v63 = vld [vmem:[%s12384_s4 + $0x220] sm:$0xff] }
 0x3f0   :  { %v11513_v45 = vpop.f32.mrf.mxu1  ;;  %v1895_v43 = vpop.f32.mrf.mxu0  ;;  %3199 = vmatpush.bf16.msra.mxu3 %v9052_v63 }
 0x3f1   :  { %v1716_v21 = vpop.f32.mrf.mxu3  ;;  %v1655_v5 = vpop.f32.mrf.mxu2 }
 0x3f2   :  { %v1717_v28 = vadd.f32 %v1716_v21, %v1648_v56 }
 0x3f4   :  { %1932 = vmatmul.bf16.gmra.mxu2 %v10913_v30  ;;  %v11520_v54 = vadd.f32 %v11451_v16, %v1717_v28  ;;  %v2788_v30 = vrot.slane %v11024_v7, 2 }
 0x3f6   :  { %v2789_v37 = vsel %vm2765_vm6, %v2784_v14, %v2788_v30  ;;  %v2792_v14 = vrot.slane %v11068_v60, 2  ;;  %v9051_v60 = vld [vmem:[%s12384_s4 + $0x218] sm:$0xff] }
 0x3f7   :  { %3200 = vmatpush.bf16.msra.mxu3 %v9051_v60 }
 0x3f8   :  { %v11522_v29 = vpop.f32.mrf.mxu1  ;;  %v1897_v3 = vpop.f32.mrf.mxu0 }
 0x3f9   :  { %v1718_v12 = vpop.f32.mrf.mxu3  ;;  %v1658_v16 = vpop.f32.mrf.mxu2 }
 0x3fa   :  { %v1719_v56 = vadd.f32 %v1718_v12, %v1650_v49 }
 0x3fc   :  { %v11529_v55 = vadd.f32 %v11463_v2, %v1719_v56 }
 0x3ff   :  { %2965 = vmatmul.bf16.gmra.mxu0 %v2789_v37  ;;  %2416 = vmatmul.bf16.gmra.mxu3 %v10974_v47  ;;  %v9043_v47 = vld [vmem:[%s12384_s4 + $0x1d8] sm:$0xff] }
 0x400   :  { %v11533_v46 = vpop.f32.mrf.mxu1  ;;  %v1900_v28 = vpop.f32.mrf.mxu0  ;;  %3004 = vmatpush.bf16.msra.mxu2 %v9043_v47 }
 0x401   :  { %v1721_v41 = vpop.f32.mrf.mxu3  ;;  %v1660_v2 = vpop.f32.mrf.mxu2 }
 0x402   :  { %v1722_v21 = vadd.f32 %v1721_v41, %v1653_v32 }
 0x404   :  { %1937 = vmatmul.bf16.gmra.mxu2 %v10951_v6  ;;  %v11537_v7 = vadd.f32 %v11477_v44, %v1722_v21  ;;  %v2793_v6 = vsel %vm2765_vm6, %v2788_v30, %v2792_v14 }
 0x408   :  { %v11539_v49 = vpop.f32.mrf.mxu1 }
 0x409   :  { %v1723_v4 = vpop.f32.mrf.mxu3 }
 0x40a   :  { %v1724_v63 = vadd.f32 %v1723_v4, %v1655_v5  ;;  %v1663_v5 = vpop.f32.mrf.mxu2 }
 0x40c   :  { %v11546_v12 = vadd.f32 %v11485_v57, %v1724_v63  ;;  %v1902_v57 = vpop.f32.mrf.mxu0 }
 0x40f   :  { %2970 = vmatmul.bf16.gmra.mxu0 %v2793_v6  ;;  %2421 = vmatmul.bf16.gmra.mxu3 %v11012_v35  ;;  %v2796_v35 = vrot.slane %v11135_v50, 2  ;;  %v9042_v50 = vld [vmem:[%s12384_s4 + $0x1d0] sm:$0xff] }
 0x410   :  { %v11550_v44 = vpop.f32.mrf.mxu1  ;;  %3005 = vmatpush.bf16.msra.mxu2 %v9042_v50 }
 0x411   :  { %v1726_v32 = vpop.f32.mrf.mxu3  ;;  %v2797_v6 = vsel %vm2765_vm6, %v2792_v14, %v2796_v35 }
 0x412   :  { %v1727_v56 = vadd.f32 %v1726_v32, %v1658_v16  ;;  %v1665_v63 = vpop.f32.mrf.mxu2 }
 0x414   :  { %1942 = vmatmul.bf16.gmra.mxu2 %v10983_v0  ;;  %v11556_v37 = vadd.f32 %v1890_v23, %v1727_v56 }
 0x418   :  { %v11558_v30 = vpop.f32.mrf.mxu1 }
 0x419   :  { %v1728_v41 = vpop.f32.mrf.mxu3 }
 0x41a   :  { %v1729_v21 = vadd.f32 %v1728_v41, %v1660_v2 }
 0x41c   :  { %v1905_v4 = vpop.f32.mrf.mxu0  ;;  %v11561_v47 = vadd.f32 %v1892_v10, %v1729_v21 }
 0x41f   :  { %2975 = vmatmul.bf16.gmra.mxu0 %v2797_v6  ;;  %2426 = vmatmul.bf16.gmra.mxu3 %v11049_v48  ;;  %v9050_v48 = vld [vmem:[%s12384_s4 + $0x210] sm:$0xff] }
 0x420   :  { %v11565_v0 = vpop.f32.mrf.mxu1  ;;  %3201 = vmatpush.bf16.msra.mxu3 %v9050_v48 }
 0x422   :  { %v1731_v23 = vpop.f32.mrf.mxu3 }
 0x423   :  { %v1732_v16 = vadd.f32 %v1731_v23, %v1663_v5 }
 0x424   :  { %1947 = vmatmul.bf16.gmra.mxu2 %v11021_v42  ;;  %v1907_v60 = vpop.f32.mrf.mxu0  ;;  %v2800_v42 = vrot.slane %v11224_v15, 2 }
 0x425   :  { %v11568_v56 = vadd.f32 %v1895_v43, %v1732_v16 }
 0x426   :  { %v2801_v43 = vsel %vm2765_vm6, %v2796_v35, %v2800_v42 }
 0x427   :  { %v1668_v32 = vpop.f32.mrf.mxu2 }
 0x428   :  { %v11573_v10 = vpop.f32.mrf.mxu1 }
 0x42a   :  { %v1733_v2 = vpop.f32.mrf.mxu3 }
 0x42b   :  { %v1734_v14 = vadd.f32 %v1733_v2, %v1665_v63 }
 0x42d   :  { %v11579_v41 = vadd.f32 %v1897_v3, %v1734_v14  ;;  %v2804_v3 = vrot.slane %v11335_v36, 2  ;;  %v9049_v14 = vld [vmem:[%s12384_s4 + $0x208] sm:$0xff] }
 0x42e   :  { %3202 = vmatpush.bf16.msra.mxu3 %v9049_v14 }
 0x42f   :  { %v1670_v5 = vpop.f32.mrf.mxu2  ;;  %2980 = vmatmul.bf16.gmra.mxu0 %v2801_v43  ;;  %2431 = vmatmul.bf16.gmra.mxu3 %v11107_v17  ;;  %v2805_v17 = vsel %vm2765_vm6, %v2800_v42, %v2804_v3 }
 0x430   :  { %v11583_v21 = vpop.f32.mrf.mxu1 }
 0x432   :  { %v1736_v6 = vpop.f32.mrf.mxu3 }
 0x433   :  { %v1737_v23 = vadd.f32 %v1736_v6, %v1668_v32  ;;  %v12475_v32 = vld [vmem:[#allocation36_spill] sm:$0xff] }
 0x434   :  { %1952 = vmatmul.bf16.gmra.mxu2 %v11063_v40  ;;  %v9041_v40 = vld [vmem:[%s12384_s4 + $0x1c8] sm:$0xff] }
 0x435   :  { %v11586_v60 = vadd.f32 %v1900_v28, %v1737_v23  ;;  %v2574_v28 = vld [vmem:[#allocation2 + $0x60] sm:$0x7]  ;;  %3006 = vmatpush.bf16.msra.mxu2 %v9041_v40 }
 0x436   :  { %v2621_v43 = vunpack.c.l.b16 %v2574_v28 }
 0x437   :  { %v1673_v16 = vpop.f32.mrf.mxu2 }
 0x438   :  { %v11588_v15 = vpop.f32.mrf.mxu1 }
 0x43a   :  { %v1738_v63 = vpop.f32.mrf.mxu3 }
 0x43b   :  { %v1739_v50 = vadd.f32 %v1738_v63, %v1670_v5  ;;  %v12476_v5 = vld [vmem:[#allocation34_spill] sm:$0xff]  ;;  %v12477_v63 = vld [vmem:[#allocation41_spill] sm:$0xff] }
 0x43d   :  { %v11591_v35 = vadd.f32 %v1902_v57, %v1739_v50 }
 0x43f   :  { %v1675_v48 = vpop.f32.mrf.mxu2  ;;  %2985 = vmatmul.bf16.gmra.mxu0 %v2805_v17  ;;  %2436 = vmatmul.bf16.gmra.mxu3 %v12475_v32 }
 0x440   :  { %v11598_v2 = vpop.f32.mrf.mxu1  ;;  %v2633_v48 = vpack.c.b16 %v2621_v43, %v2621_v43 }
 0x442   :  { %v1741_v57 = vpop.f32.mrf.mxu3  ;;  %v2808_v40 = vrot.slane %v2633_v48, 2 }
 0x443   :  { %v1742_v42 = vadd.f32 %v1741_v57, %v1673_v16  ;;  %v12480_v16 = vld [vmem:[#allocation38_spill] sm:$0xff] }
 0x444   :  { %1957 = vmatmul.bf16.gmra.mxu2 %v12476_v5  ;;  %v2809_v9 = vsel %vm2765_vm6, %v2804_v3, %v2808_v40  ;;  %v12479_v5 = vld [vmem:[#allocation40_spill] sm:$0xff] }
 0x445   :  { %v11604_v23 = vadd.f32 %v1905_v4, %v1742_v42 }
 0x447   :  { %v1918_v6 = vpop.f32.mrf.mxu2 }
 0x448   :  { %v1919_v50 = vadd.f32 %v1918_v6, %v12477_v63  ;;  %v11607_v17 = vpop.f32.mrf.mxu1 }
 0x44a   :  { %v1743_v32 = vpop.f32.mrf.mxu3 }
 0x44b   :  { %v12482_v32 = vld [vmem:[#allocation47_spill] sm:$0xff] }
 0x44f   :  { %v1920_v36 = vpop.f32.mrf.mxu2  ;;  %2990 = vmatmul.bf16.gmra.mxu0 %v2809_v9  ;;  %2441 = vmatmul.bf16.gmra.mxu3 %v12479_v5 }
 0x450   :  { %v1921_v24 = vadd.f32 %v1920_v36, %v12478_v34  ;;  %v11612_v28 = vpop.f32.mrf.mxu1  ;;  %v9040_v36 = vld [vmem:[%s12384_s4 + $0x1c0] sm:$0xff] }
 0x451   :  { %v9048_v34 = vld [vmem:[%s12384_s4 + $0x200] sm:$0xff]  ;;  %3007 = vmatpush.bf16.msra.mxu2 %v9040_v36 }
 0x452   :  { %v2402_v4 = vpop.f32.mrf.mxu3  ;;  %3203 = vmatpush.bf16.msra.mxu3 %v9048_v34 }
 0x453   :  { %v2471_v14 = vadd.f32 %v11350_v52, %v2402_v4 }
 0x454   :  { %1962 = vmatmul.bf16.gmra.mxu2 %v12480_v16 }
 0x455   :  { %v11616_v57 = vadd.f32 %v2471_v14, %v1919_v50  ;;  %v12481_v50 = vld [vmem:[#allocation44_spill] sm:$0xff] }
 0x457   :  { %v1923_v43 = vpop.f32.mrf.mxu2 }
 0x458   :  { %v1924_v42 = vadd.f32 %v1923_v43, %v11338_v51  ;;  %v11625_v9 = vpop.f32.mrf.mxu1 }
 0x45a   :  { %v2404_v3 = vpop.f32.mrf.mxu3 }
 0x45b   :  { %v2473_v52 = vadd.f32 %v11401_v8, %v2404_v3  ;;  %v12483_v3 = vld [vmem:[#allocation45_spill] sm:$0xff] }
 0x45d   :  { %v11628_v6 = vadd.f32 %v2473_v52, %v1921_v24 }
 0x45f   :  { %v1925_v63 = vpop.f32.mrf.mxu2  ;;  %2446 = vmatmul.bf16.gmra.mxu3 %v12481_v50  ;;  %2995 = vmatmul.bf16.gmra.mxu0 %v2808_v40  ;;  %v1337_v40 = vshrl.u32 %v11298_v11, 16 }
 0x460   :  { %v1926_v51 = vadd.f32 %v1925_v63, %v11389_v61  ;;  %v2527_v48 = vpop.f32.mrf.mxu1 }
 0x461   :  { %v1339_v52 = vor.u32 %v1337_v40, %v12483_v3 }
 0x462   :  { %v2407_v5 = vpop.f32.mrf.mxu3 }
 0x463   :  { %v2476_v16 = vadd.f32 %v11431_v39, %v2407_v5 }
 0x464   :  { %1967 = vmatmul.bf16.gmra.mxu2 %v12482_v32 }
 0x465   :  { %v11634_v4 = vadd.f32 %v2476_v16, %v1924_v42 }
 0x467   :  { %v1928_v14 = vpop.f32.mrf.mxu2 }
 0x468   :  { %v1929_v43 = vadd.f32 %v1928_v14, %v11424_v31 }
 0x46a   :  { %v2409_v8 = vpop.f32.mrf.mxu3 }
 0x46b   :  { %v2478_v24 = vadd.f32 %v11449_v19, %v2409_v8 }
 0x46d   :  { %v11638_v36 = vadd.f32 %v2478_v24, %v1926_v51  ;;  %v12485_v24 = vld [vmem:[#allocation21_spill] sm:$0xff] }
 0x46f   :  { %v1930_v61 = vpop.f32.mrf.mxu2  ;;  %2451 = vmatmul.bf16.gmra.mxu3 %v11374_v18  ;;  %v12484_v18 = vld [vmem:[#allocation23_spill] sm:$0xff] }
 0x470   :  { %v1931_v34 = vadd.f32 %v1930_v61, %v11442_v26  ;;  %v12486_v61 = vld [vmem:[#allocation25_spill] sm:$0xff] }
 0x472   :  { %v2412_v39 = vpop.f32.mrf.mxu3 }
 0x473   :  { %v2481_v42 = vadd.f32 %v11461_v33, %v2412_v39 }
 0x474   :  { %1972 = vmatmul.bf16.gmra.mxu2 %v1339_v52 }
 0x475   :  { %v11645_v63 = vadd.f32 %v2481_v42, %v1929_v43  ;;  %v11659_v43 = vpop.f32.mrf.mxu0 }
 0x477   :  { %v1933_v31 = vpop.f32.mrf.mxu2 }
 0x478   :  { %v1934_v19 = vadd.f32 %v1933_v31, %v11459_v20 }
 0x47a   :  { %v2414_v51 = vpop.f32.mrf.mxu3 }
 0x47b   :  { %v2483_v50 = vadd.f32 %v11475_v59, %v2414_v51 }
 0x47d   :  { %v11649_v48 = vadd.f32 %v2483_v50, %v1931_v34 }
 0x47f   :  { %v1935_v26 = vpop.f32.mrf.mxu2  ;;  %2456 = vmatmul.bf16.gmra.mxu3 %v11358_v58 }
 0x480   :  { %v1936_v11 = vadd.f32 %v1935_v26, %v11471_v38 }
 0x482   :  { %v2417_v32 = vpop.f32.mrf.mxu3 }
 0x483   :  { %v2486_v33 = vadd.f32 %v11483_v62, %v2417_v32 }
 0x484   :  { %3008 = vmatmul.bf16.vlgmr.msra.gmra.mxu2 %v12484_v18 }
 0x485   :  { %v11655_v5 = vadd.f32 %v2486_v33, %v1934_v19  ;;  %v12487_v19 = vld [vmem:[#allocation22_spill] sm:$0xff] }
 0x487   :  { %v1938_v16 = vpop.f32.mrf.mxu2 }
 0x488   :  { %v1939_v20 = vadd.f32 %v1938_v16, %v11481_v22 }
 0x48a   :  { %v2419_v14 = vpop.f32.mrf.mxu3 }
 0x48b   :  { %v2488_v59 = vadd.f32 %v11496_v1, %v2419_v14  ;;  %v11670_v1 = vpop.f32.mrf.mxu0  ;;  %v12489_v14 = vld [vmem:[#allocation24_spill] sm:$0xff] }
 0x48d   :  { %v11661_v8 = vadd.f32 %v2488_v59, %v1936_v11  ;;  %v12490_v59 = vld [vmem:[#allocation29_spill] sm:$0xff] }
 0x48f   :  { %v1940_v38 = vpop.f32.mrf.mxu2  ;;  %3204 = vmatmul.bf16.vlgmr.msra.gmra.mxu3 %v12485_v24 }
 0x490   :  { %v1941_v58 = vadd.f32 %v1940_v38, %v11492_v53 }
 0x492   :  { %v2422_v62 = vpop.f32.mrf.mxu3 }
 0x493   :  { %v2491_v34 = vadd.f32 %v11505_v13, %v2422_v62  ;;  %v11677_v51 = vpop.f32.mrf.mxu0  ;;  %v12488_v13 = vld [vmem:[#allocation27_spill] sm:$0xff] }
 0x494   :  { %3013 = vmatmul.bf16.gmra.mxu2 %v12486_v61 }
 0x495   :  { %v11667_v40 = vadd.f32 %v2491_v34, %v1939_v20 }
 0x497   :  { %v1943_v22 = vpop.f32.mrf.mxu2 }
 0x498   :  { %v1944_v3 = vadd.f32 %v1943_v22, %v11503_v25 }
 0x49a   :  { %v2424_v52 = vpop.f32.mrf.mxu3 }
 0x49b   :  { %v2493_v39 = vadd.f32 %v11513_v45, %v2424_v52  ;;  %v11684_v32 = vpop.f32.mrf.mxu0  ;;  %v12491_v52 = vld [vmem:[#allocation26_spill] sm:$0xff] }
 0x49d   :  { %v11673_v42 = vadd.f32 %v2493_v39, %v1941_v58 }
 0x49f   :  { %v1945_v53 = vpop.f32.mrf.mxu2  ;;  %3209 = vmatmul.bf16.gmra.mxu3 %v12487_v19 }
 0x4a0   :  { %v1946_v31 = vadd.f32 %v1945_v53, %v11509_v27 }
 0x4a2   :  { %v2427_v50 = vpop.f32.mrf.mxu3 }
 0x4a3   :  { %v2496_v26 = vadd.f32 %v11522_v29, %v2427_v50  ;;  %v11693_v58 = vpop.f32.mrf.mxu0 }
 0x4a4   :  { %3018 = vmatmul.bf16.gmra.mxu2 %v12488_v13 }
 0x4a5   :  { %v11681_v25 = vadd.f32 %v2496_v26, %v1944_v3 }
 0x4a7   :  { %v1948_v11 = vpop.f32.mrf.mxu2 }
 0x4a8   :  { %v1949_v18 = vadd.f32 %v1948_v11, %v11520_v54 }
 0x4aa   :  { %v2429_v45 = vpop.f32.mrf.mxu3 }
 0x4ab   :  { %v2498_v33 = vadd.f32 %v11533_v46, %v2429_v45  ;;  %v11702_v3 = vpop.f32.mrf.mxu0  ;;  %v12494_v45 = vld [vmem:[#allocation33_spill] sm:$0xff] }
 0x4ad   :  { %v11687_v27 = vadd.f32 %v2498_v33, %v1946_v31 }
 0x4af   :  { %v1950_v16 = vpop.f32.mrf.mxu2  ;;  %3214 = vmatmul.bf16.gmra.mxu3 %v12489_v14 }
 0x4b0   :  { %v1951_v20 = vadd.f32 %v1950_v16, %v11529_v55 }
 0x4b2   :  { %v2432_v29 = vpop.f32.mrf.mxu3 }
 0x4b3   :  { %v2501_v38 = vadd.f32 %v11539_v49, %v2432_v29  ;;  %v12492_v49 = vld [vmem:[#allocation31_spill] sm:$0xff] }
 0x4b4   :  { %3023 = vmatmul.bf16.gmra.mxu2 %v12490_v59 }
 0x4b5   :  { %v11695_v54 = vadd.f32 %v2501_v38, %v1949_v18  ;;  %v12493_v18 = vld [vmem:[#allocation28_spill] sm:$0xff] }
 0x4b7   :  { %v1953_v24 = vpop.f32.mrf.mxu2 }
 0x4b8   :  { %v1954_v61 = vadd.f32 %v1953_v24, %v11537_v7 }
 0x4ba   :  { %v2434_v46 = vpop.f32.mrf.mxu3 }
 0x4bb   :  { %v2503_v62 = vadd.f32 %v11550_v44, %v2434_v46  ;;  %v11710_v44 = vpop.f32.mrf.mxu0  ;;  %v12496_v46 = vld [vmem:[#allocation37_spill] sm:$0xff] }
 0x4bd   :  { %v11699_v34 = vadd.f32 %v2503_v62, %v1951_v20 }
 0x4bf   :  { %v1955_v55 = vpop.f32.mrf.mxu2  ;;  %3219 = vmatmul.bf16.gmra.mxu3 %v12491_v52 }
 0x4c0   :  { %v1956_v22 = vadd.f32 %v1955_v55, %v11546_v12 }
 0x4c2   :  { %v2437_v39 = vpop.f32.mrf.mxu3 }
 0x4c3   :  { %v2506_v53 = vadd.f32 %v11558_v30, %v2437_v39  ;;  %v11718_v33 = vpop.f32.mrf.mxu0 }
 0x4c4   :  { %3028 = vmatmul.bf16.gmra.mxu2 %v12492_v49 }
 0x4c5   :  { %v11707_v31 = vadd.f32 %v2506_v53, %v1954_v61  ;;  %v12495_v61 = vld [vmem:[#allocation30_spill] sm:$0xff] }
 0x4c7   :  { %v1958_v7 = vpop.f32.mrf.mxu2 }
 0x4c8   :  { %v1959_v19 = vadd.f32 %v1958_v7, %v11556_v37  ;;  %v12497_v7 = vld [vmem:[#allocation32_spill] sm:$0xff] }
 0x4ca   :  { %v2439_v13 = vpop.f32.mrf.mxu3 }
 0x4cb   :  { %v2508_v50 = vadd.f32 %v11565_v0, %v2439_v13  ;;  %v11725_v29 = vpop.f32.mrf.mxu0 }
 0x4cd   :  { %v11713_v12 = vadd.f32 %v2508_v50, %v1956_v22 }
 0x4cf   :  { %v1960_v26 = vpop.f32.mrf.mxu2  ;;  %3224 = vmatmul.bf16.gmra.mxu3 %v12493_v18 }
 0x4d0   :  { %v1961_v11 = vadd.f32 %v1960_v26, %v11561_v47 }
 0x4d2   :  { %v2442_v30 = vpop.f32.mrf.mxu3 }
 0x4d3   :  { %v2511_v16 = vadd.f32 %v11573_v10, %v2442_v30 }
 0x4d4   :  { %3033 = vmatmul.bf16.gmra.mxu2 %v12494_v45 }
 0x4d5   :  { %v11721_v37 = vadd.f32 %v2511_v16, %v1959_v19  ;;  %v12499_v16 = vld [vmem:[#allocation35_spill] sm:$0xff] }
 0x4d7   :  { %v1963_v20 = vpop.f32.mrf.mxu2 }
 0x4d8   :  { %v1964_v14 = vadd.f32 %v1963_v20, %v11568_v56  ;;  %v12500_v20 = vld [vmem:[#allocation50_spill] sm:$0xff] }
 0x4da   :  { %v2444_v0 = vpop.f32.mrf.mxu3 }
 0x4db   :  { %v2513_v59 = vadd.f32 %v11583_v21, %v2444_v0  ;;  %v11736_v21 = vpop.f32.mrf.mxu0 }
 0x4dd   :  { %v11727_v47 = vadd.f32 %v2513_v59, %v1961_v11 }
 0x4df   :  { %v1965_v38 = vpop.f32.mrf.mxu2  ;;  %3229 = vmatmul.bf16.gmra.mxu3 %v12495_v61 }
 0x4e0   :  { %v1966_v24 = vadd.f32 %v1965_v38, %v11579_v41 }
 0x4e2   :  { %v2447_v10 = vpop.f32.mrf.mxu3 }
 0x4e3   :  { %v2516_v62 = vadd.f32 %v11588_v15, %v2447_v10  ;;  %v11743_v19 = vpop.f32.mrf.mxu0  ;;  %v12498_v15 = vld [vmem:[#allocation42_spill] sm:$0xff] }
 0x4e4   :  { %3038 = vmatmul.bf16.gmra.mxu2 %v12496_v46 }
 0x4e5   :  { %v11733_v55 = vadd.f32 %v2516_v62, %v1964_v14  ;;  %v12501_v62 = vld [vmem:[#allocation39_spill] sm:$0xff] }
 0x4e7   :  { %v1968_v56 = vpop.f32.mrf.mxu2 }
 0x4e8   :  { %v1969_v22 = vadd.f32 %v1968_v56, %v11586_v60 }
 0x4ea   :  { %v2449_v52 = vpop.f32.mrf.mxu3 }
 0x4eb   :  { %v2518_v49 = vadd.f32 %v11598_v2, %v2449_v52  ;;  %v11750_v18 = vpop.f32.mrf.mxu0 }
 0x4ed   :  { %v11739_v39 = vadd.f32 %v2518_v49, %v1966_v24 }
 0x4ef   :  { %v1970_v41 = vpop.f32.mrf.mxu2  ;;  %3234 = vmatmul.bf16.gmra.mxu3 %v12497_v7 }
 0x4f0   :  { %v1971_v53 = vadd.f32 %v1970_v41, %v11591_v35  ;;  %v12503_v41 = vld [vmem:[#allocation48_spill] sm:$0xff] }
 0x4f2   :  { %v2452_v13 = vpop.f32.mrf.mxu3 }
 0x4f3   :  { %v2521_v50 = vadd.f32 %v11607_v17, %v2452_v13  ;;  %v11758_v0 = vpop.f32.mrf.mxu0 }
 0x4f4   :  { %3043 = vmatmul.bf16.gmra.mxu2 %v12498_v15  ;;  %v12504_v15 = vld [vmem:[#allocation51_spill] sm:$0xff] }
 0x4f5   :  { %v11747_v60 = vadd.f32 %v2521_v50, %v1969_v22 }
 0x4f7   :  { %v1973_v26 = vpop.f32.mrf.mxu2 }
 0x4f8   :  { %v1974_v11 = vadd.f32 %v1973_v26, %v11604_v23 }
 0x4fa   :  { %v2454_v2 = vpop.f32.mrf.mxu3 }
 0x4fb   :  { %v2523_v45 = vadd.f32 %v11612_v28, %v2454_v2  ;;  %v11765_v10 = vpop.f32.mrf.mxu0 }
 0x4fd   :  { %v11753_v35 = vadd.f32 %v2523_v45, %v1971_v53  ;;  %v2729_v53 = vshrl.u32 %v12503_v41, 16 }
 0x4ff   :  { %v1975_v30 = vpop.f32.mrf.mxu2  ;;  %3239 = vmatmul.bf16.gmra.mxu3 %v12499_v16 }
 0x502   :  { %v2457_v14 = vpop.f32.mrf.mxu3 }
 0x503   :  { %v2526_v17 = vadd.f32 %v11625_v9, %v2457_v14  ;;  %v12502_v9 = vld [vmem:[#allocation53_spill] sm:$0xff]  ;;  %v11778_v7 = vpop.f32.mrf.mxu0 }
 0x504   :  { %3048 = vmatmul.bf16.gmra.mxu2 %v12500_v20  ;;  %v12505_v20 = vld [vmem:[#allocation49_spill] sm:$0xff] }
 0x505   :  { %v11760_v59 = vadd.f32 %v2526_v17, %v1974_v11  ;;  %v12506_v17 = vld [vmem:[#allocation52_spill] sm:$0xff] }
 0x507   :  { %v3009_v23 = vpop.f32.mrf.mxu2 }
 0x508   :  { %v3010_v38 = vadd.f32 %v3009_v23, %v11659_v43  ;;  %v12507_v23 = vrot.slane %v12506_v17, 2 }
 0x50a   :  { %v3068_v24 = vadd.f32 %v3010_v38, %v11616_v57  ;;  %v2459_v28 = vpop.f32.mrf.mxu3  ;;  %v11775_v57 = vld [vmem:[%s12385_s5] ss:$0 sm:$0xff] }
 0x50b   :  { %v11791_v28 = vpop.f32.mrf.mxu0 }
 0x50f   :  { %v3011_v61 = vpop.f32.mrf.mxu2  ;;  %3244 = vmatmul.bf16.gmra.mxu3 %v12501_v62 }
 0x510   :  { %v3012_v46 = vadd.f32 %v3011_v61, %v11670_v1 }
 0x512   :  { %v3069_v56 = vadd.f32 %v3012_v46, %v11628_v6  ;;  %v3205_v22 = vpop.f32.mrf.mxu3  ;;  %v2731_v6 = vor.u32 %v2729_v53, %v12504_v15  ;;  %v12508_v15 = vld [vmem:[#allocation46_spill] sm:$0xff] }
 0x513   :  { %v3264_v52 = vadd.f32 %v3205_v22, %v3068_v24 }
 0x514   :  { %3053 = vmatmul.bf16.gmra.mxu2 %v12502_v9  ;;  %v2810_v45 = vrot.slane %v2731_v6, 2  ;;  %v3134_v9 = vrot.slane %v12503_v41, 3 }
 0x515   :  { %v3291_v50 = vadd.f32 %v11775_v57, %v3264_v52  ;;  %v11797_v52 = vpop.f32.mrf.mxu0 }
 0x516   :  { %v2811_v38 = vsel %vm2765_vm6, %v12507_v23, %v2810_v45 }
 0x517   :  { %v3014_v49 = vpop.f32.mrf.mxu2  ;;  %v3314_v30 = vmax.f32 %v3291_v50, 0.0 }
 0x518   :  { %v3015_v43 = vadd.f32 %v3014_v49, %v11677_v51 }
 0x51a   :  { %v3070_v1 = vadd.f32 %v3015_v43, %v11634_v4  ;;  %v3207_v13 = vpop.f32.mrf.mxu3 }
 0x51b   :  { %v3265_v26 = vadd.f32 %v3207_v13, %v3069_v56 }
 0x51d   :  { %v3292_v11 = vadd.f32 %v11775_v57, %v3265_v26 }
 0x51f   :  { %v3016_v2 = vpop.f32.mrf.mxu2  ;;  %v3315_v16 = vmax.f32 %v3292_v11, 0.0  ;;  %3249 = vmatmul.bf16.gmra.mxu3 %v12505_v20 }
 0x520   :  { %v3017_v51 = vadd.f32 %v3016_v2, %v11684_v32 }
 0x521   :  { %v11786_v14 = vpack.c.bf16 %v3315_v16, %v3314_v30 }
 0x522   :  { %v3071_v4 = vadd.f32 %v3017_v51, %v11638_v36  ;;  %v3210_v24 = vpop.f32.mrf.mxu3  ;;  %v11808_v51 = vpop.f32.mrf.mxu0 }
 0x523   :  { %v3266_v61 = vadd.f32 %v3210_v24, %v3070_v1  ;;  %v12509_v1 = vrot.slane %v12508_v15, 3 }
 0x524   :  { %3058 = vmatmul.bf16.gmra.mxu2 %v2811_v38 }
 0x525   :  { %v3293_v36 = vadd.f32 %v11775_v57, %v3266_v61  ;;  %v3135_v6 = vsel %vm3112_vm4, %v12509_v1, %v3134_v9 }
 0x527   :  { %v3019_v46 = vpop.f32.mrf.mxu2 }
 0x528   :  { %v3020_v32 = vadd.f32 %v3019_v46, %v11693_v58  ;;  %v3316_v58 = vmax.f32 %v3293_v36, 0.0 }
 0x52a   :  { %v3072_v62 = vadd.f32 %v3020_v32, %v11645_v63  ;;  %v3212_v56 = vpop.f32.mrf.mxu3  ;;  %v11815_v24 = vpop.f32.mrf.mxu0 }
 0x52b   :  { %v3267_v22 = vadd.f32 %v3212_v56, %v3071_v4 }
 0x52d   :  { %v3294_v49 = vadd.f32 %v11775_v57, %v3267_v22 }
 0x52f   :  { %v3021_v53 = vpop.f32.mrf.mxu2  ;;  %v3317_v13 = vmax.f32 %v3294_v49, 0.0  ;;  %3254 = vmatmul.bf16.gmra.mxu3 %v3135_v6 }
 0x530   :  { %v3022_v43 = vadd.f32 %v3021_v53, %v11702_v3 }
 0x531   :  { %v11805_v41 = vpack.c.bf16 %v3317_v13, %v3316_v58 }
 0x532   :  { %v3073_v63 = vadd.f32 %v3022_v43, %v11649_v48  ;;  %v3215_v50 = vpop.f32.mrf.mxu3  ;;  %v11821_v36 = vpop.f32.mrf.mxu0 }
 0x533   :  { %v3268_v26 = vadd.f32 %v3215_v50, %v3072_v62 }
 0x534   :  { %3063 = vmatmul.bf16.gmra.mxu2 %v2810_v45 }
 0x535   :  { %v3295_v16 = vadd.f32 %v11775_v57, %v3268_v26 }
 0x537   :  { %v3024_v11 = vpop.f32.mrf.mxu2  ;;  %v3318_v23 = vmax.f32 %v3295_v16, 0.0 }
 0x538   :  { %v3025_v2 = vadd.f32 %v3024_v11, %v11710_v44 }
 0x53a   :  { %v3074_v3 = vadd.f32 %v3025_v2, %v11655_v5  ;;  %v3217_v30 = vpop.f32.mrf.mxu3 }
 0x53b   :  { %v3269_v20 = vadd.f32 %v3217_v30, %v3073_v63 }
 0x53d   :  { %v3296_v4 = vadd.f32 %v11775_v57, %v3269_v20 }
 0x53f   :  { %v3026_v17 = vpop.f32.mrf.mxu2  ;;  %v3319_v45 = vmax.f32 %v3296_v4, 0.0  ;;  %3259 = vmatmul.bf16.gmra.mxu3 %v3134_v9 }
 0x540   :  { %v3027_v48 = vadd.f32 %v3026_v17, %v11718_v33 }
 0x541   :  { %v11817_v44 = vpack.c.bf16 %v3319_v45, %v3318_v23 }
 0x542   :  { %v3075_v38 = vadd.f32 %v3027_v48, %v11661_v8  ;;  %v3220_v61 = vpop.f32.mrf.mxu3 }
 0x543   :  { %v3270_v5 = vadd.f32 %v3220_v61, %v3074_v3 }
 0x545   :  { %v3297_v33 = vadd.f32 %v11775_v57, %v3270_v5 }
 0x547   :  { %v3029_v46 = vpop.f32.mrf.mxu2  ;;  %v3320_v53 = vmax.f32 %v3297_v33, 0.0 }
 0x548   :  { %v3030_v32 = vadd.f32 %v3029_v46, %v11725_v29 }
 0x54a   :  { %v3076_v62 = vadd.f32 %v3030_v32, %v11667_v40  ;;  %v3222_v56 = vpop.f32.mrf.mxu3  ;;  %v11829_v40 = vpop.f32.mrf.mxu0 }
 0x54b   :  { %v3271_v22 = vadd.f32 %v3222_v56, %v3075_v38 }
 0x54d   :  { %v3298_v9 = vadd.f32 %v11775_v57, %v3271_v22 }
 0x54f   :  { %v3031_v8 = vpop.f32.mrf.mxu2  ;;  %v3321_v43 = vmax.f32 %v3298_v9, 0.0 }
 0x550   :  { %v3032_v49 = vadd.f32 %v3031_v8, %v11736_v21 }
 0x551   :  { %v11827_v1 = vpack.c.bf16 %v3321_v43, %v3320_v53 }
 0x552   :  { %v3077_v15 = vadd.f32 %v3032_v49, %v11673_v42  ;;  %v3225_v29 = vpop.f32.mrf.mxu3  ;;  %v11836_v3 = vpop.f32.mrf.mxu0 }
 0x553   :  { %v3272_v6 = vadd.f32 %v3225_v29, %v3076_v62 }
 0x555   :  { %v3299_v26 = vadd.f32 %v11775_v57, %v3272_v6 }
 0x557   :  { %v3034_v58 = vpop.f32.mrf.mxu2  ;;  %v3322_v30 = vmax.f32 %v3299_v26, 0.0 }
 0x558   :  { %v3035_v13 = vadd.f32 %v3034_v58, %v11743_v19 }
 0x55a   :  { %v3078_v63 = vadd.f32 %v3035_v13, %v11681_v25  ;;  %v3227_v50 = vpop.f32.mrf.mxu3  ;;  %v11842_v23 = vpop.f32.mrf.mxu0 }
 0x55b   :  { %v3273_v11 = vadd.f32 %v3227_v50, %v3077_v15 }
 0x55d   :  { %v3300_v21 = vadd.f32 %v11775_v57, %v3273_v11 }
 0x55f   :  { %v3036_v2 = vpop.f32.mrf.mxu2  ;;  %v3323_v16 = vmax.f32 %v3300_v21, 0.0 }
 0x560   :  { %v3037_v42 = vadd.f32 %v3036_v2, %v11750_v18 }
 0x561   :  { %v11839_v4 = vpack.c.bf16 %v3323_v16, %v3322_v30 }
 0x562   :  { %v3079_v20 = vadd.f32 %v3037_v42, %v11687_v27  ;;  %v3230_v19 = vpop.f32.mrf.mxu3  ;;  %v2998_v56 = vpop.f32.mrf.mxu0 }
 0x563   :  { %v3274_v17 = vadd.f32 %v3230_v19, %v3078_v63 }
 0x565   :  { %v3301_v18 = vadd.f32 %v11775_v57, %v3274_v17 }
 0x567   :  { %v3039_v25 = vpop.f32.mrf.mxu2  ;;  %v3324_v32 = vmax.f32 %v3301_v18, 0.0 }
 0x568   :  { %v3040_v48 = vadd.f32 %v3039_v25, %v11758_v0 }
 0x56a   :  { %v3080_v45 = vadd.f32 %v3040_v48, %v11695_v54  ;;  %v3232_v38 = vpop.f32.mrf.mxu3 }
 0x56b   :  { %v3275_v61 = vadd.f32 %v3232_v38, %v3079_v20 }
 0x56d   :  { %v3302_v5 = vadd.f32 %v11775_v57, %v3275_v61 }
 0x56f   :  { %v3041_v46 = vpop.f32.mrf.mxu2  ;;  %v3325_v62 = vmax.f32 %v3302_v5, 0.0 }
 0x570   :  { %v3042_v27 = vadd.f32 %v3041_v46, %v11765_v10 }
 0x571   :  { %v11849_v22 = vpack.c.bf16 %v3325_v62, %v3324_v32 }
 0x572   :  { %v3081_v33 = vadd.f32 %v3042_v27, %v11699_v34  ;;  %v3235_v0 = vpop.f32.mrf.mxu3 }
 0x573   :  { %v3276_v9 = vadd.f32 %v3235_v0, %v3080_v45 }
 0x575   :  { %v3303_v43 = vadd.f32 %v11775_v57, %v3276_v9 }
 0x577   :  { %v3044_v8 = vpop.f32.mrf.mxu2  ;;  %v3326_v58 = vmax.f32 %v3303_v43, 0.0 }
 0x578   :  { %v3045_v54 = vadd.f32 %v3044_v8, %v11778_v7 }
 0x57a   :  { %v3082_v49 = vadd.f32 %v3045_v54, %v11707_v31  ;;  %v3237_v53 = vpop.f32.mrf.mxu3 }
 0x57b   :  { %v3277_v15 = vadd.f32 %v3237_v53, %v3081_v33 }
 0x57d   :  { %v3304_v10 = vadd.f32 %v11775_v57, %v3277_v15 }
 0x57f   :  { %v3046_v29 = vpop.f32.mrf.mxu2  ;;  %v3327_v34 = vmax.f32 %v3304_v10, 0.0 }
 0x580   :  { %v3047_v6 = vadd.f32 %v3046_v29, %v11791_v28 }
 0x581   :  { %v11857_v63 = vpack.c.bf16 %v3327_v34, %v3326_v58 }
 0x582   :  { %v3083_v13 = vadd.f32 %v3047_v6, %v11713_v12  ;;  %v3240_v50 = vpop.f32.mrf.mxu3 }
 0x583   :  { %v3278_v26 = vadd.f32 %v3240_v50, %v3082_v49 }
 0x585   :  { %v3305_v31 = vadd.f32 %v11775_v57, %v3278_v26 }
 0x587   :  { %v3049_v7 = vpop.f32.mrf.mxu2  ;;  %v3328_v30 = vmax.f32 %v3305_v31, 0.0 }
 0x588   :  { %v3050_v28 = vadd.f32 %v3049_v7, %v11797_v52 }
 0x58a   :  { %v3242_v11 = vpop.f32.mrf.mxu3  ;;  %v3084_v17 = vadd.f32 %v3050_v28, %v11721_v37 }
 0x58b   :  { %v3279_v21 = vadd.f32 %v3242_v11, %v3083_v13 }
 0x58d   :  { %v3306_v2 = vadd.f32 %v11775_v57, %v3279_v21 }
 0x58f   :  { %v3051_v42 = vpop.f32.mrf.mxu2  ;;  %v3329_v16 = vmax.f32 %v3306_v2, 0.0 }
 0x590   :  { %v3052_v12 = vadd.f32 %v3051_v42, %v11808_v51 }
 0x591   :  { %v3344_v20 = vpack.c.bf16 %v3329_v16, %v3328_v30 }
 0x592   :  { %v3245_v19 = vpop.f32.mrf.mxu3  ;;  %v3085_v45 = vadd.f32 %v3052_v12, %v11727_v47 }
 0x593   :  { %v3280_v48 = vadd.f32 %v3245_v19, %v3084_v17  ;;  %3425 = vmatpush.bf16.msra.mxu1 %v3344_v20 }
 0x595   :  { %v3307_v18 = vadd.f32 %v11775_v57, %v3280_v48 }
 0x597   :  { %v3054_v25 = vpop.f32.mrf.mxu2  ;;  %v3330_v27 = vmax.f32 %v3307_v18, 0.0 }
 0x598   :  { %v3055_v52 = vadd.f32 %v3054_v25, %v11815_v24 }
 0x59a   :  { %v3247_v38 = vpop.f32.mrf.mxu3  ;;  %v3086_v37 = vadd.f32 %v3055_v52, %v11733_v55 }
 0x59b   :  { %v3281_v61 = vadd.f32 %v3247_v38, %v3085_v45 }
 0x59d   :  { %v3308_v5 = vadd.f32 %v11775_v57, %v3281_v61 }
 0x59f   :  { %v3056_v46 = vpop.f32.mrf.mxu2  ;;  %v3331_v32 = vmax.f32 %v3308_v5, 0.0 }
 0x5a0   :  { %v3057_v51 = vadd.f32 %v3056_v46, %v11821_v36 }
 0x5a1   :  { %v3345_v62 = vpack.c.bf16 %v3331_v32, %v3330_v27 }
 0x5a2   :  { %v3250_v56 = vpop.f32.mrf.mxu3  ;;  %v3087_v47 = vadd.f32 %v3057_v51, %v11739_v39 }
 0x5a3   :  { %v3282_v0 = vadd.f32 %v3250_v56, %v3086_v37 }
 0x5a5   :  { %v3309_v8 = vadd.f32 %v11775_v57, %v3282_v0 }
 0x5a7   :  { %v3059_v33 = vpop.f32.mrf.mxu2  ;;  %v3332_v43 = vmax.f32 %v3309_v8, 0.0 }
 0x5a8   :  { %v3060_v24 = vadd.f32 %v3059_v33, %v11829_v40 }
 0x5aa   :  { %v3252_v9 = vpop.f32.mrf.mxu3  ;;  %v3088_v55 = vadd.f32 %v3060_v24, %v11747_v60 }
 0x5ab   :  { %v3283_v54 = vadd.f32 %v3252_v9, %v3087_v47 }
 0x5ad   :  { %v3310_v49 = vadd.f32 %v11775_v57, %v3283_v54 }
 0x5af   :  { %v3061_v53 = vpop.f32.mrf.mxu2  ;;  %v3333_v15 = vmax.f32 %v3310_v49, 0.0 }
 0x5b0   :  { %v3062_v36 = vadd.f32 %v3061_v53, %v11836_v3 }
 0x5b1   :  { %v3346_v10 = vpack.c.bf16 %v3333_v15, %v3332_v43 }
 0x5b2   :  { %v3255_v29 = vpop.f32.mrf.mxu3  ;;  %v3089_v39 = vadd.f32 %v3062_v36, %v11753_v35 }
 0x5b3   :  { %v3284_v58 = vadd.f32 %v3255_v29, %v3088_v55 }
 0x5b5   :  { %v3311_v13 = vadd.f32 %v11775_v57, %v3284_v58 }
 0x5b7   :  { %v3064_v6 = vpop.f32.mrf.mxu2  ;;  %v3334_v40 = vmax.f32 %v3311_v13, 0.0 }
 0x5b8   :  { %v3065_v26 = vadd.f32 %v3064_v6, %v11842_v23 }
 0x5ba   :  { %v3257_v34 = vpop.f32.mrf.mxu3  ;;  %v3090_v3 = vadd.f32 %v3065_v26, %v11760_v59 }
 0x5bb   :  { %v3285_v50 = vadd.f32 %v3257_v34, %v3089_v39 }
 0x5bd   :  { %v3312_v7 = vadd.f32 %v11775_v57, %v3285_v50 }
 0x5bf   :  { %v3066_v11 = vpop.f32.mrf.mxu2  ;;  %v3335_v31 = vmax.f32 %v3312_v7, 0.0 }
 0x5c1   :  { %v3347_v21 = vpack.c.bf16 %v3335_v31, %v3334_v40 }
 0x5c2   :  { %v3260_v2 = vpop.f32.mrf.mxu3 }
 0x5c3   :  { %v3286_v60 = vadd.f32 %v3260_v2, %v3090_v3 }
 0x5c5   :  { %v3313_v42 = vadd.f32 %v11775_v57, %v3286_v60 }
 0x5c7   :  { %v3336_v30 = vmax.f32 %v3313_v42, 0.0 }
 0x5c9   :  { %v3348_v35 = vpack.c.bf16 %v3336_v30, %v3336_v30 }
 0x5ca   :  { %v3262_v16 = vpop.f32.mrf.mxu3 }
 0x5cb   :  { %9719 = dma.done.wait [#allocation8], 10240 }
 0x5cc   :  { %9720 = vsyncadd [#allocation8], 4294957056  ;;  %3426 = vmatpush.bf16.msra.mxu1 %v11857_v63  ;;  %vm3421_vm7 = vcmask 1040384   ;;  %v7646_v59 = vld [vmem:[#allocation11] sm:$0xf]  ;;  %vm3405_vm8 = vcmask 408576  }
 0x5cd   :  { %v9057_v57 = vld [vmem:[#allocation11 + $0x4] sm:$0xf0]  ;;  %v3423_v23 = vsel %vm3421_vm7, %v3348_v35, 0  ;;  %v9059_v63 = vld [vmem:[#allocation11 + $0x14] sm:$0xf0]  ;;  %v3362_v17 = vld [vmem:[#allocation11 + $0x40] sm:$0xff] }
 0x5ce   :  { %v7647_v28 = vor.u32 %v9057_v57, %v7646_v59  ;;  %v9063_v19 = vld [vmem:[#allocation11 + $0x34] sm:$0xf0]  ;;  %v3388_v25 = vunpack.c.l.b16 %v3362_v17  ;;  %v9056_v48 = vld [vmem:[#allocation11 + $0x4] sm:$0xf]  ;;  %v7648_v45 = vld [vmem:[#allocation11 + $0x8] sm:$0xf0]  ;;  %v3389_v33 = vunpack.c.h.b16 %v3362_v17 }
 0x5cf   :  { %v7651_v38 = vor.u32 %v9056_v48, %v7648_v45  ;;  %v9058_v18 = vld [vmem:[#allocation11 + $0x14] sm:$0xf]  ;;  %v7656_v61 = vld [vmem:[#allocation11 + $0x18] sm:$0xf0]  ;;  %v9060_v46 = vld [vmem:[#allocation11 + $0x24] sm:$0xf] }
 0x5d0   :  { %3427 = vmatpush.bf16.msra.mxu1 %v11849_v22  ;;  %v7654_v22 = vld [vmem:[#allocation11 + $0x10] sm:$0xf]  ;;  %v7659_v5 = vor.u32 %v9058_v18, %v7656_v61  ;;  %v7664_v27 = vld [vmem:[#allocation11 + $0x28] sm:$0xf0]  ;;  %v9062_v52 = vld [vmem:[#allocation11 + $0x34] sm:$0xf]  ;;  %v3399_v0 = vpack.c.b16 %v3389_v33, %v3389_v33 }
 0x5d1   :  { %v7667_v32 = vor.u32 %v9060_v46, %v7664_v27  ;;  %v9073_v8 = vld [vmem:[#allocation5 + $0x120] sm:$0xff]  ;;  %v9072_v49 = vld [vmem:[#allocation5 + $0x70] sm:$0xff]  ;;  %v9070_v15 = vld [vmem:[#allocation5 + $0xe8] sm:$0xff]  ;;  %vm4099_vm9 = vsmask.f32 4352 }
 0x5d2   :  { %v9071_v53 = vld [vmem:[#allocation5 + $0xf0] sm:$0xff]  ;;  %v9069_v24 = vld [vmem:[#allocation5 + $0x28] sm:$0xff]  ;;  %v9068_v29 = vld [vmem:[#allocation5 + $0x40] sm:$0xff]  ;;  %vm4030_vm10 = vsmask.f32 3328 }
 0x5d3   :  { %v9105_v36 = vld [vmem:[#allocation5 + $0x228] sm:$0xff]  ;;  %v9089_v39 = vld [vmem:[#allocation5 + $0x218] sm:$0xff]  ;;  %v9081_v13 = vld [vmem:[#allocation5 + $0x200] sm:$0xff] }
 0x5d4   :  { %3428 = vmatpush.bf16.msra.mxu1 %v11839_v4  ;;  %v7655_v4 = vor.u32 %v9059_v63, %v7654_v22  ;;  %v9067_v55 = vld [vmem:[#allocation5 + $0x8] sm:$0xff]  ;;  %4284 = vmatpush.bf16.msrb.mxu3 %v9105_v36  ;;  %v9103_v50 = vld [vmem:[#allocation5 + $0x1e0] sm:$0xff]  ;;  %v9102_v11 = vld [vmem:[#allocation5 + $0x1d0] sm:$0xff] }
 0x5d5   :  { %v9104_v6 = vld [vmem:[#allocation5 + $0x1a8] sm:$0xff]  ;;  %3782 = vmatpush.bf16.msrb.mxu0 %v9089_v39  ;;  %3965 = vmatpush.bf16.msrb.mxu2 %v9081_v13  ;;  %v9080_v7 = vld [vmem:[#allocation5 + $0x140] sm:$0xff]  ;;  %v9086_v3 = vld [vmem:[#allocation5 + $0x1d8] sm:$0xff] }
 0x5d6   :  { %v9066_v34 = vld [vmem:[#allocation5 + $0xc8] sm:$0xff]  ;;  %v9087_v31 = vld [vmem:[#allocation5 + $0x1a0] sm:$0xff]  ;;  %v9101_v2 = vld [vmem:[#allocation5 + $0x198] sm:$0xff] }
 0x5d7   :  { %v9088_v26 = vld [vmem:[#allocation5 + $0x248] sm:$0xff]  ;;  %v9078_v60 = vld [vmem:[#allocation5 + $0x220] sm:$0xff]  ;;  %v9099_v59 = vld [vmem:[#allocation5 + $0x98] sm:$0xff] }
 0x5d8   :  { %3429 = vmatpush.bf16.msra.mxu1 %v11827_v1  ;;  %v7662_v1 = vld [vmem:[#allocation11 + $0x20] sm:$0xf]  ;;  %4285 = vmatpush.bf16.msrb.mxu3 %v9104_v6  ;;  %v9077_v16 = vld [vmem:[#allocation5 + $0x108] sm:$0xff]  ;;  %v9084_v57 = vld [vmem:[#allocation5 + $0x10] sm:$0xff] }
 0x5d9   :  { %3783 = vmatpush.bf16.msrb.mxu0 %v9088_v26  ;;  %3966 = vmatpush.bf16.msrb.mxu2 %v9080_v7  ;;  %v9100_v42 = vld [vmem:[#allocation5 + $0xe0] sm:$0xff]  ;;  %v9083_v63 = vld [vmem:[#allocation5 + $0x30] sm:$0xff]  ;;  %v9097_v17 = vld [vmem:[#allocation5 + $0x268] sm:$0xff] }
 0x5da   :  { %v9085_v35 = vld [vmem:[#allocation5 + $0x160] sm:$0xff]  ;;  %v9119_v13 = vld [vmem:[#allocation5 + $0x258] sm:$0xff] }
 0x5db   :  { %v9121_v46 = vld [vmem:[#allocation5 + $0x100] sm:$0xff] }
 0x5dc   :  { %3430 = vmatpush.bf16.msra.mxu1 %v11817_v44  ;;  %v9061_v44 = vld [vmem:[#allocation11 + $0x24] sm:$0xf0]  ;;  %4286 = vmatpush.bf16.msrb.mxu3 %v9103_v50 }
 0x5dd   :  { %v7663_v20 = vor.u32 %v9061_v44, %v7662_v1  ;;  %3784 = vmatpush.bf16.msrb.mxu0 %v9087_v31  ;;  %v9082_v1 = vld [vmem:[#allocation5 + $0x80] sm:$0xff]  ;;  %v9074_v44 = vld [vmem:[#allocation5 + $0xd8] sm:$0xff] }
 0x5e0   :  { %3431 = vmatpush.bf16.msra.mxu1 %v11805_v41  ;;  %v7670_v41 = vld [vmem:[#allocation11 + $0x30] sm:$0xf]  ;;  %4287 = vmatpush.bf16.msrb.mxu3 %v9102_v11 }
 0x5e1   :  { %v7671_v12 = vor.u32 %v9063_v19, %v7670_v41  ;;  %3785 = vmatpush.bf16.msrb.mxu0 %v9086_v3 }
 0x5e4   :  { %3432 = vmatpush.bf16.msra.mxu1 %v11786_v14  ;;  %v3398_v14 = vpack.c.b16 %v3388_v25, %v3388_v25  ;;  %4288 = vmatpush.bf16.msrb.mxu3 %v9101_v2  ;;  %v9118_v2 = vld [vmem:[#allocation5 + $0x58] sm:$0xff] }
 0x5e5   :  { %3786 = vmatpush.bf16.msrb.mxu0 %v9085_v35  ;;  %v9137_v35 = vld [vmem:[#allocation5 + $0x128] sm:$0xff] }
 0x5e7   :  { %3433 = vmatmul.bf16.vlgmr.msra.gmra.mxu1 %v7647_v28  ;;  %v9098_v28 = vld [vmem:[#allocation5 + $0xf8] sm:$0xff] }
 0x5e8   :  { %3462 = vmatpush.bf16.msrb.mxu1 %v3423_v23  ;;  %4289 = vmatpush.bf16.msrb.mxu3 %v9100_v42  ;;  %v9076_v23 = vld [vmem:[#allocation5 + $0x158] sm:$0xff] }
 0x5e9   :  { %3787 = vmatpush.bf16.msrb.mxu0 %v9084_v57 }
 0x5ec   :  { %3463 = vmatpush.bf16.msrb.mxu1 %v3347_v21  ;;  %v9079_v21 = vld [vmem:[#allocation5 + $0xc0] sm:$0xff]  ;;  %4290 = vmatpush.bf16.msrb.mxu3 %v9099_v59 }
 0x5ed   :  { %3967 = vmatpush.bf16.msrb.mxu2 %v9079_v21  ;;  %3788 = vmatpush.bf16.msrb.mxu0 %v9083_v63 }
 0x5f0   :  { %3464 = vmatpush.bf16.msrb.mxu1 %v3346_v10  ;;  %4291 = vmatpush.bf16.msrb.mxu3 %v9098_v28 }
 0x5f1   :  { %3968 = vmatpush.bf16.msrb.mxu2 %v9078_v60  ;;  %3789 = vmatpush.bf16.msrb.mxu0 %v9082_v1  ;;  %v9117_v1 = vld [vmem:[#allocation5 + $0x1f8] sm:$0xff] }
 0x5f4   :  { %3465 = vmatpush.bf16.msrb.mxu1 %v3345_v62  ;;  %v7672_v62 = vld [vmem:[#allocation11 + $0x38] sm:$0xf0]  ;;  %4680 = vmatpush.bf16.msra.mxu3 %v9137_v35 }
 0x5f5   :  { %v7675_v56 = vor.u32 %v9062_v52, %v7672_v62  ;;  %3969 = vmatpush.bf16.msrb.mxu2 %v9077_v16  ;;  %3811 = vmatpush.bf16.msra.mxu0 %v9097_v17 }
 0x5f7   :  { %3438 = vmatmul.bf16.gmra.mxu1 %v7655_v4  ;;  %v9075_v4 = vld [vmem:[#allocation5 + $0x148] sm:$0xff] }
 0x5f8   :  { %3936 = vmatpush.bf16.msra.mxu1 %v9073_v8  ;;  %v9120_v8 = vld [vmem:[#allocation5 + $0x260] sm:$0xff] }
 0x5f9   :  { %3970 = vmatpush.bf16.msrb.mxu2 %v9076_v23 }
 0x5fc   :  { %3937 = vmatpush.bf16.msra.mxu1 %v9072_v49 }
 0x5fd   :  { %3971 = vmatpush.bf16.msrb.mxu2 %v9075_v4 }
 0x600   :  { %3938 = vmatpush.bf16.msra.mxu1 %v9071_v53 }
 0x601   :  { %3972 = vmatpush.bf16.msrb.mxu2 %v9074_v44 }
 0x604   :  { %3939 = vmatpush.bf16.msra.mxu1 %v9070_v15 }
 0x607   :  { %3443 = vmatmul.bf16.gmra.mxu1 %v7663_v20 }
 0x608   :  { %3940 = vmatpush.bf16.msra.mxu1 %v9069_v24 }
 0x60c   :  { %3941 = vmatpush.bf16.msra.mxu1 %v9068_v29  ;;  %v9095_v29 = vld [vmem:[#allocation5 + $0x250] sm:$0xff] }
 0x610   :  { %3942 = vmatpush.bf16.msra.mxu1 %v9067_v55 }
 0x614   :  { %3943 = vmatpush.bf16.msra.mxu1 %v9066_v34 }
 0x617   :  { %3448 = vmatmul.bf16.gmra.mxu1 %v7671_v12 }
 0x627   :  { %3453 = vmatmul.bf16.gmra.mxu1 %v3398_v14  ;;  %v9096_v14 = vld [vmem:[#allocation5 + $0xb8] sm:$0xff] }
 0x628   :  { %3812 = vmatpush.bf16.msra.mxu0 %v9096_v14  ;;  %v9116_v14 = vld [vmem:[#allocation5 + $0xa0] sm:$0xff] }
 0x62c   :  { %3813 = vmatpush.bf16.msra.mxu0 %v9095_v29 }
 0x637   :  { %7676 = vmatmul.msk.bf16.vlgmr.msrb.gmra.mxu1 %vm3405_vm8, %v7651_v38 }
 0x638   :  { %4534 = vmatpush.bf16.msrb.mxu1 %v9121_v46  ;;  %v9128_v46 = vld [vmem:[#allocation5 + $0x130] sm:$0xff] }
 0x63c   :  { %4535 = vmatpush.bf16.msrb.mxu1 %v9120_v8 }
 0x640   :  { %4536 = vmatpush.bf16.msrb.mxu1 %v9119_v13 }
 0x644   :  { %4537 = vmatpush.bf16.msrb.mxu1 %v9118_v2 }
 0x647   :  { %7677 = vmatmul.msk.bf16.gmra.mxu1 %vm3405_vm8, %v7659_v5 }
 0x648   :  { %4538 = vmatpush.bf16.msrb.mxu1 %v9117_v1 }
 0x64c   :  { %4539 = vmatpush.bf16.msrb.mxu1 %v9116_v14 }
 0x657   :  { %7678 = vmatmul.msk.bf16.gmra.mxu1 %vm3405_vm8, %v7667_v32 }
 0x664   :  { %v11892_v51 = vpop.f32.mrf.mxu1 }
 0x667   :  { %7679 = vmatmul.msk.bf16.gmra.mxu1 %vm3405_vm8, %v7675_v56 }
 0x66c   :  { %v11895_v37 = vpop.f32.mrf.mxu1 }
 0x674   :  { %v11897_v47 = vpop.f32.mrf.mxu1 }
 0x677   :  { %7680 = vmatmul.msk.bf16.gmra.mxu1 %vm3405_vm8, %v3399_v0 }
 0x67c   :  { %v11900_v9 = vpop.f32.mrf.mxu1 }
 0x684   :  { %v11902_v54 = vpop.f32.mrf.mxu1 }
 0x68c   :  { %v11904_v43 = vpop.f32.mrf.mxu1 }
 0x694   :  { %v11906_v10 = vpop.f32.mrf.mxu1 }
 0x69c   :  { %v11908_v58 = vpop.f32.mrf.mxu1 }
 0x6a4   :  { %v11910_v40 = vpop.f32.mrf.mxu1 }
 0x6ac   :  { %v3456_v30 = vpop.f32.mrf.mxu1 }
 0x6ad   :  { %v9094_v30 = vld [vmem:[#allocation5 + $0x188] sm:$0xff] }
 0x6ae   :  { %3814 = vmatpush.bf16.msra.mxu0 %v9094_v30 }
 0x6b4   :  { %v3467_v22 = vpop.f32.mrf.mxu1 }
 0x6b5   :  { %v3468_v41 = vadd.f32 %v3467_v22, %v11892_v51 }
 0x6bc   :  { %v3469_v20 = vpop.f32.mrf.mxu1 }
 0x6bd   :  { %v3470_v19 = vadd.f32 %v3469_v20, %v11895_v37 }
 0x6bf   :  { %v11914_v12 = vpack.c.bf16 %v3470_v19, %v3468_v41  ;;  %v9136_v19 = vld [vmem:[#allocation5 + $0x118] sm:$0xff] }
 0x6c0   :  { %4681 = vmatpush.bf16.msra.mxu3 %v9136_v19 }
 0x6c1   :  { %9488 = vst [vmem:[#allocation3] sm:$0xff] %v11914_v12   ;;  %3944 = vmatmul.bf16.vlgmr.msra.gmra.mxu1 %v11914_v12  ;;  %v3548_v34 = vshll.u32 %v11914_v12, 16  ;;  %v3546_v42 = vshrl.u32 %v11914_v12, 16 }
 0x6c3   :  { %v3550_v3 = vrot.slane %v3548_v34, 1 }
 0x6c4   :  { %v3472_v25 = vpop.f32.mrf.mxu1 }
 0x6c5   :  { %v3473_v27 = vadd.f32 %v3472_v25, %v11897_v47  ;;  %v3551_v63 = vor.u32 %v3550_v3, %v3546_v42  ;;  %v9093_v25 = vld [vmem:[#allocation5 + $0x238] sm:$0xff] }
 0x6c6   :  { %3815 = vmatpush.bf16.msra.mxu0 %v9093_v25  ;;  %v9132_v42 = vld [vmem:[#allocation5 + $0x138] sm:$0xff]  ;;  %v9124_v25 = vld [vmem:[#allocation5 + $0xd0] sm:$0xff] }
 0x6c8   :  { %v3994_v48 = vld [vmem:[#allocation3] sm:$0x8]  ;;  %v3995_v45 = vld [vmem:[#allocation3 + $0x4] sm:$0xf] }
 0x6c9   :  { %v4012_v38 = vunpack.c.l.b16 %v3994_v48  ;;  %v4013_v18 = vunpack.c.l.b16 %v3995_v45  ;;  %v3612_v52 = vld [vmem:[#allocation3] sm:$0xe] }
 0x6ca   :  { %v3613_v37 = vld [vmem:[#allocation3] sm:$0x8]  ;;  %v3616_v33 = vunpack.c.l.b16 %v3612_v52 }
 0x6cb   :  { %v4021_v61 = vpack.c.b16 %v4013_v18, %v4012_v38  ;;  %v3620_v47 = vunpack.c.l.b16 %v3613_v37  ;;  %v9129_v38 = vld [vmem:[#allocation5 + $0x110] sm:$0xff]  ;;  %v9114_v37 = vld [vmem:[#allocation5 + $0x78] sm:$0xff] }
 0x6cc   :  { %v3474_v5 = vpop.f32.mrf.mxu1  ;;  %4563 = vmatpush.bf16.msra.mxu2 %v9129_v38 }
 0x6cd   :  { %v3475_v32 = vadd.f32 %v3474_v5, %v11900_v9  ;;  %v4101_v62 = vshrl.u32 %v4021_v61, 16  ;;  %v4104_v56 = vshll.u32 %v4021_v61, 16  ;;  %v9507_v9 = vunpack.c.h.b16 %v11914_v12  ;;  %v9092_v61 = vld [vmem:[#allocation5 + $0x68] sm:$0xff] }
 0x6ce   :  { %3816 = vmatpush.bf16.msra.mxu0 %v9092_v61 }
 0x6cf   :  { %v9492_v51 = vpack.c.bf16 %v3475_v32, %v3473_v27  ;;  %v4103_v0 = vrot.slane %v4101_v62, 3  ;;  %v4106_v53 = vrot.slane %v4104_v56, 4  ;;  %v3617_v50 = vpack.c.b16 %v9507_v9, %v3616_v33  ;;  %v9134_v56 = vld [vmem:[#allocation5 + $0x240] sm:$0xff] }
 0x6d0   :  { %v3622_v11 = vpack.c.b16 %v9507_v9, %v3620_v47  ;;  %4564 = vmatpush.bf16.msra.mxu2 %v9128_v46  ;;  %v9127_v33 = vld [vmem:[#allocation5 + $0x180] sm:$0xff]  ;;  %v9133_v9 = vld [vmem:[#allocation5 + $0x208] sm:$0xff] }
 0x6d1   :  { %9608 = vst [vmem:[#allocation3 + $0x8] sm:$0xff] %v9492_v51   ;;  %v11920_v49 = vunpack.c.l.b16 %v9492_v51  ;;  %v4109_v15 = vshrl.u32 %v9492_v51, 16  ;;  %v4112_v24 = vshll.u32 %v9492_v51, 16  ;;  %v4107_v26 = vor.u32 %v4106_v53, %v4103_v0  ;;  %v9123_v46 = vld [vmem:[#allocation5 + $0x168] sm:$0xff] }
 0x6d2   :  { %v3664_v60 = vrot.slane %v3617_v50, 1  ;;  %v3624_v57 = vrot.slane %v3622_v11, 2 }
 0x6d3   :  { %v11924_v36 = vpack.c.b16 %v11920_v49, %v4013_v18  ;;  %v4111_v55 = vrot.slane %v4109_v15, 3  ;;  %v4114_v6 = vrot.slane %v4112_v24, 4  ;;  %v9135_v18 = vld [vmem:[#allocation5 + $0x88] sm:$0xff] }
 0x6d4   :  { %v3477_v39 = vpop.f32.mrf.mxu1  ;;  %4682 = vmatpush.bf16.msra.mxu3 %v9135_v18  ;;  %4565 = vmatpush.bf16.msra.mxu2 %v9127_v33 }
 0x6d5   :  { %v4115_v7 = vor.u32 %v4114_v6, %v4111_v55  ;;  %v3478_v20 = vadd.f32 %v3477_v39, %v11902_v54  ;;  %v4032_v27 = vshrl.u32 %v11924_v36, 16  ;;  %v4035_v32 = vshll.u32 %v11924_v36, 16 }
 0x6d7   :  { %v4116_v31 = vsel %vm4099_vm9, %v4107_v26, %v4115_v7  ;;  %v4034_v0 = vrot.slane %v4032_v27, 4  ;;  %v4037_v8 = vrot.slane %v4035_v32, 5 }
 0x6d8   :  { %v11928_v21 = vld [vmem:[#allocation3 + $0x8] sm:$0xff]  ;;  %4292 = vmatmul.bf16.vlgmr.msrb.gmra.mxu3 %v4116_v31 }
 0x6d9   :  { %3949 = vmatmul.bf16.gmra.mxu1 %v11928_v21  ;;  %v3665_v16 = vrot.slane %v11928_v21, 1  ;;  %v3553_v59 = vshll.u32 %v11928_v21, 16  ;;  %v3625_v23 = vrot.slane %v11928_v21, 2  ;;  %4683 = vmatpush.bf16.msra.mxu3 %v9134_v56  ;;  %v3557_v29 = vshrl.u32 %v11928_v21, 16  ;;  %v9126_v31 = vld [vmem:[#allocation5 + $0x210] sm:$0xff]  ;;  %v9091_v21 = vld [vmem:[#allocation5 + $0x48] sm:$0xff] }
 0x6da   :  { %v4038_v26 = vor.u32 %v4037_v8, %v4034_v0  ;;  %4566 = vmatpush.bf16.msra.mxu2 %v9126_v31  ;;  %3817 = vmatpush.bf16.msra.mxu0 %v9091_v21 }
 0x6db   :  { %v3666_v22 = vsel %vm1442_vm2, %v3664_v60, %v3665_v16  ;;  %v3555_v4 = vrot.slane %v3553_v59, 1  ;;  %v11941_v44 = vsel %vm2765_vm6, %v3624_v57, %v3625_v23 }
 0x6dc   :  { %v3479_v28 = vpop.f32.mrf.mxu1  ;;  %3790 = vmatmul.bf16.vlgmr.msrb.gmra.mxu0 %v3666_v22  ;;  %v4118_v57 = vshrl.u32 %v4038_v26, 16 }
 0x6dd   :  { %v3480_v41 = vadd.f32 %v3479_v28, %v11904_v43  ;;  %v3556_v12 = vsel %vm1244_vm3, %v3551_v63, %v3555_v4  ;;  %v9115_v43 = vld [vmem:[#allocation5 + $0x1f0] sm:$0xff]  ;;  %v3559_v13 = vor.u32 %v3557_v29, %v3555_v4  ;;  %4684 = vmatpush.bf16.msra.mxu3 %v9133_v9  ;;  %v9125_v63 = vld [vmem:[#allocation5 + $0x278] sm:$0xff] }
 0x6de   :  { %3973 = vmatmul.bf16.vlgmr.msrb.gmra.mxu2 %v3556_v12  ;;  %4540 = vmatpush.bf16.msrb.mxu1 %v9115_v43  ;;  %v9090_v4 = vld [vmem:[#allocation5 + $0x190] sm:$0xff]  ;;  %v4120_v14 = vrot.slane %v4118_v57, 3 }
 0x6df   :  { %v9497_v17 = vpack.c.bf16 %v3480_v41, %v3478_v20  ;;  %v9131_v41 = vld [vmem:[#allocation5 + $0x60] sm:$0xff]  ;;  %4567 = vmatpush.bf16.msra.mxu2 %v9125_v63  ;;  %3818 = vmatpush.bf16.msra.mxu0 %v9090_v4  ;;  %v4350_v57 = vld [vmem:[#allocation3 + $0x4] sm:$0xc] }
 0x6e0   :  { %v4355_v4 = vunpack.c.l.b16 %v4350_v57 }
 0x6e1   :  { %9609 = vst [vmem:[#allocation3 + $0x10] sm:$0xff] %v9497_v17   ;;  %v4135_v48 = vshrl.u32 %v9497_v17, 16  ;;  %v4138_v45 = vshll.u32 %v9497_v17, 16  ;;  %4685 = vmatpush.bf16.msra.mxu3 %v9132_v42 }
 0x6e2   :  { %4541 = vmatpush.bf16.msrb.mxu1 %v9114_v37 }
 0x6e3   :  { %v4137_v54 = vrot.slane %v4135_v48, 3  ;;  %v4140_v5 = vrot.slane %v4138_v45, 4  ;;  %4568 = vmatpush.bf16.msra.mxu2 %v9124_v25 }
 0x6e4   :  { %v3482_v52 = vpop.f32.mrf.mxu1 }
 0x6e5   :  { %v11948_v62 = vor.u32 %v4140_v5, %v4137_v54  ;;  %4686 = vmatpush.bf16.msra.mxu3 %v9131_v41  ;;  %v9130_v54 = vld [vmem:[#allocation5 + $0xa8] sm:$0xff] }
 0x6e7   :  { %v4142_v51 = vsel %vm4099_vm9, %v4115_v7, %v11948_v62  ;;  %v3483_v7 = vadd.f32 %v3482_v52, %v11906_v10  ;;  %v3667_v10 = vrot.slane %v11941_v44, 1  ;;  %4569 = vmatpush.bf16.msra.mxu2 %v9123_v46 }
 0x6e8   :  { %v11952_v53 = vld [vmem:[#allocation3 + $0x10] sm:$0xff]  ;;  %4297 = vmatmul.bf16.gmra.mxu3 %v4142_v51 }
 0x6e9   :  { %v11954_v15 = vld [vmem:[#allocation3 + $0xc] sm:$0xff]   ;;  %3954 = vmatmul.bf16.gmra.mxu1 %v11952_v53  ;;  %v3670_v24 = vrot.slane %v11952_v53, 1  ;;  %v3561_v47 = vshll.u32 %v11952_v53, 16  ;;  %v3627_v36 = vrot.slane %v11952_v53, 2  ;;  %4687 = vmatpush.bf16.msra.mxu3 %v9130_v54 }
 0x6ea   :  { %v4040_v55 = vshrl.u32 %v11954_v15, 16  ;;  %v4043_v6 = vshll.u32 %v11954_v15, 16 }
 0x6eb   :  { %v3671_v34 = vsel %vm1442_vm2, %v3665_v16, %v3670_v24  ;;  %v11968_v50 = vrot.slane %v3561_v47, 1  ;;  %v11977_v3 = vsel %vm2765_vm6, %v3625_v23, %v3627_v36  ;;  %v4121_v23 = vshll.u32 %v4038_v26, 16 }
 0x6ec   :  { %v3484_v39 = vpop.f32.mrf.mxu1  ;;  %3795 = vmatmul.bf16.gmra.mxu0 %v3671_v34  ;;  %v4042_v2 = vrot.slane %v4040_v55, 4  ;;  %v4045_v30 = vrot.slane %v4043_v6, 5 }
 0x6ed   :  { %v3485_v11 = vadd.f32 %v3484_v39, %v11908_v58  ;;  %v3564_v60 = vsel %vm1244_vm3, %v3559_v13, %v11968_v50  ;;  %v3668_v58 = vrot.slane %v11977_v3, 1  ;;  %v4123_v48 = vrot.slane %v4121_v23, 4 }
 0x6ee   :  { %3978 = vmatmul.bf16.gmra.mxu2 %v3564_v60  ;;  %v11994_v59 = vor.u32 %v4045_v30, %v4042_v2  ;;  %v3565_v13 = vshrl.u32 %v11952_v53, 16  ;;  %v9113_v30 = vld [vmem:[#allocation5 + $0x18] sm:$0xff]  ;;  %v9107_v53 = vld [vmem:[#allocation5 + $0x1b0] sm:$0xff] }
 0x6ef   :  { %v11987_v35 = vpack.c.bf16 %v3485_v11, %v3483_v7  ;;  %v11992_v16 = vsel %vm1442_vm2, %v3667_v10, %v3668_v58  ;;  %v9122_v7 = vld [vmem:[#allocation5 + $0x1b8] sm:$0xff]  ;;  %4313 = vmatpush.bf16.msrb.mxu0 %v9113_v30 }
 0x6f0   :  { %v4047_v1 = vsel %vm4030_vm10, %v4038_v26, %v11994_v59  ;;  %v3567_v2 = vor.u32 %v3565_v13, %v11968_v50  ;;  %4570 = vmatpush.bf16.msra.mxu2 %v9122_v7  ;;  %v9111_v13 = vld [vmem:[#allocation5 + $0x38] sm:$0xff] }
 0x6f1   :  { %9610 = vst [vmem:[#allocation3 + $0x18] sm:$0xff] %v11987_v35   ;;  %v4153_v28 = vshrl.u32 %v11987_v35, 16  ;;  %v4156_v22 = vshll.u32 %v11987_v35, 16  ;;  %v4126_v19 = vshrl.u32 %v4047_v1, 16  ;;  %v4129_v12 = vshll.u32 %v4047_v1, 16 }
 0x6f3   :  { %v4155_v44 = vrot.slane %v4153_v28, 3  ;;  %v4158_v20 = vrot.slane %v4156_v22, 4  ;;  %v4128_v18 = vrot.slane %v4126_v19, 3  ;;  %v4131_v61 = vrot.slane %v4129_v12, 4 }
 0x6f4   :  { %v3487_v17 = vpop.f32.mrf.mxu1  ;;  %v12031_v28 = vunpack.c.h.b16 %v11987_v35  ;;  %v4357_v19 = vpack.c.b16 %v11920_v49, %v4355_v4 }
 0x6f5   :  { %v3488_v45 = vadd.f32 %v3487_v17, %v11910_v40  ;;  %v12002_v38 = vor.u32 %v4158_v20, %v4155_v44  ;;  %v12007_v27 = vor.u32 %v4131_v61, %v4128_v18  ;;  %v4124_v40 = vor.u32 %v4123_v48, %v4120_v14 }
 0x6f6   :  { %v4417_v14 = vrot.slane %v11954_v15, 2  ;;  %v4416_v54 = vrot.slane %v4357_v19, 2 }
 0x6f7   :  { %v3499_v5 = vpack.c.bf16 %v3488_v45, %v3488_v45  ;;  %v4160_v43 = vsel %vm4099_vm9, %v11948_v62, %v12002_v38  ;;  %v12016_v62 = vsel %vm4099_vm9, %v4124_v40, %v12007_v27 }
 0x6f8   :  { %v12009_v32 = vld [vmem:[#allocation3 + $0x18] sm:$0xff]   ;;  %4302 = vmatmul.bf16.gmra.mxu3 %v4160_v43 }
 0x6f9   :  { %v3516_v52 = vld [vmem:[#allocation3 + $0x1c] sm:$0x1]  ;;  %3508 = vst [vmem:[#allocation3 + $0x20] sm:$0xf] %v3499_v5  ;;  %v3532_v51 = vunpack.c.l.b16 %v12009_v32  ;;  %v12012_v0 = vld [vmem:[#allocation3 + $0x14] sm:$0xff]  }
 0x6fa   :  { %v3517_v56 = vld [vmem:[#allocation3 + $0x1c] sm:$0x3]  ;;  %v3533_v37 = vunpack.c.l.b16 %v3516_v52  ;;  %v4052_v47 = vshll.u32 %v12012_v0, 16  ;;  %v4049_v9 = vshrl.u32 %v12012_v0, 16 }
 0x6fb   :  { %v3543_v33 = vunpack.c.l.b16 %v3517_v56 }
 0x6fc   :  { %v3537_v8 = vpack.c.b16 %v3533_v37, %v3532_v51  ;;  %v3489_v39 = vpop.f32.mrf.mxu1  ;;  %v4054_v11 = vrot.slane %v4052_v47, 5  ;;  %v4051_v42 = vrot.slane %v4049_v9, 4  ;;  %v4372_v30 = vrot.slane %v4052_v47, 1 }
 0x6fd   :  { %v3544_v29 = vpack.c.b16 %v3543_v33, %v3532_v51 }
 0x6fe   :  { %3959 = vmatmul.bf16.gmra.mxu1 %v3537_v8  ;;  %v4055_v22 = vor.u32 %v4054_v11, %v4051_v42 }
 0x6ff   :  { %v3674_v34 = vrot.slane %v3544_v29, 1  ;;  %v3569_v26 = vshll.u32 %v3544_v29, 16  ;;  %v3573_v37 = vshrl.u32 %v3544_v29, 16 }
 0x700   :  { %v4002_v10 = vld [vmem:[#allocation3 + $0x20] sm:$0x1]  ;;  %v4056_v41 = vsel %vm4030_vm10, %v11994_v59, %v4055_v22  ;;  %v4418_v59 = vsel %vm2765_vm6, %v4416_v54, %v4417_v14 }
 0x701   :  { %v3675_v31 = vsel %vm1442_vm2, %v3670_v24, %v3674_v34  ;;  %v3571_v60 = vrot.slane %v3569_v26, 1  ;;  %v4020_v23 = vunpack.c.l.b16 %v4002_v10  ;;  %v9112_v24 = vld [vmem:[#allocation5 + $0x1c8] sm:$0xff]  ;;  %v4144_v35 = vshrl.u32 %v4056_v41, 16 }
 0x702   :  { %3800 = vmatmul.bf16.gmra.mxu0 %v3675_v31  ;;  %v4147_v17 = vshll.u32 %v4056_v41, 16  ;;  %v4365_v31 = vshll.u32 %v4357_v19, 16  ;;  %v4352_v57 = vld [vmem:[#allocation3 + $0x20] sm:$0xf] }
 0x703   :  { %v3572_v21 = vsel %vm1244_vm3, %v3567_v2, %v3571_v60  ;;  %v4025_v50 = vpack.c.b16 %v4020_v23, %v4020_v23  ;;  %v4029_v63 = vpack.c.b16 %v4020_v23, %v12031_v28  ;;  %4314 = vmatpush.bf16.msrb.mxu0 %v9112_v24  ;;  %v4146_v18 = vrot.slane %v4144_v35, 3  ;;  %v9110_v2 = vld [vmem:[#allocation5 + $0x1e8] sm:$0xff]  ;;  %v9108_v35 = vld [vmem:[#allocation5 + $0x90] sm:$0xff] }
 0x704   :  { %3983 = vmatmul.bf16.gmra.mxu2 %v3572_v21  ;;  %v4149_v61 = vrot.slane %v4147_v17, 4  ;;  %v3575_v39 = vor.u32 %v3573_v37, %v3571_v60  ;;  %v4622_v60 = vrot.slane %v11954_v15, 3  ;;  %v4367_v10 = vrot.slane %v4365_v31, 1 }
 0x705   :  { %v4171_v1 = vshll.u32 %v4025_v50, 16  ;;  %v4058_v44 = vshrl.u32 %v4029_v63, 16  ;;  %v4061_v20 = vshll.u32 %v4029_v63, 16  ;;  %v4363_v23 = vshrl.u32 %v4357_v19, 16 }
 0x706   :  { %v4150_v43 = vor.u32 %v4149_v61, %v4146_v18  ;;  %v4360_v63 = vunpack.c.l.b16 %v4352_v57  ;;  %v4374_v18 = vor.u32 %v4372_v30, %v4049_v9 }
 0x707   :  { %v4173_v12 = vrot.slane %v4171_v1, 4  ;;  %v4060_v25 = vrot.slane %v4058_v44, 4  ;;  %v4063_v48 = vrot.slane %v4061_v20, 5  ;;  %4315 = vmatpush.bf16.msrb.mxu0 %v9111_v13  ;;  %v4368_v50 = vor.u32 %v4367_v10, %v4363_v23  ;;  %v4351_v44 = vld [vmem:[#allocation3 + $0x20] sm:$0x7] }
 0x708   :  { %v12044_v52 = vsel %vm4099_vm9, %v12007_v27, %v4150_v43  ;;  %v4361_v20 = vpack.c.b16 %v4360_v63, %v12031_v28  ;;  %v4356_v15 = vunpack.c.l.b16 %v4351_v44 }
 0x709   :  { %v4174_v45 = vsel %vm4099_vm9, %v12002_v38, %v4173_v12  ;;  %v4064_v5 = vor.u32 %v4063_v48, %v4060_v25  ;;  %v4176_v51 = vshll.u32 %v4060_v25, 16  ;;  %v4600_v38 = vld [vmem:[#allocation3 + $0x4] sm:$0x8]  ;;  %v3629_v25 = vrot.slane %v12009_v32, 2 }
 0x70a   :  { %4307 = vmatmul.bf16.gmra.mxu3 %v4174_v45  ;;  %v4619_v26 = vunpack.c.l.b16 %v4600_v38  ;;  %v4376_v12 = vshll.u32 %v4361_v20, 16  ;;  %v4358_v17 = vpack.c.b16 %v4356_v15, %v12031_v28  ;;  %v4380_v9 = vshrl.u32 %v4361_v20, 16 }
 0x70b   :  { %v4065_v46 = vsel %vm4030_vm10, %v4055_v22, %v4064_v5  ;;  %v4178_v11 = vrot.slane %v4176_v51, 4  ;;  %4316 = vmatpush.bf16.msrb.mxu0 %v9110_v2 }
 0x70c   :  { %v4162_v56 = vshrl.u32 %v4065_v46, 16  ;;  %v4165_v40 = vshll.u32 %v4065_v46, 16  ;;  %v4620_v27 = vpack.c.b16 %v11920_v49, %v4619_v26  ;;  %v4422_v49 = vrot.slane %v12012_v0, 2 }
 0x70d   :  { %v4378_v48 = vrot.slane %v4376_v12, 1  ;;  %v4426_v45 = vrot.slane %v4358_v17, 2 }
 0x70e   :  { %4542 = vmatmul.bf16.vlgmr.msrb.gmra.mxu1 %v4418_v59  ;;  %v4164_v33 = vrot.slane %v4162_v56, 3  ;;  %v4167_v8 = vrot.slane %v4165_v40, 4  ;;  %v4621_v21 = vrot.slane %v4620_v27, 3  ;;  %v4423_v4 = vsel %vm2765_vm6, %v4417_v14, %v4422_v49  ;;  %v9106_v59 = vld [vmem:[#allocation5] sm:$0xff] }
 0x70f   :  { %v4624_v14 = vrot.slane %v12012_v0, 3  ;;  %v4379_v54 = vsel %vm1244_vm3, %v4374_v18, %v4378_v48  ;;  %v4427_v32 = vsel %vm2765_vm6, %v4422_v49, %v4426_v45  ;;  %v4626_v0 = vrot.slane %v4361_v20, 3 }
 0x710   :  { %v4168_v7 = vor.u32 %v4167_v8, %v4164_v33  ;;  %v4623_v22 = vsel %vm3112_vm4, %v4621_v21, %v4622_v60  ;;  %v4424_v5 = vrot.slane %v4379_v54, 2  ;;  %v4382_v56 = vor.u32 %v4380_v9, %v4378_v48 }
 0x711   :  { %v4625_v61 = vsel %vm3112_vm4, %v4622_v60, %v4624_v14  ;;  %v4627_v46 = vsel %vm3112_vm4, %v4624_v14, %v4626_v0  ;;  %v3676_v40 = vrot.slane %v3629_v25, 1 }
 0x712   :  { %3805 = vmatmul.bf16.gmra.mxu0 %v3674_v34  ;;  %v12048_v42 = vsel %vm4099_vm9, %v4150_v43, %v4168_v7  ;;  %v12051_v29 = vsel %vm4099_vm9, %v4168_v7, %v4178_v11  ;;  %v4369_v34 = vrot.slane %v4043_v6, 1  ;;  %v4428_v51 = vrot.slane %v4382_v56, 2 }
 0x714   :  { %3988 = vmatmul.bf16.gmra.mxu2 %v3575_v39  ;;  %v4371_v24 = vor.u32 %v4369_v34, %v4040_v55  ;;  %v4370_v47 = vsel %vm1244_vm3, %v4368_v50, %v4369_v34  ;;  %v9109_v55 = vld [vmem:[#allocation5 + $0x270] sm:$0xff] }
 0x715   :  { %v4419_v41 = vrot.slane %v4370_v47, 2  ;;  %4317 = vmatpush.bf16.msrb.mxu0 %v9109_v55 }
 0x716   :  { %v4373_v6 = vsel %vm1244_vm3, %v4371_v24, %v4372_v30 }
 0x717   :  { %v4420_v1 = vrot.slane %v4373_v6, 2 }
 0x719   :  { %v4421_v19 = vsel %vm2765_vm6, %v4419_v41, %v4420_v1  ;;  %4318 = vmatpush.bf16.msrb.mxu0 %v9108_v35 }
 0x71a   :  { %4688 = vmatmul.bf16.vlgmr.msra.gmra.mxu3 %v4623_v22 }
 0x71d   :  { %4319 = vmatpush.bf16.msrb.mxu0 %v9107_v53 }
 0x71e   :  { %4547 = vmatmul.bf16.gmra.mxu1 %v4423_v4 }
 0x721   :  { %4320 = vmatpush.bf16.msrb.mxu0 %v9106_v59 }
 0x722   :  { %3819 = vmatmul.bf16.vlgmr.msra.gmra.mxu0 %v11992_v16  ;;  %v3630_v16 = vsel %vm2765_vm6, %v3627_v36, %v3629_v25  ;;  %v4425_v36 = vsel %vm2765_vm6, %v4420_v1, %v4424_v5 }
 0x723   :  { %v3672_v28 = vrot.slane %v3630_v16, 1 }
 0x724   :  { %4571 = vmatmul.bf16.vlgmr.msra.gmra.mxu2 %v4421_v19 }
 0x725   :  { %v3673_v43 = vsel %vm1442_vm2, %v3668_v58, %v3672_v28  ;;  %v3677_v3 = vsel %vm1442_vm2, %v3672_v28, %v3676_v40  ;;  %v4429_v58 = vsel %vm2765_vm6, %v4424_v5, %v4428_v51 }
 0x72a   :  { %4693 = vmatmul.bf16.gmra.mxu3 %v4625_v61 }
 0x72e   :  { %4552 = vmatmul.bf16.gmra.mxu1 %v4427_v32 }
 0x732   :  { %3824 = vmatmul.bf16.gmra.mxu0 %v3673_v43 }
 0x734   :  { %4576 = vmatmul.bf16.gmra.mxu2 %v4425_v36 }
 0x73a   :  { %4698 = vmatmul.bf16.gmra.mxu3 %v4627_v46 }
 0x73e   :  { %4557 = vmatmul.bf16.gmra.mxu1 %v4426_v45  ;;  %v3945_v26 = vpop.f32.mrf.mxu1 }
 0x742   :  { %3829 = vmatmul.bf16.gmra.mxu0 %v3677_v3 }
 0x744   :  { %4581 = vmatmul.bf16.gmra.mxu2 %v4429_v58 }
 0x746   :  { %v3947_v27 = vpop.f32.mrf.mxu1 }
 0x74a   :  { %4703 = vmatmul.bf16.gmra.mxu3 %v4626_v0 }
 0x752   :  { %3834 = vmatmul.bf16.gmra.mxu0 %v3676_v40 }
 0x754   :  { %4586 = vmatmul.bf16.gmra.mxu2 %v4428_v51 }
 0x756   :  { %v3950_v10 = vpop.f32.mrf.mxu1 }
 0x759   :  { %v3791_v37 = vpop.f32.mrf.mxu0 }
 0x75b   :  { %v4293_v11 = vpop.f32.mrf.mxu3 }
 0x75e   :  { %v3952_v49 = vpop.f32.mrf.mxu1 }
 0x761   :  { %v3793_v38 = vpop.f32.mrf.mxu0  ;;  %v3974_v13 = vpop.f32.mrf.mxu2 }
 0x762   :  { %4321 = vmatmul.bf16.vlgmr.msrb.gmra.mxu0 %v12016_v62 }
 0x763   :  { %v12090_v34 = vpop.f32.mrf.mxu3 }
 0x766   :  { %v3955_v4 = vpop.f32.mrf.mxu1 }
 0x769   :  { %v3796_v33 = vpop.f32.mrf.mxu0  ;;  %v3976_v31 = vpop.f32.mrf.mxu2 }
 0x76e   :  { %v3957_v55 = vpop.f32.mrf.mxu1 }
 0x771   :  { %v3798_v8 = vpop.f32.mrf.mxu0  ;;  %v3979_v62 = vpop.f32.mrf.mxu2 }
 0x772   :  { %4326 = vmatmul.bf16.gmra.mxu0 %v12044_v52  ;;  %v12094_v52 = vpop.f32.mrf.mxu3 }
 0x77a   :  { %v12096_v24 = vpop.f32.mrf.mxu3 }
 0x77b   :  { %v3960_v48 = vpop.f32.mrf.mxu1 }
 0x77f   :  { %v3801_v39 = vpop.f32.mrf.mxu0 }
 0x782   :  { %4331 = vmatmul.bf16.gmra.mxu0 %v12048_v42  ;;  %v3981_v42 = vpop.f32.mrf.mxu2  ;;  %v12098_v44 = vpop.f32.mrf.mxu3 }
 0x783   :  { %v12108_v43 = vpop.f32.mrf.mxu1 }
 0x787   :  { %v3803_v7 = vpop.f32.mrf.mxu0 }
 0x78a   :  { %v3984_v6 = vpop.f32.mrf.mxu2  ;;  %v12100_v17 = vpop.f32.mrf.mxu3 }
 0x78b   :  { %v4543_v40 = vpop.f32.mrf.mxu1 }
 0x78f   :  { %v3806_v2 = vpop.f32.mrf.mxu0 }
 0x792   :  { %4336 = vmatmul.bf16.gmra.mxu0 %v12051_v29  ;;  %v3986_v41 = vpop.f32.mrf.mxu2  ;;  %v12102_v61 = vpop.f32.mrf.mxu3 }
 0x797   :  { %v12092_v60 = vpop.f32.mrf.mxu0 }
 0x79a   :  { %v3989_v14 = vpop.f32.mrf.mxu2  ;;  %v12112_v0 = vpop.f32.mrf.mxu3 }
 0x79f   :  { %v3820_v30 = vpop.f32.mrf.mxu0 }
 0x7a0   :  { %v3821_v21 = vadd.f32 %v3820_v30, %v3791_v37 }
 0x7a2   :  { %v3946_v57 = vadd.f32 %v3945_v26, %v3821_v21  ;;  %v12106_v28 = vpop.f32.mrf.mxu2  ;;  %v4689_v3 = vpop.f32.mrf.mxu3  ;;  %v12122_v21 = vld [vmem:[%s12387_s7] ss:$0 sm:$0xff] }
 0x7a4   :  { %v3975_v23 = vadd.f32 %v3974_v13, %v3946_v57 }
 0x7a7   :  { %v3822_v22 = vpop.f32.mrf.mxu0 }
 0x7a8   :  { %v3823_v50 = vadd.f32 %v3822_v22, %v3793_v38  ;;  %v4545_v38 = vpop.f32.mrf.mxu1 }
 0x7aa   :  { %v3948_v29 = vadd.f32 %v3947_v27, %v3823_v50  ;;  %v4572_v46 = vpop.f32.mrf.mxu2 }
 0x7ab   :  { %v4573_v26 = vadd.f32 %v4572_v46, %v4543_v40 }
 0x7ac   :  { %v3977_v63 = vadd.f32 %v3976_v31, %v3948_v29 }
 0x7af   :  { %v3825_v47 = vpop.f32.mrf.mxu0 }
 0x7b0   :  { %v3826_v1 = vadd.f32 %v3825_v47, %v3796_v33  ;;  %v4548_v27 = vpop.f32.mrf.mxu1 }
 0x7b2   :  { %v3951_v20 = vadd.f32 %v3950_v10, %v3826_v1  ;;  %v4574_v37 = vpop.f32.mrf.mxu2 }
 0x7b3   :  { %v4575_v10 = vadd.f32 %v4574_v37, %v4545_v38 }
 0x7b4   :  { %v3980_v15 = vadd.f32 %v3979_v62, %v3951_v20 }
 0x7b7   :  { %v3827_v19 = vpop.f32.mrf.mxu0 }
 0x7b8   :  { %v3828_v12 = vadd.f32 %v3827_v19, %v3798_v8 }
 0x7ba   :  { %v3953_v35 = vadd.f32 %v3952_v49, %v3828_v12 }
 0x7bc   :  { %v3982_v25 = vadd.f32 %v3981_v42, %v3953_v35 }
 0x7bf   :  { %v3830_v45 = vpop.f32.mrf.mxu0 }
 0x7c0   :  { %v3831_v16 = vadd.f32 %v3830_v45, %v3801_v39  ;;  %v4691_v39 = vpop.f32.mrf.mxu3 }
 0x7c2   :  { %v3956_v18 = vadd.f32 %v3955_v4, %v3831_v16 }
 0x7c4   :  { %v12104_v54 = vadd.f32 %v3984_v6, %v3956_v18 }
 0x7c7   :  { %v3832_v32 = vpop.f32.mrf.mxu0 }
 0x7c8   :  { %v3833_v5 = vadd.f32 %v3832_v32, %v3803_v7  ;;  %v4577_v7 = vpop.f32.mrf.mxu2  ;;  %v4694_v57 = vpop.f32.mrf.mxu3 }
 0x7c9   :  { %v4578_v20 = vadd.f32 %v4577_v7, %v4548_v27 }
 0x7ca   :  { %v3958_v53 = vadd.f32 %v3957_v55, %v3833_v5 }
 0x7cc   :  { %v12110_v36 = vadd.f32 %v3986_v41, %v3958_v53 }
 0x7cf   :  { %v3835_v9 = vpop.f32.mrf.mxu0 }
 0x7d0   :  { %v3836_v59 = vadd.f32 %v3835_v9, %v3806_v2  ;;  %v4579_v22 = vpop.f32.mrf.mxu2  ;;  %v4696_v55 = vpop.f32.mrf.mxu3 }
 0x7d2   :  { %v3961_v56 = vadd.f32 %v3960_v48, %v3836_v59 }
 0x7d4   :  { %v12114_v51 = vadd.f32 %v3989_v14, %v3961_v56 }
 0x7d7   :  { %v12116_v58 = vpop.f32.mrf.mxu0 }
 0x7d8   :  { %v4582_v35 = vpop.f32.mrf.mxu2  ;;  %v4699_v5 = vpop.f32.mrf.mxu3 }
 0x7df   :  { %v4322_v33 = vpop.f32.mrf.mxu0 }
 0x7e0   :  { %v4323_v8 = vadd.f32 %v4322_v33, %v4293_v11 }
 0x7e2   :  { %v4342_v13 = vadd.f32 %v4323_v8, %v3975_v23  ;;  %v4701_v8 = vpop.f32.mrf.mxu3 }
 0x7e4   :  { %v4592_v31 = vadd.f32 %v4573_v26, %v4342_v13 }
 0x7e6   :  { %v4709_v30 = vadd.f32 %v4689_v3, %v4592_v31 }
 0x7e7   :  { %v4324_v62 = vpop.f32.mrf.mxu0 }
 0x7e8   :  { %v4325_v2 = vadd.f32 %v4324_v62, %v12090_v34  ;;  %v4721_v11 = vadd.f32 %v12122_v21, %v4709_v30  ;;  %v4550_v34 = vpop.f32.mrf.mxu1 }
 0x7e9   :  { %v4580_v14 = vadd.f32 %v4579_v22, %v4550_v34 }
 0x7ea   :  { %v4343_v42 = vadd.f32 %v4325_v2, %v3977_v63  ;;  %v4729_v4 = vmax.f32 %v4721_v11, 0.0  ;;  %v3838_v2 = vadd.f32 %v12116_v58, %v12092_v60 }
 0x7ec   :  { %v4593_v49 = vadd.f32 %v4575_v10, %v4343_v42 }
 0x7ee   :  { %v4710_v23 = vadd.f32 %v4691_v39, %v4593_v49  ;;  %v4704_v49 = vpop.f32.mrf.mxu3 }
 0x7ef   :  { %v4327_v50 = vpop.f32.mrf.mxu0 }
 0x7f0   :  { %v4722_v6 = vadd.f32 %v12122_v21, %v4710_v23  ;;  %v4328_v29 = vadd.f32 %v4327_v50, %v12094_v52  ;;  %v4553_v16 = vpop.f32.mrf.mxu1 }
 0x7f1   :  { %v4583_v40 = vadd.f32 %v4582_v35, %v4553_v16 }
 0x7f2   :  { %v4730_v47 = vmax.f32 %v4722_v6, 0.0  ;;  %v4344_v1 = vadd.f32 %v4328_v29, %v3980_v15 }
 0x7f4   :  { %v12127_v41 = vpack.c.bf16 %v4730_v47, %v4729_v4  ;;  %v4594_v63 = vadd.f32 %v4578_v20, %v4344_v1 }
 0x7f6   :  { %v4711_v48 = vadd.f32 %v4694_v57, %v4594_v63  ;;  %v4706_v1 = vpop.f32.mrf.mxu3 }
 0x7f7   :  { %v4329_v19 = vpop.f32.mrf.mxu0 }
 0x7f8   :  { %v4330_v12 = vadd.f32 %v4329_v19, %v12096_v24  ;;  %v4723_v52 = vadd.f32 %v12122_v21, %v4711_v48  ;;  %v4584_v24 = vpop.f32.mrf.mxu2  ;;  %v4555_v37 = vpop.f32.mrf.mxu1 }
 0x7f9   :  { %v4585_v39 = vadd.f32 %v4584_v24, %v4555_v37 }
 0x7fa   :  { %v4345_v45 = vadd.f32 %v4330_v12, %v3982_v25  ;;  %v4731_v59 = vmax.f32 %v4723_v52, 0.0 }
 0x7fc   :  { %v4595_v18 = vadd.f32 %v4580_v14, %v4345_v45 }
 0x7fe   :  { %v4712_v32 = vadd.f32 %v4696_v55, %v4595_v18 }
 0x7ff   :  { %v4332_v53 = vpop.f32.mrf.mxu0 }
 0x800   :  { %v4724_v15 = vadd.f32 %v12122_v21, %v4712_v32  ;;  %v4333_v9 = vadd.f32 %v4332_v53, %v12098_v44  ;;  %v4587_v31 = vpop.f32.mrf.mxu2  ;;  %v4558_v62 = vpop.f32.mrf.mxu1 }
 0x801   :  { %v4588_v11 = vadd.f32 %v4587_v31, %v4558_v62 }
 0x802   :  { %v4732_v46 = vmax.f32 %v4724_v15, 0.0  ;;  %v4346_v56 = vadd.f32 %v4333_v9, %v12104_v54 }
 0x804   :  { %v4738_v3 = vpack.c.bf16 %v4732_v46, %v4731_v59  ;;  %v4596_v25 = vadd.f32 %v4583_v40, %v4346_v56 }
 0x806   :  { %v4713_v13 = vadd.f32 %v4699_v5, %v4596_v25 }
 0x807   :  { %v4334_v38 = vpop.f32.mrf.mxu0 }
 0x808   :  { %v4335_v33 = vadd.f32 %v4334_v38, %v12100_v17  ;;  %v4725_v44 = vadd.f32 %v12122_v21, %v4713_v13  ;;  %v4589_v50 = vpop.f32.mrf.mxu2  ;;  %v4560_v58 = vpop.f32.mrf.mxu1 }
 0x809   :  { %v4590_v34 = vadd.f32 %v4589_v50, %v4560_v58 }
 0x80a   :  { %v4347_v26 = vadd.f32 %v4335_v33, %v12110_v36  ;;  %v4733_v17 = vmax.f32 %v4725_v44, 0.0  ;;  %v3963_v36 = vadd.f32 %v12108_v43, %v3838_v2 }
 0x80c   :  { %v4597_v7 = vadd.f32 %v4585_v39, %v4347_v26  ;;  %v3992_v29 = vadd.f32 %v12106_v28, %v3963_v36 }
 0x80e   :  { %v4714_v27 = vadd.f32 %v4701_v8, %v4597_v7 }
 0x80f   :  { %v4337_v54 = vpop.f32.mrf.mxu0 }
 0x810   :  { %v4726_v10 = vadd.f32 %v12122_v21, %v4714_v27  ;;  %v4338_v30 = vadd.f32 %v4337_v54, %v12102_v61 }
 0x812   :  { %v4734_v42 = vmax.f32 %v4726_v10, 0.0  ;;  %v4348_v57 = vadd.f32 %v4338_v30, %v12114_v51 }
 0x814   :  { %v4739_v23 = vpack.c.bf16 %v4734_v42, %v4733_v17  ;;  %v4598_v22 = vadd.f32 %v4588_v11, %v4348_v57 }
 0x816   :  { %v4715_v4 = vadd.f32 %v4704_v49, %v4598_v22 }
 0x817   :  { %v4339_v6 = vpop.f32.mrf.mxu0 }
 0x818   :  { %v4340_v60 = vadd.f32 %v4339_v6, %v12112_v0  ;;  %v4727_v51 = vadd.f32 %v12122_v21, %v4715_v4 }
 0x81a   :  { %v4349_v61 = vadd.f32 %v4340_v60, %v3992_v29  ;;  %v4735_v55 = vmax.f32 %v4727_v51, 0.0 }
 0x81c   :  { %v4599_v47 = vadd.f32 %v4590_v34, %v4349_v61 }
 0x81e   :  { %v4716_v20 = vadd.f32 %v4706_v1, %v4599_v47 }
 0x820   :  { %v4728_v43 = vadd.f32 %v12122_v21, %v4716_v20 }
 0x822   :  { %v4736_v63 = vmax.f32 %v4728_v43, 0.0 }
 0x824   :  { %v4740_v19 = vpack.c.bf16 %v4736_v63, %v4735_v55 }
 0x826   :  { %v4767_v12 = vsel %vm3112_vm4, %v4740_v19, 0 }
 0x827   :  { %9721 = dma.done.wait [#allocation8 + $0x1], 20480 }
 0x828   :  { %9722 = vsyncadd [#allocation8 + $0x1], 4294946816  ;;  %4773 = vmatpush.bf16.msra.mxu0 %v4767_v12  ;;  %v9138_v28 = vld [vmem:[%s12388_s8] sm:$0xff]  ;;  %vm4758_vm11 = vcmask 474112   ;;  %v9139_v0 = vld [vmem:[%s12388_s8 + $0x8] sm:$0xff]  ;;  %vm6192_vm13 = vcmask 1042432  }
 0x829   :  { %v8045_v21 = vld [vmem:[#allocation6 + $0x170] sm:$0xf]  ;;  %v9187_v35 = vld [vmem:[#allocation6 + $0x174] sm:$0xf0]  ;;  %v9186_v14 = vld [vmem:[#allocation6 + $0x174] sm:$0xf] }
 0x82a   :  { %v8046_v48 = vor.u32 %v9187_v35, %v8045_v21  ;;  %v8047_v45 = vld [vmem:[#allocation6 + $0x178] sm:$0xf0]  ;;  %v8109_v18 = vld [vmem:[#allocation6 + $0x1f0] sm:$0xf]  ;;  %v9203_v52 = vld [vmem:[#allocation6 + $0x1f4] sm:$0xf0] }
 0x82b   :  { %v8050_v16 = vor.u32 %v9186_v14, %v8047_v45  ;;  %v9202_v32 = vld [vmem:[#allocation6 + $0x1f4] sm:$0xf]  ;;  %v8110_v5 = vor.u32 %v9203_v52, %v8109_v18  ;;  %v8037_v53 = vld [vmem:[#allocation6 + $0x160] sm:$0xf]  ;;  %v9185_v15 = vld [vmem:[#allocation6 + $0x164] sm:$0xf0] }
 0x82c   :  { %4774 = vmatpush.bf16.msra.mxu0 %v4739_v23  ;;  %5086 = vmatpush.bf16.msra.mxu1 %v8046_v48  ;;  %v8038_v59 = vor.u32 %v9185_v15, %v8037_v53  ;;  %v9184_v46 = vld [vmem:[#allocation6 + $0x164] sm:$0xf]  ;;  %v8039_v56 = vld [vmem:[#allocation6 + $0x168] sm:$0xf0]  ;;  %v8101_v40 = vld [vmem:[#allocation6 + $0x1e0] sm:$0xf] }
 0x82d   :  { %5122 = vmatpush.bf16.msrb.mxu3 %v8050_v16  ;;  %5104 = vmatpush.bf16.msrb.mxu2 %v8110_v5  ;;  %v8042_v24 = vor.u32 %v9184_v46, %v8039_v56  ;;  %v9200_v37 = vld [vmem:[#allocation6 + $0x1e4] sm:$0xf]  ;;  %v8103_v38 = vld [vmem:[#allocation6 + $0x1e8] sm:$0xf0]  ;;  %v8029_v33 = vld [vmem:[#allocation6 + $0x150] sm:$0xf] }
 0x82e   :  { %v9183_v8 = vld [vmem:[#allocation6 + $0x154] sm:$0xf0]  ;;  %v8106_v39 = vor.u32 %v9200_v37, %v8103_v38  ;;  %v9182_v26 = vld [vmem:[#allocation6 + $0x154] sm:$0xf]  ;;  %v8031_v7 = vld [vmem:[#allocation6 + $0x158] sm:$0xf0] }
 0x82f   :  { %v8030_v13 = vor.u32 %v9183_v8, %v8029_v33  ;;  %v8093_v31 = vld [vmem:[#allocation6 + $0x1d0] sm:$0xf]  ;;  %v8034_v44 = vor.u32 %v9182_v26, %v8031_v7  ;;  %v9199_v27 = vld [vmem:[#allocation6 + $0x1d4] sm:$0xf0]  ;;  %v9198_v62 = vld [vmem:[#allocation6 + $0x1d4] sm:$0xf] }
 0x830   :  { %4775 = vmatpush.bf16.msra.mxu0 %v4738_v3  ;;  %5087 = vmatpush.bf16.msra.mxu1 %v8038_v59  ;;  %v9201_v3 = vld [vmem:[#allocation6 + $0x1e4] sm:$0xf0]  ;;  %v8095_v54 = vld [vmem:[#allocation6 + $0x1d8] sm:$0xf0]  ;;  %v8094_v2 = vor.u32 %v9199_v27, %v8093_v31  ;;  %v8021_v30 = vld [vmem:[#allocation6 + $0x140] sm:$0xf] }
 0x831   :  { %5123 = vmatpush.bf16.msrb.mxu3 %v8042_v24  ;;  %v8102_v25 = vor.u32 %v9201_v3, %v8101_v40  ;;  %v8098_v10 = vor.u32 %v9198_v62, %v8095_v54  ;;  %v9181_v17 = vld [vmem:[#allocation6 + $0x144] sm:$0xf0]  ;;  %v9180_v42 = vld [vmem:[#allocation6 + $0x144] sm:$0xf]  ;;  %v8023_v49 = vld [vmem:[#allocation6 + $0x148] sm:$0xf0] }
 0x832   :  { %v8022_v57 = vor.u32 %v9181_v17, %v8021_v30  ;;  %v8026_v36 = vor.u32 %v9180_v42, %v8023_v49  ;;  %v8085_v11 = vld [vmem:[#allocation6 + $0x1c0] sm:$0xf]  ;;  %v9197_v23 = vld [vmem:[#allocation6 + $0x1c4] sm:$0xf0]  ;;  %v9196_v22 = vld [vmem:[#allocation6 + $0x1c4] sm:$0xf] }
 0x833   :  { %5105 = vmatpush.bf16.msrb.mxu2 %v8102_v25  ;;  %v8086_v50 = vor.u32 %v9197_v23, %v8085_v11  ;;  %v8087_v6 = vld [vmem:[#allocation6 + $0x1c8] sm:$0xf0]  ;;  %v8013_v29 = vld [vmem:[#allocation6 + $0x130] sm:$0xf]  ;;  %v9179_v60 = vld [vmem:[#allocation6 + $0x134] sm:$0xf0] }
 0x834   :  { %4776 = vmatpush.bf16.msra.mxu0 %v12127_v41  ;;  %v8111_v41 = vld [vmem:[#allocation6 + $0x1f8] sm:$0xf0]  ;;  %5088 = vmatpush.bf16.msra.mxu1 %v8030_v13  ;;  %v8090_v58 = vor.u32 %v9196_v22, %v8087_v6  ;;  %v8014_v34 = vor.u32 %v9179_v60, %v8013_v29  ;;  %v9178_v4 = vld [vmem:[#allocation6 + $0x134] sm:$0xf]  ;;  %v8077_v1 = vld [vmem:[#allocation6 + $0x1b0] sm:$0xf] }
 0x835   :  { %v8114_v9 = vor.u32 %v9202_v32, %v8111_v41  ;;  %5124 = vmatpush.bf16.msrb.mxu3 %v8034_v44  ;;  %v8015_v61 = vld [vmem:[#allocation6 + $0x138] sm:$0xf0]  ;;  %v9195_v51 = vld [vmem:[#allocation6 + $0x1b4] sm:$0xf0]  ;;  %v9194_v20 = vld [vmem:[#allocation6 + $0x1b4] sm:$0xf] }
 0x836   :  { %v8018_v47 = vor.u32 %v9178_v4, %v8015_v61  ;;  %v8078_v43 = vor.u32 %v9195_v51, %v8077_v1  ;;  %v8079_v55 = vld [vmem:[#allocation6 + $0x1b8] sm:$0xf0]  ;;  %v8005_v63 = vld [vmem:[#allocation6 + $0x120] sm:$0xf]  ;;  %v9177_v19 = vld [vmem:[#allocation6 + $0x124] sm:$0xf0] }
 0x837   :  { %7985 = vmatmul.msk.bf16.vlgmr.msra.gmra.mxu0 %vm4758_vm11, %v9138_v28  ;;  %5106 = vmatpush.bf16.msrb.mxu2 %v8094_v2  ;;  %v8082_v12 = vor.u32 %v9194_v20, %v8079_v55  ;;  %v8006_v28 = vor.u32 %v9177_v19, %v8005_v63  ;;  %v8007_v21 = vld [vmem:[#allocation6 + $0x128] sm:$0xf0]  ;;  %v8069_v35 = vld [vmem:[#allocation6 + $0x1a0] sm:$0xf]  ;;  %v9193_v48 = vld [vmem:[#allocation6 + $0x1a4] sm:$0xf0] }
 0x838   :  { %5140 = vmatpush.bf16.msrb.mxu0 %v8114_v9  ;;  %5089 = vmatpush.bf16.msra.mxu1 %v8022_v57  ;;  %v9192_v45 = vld [vmem:[#allocation6 + $0x1a4] sm:$0xf]  ;;  %v8071_v16 = vld [vmem:[#allocation6 + $0x1a8] sm:$0xf0]  ;;  %v8070_v18 = vor.u32 %v9193_v48, %v8069_v35  ;;  %v7997_v32 = vld [vmem:[#allocation6 + $0x110] sm:$0xf] }
 0x839   :  { %5125 = vmatpush.bf16.msrb.mxu3 %v8026_v36  ;;  %v8074_v52 = vor.u32 %v9192_v45, %v8071_v16  ;;  %v9175_v5 = vld [vmem:[#allocation6 + $0x114] sm:$0xf0]  ;;  %v9174_v41 = vld [vmem:[#allocation6 + $0x114] sm:$0xf]  ;;  %v7999_v9 = vld [vmem:[#allocation6 + $0x118] sm:$0xf0] }
 0x83a   :  { %v7998_v15 = vor.u32 %v9175_v5, %v7997_v32  ;;  %v8061_v59 = vld [vmem:[#allocation6 + $0x190] sm:$0xf]  ;;  %v9191_v46 = vld [vmem:[#allocation6 + $0x194] sm:$0xf0]  ;;  %v8002_v56 = vor.u32 %v9174_v41, %v7999_v9  ;;  %v9190_v24 = vld [vmem:[#allocation6 + $0x194] sm:$0xf] }
 0x83b   :  { %5107 = vmatpush.bf16.msrb.mxu2 %v8086_v50  ;;  %v8063_v40 = vld [vmem:[#allocation6 + $0x198] sm:$0xf0]  ;;  %v7989_v3 = vld [vmem:[#allocation6 + $0x100] sm:$0xf]  ;;  %v8062_v37 = vor.u32 %v9191_v46, %v8061_v59  ;;  %v9173_v25 = vld [vmem:[#allocation6 + $0x104] sm:$0xf0] }
 0x83c   :  { %5141 = vmatpush.bf16.msrb.mxu0 %v8106_v39  ;;  %5090 = vmatpush.bf16.msra.mxu1 %v8014_v34  ;;  %v9172_v38 = vld [vmem:[#allocation6 + $0x104] sm:$0xf]  ;;  %v7991_v33 = vld [vmem:[#allocation6 + $0x108] sm:$0xf0]  ;;  %v8066_v8 = vor.u32 %v9190_v24, %v8063_v40  ;;  %v7990_v39 = vor.u32 %v9173_v25, %v7989_v3  ;;  %v8053_v26 = vld [vmem:[#allocation6 + $0x180] sm:$0xf] }
 0x83d   :  { %5126 = vmatpush.bf16.msrb.mxu3 %v8018_v47  ;;  %v7994_v13 = vor.u32 %v9172_v38, %v7991_v33  ;;  %v9189_v7 = vld [vmem:[#allocation6 + $0x184] sm:$0xf0]  ;;  %v9188_v31 = vld [vmem:[#allocation6 + $0x184] sm:$0xf]  ;;  %v8055_v62 = vld [vmem:[#allocation6 + $0x188] sm:$0xf0] }
 0x83e   :  { %v8054_v27 = vor.u32 %v9189_v7, %v8053_v26  ;;  %v8173_v54 = vld [vmem:[#allocation6 + $0x70] sm:$0xf]  ;;  %v9155_v2 = vld [vmem:[#allocation6 + $0x74] sm:$0xf0]  ;;  %v8058_v30 = vor.u32 %v9188_v31, %v8055_v62  ;;  %v9154_v42 = vld [vmem:[#allocation6 + $0x74] sm:$0xf] }
 0x83f   :  { %5108 = vmatpush.bf16.msrb.mxu2 %v8078_v43  ;;  %v8174_v17 = vor.u32 %v9155_v2, %v8173_v54  ;;  %v8175_v57 = vld [vmem:[#allocation6 + $0x78] sm:$0xf0]  ;;  %v8237_v36 = vld [vmem:[#allocation6 + $0xf0] sm:$0xf]  ;;  %v9171_v11 = vld [vmem:[#allocation6 + $0xf4] sm:$0xf0] }
 0x840   :  { %5142 = vmatpush.bf16.msrb.mxu0 %v8098_v10  ;;  %5091 = vmatpush.bf16.msra.mxu1 %v8006_v28  ;;  %v8178_v49 = vor.u32 %v9154_v42, %v8175_v57  ;;  %v8238_v23 = vor.u32 %v9171_v11, %v8237_v36  ;;  %v9170_v22 = vld [vmem:[#allocation6 + $0xf4] sm:$0xf]  ;;  %v8239_v50 = vld [vmem:[#allocation6 + $0xf8] sm:$0xf0]  ;;  %v8165_v6 = vld [vmem:[#allocation6 + $0x60] sm:$0xf] }
 0x841   :  { %v8242_v29 = vor.u32 %v9170_v22, %v8239_v50  ;;  %v9153_v60 = vld [vmem:[#allocation6 + $0x64] sm:$0xf0]  ;;  %v8167_v34 = vld [vmem:[#allocation6 + $0x68] sm:$0xf0]  ;;  %v8229_v47 = vld [vmem:[#allocation6 + $0xe0] sm:$0xf] }
 0x842   :  { %v8166_v4 = vor.u32 %v9153_v60, %v8165_v6  ;;  %v9169_v1 = vld [vmem:[#allocation6 + $0xe4] sm:$0xf0]  ;;  %v9168_v51 = vld [vmem:[#allocation6 + $0xe4] sm:$0xf]  ;;  %v8231_v43 = vld [vmem:[#allocation6 + $0xe8] sm:$0xf0] }
 0x843   :  { %5109 = vmatpush.bf16.msrb.mxu2 %v8070_v18  ;;  %v8230_v20 = vor.u32 %v9169_v1, %v8229_v47  ;;  %v8157_v55 = vld [vmem:[#allocation6 + $0x50] sm:$0xf]  ;;  %v9151_v63 = vld [vmem:[#allocation6 + $0x54] sm:$0xf0]  ;;  %v9166_v45 = vld [vmem:[#allocation6 + $0xd4] sm:$0xf] }
 0x844   :  { %5143 = vmatpush.bf16.msrb.mxu0 %v8090_v58  ;;  %5092 = vmatpush.bf16.msra.mxu1 %v7998_v15  ;;  %v9152_v58 = vld [vmem:[#allocation6 + $0x64] sm:$0xf]  ;;  %v8158_v28 = vor.u32 %v9151_v63, %v8157_v55  ;;  %v8221_v35 = vld [vmem:[#allocation6 + $0xd0] sm:$0xf]  ;;  %v9167_v48 = vld [vmem:[#allocation6 + $0xd4] sm:$0xf0] }
 0x845   :  { %v8170_v61 = vor.u32 %v9152_v58, %v8167_v34  ;;  %v8223_v16 = vld [vmem:[#allocation6 + $0xd8] sm:$0xf0]  ;;  %v8222_v18 = vor.u32 %v9167_v48, %v8221_v35  ;;  %v8149_v32 = vld [vmem:[#allocation6 + $0x40] sm:$0xf]  ;;  %v9149_v5 = vld [vmem:[#allocation6 + $0x44] sm:$0xf0] }
 0x846   :  { %v9148_v41 = vld [vmem:[#allocation6 + $0x44] sm:$0xf]  ;;  %v8151_v15 = vld [vmem:[#allocation6 + $0x48] sm:$0xf0]  ;;  %v8213_v59 = vld [vmem:[#allocation6 + $0xc0] sm:$0xf] }
 0x847   :  { %7986 = vmatmul.msk.bf16.gmra.mxu0 %vm4758_vm11, %v9139_v0  ;;  %v9176_v0 = vld [vmem:[#allocation6 + $0x124] sm:$0xf]  ;;  %5110 = vmatpush.bf16.msrb.mxu2 %v8062_v37  ;;  %v8154_v9 = vor.u32 %v9148_v41, %v8151_v15  ;;  %v9165_v46 = vld [vmem:[#allocation6 + $0xc4] sm:$0xf0]  ;;  %v8215_v3 = vld [vmem:[#allocation6 + $0xc8] sm:$0xf0] }
 0x848   :  { %v8010_v14 = vor.u32 %v9176_v0, %v8007_v21  ;;  %5144 = vmatpush.bf16.msrb.mxu0 %v8082_v12  ;;  %5093 = vmatpush.bf16.msra.mxu1 %v7990_v39  ;;  %v8234_v12 = vor.u32 %v9168_v51, %v8231_v43  ;;  %v9150_v0 = vld [vmem:[#allocation6 + $0x54] sm:$0xf]  ;;  %v8159_v21 = vld [vmem:[#allocation6 + $0x58] sm:$0xf0]  ;;  %v8214_v40 = vor.u32 %v9165_v46, %v8213_v59  ;;  %v8141_v37 = vld [vmem:[#allocation6 + $0x30] sm:$0xf] }
 0x849   :  { %v9147_v25 = vld [vmem:[#allocation6 + $0x34] sm:$0xf0]  ;;  %v9146_v39 = vld [vmem:[#allocation6 + $0x34] sm:$0xf]  ;;  %v8205_v7 = vld [vmem:[#allocation6 + $0xb0] sm:$0xf] }
 0x84a   :  { %5127 = vmatpush.bf16.msrb.mxu3 %v8010_v14  ;;  %v8162_v14 = vor.u32 %v9150_v0, %v8159_v21  ;;  %v9163_v31 = vld [vmem:[#allocation6 + $0xb4] sm:$0xf0]  ;;  %v8207_v62 = vld [vmem:[#allocation6 + $0xb8] sm:$0xf0]  ;;  %v8133_v54 = vld [vmem:[#allocation6 + $0x20] sm:$0xf] }
 0x84b   :  { %5111 = vmatpush.bf16.msrb.mxu2 %v8054_v27  ;;  %v9162_v27 = vld [vmem:[#allocation6 + $0xb4] sm:$0xf]  ;;  %v9145_v57 = vld [vmem:[#allocation6 + $0x24] sm:$0xf0]  ;;  %v8135_v36 = vld [vmem:[#allocation6 + $0x28] sm:$0xf0] }
 0x84c   :  { %5145 = vmatpush.bf16.msrb.mxu0 %v8074_v52  ;;  %5318 = vmatpush.bf16.msrb.mxu1 %v8174_v17  ;;  %v8226_v52 = vor.u32 %v9166_v45, %v8223_v16  ;;  %v8210_v42 = vor.u32 %v9162_v27, %v8207_v62  ;;  %v8134_v11 = vor.u32 %v9145_v57, %v8133_v54  ;;  %v8197_v22 = vld [vmem:[#allocation6 + $0xa0] sm:$0xf]  ;;  %v9161_v50 = vld [vmem:[#allocation6 + $0xa4] sm:$0xf0]  ;;  %v9160_v6 = vld [vmem:[#allocation6 + $0xa4] sm:$0xf] }
 0x84d   :  { %v8199_v60 = vld [vmem:[#allocation6 + $0xa8] sm:$0xf0]  ;;  %v8125_v58 = vld [vmem:[#allocation6 + $0x10] sm:$0xf]  ;;  %v9143_v34 = vld [vmem:[#allocation6 + $0x14] sm:$0xf0] }
 0x84e   :  { %5128 = vmatpush.bf16.msrb.mxu3 %v8002_v56  ;;  %v9164_v56 = vld [vmem:[#allocation6 + $0xc4] sm:$0xf]  ;;  %v9142_v47 = vld [vmem:[#allocation6 + $0x14] sm:$0xf]  ;;  %v8127_v1 = vld [vmem:[#allocation6 + $0x18] sm:$0xf0] }
 0x84f   :  { %5336 = vmatpush.bf16.msra.mxu2 %v8238_v23  ;;  %v8218_v33 = vor.u32 %v9164_v56, %v8215_v3  ;;  %v8189_v51 = vld [vmem:[#allocation6 + $0x90] sm:$0xf]  ;;  %v9159_v43 = vld [vmem:[#allocation6 + $0x94] sm:$0xf0]  ;;  %v9158_v55 = vld [vmem:[#allocation6 + $0x94] sm:$0xf] }
 0x850   :  { %5146 = vmatpush.bf16.msrb.mxu0 %v8066_v8  ;;  %5319 = vmatpush.bf16.msrb.mxu1 %v8166_v4  ;;  %v8142_v8 = vor.u32 %v9147_v25, %v8141_v37  ;;  %v8202_v4 = vor.u32 %v9160_v6, %v8199_v60  ;;  %v8191_v63 = vld [vmem:[#allocation6 + $0x98] sm:$0xf0]  ;;  %v8190_v35 = vor.u32 %v9159_v43, %v8189_v51  ;;  %v8181_v25 = vld [vmem:[#allocation6 + $0x80] sm:$0xf]  ;;  %v8365_v57 = vld [vmem:[#allocation6 + $0x2f0] sm:$0xf] }
 0x851   :  { %v9216_v60 = vld [vmem:[#allocation6 + $0x264] sm:$0xf]  ;;  %v8285_v43 = vld [vmem:[#allocation6 + $0x250] sm:$0xf]  ;;  %vm5446_vm12 = vsmask.f32 5376 }
 0x852   :  { %5129 = vmatpush.bf16.msrb.mxu3 %v7994_v13  ;;  %v8143_v13 = vld [vmem:[#allocation6 + $0x38] sm:$0xf0]  ;;  %vm6188_vm14 = vcmask 179200  }
 0x853   :  { %5337 = vmatpush.bf16.msra.mxu2 %v8230_v20  ;;  %v8146_v26 = vor.u32 %v9146_v39, %v8143_v13  ;;  %v8130_v20 = vor.u32 %v9142_v47, %v8127_v1  ;;  %v9232_v47 = vld [vmem:[#allocation6 + $0x2e4] sm:$0xf]  ;;  %v8359_v1 = vld [vmem:[#allocation6 + $0x2e8] sm:$0xf0] }
 0x854   :  { %5147 = vmatpush.bf16.msrb.mxu0 %v8058_v30  ;;  %5320 = vmatpush.bf16.msrb.mxu1 %v8158_v28 }
 0x856   :  { %5354 = vmatpush.bf16.msra.mxu3 %v8178_v49  ;;  %v9144_v49 = vld [vmem:[#allocation6 + $0x24] sm:$0xf] }
 0x857   :  { %5338 = vmatpush.bf16.msra.mxu2 %v8222_v18  ;;  %v8138_v23 = vor.u32 %v9144_v49, %v8135_v36  ;;  %v9235_v49 = vld [vmem:[#allocation6 + $0x2f4] sm:$0xf0]  ;;  %v9234_v36 = vld [vmem:[#allocation6 + $0x2f4] sm:$0xf] }
 0x858   :  { %5372 = vmatpush.bf16.msra.mxu0 %v8242_v29  ;;  %v8198_v29 = vor.u32 %v9161_v50, %v8197_v22  ;;  %v8293_v22 = vld [vmem:[#allocation6 + $0x260] sm:$0xf]  ;;  %v9217_v50 = vld [vmem:[#allocation6 + $0x264] sm:$0xf0] }
 0x85a   :  { %5355 = vmatpush.bf16.msra.mxu3 %v8170_v61  ;;  %v8126_v61 = vor.u32 %v9143_v34, %v8125_v58  ;;  %v8295_v58 = vld [vmem:[#allocation6 + $0x268] sm:$0xf0]  ;;  %v8357_v34 = vld [vmem:[#allocation6 + $0x2e0] sm:$0xf] }
 0x85b   :  { %5339 = vmatpush.bf16.msra.mxu2 %v8214_v40 }
 0x85c   :  { %5373 = vmatpush.bf16.msra.mxu0 %v8234_v12 }
 0x85e   :  { %5356 = vmatpush.bf16.msra.mxu3 %v8162_v14  ;;  %v8194_v14 = vor.u32 %v9158_v55, %v8191_v63  ;;  %v9215_v55 = vld [vmem:[#allocation6 + $0x254] sm:$0xf0]  ;;  %v9214_v63 = vld [vmem:[#allocation6 + $0x254] sm:$0xf] }
 0x860   :  { %5374 = vmatpush.bf16.msra.mxu0 %v8226_v52  ;;  %v8117_v52 = vld [vmem:[#allocation6] sm:$0xf] }
 0x862   :  { %5357 = vmatpush.bf16.msra.mxu3 %v8154_v9 }
 0x864   :  { %5375 = vmatpush.bf16.msra.mxu0 %v8218_v33  ;;  %v9156_v33 = vld [vmem:[#allocation6 + $0x84] sm:$0xf] }
 0x866   :  { %5358 = vmatpush.bf16.msra.mxu3 %v8146_v26 }
 0x868   :  { %5376 = vmatpush.bf16.msra.mxu0 %v8210_v42 }
 0x86a   :  { %5359 = vmatpush.bf16.msra.mxu3 %v8138_v23  ;;  %v8367_v23 = vld [vmem:[#allocation6 + $0x2f8] sm:$0xf0] }
 0x86b   :  { %v8370_v6 = vor.u32 %v9234_v36, %v8367_v23  ;;  %v8263_v23 = vld [vmem:[#allocation6 + $0x228] sm:$0xf0] }
 0x86c   :  { %5377 = vmatpush.bf16.msra.mxu0 %v8202_v4  ;;  %v8298_v4 = vor.u32 %v9216_v60, %v8295_v58  ;;  %v8253_v58 = vld [vmem:[#allocation6 + $0x210] sm:$0xf] }
 0x86e   :  { %5360 = vmatpush.bf16.msra.mxu3 %v8130_v20  ;;  %v8362_v20 = vor.u32 %v9232_v47, %v8359_v1  ;;  %v8255_v1 = vld [vmem:[#allocation6 + $0x218] sm:$0xf0] }
 0x870   :  { %5378 = vmatpush.bf16.msra.mxu0 %v8194_v14  ;;  %v8351_v14 = vld [vmem:[#allocation6 + $0x2d8] sm:$0xf0] }
 0x8b4   :  { %v4778_v53 = vpop.f32.mrf.mxu0 }
 0x8bc   :  { %v4780_v44 = vpop.f32.mrf.mxu0 }
 0x8bd   :  { %v12155_v10 = vpack.c.bf16 %v4780_v44, %v4778_v53  ;;  %v8150_v53 = vor.u32 %v9149_v5, %v8149_v32  ;;  %v8206_v44 = vor.u32 %v9163_v31, %v8205_v7  ;;  %v9141_v32 = vld [vmem:[#allocation6 + $0x4] sm:$0xf0]  ;;  %v9140_v5 = vld [vmem:[#allocation6 + $0x4] sm:$0xf]  ;;  %v8301_v31 = vld [vmem:[#allocation6 + $0x270] sm:$0xf] }
 0x8be   :  { %v8118_v41 = vor.u32 %v9141_v32, %v8117_v52  ;;  %v9213_v52 = vld [vmem:[#allocation6 + $0x244] sm:$0xf0]  ;;  %v9212_v32 = vld [vmem:[#allocation6 + $0x244] sm:$0xf] }
 0x8bf   :  { %9524 = vst [vmem:[#allocation4] sm:$0xff] %v12155_v10   ;;  %5321 = vmatpush.bf16.msrb.mxu1 %v8150_v53  ;;  %5340 = vmatpush.bf16.msra.mxu2 %v8206_v44  ;;  %v8119_v53 = vld [vmem:[#allocation6 + $0x8] sm:$0xf0]  ;;  %v9219_v44 = vld [vmem:[#allocation6 + $0x274] sm:$0xf0] }
 0x8c0   :  { %v8122_v46 = vor.u32 %v9140_v5, %v8119_v53  ;;  %v8302_v54 = vor.u32 %v9219_v44, %v8301_v31  ;;  %v8279_v5 = vld [vmem:[#allocation6 + $0x248] sm:$0xf0]  ;;  %v8271_v31 = vld [vmem:[#allocation6 + $0x238] sm:$0xf0] }
 0x8c2   :  { %5361 = vmatpush.bf16.msra.mxu3 %v8122_v46  ;;  %v4816_v46 = vshll.u32 %v12155_v10, 16 }
 0x8c3   :  { %5322 = vmatpush.bf16.msrb.mxu1 %v8142_v8  ;;  %5341 = vmatpush.bf16.msra.mxu2 %v8198_v29  ;;  %v8183_v8 = vld [vmem:[#allocation6 + $0x88] sm:$0xf0]  ;;  %v8294_v29 = vor.u32 %v9217_v50, %v8293_v22  ;;  %v8325_v22 = vld [vmem:[#allocation6 + $0x2a0] sm:$0xf] }
 0x8c4   :  { %v4783_v19 = vpop.f32.mrf.mxu0  ;;  %v8186_v62 = vor.u32 %v9156_v33, %v8183_v8  ;;  %v8269_v33 = vld [vmem:[#allocation6 + $0x230] sm:$0xf]  ;;  %v9211_v8 = vld [vmem:[#allocation6 + $0x234] sm:$0xf0] }
 0x8c6   :  { %v9625_v2 = vld [vmem:[#allocation4] sm:$0xf0]  ;;  %v9626_v30 = vld [vmem:[#allocation4] sm:$0xe]  ;;  %5379 = vmatpush.bf16.msra.mxu0 %v8186_v62 }
 0x8c7   :  { %v4863_v17 = vld [vmem:[#allocation4] sm:$0xc]  ;;  %5323 = vmatpush.bf16.msrb.mxu1 %v8134_v11  ;;  %v9627_v12 = vor.u32 %v9626_v30, %v9625_v2  ;;  %5342 = vmatpush.bf16.msra.mxu2 %v8190_v35  ;;  %v9218_v2 = vld [vmem:[#allocation6 + $0x274] sm:$0xf]  ;;  %v8303_v30 = vld [vmem:[#allocation6 + $0x278] sm:$0xf0]  ;;  %v8366_v11 = vor.u32 %v9235_v49, %v8365_v57 }
 0x8c8   :  { %v4874_v21 = vunpack.c.l.b16 %v4863_v17  ;;  %v8306_v17 = vor.u32 %v9218_v2, %v8303_v30  ;;  %v9230_v35 = vld [vmem:[#allocation6 + $0x2d4] sm:$0xf]  ;;  %v8333_v62 = vld [vmem:[#allocation6 + $0x2b0] sm:$0xf]  ;;  %v9209_v57 = vld [vmem:[#allocation6 + $0x224] sm:$0xf0] }
 0x8c9   :  { %v5391_v2 = vld [vmem:[#allocation4] sm:$0x8] }
 0x8cb   :  { %5324 = vmatpush.bf16.msrb.mxu1 %v8126_v61  ;;  %v9233_v61 = vld [vmem:[#allocation6 + $0x2e4] sm:$0xf0] }
 0x8cc   :  { %v4785_v24 = vpop.f32.mrf.mxu0  ;;  %v8358_v51 = vor.u32 %v9233_v61, %v8357_v34  ;;  %v9207_v34 = vld [vmem:[#allocation6 + $0x214] sm:$0xf0] }
 0x8cd   :  { %v9528_v38 = vpack.c.bf16 %v4785_v24, %v4783_v19  ;;  %v4916_v24 = vrot.slane %v9627_v12, 1  ;;  %v8287_v12 = vld [vmem:[#allocation6 + $0x258] sm:$0xf0] }
 0x8cf   :  { %9624 = vst [vmem:[#allocation4 + $0x8] sm:$0xff] %v9528_v38   ;;  %5325 = vmatpush.bf16.msrb.mxu1 %v8118_v41  ;;  %v9157_v38 = vld [vmem:[#allocation6 + $0x84] sm:$0xf0]  ;;  %v8354_v41 = vor.u32 %v9230_v35, %v8351_v14 }
 0x8d0   :  { %v8182_v7 = vor.u32 %v9157_v38, %v8181_v25  ;;  %v8343_v38 = vld [vmem:[#allocation6 + $0x2c8] sm:$0xf0] }
 0x8d2   :  { %5343 = vmatpush.bf16.msra.mxu2 %v8182_v7  ;;  %v9210_v7 = vld [vmem:[#allocation6 + $0x234] sm:$0xf] }
 0x8d6   :  { %v4799_v19 = vld [vmem:[#allocation4 + $0x4] sm:$0xff]   ;;  %v4866_v0 = vld [vmem:[#allocation4 + $0xc] sm:$0x1] }
 0x8d7   :  { %v4865_v28 = vld [vmem:[#allocation4 + $0x8] sm:$0xf]  ;;  %v4811_v48 = vunpack.c.h.b16 %v4799_v19  ;;  %v12158_v45 = vunpack.c.l.b16 %v4799_v19  ;;  %v4877_v18 = vunpack.c.l.b16 %v4866_v0  ;;  %v8286_v19 = vor.u32 %v9215_v55, %v8285_v43  ;;  %v5390_v44 = vld [vmem:[#allocation4 + $0xc] sm:$0x3] }
 0x8d8   :  { %v12160_v16 = vunpack.c.l.b16 %v4865_v28  ;;  %v8349_v28 = vld [vmem:[#allocation6 + $0x2d0] sm:$0xf]  ;;  %v9231_v0 = vld [vmem:[#allocation6 + $0x2d4] sm:$0xf0]  ;;  %v5393_v60 = vunpack.c.l.b16 %v5390_v44  ;;  %v8254_v55 = vor.u32 %v9207_v34, %v8253_v58  ;;  %v9265_v58 = vld [vmem:[#allocation6 + $0x3e4] sm:$0xf0] }
 0x8d9   :  { %v12162_v15 = vpack.c.b16 %v4811_v48, %v4811_v48  ;;  %v12165_v9 = vpack.c.b16 %v12158_v45, %v4874_v21  ;;  %v8290_v21 = vor.u32 %v9214_v63, %v8287_v12  ;;  %v8277_v48 = vld [vmem:[#allocation6 + $0x240] sm:$0xf]  ;;  %v9223_v12 = vld [vmem:[#allocation6 + $0x294] sm:$0xf0]  ;;  %v9264_v34 = vld [vmem:[#allocation6 + $0x3e4] sm:$0xf] }
 0x8da   :  { %v4879_v59 = vpack.c.b16 %v4877_v18, %v12160_v16  ;;  %v12170_v56 = vpack.c.b16 %v12160_v16, %v12158_v45  ;;  %v8350_v18 = vor.u32 %v9231_v0, %v8349_v28  ;;  %v8278_v53 = vor.u32 %v9213_v52, %v8277_v48  ;;  %v9222_v28 = vld [vmem:[#allocation6 + $0x294] sm:$0xf]  ;;  %v8319_v0 = vld [vmem:[#allocation6 + $0x298] sm:$0xf0]  ;;  %v9205_v48 = vld [vmem:[#allocation6 + $0x204] sm:$0xf0] }
 0x8db   :  { %v12173_v40 = vrot.slane %v12162_v15, 1  ;;  %v4880_v3 = vrot.slane %v12165_v9, 1  ;;  %v4821_v43 = vshll.u32 %v12162_v15, 16  ;;  %v12190_v35 = vpack.c.b16 %v5393_v60, %v12160_v16  ;;  %v8247_v52 = vld [vmem:[#allocation6 + $0x208] sm:$0xf0] }
 0x8dc   :  { %v4881_v37 = vrot.slane %v4879_v59, 1  ;;  %v8282_v59 = vor.u32 %v9212_v32, %v8279_v5  ;;  %v4814_v32 = vshrl.u32 %v12155_v10, 16 }
 0x8dd   :  { %v4918_v39 = vsel %vm1442_vm2, %v4916_v24, %v12173_v40  ;;  %v8341_v24 = vld [vmem:[#allocation6 + $0x2c0] sm:$0xf]  ;;  %v12196_v5 = vrot.slane %v4821_v43, 1 }
 0x8de   :  { %v4882_v13 = vsel %vm1442_vm2, %v4880_v3, %v4881_v37  ;;  %v12179_v26 = vrot.slane %v4881_v37, 1  ;;  %5094 = vmatmul.bf16.vlgmr.msra.gmra.mxu1 %v4918_v39  ;;  %5130 = vmatmul.bf16.vlgmr.msrb.gmra.mxu3 %v4918_v39  ;;  %v9229_v3 = vld [vmem:[#allocation6 + $0x2c4] sm:$0xf0]  ;;  %v9228_v37 = vld [vmem:[#allocation6 + $0x2c4] sm:$0xf] }
 0x8df   :  { %v4919_v27 = vrot.slane %v4882_v13, 1  ;;  %5640 = vmatpush.bf16.msra.mxu1 %v8302_v54  ;;  %5676 = vmatpush.bf16.msrb.mxu3 %v8306_v17  ;;  %v8342_v25 = vor.u32 %v9229_v3, %v8341_v24  ;;  %v8346_v39 = vor.u32 %v9228_v37, %v8343_v38  ;;  %v8270_v13 = vor.u32 %v9211_v8, %v8269_v33  ;;  %v9226_v54 = vld [vmem:[#allocation6 + $0x2b4] sm:$0xf]  ;;  %v8335_v17 = vld [vmem:[#allocation6 + $0x2b8] sm:$0xf0] }
 0x8e0   :  { %v8338_v49 = vor.u32 %v9226_v54, %v8335_v17  ;;  %v5406_v24 = vshll.u32 %v12190_v35, 16  ;;  %v9221_v38 = vld [vmem:[#allocation6 + $0x284] sm:$0xf0]  ;;  %v9220_v33 = vld [vmem:[#allocation6 + $0x284] sm:$0xf] }
 0x8e1   :  { %v4921_v42 = vsel %vm1442_vm2, %v4919_v27, %v12179_v26  ;;  %v8274_v27 = vor.u32 %v9210_v7, %v8271_v31  ;;  %v8429_v7 = vld [vmem:[#allocation6 + $0x370] sm:$0xf]  ;;  %v9251_v31 = vld [vmem:[#allocation6 + $0x374] sm:$0xf0] }
 0x8e2   :  { %5112 = vmatmul.bf16.vlgmr.msrb.gmra.mxu2 %v4921_v42  ;;  %5148 = vmatmul.bf16.vlgmr.msrb.gmra.mxu0 %v4921_v42  ;;  %v8261_v42 = vld [vmem:[#allocation6 + $0x220] sm:$0xf]  ;;  %v9267_v17 = vld [vmem:[#allocation6 + $0x3f4] sm:$0xf0] }
 0x8e3   :  { %5658 = vmatpush.bf16.msrb.mxu2 %v8366_v11  ;;  %5694 = vmatpush.bf16.msrb.mxu0 %v8370_v6  ;;  %v8262_v36 = vor.u32 %v9209_v57, %v8261_v42  ;;  %v9208_v11 = vld [vmem:[#allocation6 + $0x224] sm:$0xf]  ;;  %v9266_v42 = vld [vmem:[#allocation6 + $0x3f4] sm:$0xf]  ;;  %v4798_v57 = vld [vmem:[#allocation4 + $0x8] sm:$0x7] }
 0x8e4   :  { %5641 = vmatpush.bf16.msra.mxu1 %v8294_v29  ;;  %5677 = vmatpush.bf16.msrb.mxu3 %v8298_v4  ;;  %v8266_v50 = vor.u32 %v9208_v11, %v8263_v23  ;;  %v9224_v6 = vld [vmem:[#allocation6 + $0x2a4] sm:$0xf]  ;;  %v8327_v29 = vld [vmem:[#allocation6 + $0x2a8] sm:$0xf0]  ;;  %v9206_v4 = vld [vmem:[#allocation6 + $0x214] sm:$0xf] }
 0x8e5   :  { %v8330_v47 = vor.u32 %v9224_v6, %v8327_v29  ;;  %v8258_v63 = vor.u32 %v9206_v4, %v8255_v1  ;;  %v8421_v11 = vld [vmem:[#allocation6 + $0x360] sm:$0xf]  ;;  %v9249_v23 = vld [vmem:[#allocation6 + $0x364] sm:$0xf0]  ;;  %v8423_v6 = vld [vmem:[#allocation6 + $0x368] sm:$0xf0] }
 0x8e6   :  { %v8485_v29 = vld [vmem:[#allocation6 + $0x3e0] sm:$0xf]  ;;  %v8487_v4 = vld [vmem:[#allocation6 + $0x3e8] sm:$0xf0]  ;;  %v8413_v1 = vld [vmem:[#allocation6 + $0x350] sm:$0xf] }
 0x8e7   :  { %5659 = vmatpush.bf16.msrb.mxu2 %v8358_v51  ;;  %5695 = vmatpush.bf16.msrb.mxu0 %v8362_v20  ;;  %v5396_v51 = vunpack.c.l.b16 %v5391_v2  ;;  %v4818_v20 = vrot.slane %v4816_v46, 1 }
 0x8e8   :  { %5642 = vmatpush.bf16.msra.mxu1 %v8286_v19  ;;  %5678 = vmatpush.bf16.msrb.mxu3 %v8290_v21  ;;  %v8317_v19 = vld [vmem:[#allocation6 + $0x290] sm:$0xf]  ;;  %v8245_v21 = vld [vmem:[#allocation6 + $0x200] sm:$0xf] }
 0x8e9   :  { %v12193_v14 = vpack.c.b16 %v12158_v45, %v5396_v51  ;;  %v4819_v3 = vor.u32 %v4818_v20, %v4814_v32  ;;  %v9247_v51 = vld [vmem:[#allocation6 + $0x354] sm:$0xf0]  ;;  %v9246_v20 = vld [vmem:[#allocation6 + $0x354] sm:$0xf] }
 0x8eb   :  { %5660 = vmatpush.bf16.msrb.mxu2 %v8350_v18  ;;  %5696 = vmatpush.bf16.msrb.mxu0 %v8354_v41  ;;  %v9204_v18 = vld [vmem:[#allocation6 + $0x204] sm:$0xf]  ;;  %v8318_v41 = vor.u32 %v9223_v12, %v8317_v19  ;;  %v5401_v45 = vshll.u32 %v12193_v14, 16  ;;  %v5399_v37 = vshrl.u32 %v12193_v14, 16  ;;  %v4824_v8 = vsel %vm1244_vm3, %v4819_v3, %v12196_v5  ;;  %v8477_v19 = vld [vmem:[#allocation6 + $0x3d0] sm:$0xf] }
 0x8ec   :  { %5643 = vmatpush.bf16.msra.mxu1 %v8278_v53  ;;  %5679 = vmatpush.bf16.msrb.mxu3 %v8282_v59  ;;  %v8322_v53 = vor.u32 %v9222_v28, %v8319_v0  ;;  %v8246_v59 = vor.u32 %v9205_v48, %v8245_v21  ;;  %v8250_v46 = vor.u32 %v9204_v18, %v8247_v52  ;;  %v9263_v12 = vld [vmem:[#allocation6 + $0x3d4] sm:$0xf0]  ;;  %v4805_v28 = vunpack.c.l.b16 %v4798_v57  ;;  %v9262_v21 = vld [vmem:[#allocation6 + $0x3d4] sm:$0xf]  ;;  %v8479_v14 = vld [vmem:[#allocation6 + $0x3d8] sm:$0xf0] }
 0x8ed   :  { %v5403_v54 = vrot.slane %v5401_v45, 1  ;;  %v5410_v0 = vshrl.u32 %v12190_v35, 16  ;;  %v5448_v48 = vshrl.u32 %v12165_v9, 16  ;;  %v5451_v18 = vshll.u32 %v12165_v9, 16  ;;  %v9244_v45 = vld [vmem:[#allocation6 + $0x344] sm:$0xf] }
 0x8ee   :  { %5099 = vmatmul.bf16.gmra.mxu1 %v12173_v40  ;;  %5135 = vmatmul.bf16.gmra.mxu3 %v12173_v40  ;;  %v9227_v40 = vld [vmem:[#allocation6 + $0x2b4] sm:$0xf0]  ;;  %v8478_v32 = vor.u32 %v9263_v12, %v8477_v19  ;;  %v8407_v3 = vld [vmem:[#allocation6 + $0x348] sm:$0xf0]  ;;  %v4825_v9 = vshrl.u32 %v12162_v15, 16 }
 0x8ef   :  { %5661 = vmatpush.bf16.msrb.mxu2 %v8342_v25  ;;  %5697 = vmatpush.bf16.msrb.mxu0 %v8346_v39  ;;  %v8334_v30 = vor.u32 %v9227_v40, %v8333_v62  ;;  %v8309_v25 = vld [vmem:[#allocation6 + $0x280] sm:$0xf]  ;;  %v9250_v62 = vld [vmem:[#allocation6 + $0x374] sm:$0xf]  ;;  %v8431_v40 = vld [vmem:[#allocation6 + $0x378] sm:$0xf0]  ;;  %v5404_v43 = vor.u32 %v5403_v54, %v5399_v37 }
 0x8f0   :  { %5644 = vmatpush.bf16.msra.mxu1 %v8270_v13  ;;  %5680 = vmatpush.bf16.msrb.mxu3 %v8274_v27  ;;  %v8310_v39 = vor.u32 %v9221_v38, %v8309_v25  ;;  %v8311_v13 = vld [vmem:[#allocation6 + $0x288] sm:$0xf0]  ;;  %v8430_v27 = vor.u32 %v9251_v31, %v8429_v7  ;;  %v8434_v2 = vor.u32 %v9250_v62, %v8431_v40  ;;  %v12224_v7 = vrot.slane %v5406_v24, 3  ;;  %v8469_v15 = vld [vmem:[#allocation6 + $0x3c0] sm:$0xf] }
 0x8f1   :  { %v8314_v44 = vor.u32 %v9220_v33, %v8311_v13  ;;  %v4807_v25 = vpack.c.b16 %v4805_v28, %v4805_v28  ;;  %v12216_v33 = vrot.slane %v5448_v48, 2  ;;  %v12220_v13 = vrot.slane %v5410_v0, 2  ;;  %v9260_v62 = vld [vmem:[#allocation6 + $0x3c4] sm:$0xf]  ;;  %v9242_v57 = vld [vmem:[#allocation6 + $0x334] sm:$0xf] }
 0x8f2   :  { %5117 = vmatmul.bf16.gmra.mxu2 %v12179_v26  ;;  %5153 = vmatmul.bf16.gmra.mxu0 %v12179_v26  ;;  %v9225_v26 = vld [vmem:[#allocation6 + $0x2a4] sm:$0xf0]  ;;  %v4827_v40 = vor.u32 %v4825_v9, %v12196_v5  ;;  %v9258_v5 = vld [vmem:[#allocation6 + $0x3b4] sm:$0xf] }
 0x8f3   :  { %5662 = vmatpush.bf16.msrb.mxu2 %v8334_v30  ;;  %5698 = vmatpush.bf16.msrb.mxu0 %v8338_v49  ;;  %v8326_v61 = vor.u32 %v9225_v26, %v8325_v22  ;;  %v8493_v30 = vld [vmem:[#allocation6 + $0x3f0] sm:$0xf]  ;;  %v9248_v26 = vld [vmem:[#allocation6 + $0x364] sm:$0xf] }
 0x8f4   :  { %5645 = vmatpush.bf16.msra.mxu1 %v8262_v36  ;;  %5681 = vmatpush.bf16.msrb.mxu3 %v8266_v50  ;;  %v8494_v49 = vor.u32 %v9267_v17, %v8493_v30  ;;  %v8495_v36 = vld [vmem:[#allocation6 + $0x3f8] sm:$0xf0]  ;;  %v8422_v50 = vor.u32 %v9249_v23, %v8421_v11  ;;  %v8426_v60 = vor.u32 %v9248_v26, %v8423_v6  ;;  %v9243_v30 = vld [vmem:[#allocation6 + $0x334] sm:$0xf0]  ;;  %v8461_v11 = vld [vmem:[#allocation6 + $0x3b0] sm:$0xf] }
 0x8f5   :  { %v8498_v22 = vor.u32 %v9266_v42, %v8495_v36  ;;  %v9259_v23 = vld [vmem:[#allocation6 + $0x3b4] sm:$0xf0]  ;;  %v8389_v26 = vld [vmem:[#allocation6 + $0x320] sm:$0xf]  ;;  %v9241_v6 = vld [vmem:[#allocation6 + $0x324] sm:$0xf0] }
 0x8f7   :  { %5663 = vmatpush.bf16.msrb.mxu2 %v8326_v61  ;;  %5699 = vmatpush.bf16.msrb.mxu0 %v8330_v47  ;;  %v8486_v61 = vor.u32 %v9265_v58, %v8485_v29  ;;  %v8490_v47 = vor.u32 %v9264_v34, %v8487_v4  ;;  %v9240_v58 = vld [vmem:[#allocation6 + $0x324] sm:$0xf]  ;;  %v8391_v34 = vld [vmem:[#allocation6 + $0x328] sm:$0xf0]  ;;  %v8453_v4 = vld [vmem:[#allocation6 + $0x3a0] sm:$0xf] }
 0x8f8   :  { %5646 = vmatpush.bf16.msra.mxu1 %v8254_v55  ;;  %5682 = vmatpush.bf16.msrb.mxu3 %v8258_v63  ;;  %v8414_v55 = vor.u32 %v9247_v51, %v8413_v1  ;;  %v8415_v63 = vld [vmem:[#allocation6 + $0x358] sm:$0xf0]  ;;  %v9256_v1 = vld [vmem:[#allocation6 + $0x3a4] sm:$0xf]  ;;  %v8455_v51 = vld [vmem:[#allocation6 + $0x3a8] sm:$0xf0] }
 0x8f9   :  { %v8418_v52 = vor.u32 %v9246_v20, %v8415_v63  ;;  %v8381_v20 = vld [vmem:[#allocation6 + $0x310] sm:$0xf]  ;;  %v8458_v28 = vor.u32 %v9256_v1, %v8455_v51  ;;  %v5719_v1 = vld [vmem:[#allocation4 + $0xc] sm:$0xf] }
 0x8fb   :  { %5664 = vmatpush.bf16.msrb.mxu2 %v8318_v41  ;;  %5700 = vmatpush.bf16.msrb.mxu0 %v8322_v53  ;;  %v8405_v41 = vld [vmem:[#allocation6 + $0x340] sm:$0xf]  ;;  %v9245_v53 = vld [vmem:[#allocation6 + $0x344] sm:$0xf0] }
 0x8fc   :  { %5647 = vmatpush.bf16.msra.mxu1 %v8246_v59  ;;  %5683 = vmatpush.bf16.msrb.mxu3 %v8250_v46  ;;  %v8482_v46 = vor.u32 %v9262_v21, %v8479_v14  ;;  %v8406_v38 = vor.u32 %v9245_v53, %v8405_v41  ;;  %v9254_v41 = vld [vmem:[#allocation6 + $0x394] sm:$0xf]  ;;  %v8447_v53 = vld [vmem:[#allocation6 + $0x398] sm:$0xf0] }
 0x8fd   :  { %v8450_v9 = vor.u32 %v9254_v41, %v8447_v53 }
 0x8fe   :  { %5326 = vmatmul.bf16.vlgmr.msrb.gmra.mxu1 %v12155_v10  ;;  %5362 = vmatmul.bf16.vlgmr.msra.gmra.mxu3 %v12155_v10  ;;  %v5408_v10 = vrot.slane %v5406_v24, 1 }
 0x8ff   :  { %5665 = vmatpush.bf16.msrb.mxu2 %v8310_v39  ;;  %5701 = vmatpush.bf16.msrb.mxu0 %v8314_v44  ;;  %v8410_v39 = vor.u32 %v9244_v45, %v8407_v3  ;;  %v5457_v45 = vor.u32 %v12224_v7, %v12220_v13  ;;  %v9237_v3 = vld [vmem:[#allocation6 + $0x304] sm:$0xf0]  ;;  %v9252_v13 = vld [vmem:[#allocation6 + $0x384] sm:$0xf] }
 0x900   :  { %5939 = vmatpush.bf16.msrb.mxu1 %v8430_v27  ;;  %5975 = vmatpush.bf16.msra.mxu3 %v8434_v2  ;;  %v12210_v59 = vor.u32 %v5410_v0, %v5408_v10  ;;  %v12213_v37 = vsel %vm1244_vm3, %v5404_v43, %v5408_v10  ;;  %v9261_v27 = vld [vmem:[#allocation6 + $0x3c4] sm:$0xf0]  ;;  %v8471_v10 = vld [vmem:[#allocation6 + $0x3c8] sm:$0xf0]  ;;  %v8397_v2 = vld [vmem:[#allocation6 + $0x330] sm:$0xf] }
 0x901   :  { %v5460_v31 = vshrl.u32 %v12213_v37, 16  ;;  %v8470_v54 = vor.u32 %v9261_v27, %v8469_v15  ;;  %v5463_v35 = vshll.u32 %v12213_v37, 16  ;;  %v8474_v17 = vor.u32 %v9260_v62, %v8471_v10  ;;  %v9239_v43 = vld [vmem:[#allocation6 + $0x314] sm:$0xf0]  ;;  %v8383_v0 = vld [vmem:[#allocation6 + $0x318] sm:$0xf0] }
 0x902   :  { %5344 = vmatmul.bf16.vlgmr.msra.gmra.mxu2 %v4824_v8  ;;  %5380 = vmatmul.bf16.vlgmr.msra.gmra.mxu0 %v4824_v8  ;;  %v12218_v8 = vrot.slane %v5451_v18, 3  ;;  %v5468_v44 = vshrl.u32 %v12210_v59, 16  ;;  %v5471_v24 = vshll.u32 %v12210_v59, 16  ;;  %v8398_v42 = vor.u32 %v9243_v30, %v8397_v2  ;;  %v8445_v18 = vld [vmem:[#allocation6 + $0x390] sm:$0xf] }
 0x903   :  { %5957 = vmatpush.bf16.msra.mxu2 %v8494_v49  ;;  %5993 = vmatpush.bf16.msra.mxu0 %v8498_v22  ;;  %v8399_v49 = vld [vmem:[#allocation6 + $0x338] sm:$0xf0]  ;;  %v8462_v22 = vor.u32 %v9259_v23, %v8461_v11  ;;  %v5462_v63 = vrot.slane %v5460_v31, 2  ;;  %v5465_v21 = vrot.slane %v5463_v35, 3  ;;  %v8382_v48 = vor.u32 %v9239_v43, %v8381_v20  ;;  %v8373_v59 = vld [vmem:[#allocation6 + $0x300] sm:$0xf] }
 0x904   :  { %5940 = vmatpush.bf16.msrb.mxu1 %v8422_v50  ;;  %5976 = vmatpush.bf16.msra.mxu3 %v8426_v60  ;;  %v8402_v36 = vor.u32 %v9242_v57, %v8399_v49  ;;  %v8463_v50 = vld [vmem:[#allocation6 + $0x3b8] sm:$0xf0]  ;;  %v8390_v60 = vor.u32 %v9241_v6, %v8389_v26  ;;  %v5470_v19 = vrot.slane %v5468_v44, 2  ;;  %v5473_v14 = vrot.slane %v5471_v24, 3  ;;  %v9236_v37 = vld [vmem:[#allocation6 + $0x304] sm:$0xf] }
 0x905   :  { %v8466_v29 = vor.u32 %v9258_v5, %v8463_v50  ;;  %v8374_v44 = vor.u32 %v9237_v3, %v8373_v59  ;;  %v8439_v62 = vld [vmem:[#allocation6 + $0x388] sm:$0xf0]  ;;  %v9282_v35 = vld [vmem:[#allocation6 + $0x474] sm:$0xf]  ;;  %v8559_v24 = vld [vmem:[#allocation6 + $0x478] sm:$0xf0] }
 0x906   :  { %v5474_v31 = vor.u32 %v5473_v14, %v5470_v19  ;;  %v8442_v2 = vor.u32 %v9252_v13, %v8439_v62  ;;  %v9281_v57 = vld [vmem:[#allocation6 + $0x464] sm:$0xf0]  ;;  %v9280_v49 = vld [vmem:[#allocation6 + $0x464] sm:$0xf]  ;;  %v8541_v23 = vld [vmem:[#allocation6 + $0x450] sm:$0xf] }
 0x907   :  { %5958 = vmatpush.bf16.msra.mxu2 %v8486_v61  ;;  %5994 = vmatpush.bf16.msra.mxu0 %v8490_v47  ;;  %v8394_v61 = vor.u32 %v9240_v58, %v8391_v34  ;;  %v9257_v47 = vld [vmem:[#allocation6 + $0x3a4] sm:$0xf0]  ;;  %v9279_v5 = vld [vmem:[#allocation6 + $0x454] sm:$0xf0]  ;;  %v9278_v50 = vld [vmem:[#allocation6 + $0x454] sm:$0xf] }
 0x908   :  { %5941 = vmatpush.bf16.msrb.mxu1 %v8414_v55  ;;  %5977 = vmatpush.bf16.msra.mxu3 %v8418_v52  ;;  %v9238_v55 = vld [vmem:[#allocation6 + $0x314] sm:$0xf]  ;;  %v8454_v12 = vor.u32 %v9257_v47, %v8453_v4  ;;  %v9255_v52 = vld [vmem:[#allocation6 + $0x394] sm:$0xf0]  ;;  %v8543_v26 = vld [vmem:[#allocation6 + $0x458] sm:$0xf0]  ;;  %v8542_v6 = vor.u32 %v9279_v5, %v8541_v23 }
 0x909   :  { %v9277_v58 = vld [vmem:[#allocation6 + $0x444] sm:$0xf0]  ;;  %v9276_v4 = vld [vmem:[#allocation6 + $0x444] sm:$0xf]  ;;  %v8525_v47 = vld [vmem:[#allocation6 + $0x430] sm:$0xf] }
 0x90a   :  { %v9275_v20 = vld [vmem:[#allocation6 + $0x434] sm:$0xf0]  ;;  %v8517_v19 = vld [vmem:[#allocation6 + $0x420] sm:$0xf]  ;;  %v9272_v14 = vld [vmem:[#allocation6 + $0x424] sm:$0xf] }
 0x90b   :  { %5959 = vmatpush.bf16.msra.mxu2 %v8478_v32  ;;  %5995 = vmatpush.bf16.msra.mxu0 %v8482_v46  ;;  %v8386_v32 = vor.u32 %v9238_v55, %v8383_v0  ;;  %v5454_v46 = vor.u32 %v12218_v8, %v12216_v33  ;;  %v8437_v33 = vld [vmem:[#allocation6 + $0x380] sm:$0xf]  ;;  %v9253_v8 = vld [vmem:[#allocation6 + $0x384] sm:$0xf0]  ;;  %v8526_v43 = vor.u32 %v9275_v20, %v8525_v47  ;;  %v9274_v55 = vld [vmem:[#allocation6 + $0x434] sm:$0xf] }
 0x90c   :  { %5942 = vmatpush.bf16.msrb.mxu1 %v8406_v38  ;;  %5978 = vmatpush.bf16.msra.mxu3 %v8410_v39  ;;  %v8446_v38 = vor.u32 %v9255_v52, %v8445_v18  ;;  %v5466_v39 = vor.u32 %v5465_v21, %v5462_v63  ;;  %v8438_v7 = vor.u32 %v9253_v8, %v8437_v33  ;;  %v8527_v63 = vld [vmem:[#allocation6 + $0x438] sm:$0xf0]  ;;  %v9273_v0 = vld [vmem:[#allocation6 + $0x424] sm:$0xf0]  ;;  %v5732_v18 = vshll.u32 %v12170_v56, 16 }
 0x90d   :  { %v5458_v27 = vsel %vm5446_vm12, %v5454_v46, %v5457_v45  ;;  %v8518_v21 = vor.u32 %v9273_v0, %v8517_v19  ;;  %v8509_v52 = vld [vmem:[#allocation6 + $0x410] sm:$0xf]  ;;  %v8511_v3 = vld [vmem:[#allocation6 + $0x418] sm:$0xf0]  ;;  %v8503_v33 = vld [vmem:[#allocation6 + $0x408] sm:$0xf0] }
 0x90e   :  { %5331 = vmatmul.bf16.gmra.mxu1 %v4807_v25  ;;  %5367 = vmatmul.bf16.gmra.mxu3 %v4807_v25  ;;  %v8375_v25 = vld [vmem:[#allocation6 + $0x308] sm:$0xf0]  ;;  %v5475_v10 = vsel %vm5446_vm12, %v5466_v39, %v5474_v31  ;;  %v5734_v46 = vrot.slane %v5732_v18, 1  ;;  %v9269_v39 = vld [vmem:[#allocation6 + $0x404] sm:$0xf0] }
 0x90f   :  { %5960 = vmatpush.bf16.msra.mxu2 %v8470_v54  ;;  %5996 = vmatpush.bf16.msra.mxu0 %v8474_v17  ;;  %v8378_v15 = vor.u32 %v9236_v37, %v8375_v25  ;;  %v9283_v54 = vld [vmem:[#allocation6 + $0x474] sm:$0xf0]  ;;  %v8549_v17 = vld [vmem:[#allocation6 + $0x460] sm:$0xf]  ;;  %v5730_v37 = vshrl.u32 %v12170_v56, 16 }
 0x910   :  { %5943 = vmatpush.bf16.msrb.mxu1 %v8398_v42  ;;  %5979 = vmatpush.bf16.msra.mxu3 %v8402_v36  ;;  %v8562_v42 = vor.u32 %v9282_v35, %v8559_v24  ;;  %v8551_v36 = vld [vmem:[#allocation6 + $0x468] sm:$0xf0]  ;;  %v8550_v11 = vor.u32 %v9281_v57, %v8549_v17 }
 0x912   :  { %5349 = vmatmul.bf16.gmra.mxu2 %v4827_v40  ;;  %5385 = vmatmul.bf16.gmra.mxu0 %v4827_v40  ;;  %v8557_v40 = vld [vmem:[#allocation6 + $0x470] sm:$0xf] }
 0x913   :  { %5961 = vmatpush.bf16.msra.mxu2 %v8462_v22  ;;  %5997 = vmatpush.bf16.msra.mxu0 %v8466_v29  ;;  %v8558_v30 = vor.u32 %v9283_v54, %v8557_v40  ;;  %v8554_v22 = vor.u32 %v9280_v49, %v8551_v36  ;;  %v8546_v29 = vor.u32 %v9278_v50, %v8543_v26 }
 0x914   :  { %5944 = vmatpush.bf16.msrb.mxu1 %v8390_v60  ;;  %5980 = vmatpush.bf16.msra.mxu3 %v8394_v61  ;;  %v8533_v60 = vld [vmem:[#allocation6 + $0x440] sm:$0xf]  ;;  %v8535_v61 = vld [vmem:[#allocation6 + $0x448] sm:$0xf0] }
 0x915   :  { %v8534_v34 = vor.u32 %v9277_v58, %v8533_v60  ;;  %v8538_v51 = vor.u32 %v9276_v4, %v8535_v61 }
 0x917   :  { %5962 = vmatpush.bf16.msra.mxu2 %v8454_v12  ;;  %5998 = vmatpush.bf16.msra.mxu0 %v8458_v28  ;;  %v5727_v12 = vunpack.c.l.b16 %v5719_v1  ;;  %v8530_v28 = vor.u32 %v9274_v55, %v8527_v63 }
 0x918   :  { %5945 = vmatpush.bf16.msrb.mxu1 %v8382_v48  ;;  %5981 = vmatpush.bf16.msra.mxu3 %v8386_v32  ;;  %v8519_v48 = vld [vmem:[#allocation6 + $0x428] sm:$0xf0]  ;;  %v9271_v32 = vld [vmem:[#allocation6 + $0x414] sm:$0xf0] }
 0x919   :  { %v5728_v41 = vpack.c.b16 %v5727_v12, %v5727_v12  ;;  %v8522_v53 = vor.u32 %v9272_v14, %v8519_v48  ;;  %v8510_v59 = vor.u32 %v9271_v32, %v8509_v52 }
 0x91b   :  { %5963 = vmatpush.bf16.msra.mxu2 %v8446_v38  ;;  %5999 = vmatpush.bf16.msra.mxu0 %v8450_v9  ;;  %v5737_v25 = vshll.u32 %v5728_v41, 16  ;;  %v8501_v9 = vld [vmem:[#allocation6 + $0x400] sm:$0xf]  ;;  %v5741_v54 = vshrl.u32 %v5728_v41, 16  ;;  %v6039_v24 = vrot.slane %v5728_v41, 1 }
 0x91c   :  { %5946 = vmatpush.bf16.msrb.mxu1 %v8374_v44  ;;  %5982 = vmatpush.bf16.msra.mxu3 %v8378_v15  ;;  %v8502_v44 = vor.u32 %v9269_v39, %v8501_v9 }
 0x91d   :  { %v5739_v15 = vrot.slane %v5737_v25, 1 }
 0x91e   :  { %5648 = vmatmul.bf16.vlgmr.msra.gmra.mxu1 %v5458_v27  ;;  %5684 = vmatmul.bf16.vlgmr.msrb.gmra.mxu3 %v5458_v27  ;;  %v9268_v27 = vld [vmem:[#allocation6 + $0x404] sm:$0xf] }
 0x91f   :  { %5964 = vmatpush.bf16.msra.mxu2 %v8438_v7  ;;  %6000 = vmatpush.bf16.msra.mxu0 %v8442_v2  ;;  %v8506_v8 = vor.u32 %v9268_v27, %v8503_v33  ;;  %v5718_v7 = vld [vmem:[#allocation4 + $0xc] sm:$0x7]  ;;  %v6017_v2 = vld [vmem:[#allocation4 + $0x4] sm:$0xe] }
 0x920   :  { %6123 = vmatpush.bf16.msra.mxu1 %v8558_v30  ;;  %v5721_v62 = vunpack.c.l.b16 %v5718_v7 }
 0x922   :  { %5666 = vmatmul.bf16.vlgmr.msrb.gmra.mxu2 %v5475_v10  ;;  %5702 = vmatmul.bf16.vlgmr.msrb.gmra.mxu0 %v5475_v10  ;;  %v5723_v40 = vpack.c.b16 %v5721_v62, %v5721_v62  ;;  %v5743_v10 = vor.u32 %v5741_v54, %v5739_v15 }
 0x923   :  { %6141 = vmatpush.bf16.msrb.mxu2 %v8562_v42 }
 0x924   :  { %6124 = vmatpush.bf16.msra.mxu1 %v8550_v11 }
 0x927   :  { %6142 = vmatpush.bf16.msrb.mxu2 %v8554_v22 }
 0x928   :  { %6125 = vmatpush.bf16.msra.mxu1 %v8542_v6 }
 0x92b   :  { %6143 = vmatpush.bf16.msrb.mxu2 %v8546_v29 }
 0x92c   :  { %6126 = vmatpush.bf16.msra.mxu1 %v8534_v34 }
 0x92e   :  { %5653 = vmatmul.bf16.gmra.mxu1 %v5457_v45  ;;  %5689 = vmatmul.bf16.gmra.mxu3 %v5457_v45  ;;  %v9270_v45 = vld [vmem:[#allocation6 + $0x414] sm:$0xf] }
 0x92f   :  { %6144 = vmatpush.bf16.msrb.mxu2 %v8538_v51  ;;  %v8514_v38 = vor.u32 %v9270_v45, %v8511_v3 }
 0x930   :  { %6127 = vmatpush.bf16.msra.mxu1 %v8526_v43 }
 0x932   :  { %5671 = vmatmul.bf16.gmra.mxu2 %v5474_v31  ;;  %5707 = vmatmul.bf16.gmra.mxu0 %v5474_v31  ;;  %v5735_v31 = vor.u32 %v5734_v46, %v5730_v37 }
 0x933   :  { %6145 = vmatpush.bf16.msrb.mxu2 %v8530_v28 }
 0x934   :  { %6128 = vmatpush.bf16.msra.mxu1 %v8518_v21  ;;  %v5740_v13 = vsel %vm1244_vm3, %v5735_v31, %v5739_v15 }
 0x937   :  { %6146 = vmatpush.bf16.msrb.mxu2 %v8522_v53 }
 0x938   :  { %6129 = vmatpush.bf16.msra.mxu1 %v8510_v59 }
 0x93b   :  { %6147 = vmatpush.bf16.msrb.mxu2 %v8514_v38 }
 0x93c   :  { %6130 = vmatpush.bf16.msra.mxu1 %v8502_v44 }
 0x93e   :  { %5947 = vmatmul.bf16.vlgmr.msrb.gmra.mxu1 %v12170_v56  ;;  %5983 = vmatmul.bf16.vlgmr.msra.gmra.mxu3 %v12170_v56  ;;  %v6036_v56 = vunpack.c.l.b16 %v6017_v2 }
 0x93f   :  { %6148 = vmatpush.bf16.msrb.mxu2 %v8506_v8 }
 0x940   :  { %v6037_v30 = vpack.c.b16 %v12160_v16, %v6036_v56 }
 0x942   :  { %5965 = vmatmul.bf16.vlgmr.msra.gmra.mxu2 %v5740_v13  ;;  %6001 = vmatmul.bf16.vlgmr.msra.gmra.mxu0 %v5740_v13  ;;  %v6038_v35 = vrot.slane %v6037_v30, 1 }
 0x944   :  { %v6040_v42 = vsel %vm1442_vm2, %v6038_v35, %v6039_v24 }
 0x94e   :  { %5952 = vmatmul.bf16.gmra.mxu1 %v5723_v40  ;;  %5988 = vmatmul.bf16.gmra.mxu3 %v5723_v40 }
 0x952   :  { %5970 = vmatmul.bf16.gmra.mxu2 %v5743_v10  ;;  %6006 = vmatmul.bf16.gmra.mxu0 %v5743_v10 }
 0x95b   :  { %v5095_v17 = vpop.f32.mrf.mxu1 }
 0x95e   :  { %6131 = vmatmul.bf16.vlgmr.msra.gmra.mxu1 %v6040_v42 }
 0x95f   :  { %v5149_v57 = vpop.f32.mrf.mxu0 }
 0x961   :  { %v5131_v49 = vpop.f32.mrf.mxu3 }
 0x962   :  { %6149 = vmatmul.bf16.vlgmr.msrb.gmra.mxu2 %v6040_v42  ;;  %v5150_v36 = vadd.f32 %v5149_v57, %v5131_v49 }
 0x963   :  { %v5097_v11 = vpop.f32.mrf.mxu1 }
 0x965   :  { %v5113_v23 = vpop.f32.mrf.mxu2 }
 0x966   :  { %v5114_v5 = vadd.f32 %v5113_v23, %v5095_v17 }
 0x967   :  { %v5151_v22 = vpop.f32.mrf.mxu0 }
 0x969   :  { %v5133_v50 = vpop.f32.mrf.mxu3 }
 0x96a   :  { %v5152_v26 = vadd.f32 %v5151_v22, %v5133_v50 }
 0x96b   :  { %v5100_v6 = vpop.f32.mrf.mxu1 }
 0x96d   :  { %v5115_v29 = vpop.f32.mrf.mxu2 }
 0x96e   :  { %v5116_v60 = vadd.f32 %v5115_v29, %v5097_v11  ;;  %6136 = vmatmul.bf16.gmra.mxu1 %v6039_v24 }
 0x96f   :  { %v5154_v16 = vpop.f32.mrf.mxu0 }
 0x971   :  { %v5136_v58 = vpop.f32.mrf.mxu3 }
 0x972   :  { %6154 = vmatmul.bf16.gmra.mxu2 %v6039_v24  ;;  %v5155_v34 = vadd.f32 %v5154_v16, %v5136_v58 }
 0x973   :  { %v5102_v4 = vpop.f32.mrf.mxu1 }
 0x975   :  { %v5118_v61 = vpop.f32.mrf.mxu2 }
 0x976   :  { %v5119_v47 = vadd.f32 %v5118_v61, %v5100_v6 }
 0x977   :  { %v5156_v1 = vpop.f32.mrf.mxu0 }
 0x979   :  { %v5138_v51 = vpop.f32.mrf.mxu3 }
 0x97b   :  { %v5327_v20 = vpop.f32.mrf.mxu1 }
 0x97c   :  { %v5328_v43 = vadd.f32 %v5327_v20, %v5114_v5 }
 0x97d   :  { %v5120_v55 = vpop.f32.mrf.mxu2 }
 0x97f   :  { %v5381_v63 = vpop.f32.mrf.mxu0 }
 0x981   :  { %v5363_v19 = vpop.f32.mrf.mxu3 }
 0x982   :  { %v5364_v12 = vadd.f32 %v5363_v19, %v5150_v36 }
 0x983   :  { %v5329_v28 = vpop.f32.mrf.mxu1 }
 0x984   :  { %v5382_v0 = vadd.f32 %v5381_v63, %v5364_v12  ;;  %v5330_v21 = vadd.f32 %v5329_v28, %v5116_v60 }
 0x985   :  { %v5345_v14 = vpop.f32.mrf.mxu2 }
 0x986   :  { %v5346_v48 = vadd.f32 %v5345_v14, %v5328_v43  ;;  %v6165_v14 = vld [vmem:[%s12389_s9] sm:$0x3] }
 0x987   :  { %v5383_v18 = vpop.f32.mrf.mxu0 }
 0x989   :  { %v5365_v52 = vpop.f32.mrf.mxu3 }
 0x98a   :  { %v5366_v32 = vadd.f32 %v5365_v52, %v5152_v26 }
 0x98b   :  { %v5332_v41 = vpop.f32.mrf.mxu1 }
 0x98c   :  { %v5384_v53 = vadd.f32 %v5383_v18, %v5366_v32  ;;  %v5333_v59 = vadd.f32 %v5332_v41, %v5119_v47  ;;  %v6167_v32 = vperm.slane %v6165_v14, 0 }
 0x98d   :  { %v5347_v46 = vpop.f32.mrf.mxu2 }
 0x98e   :  { %v5348_v45 = vadd.f32 %v5347_v46, %v5330_v21 }
 0x98f   :  { %v5386_v3 = vpop.f32.mrf.mxu0 }
 0x991   :  { %v5368_v37 = vpop.f32.mrf.mxu3 }
 0x992   :  { %v5369_v25 = vadd.f32 %v5368_v37, %v5155_v34 }
 0x993   :  { %v5334_v38 = vpop.f32.mrf.mxu1 }
 0x994   :  { %v5387_v9 = vadd.f32 %v5386_v3, %v5369_v25 }
 0x995   :  { %v5350_v39 = vpop.f32.mrf.mxu2 }
 0x996   :  { %v12244_v31 = vadd.f32 %v5350_v39, %v5333_v59 }
 0x997   :  { %v5388_v44 = vpop.f32.mrf.mxu0 }
 0x999   :  { %v5370_v15 = vpop.f32.mrf.mxu3 }
 0x99b   :  { %v5649_v27 = vpop.f32.mrf.mxu1 }
 0x99d   :  { %v5352_v33 = vpop.f32.mrf.mxu2 }
 0x99f   :  { %v5703_v8 = vpop.f32.mrf.mxu0 }
 0x9a1   :  { %v5685_v13 = vpop.f32.mrf.mxu3 }
 0x9a2   :  { %v5704_v7 = vadd.f32 %v5703_v8, %v5685_v13  ;;  %v6168_v8 = vperm.slane %v6165_v14, 1 }
 0x9a3   :  { %v5651_v62 = vpop.f32.mrf.mxu1 }
 0x9a4   :  { %v5713_v40 = vadd.f32 %v5704_v7, %v5382_v0 }
 0x9a5   :  { %v5667_v54 = vpop.f32.mrf.mxu2 }
 0x9a6   :  { %v5668_v10 = vadd.f32 %v5667_v54, %v5649_v27 }
 0x9a7   :  { %v5705_v2 = vpop.f32.mrf.mxu0 }
 0x9a8   :  { %v5712_v56 = vadd.f32 %v5668_v10, %v5346_v48 }
 0x9a9   :  { %v5687_v30 = vpop.f32.mrf.mxu3 }
 0x9aa   :  { %v5706_v35 = vadd.f32 %v5705_v2, %v5687_v30 }
 0x9ab   :  { %v5654_v24 = vpop.f32.mrf.mxu1 }
 0x9ac   :  { %v5715_v17 = vadd.f32 %v5706_v35, %v5384_v53 }
 0x9ad   :  { %v5669_v42 = vpop.f32.mrf.mxu2 }
 0x9ae   :  { %v5670_v57 = vadd.f32 %v5669_v42, %v5651_v62 }
 0x9af   :  { %v5708_v49 = vpop.f32.mrf.mxu0 }
 0x9b0   :  { %v5714_v36 = vadd.f32 %v5670_v57, %v5348_v45 }
 0x9b1   :  { %v5690_v11 = vpop.f32.mrf.mxu3 }
 0x9b2   :  { %v5709_v23 = vadd.f32 %v5708_v49, %v5690_v11 }
 0x9b3   :  { %v5656_v5 = vpop.f32.mrf.mxu1 }
 0x9b4   :  { %v5717_v22 = vadd.f32 %v5709_v23, %v5387_v9 }
 0x9b5   :  { %v5672_v50 = vpop.f32.mrf.mxu2 }
 0x9b6   :  { %v5673_v46 = vadd.f32 %v5672_v50, %v5654_v24 }
 0x9b7   :  { %v5710_v26 = vpop.f32.mrf.mxu0 }
 0x9b8   :  { %v5716_v44 = vadd.f32 %v5673_v46, %v12244_v31 }
 0x9b9   :  { %v5692_v6 = vpop.f32.mrf.mxu3 }
 0x9bb   :  { %v5948_v29 = vpop.f32.mrf.mxu1 }
 0x9bd   :  { %v5674_v60 = vpop.f32.mrf.mxu2 }
 0x9bf   :  { %v6002_v16 = vpop.f32.mrf.mxu0 }
 0x9c1   :  { %v5984_v58 = vpop.f32.mrf.mxu3 }
 0x9c2   :  { %v6003_v53 = vadd.f32 %v6002_v16, %v5984_v58 }
 0x9c3   :  { %v5950_v34 = vpop.f32.mrf.mxu1 }
 0x9c4   :  { %v6012_v39 = vadd.f32 %v6003_v53, %v5713_v40 }
 0x9c5   :  { %v5966_v4 = vpop.f32.mrf.mxu2 }
 0x9c6   :  { %v5967_v28 = vadd.f32 %v5966_v4, %v5948_v29  ;;  %v6187_v29 = vld [vmem:[%s12390_s10] sm:$0x1] }
 0x9c7   :  { %v6004_v61 = vpop.f32.mrf.mxu0 }
 0x9c8   :  { %v6011_v18 = vadd.f32 %v5967_v28, %v5712_v56 }
 0x9c9   :  { %v5986_v47 = vpop.f32.mrf.mxu3 }
 0x9ca   :  { %v6005_v9 = vadd.f32 %v6004_v61, %v5986_v47 }
 0x9cb   :  { %v5953_v1 = vpop.f32.mrf.mxu1 }
 0x9cc   :  { %v6014_v54 = vadd.f32 %v6005_v9, %v5715_v17 }
 0x9cd   :  { %v5968_v51 = vpop.f32.mrf.mxu2 }
 0x9ce   :  { %v5969_v48 = vadd.f32 %v5968_v51, %v5950_v34 }
 0x9cf   :  { %v6007_v20 = vpop.f32.mrf.mxu0 }
 0x9d0   :  { %v6013_v41 = vadd.f32 %v5969_v48, %v5714_v36 }
 0x9d1   :  { %v5989_v43 = vpop.f32.mrf.mxu3 }
 0x9d2   :  { %v6008_v24 = vadd.f32 %v6007_v20, %v5989_v43 }
 0x9d3   :  { %v5955_v55 = vpop.f32.mrf.mxu1 }
 0x9d4   :  { %v6016_v11 = vadd.f32 %v6008_v24, %v5717_v22 }
 0x9d5   :  { %v5971_v63 = vpop.f32.mrf.mxu2 }
 0x9d6   :  { %v5972_v25 = vadd.f32 %v5971_v63, %v5953_v1 }
 0x9d7   :  { %v6009_v19 = vpop.f32.mrf.mxu0 }
 0x9d8   :  { %v6015_v13 = vadd.f32 %v5972_v25, %v5716_v44 }
 0x9d9   :  { %v5991_v12 = vpop.f32.mrf.mxu3 }
 0x9db   :  { %v6132_v0 = vpop.f32.mrf.mxu1 }
 0x9dc   :  { %v6159_v52 = vadd.f32 %v6132_v0, %v6011_v18 }
 0x9dd   :  { %v5973_v21 = vpop.f32.mrf.mxu2 }
 0x9de   :  { %v6171_v45 = vadd.f32 %v6167_v32, %v6159_v52 }
 0x9e0   :  { %v6177_v15 = vmax.f32 %v6171_v45, 0.0 }
 0x9e3   :  { %v6134_v59 = vpop.f32.mrf.mxu1 }
 0x9e4   :  { %v6161_v3 = vadd.f32 %v6134_v59, %v6013_v41 }
 0x9e5   :  { %v6150_v37 = vpop.f32.mrf.mxu2 }
 0x9e6   :  { %v6173_v38 = vadd.f32 %v6167_v32, %v6161_v3  ;;  %v6160_v33 = vadd.f32 %v6150_v37, %v6012_v39 }
 0x9e8   :  { %v6179_v27 = vmax.f32 %v6173_v38, 0.0  ;;  %v6172_v56 = vadd.f32 %v6168_v8, %v6160_v33 }
 0x9ea   :  { %v6183_v7 = vpack.c.bf16 %v6179_v27, %v6177_v15  ;;  %v6178_v49 = vmax.f32 %v6172_v56, 0.0 }
 0x9eb   :  { %v6137_v62 = vpop.f32.mrf.mxu1 }
 0x9ec   :  { %v6163_v10 = vadd.f32 %v6137_v62, %v6015_v13 }
 0x9ed   :  { %v6152_v2 = vpop.f32.mrf.mxu2 }
 0x9ee   :  { %v6162_v30 = vadd.f32 %v6152_v2, %v6014_v54  ;;  %v6175_v35 = vadd.f32 %v6167_v32, %v6163_v10 }
 0x9f0   :  { %v6174_v42 = vadd.f32 %v6168_v8, %v6162_v30  ;;  %v6181_v57 = vmax.f32 %v6175_v35, 0.0 }
 0x9f2   :  { %v6180_v40 = vmax.f32 %v6174_v42, 0.0  ;;  %v6185_v31 = vpack.c.bf16 %v6181_v57, %v6181_v57 }
 0x9f3   :  { %v6139_v36 = vpop.f32.mrf.mxu1 }
 0x9f4   :  { %v6184_v23 = vpack.c.bf16 %v6180_v40, %v6178_v49  ;;  %v6194_v50 = vsel %vm6192_vm13, %v6185_v31, 0 }
 0x9f5   :  { %v6155_v5 = vpop.f32.mrf.mxu2  ;;  %6205 = vmatpush.bf16.msrb.mxu3 %v6194_v50 }
 0x9f6   :  { %v6164_v26 = vadd.f32 %v6155_v5, %v6016_v11 }
 0x9f8   :  { %v6176_v17 = vadd.f32 %v6168_v8, %v6164_v26 }
 0x9f9   :  { %6206 = vmatpush.bf16.msrb.mxu3 %v6183_v7 }
 0x9fa   :  { %v6182_v6 = vmax.f32 %v6176_v17, 0.0 }
 0x9fc   :  { %v6186_v60 = vpack.c.bf16 %v6182_v6, %v6182_v6  ;;  %8563 = vmatmul.msk.bf16.vlgmr.msrb.gmra.mxu3 %vm6188_vm14, %v6187_v29 }
 0x9fd   :  { %v6157_v16 = vpop.f32.mrf.mxu2 }
 0x9fe   :  { %v6197_v58 = vsel %vm6192_vm13, %v6186_v60, 0 }
 0x9ff   :  { %6218 = vmatpush.bf16.msrb.mxu0 %v6197_v58 }
 0xa03   :  { %6219 = vmatpush.bf16.msrb.mxu0 %v6184_v23 }
 0xa06   :  { %8564 = vmatmul.msk.bf16.vlgmr.msrb.gmra.mxu0 %vm6188_vm14, %v6187_v29 }
 0xa7f   :  { %v12255_v22 = vpop.f32.mrf.mxu3 }
 0xa83   :  { %v12257_v34 = vpop.f32.mrf.mxu0 }
 0xa87   :  { %v6210_v4 = vpop.f32.mrf.mxu3 }
 0xa8b   :  { %v6223_v61 = vpop.f32.mrf.mxu0 }
 0xa8c   :  { %9723 = dma.done.wait [#allocation8 + $0x2], 8192 }
 0xa8d   :  { %9724 = vsyncadd [#allocation8 + $0x2], 4294959104  ;;  %v8679_v47 = vld [vmem:[#allocation7 + $0xe0] sm:$0xf]  ;;  %v9314_v1 = vld [vmem:[#allocation7 + $0xec] sm:$0xf0] }
 0xa8e   :  { %v8807_v51 = vld [vmem:[#allocation7 + $0x1e0] sm:$0xf]  ;;  %v8680_v20 = vor.u32 %v9314_v1, %v8679_v47  ;;  %v9346_v43 = vld [vmem:[#allocation7 + $0x1ec] sm:$0xf0]  ;;  %v9312_v55 = vld [vmem:[#allocation7 + $0xe4] sm:$0xf] }
 0xa8f   :  { %v8681_v63 = vld [vmem:[#allocation7 + $0xf0] sm:$0xf0]  ;;  %v8808_v19 = vor.u32 %v9346_v43, %v8807_v51  ;;  %v8663_v28 = vld [vmem:[#allocation7 + $0xc0] sm:$0xf]  ;;  %v9310_v0 = vld [vmem:[#allocation7 + $0xcc] sm:$0xf0] }
 0xa90   :  { %v8684_v12 = vor.u32 %v9312_v55, %v8681_v63  ;;  %v8791_v21 = vld [vmem:[#allocation7 + $0x1c0] sm:$0xf]  ;;  %6625 = vmatpush.bf16.msrb.mxu1 %v8680_v20  ;;  %v8664_v14 = vor.u32 %v9310_v0, %v8663_v28  ;;  %v9342_v48 = vld [vmem:[#allocation7 + $0x1cc] sm:$0xf0]  ;;  %v9308_v18 = vld [vmem:[#allocation7 + $0xc4] sm:$0xf] }
 0xa91   :  { %v8665_v52 = vld [vmem:[#allocation7 + $0xd0] sm:$0xf0]  ;;  %6638 = vmatpush.bf16.msra.mxu2 %v8808_v19  ;;  %v8792_v32 = vor.u32 %v9342_v48, %v8791_v21  ;;  %v9344_v53 = vld [vmem:[#allocation7 + $0x1e4] sm:$0xf]  ;;  %v8647_v46 = vld [vmem:[#allocation7 + $0xa0] sm:$0xf] }
 0xa92   :  { %6651 = vmatpush.bf16.msra.mxu3 %v8684_v12  ;;  %v8668_v41 = vor.u32 %v9308_v18, %v8665_v52  ;;  %v8809_v59 = vld [vmem:[#allocation7 + $0x1f0] sm:$0xf0]  ;;  %v9306_v3 = vld [vmem:[#allocation7 + $0xac] sm:$0xf0]  ;;  %v8775_v37 = vld [vmem:[#allocation7 + $0x1a0] sm:$0xf] }
 0xa93   :  { %v8812_v45 = vor.u32 %v9344_v53, %v8809_v59  ;;  %v9338_v25 = vld [vmem:[#allocation7 + $0x1ac] sm:$0xf0]  ;;  %v9304_v38 = vld [vmem:[#allocation7 + $0xa4] sm:$0xf]  ;;  %v8649_v9 = vld [vmem:[#allocation7 + $0xb0] sm:$0xf0]  ;;  %v8648_v44 = vor.u32 %v9306_v3, %v8647_v46 }
 0xa94   :  { %v9340_v39 = vld [vmem:[#allocation7 + $0x1c4] sm:$0xf]  ;;  %6626 = vmatpush.bf16.msrb.mxu1 %v8664_v14  ;;  %v8793_v15 = vld [vmem:[#allocation7 + $0x1d0] sm:$0xf0]  ;;  %v8631_v27 = vld [vmem:[#allocation7 + $0x80] sm:$0xf]  ;;  %v8776_v8 = vor.u32 %v9338_v25, %v8775_v37  ;;  %v8652_v13 = vor.u32 %v9304_v38, %v8649_v9 }
 0xa95   :  { %6664 = vmatpush.bf16.msra.mxu0 %v8812_v45  ;;  %v9302_v33 = vld [vmem:[#allocation7 + $0x8c] sm:$0xf0]  ;;  %6639 = vmatpush.bf16.msra.mxu2 %v8792_v32  ;;  %v8796_v7 = vor.u32 %v9340_v39, %v8793_v15  ;;  %v8759_v62 = vld [vmem:[#allocation7 + $0x180] sm:$0xf]  ;;  %v9300_v10 = vld [vmem:[#allocation7 + $0x84] sm:$0xf] }
 0xa96   :  { %6652 = vmatpush.bf16.msra.mxu3 %v8668_v41  ;;  %v9334_v54 = vld [vmem:[#allocation7 + $0x18c] sm:$0xf0]  ;;  %v8633_v2 = vld [vmem:[#allocation7 + $0x90] sm:$0xf0]  ;;  %v9336_v56 = vld [vmem:[#allocation7 + $0x1a4] sm:$0xf]  ;;  %v8632_v35 = vor.u32 %v9302_v33, %v8631_v27 }
 0xa97   :  { %v8777_v30 = vld [vmem:[#allocation7 + $0x1b0] sm:$0xf0]  ;;  %v8615_v42 = vld [vmem:[#allocation7 + $0x60] sm:$0xf]  ;;  %v9298_v57 = vld [vmem:[#allocation7 + $0x6c] sm:$0xf0]  ;;  %v8760_v49 = vor.u32 %v9334_v54, %v8759_v62  ;;  %v8636_v40 = vor.u32 %v9300_v10, %v8633_v2 }
 0xa98   :  { %6627 = vmatpush.bf16.msrb.mxu1 %v8648_v44  ;;  %v8780_v24 = vor.u32 %v9336_v56, %v8777_v30  ;;  %v8743_v31 = vld [vmem:[#allocation7 + $0x160] sm:$0xf]  ;;  %v9332_v36 = vld [vmem:[#allocation7 + $0x184] sm:$0xf]  ;;  %v8761_v11 = vld [vmem:[#allocation7 + $0x190] sm:$0xf0]  ;;  %v8616_v26 = vor.u32 %v9298_v57, %v8615_v42 }
 0xa99   :  { %6665 = vmatpush.bf16.msra.mxu0 %v8796_v7  ;;  %6640 = vmatpush.bf16.msra.mxu2 %v8776_v8  ;;  %v9330_v23 = vld [vmem:[#allocation7 + $0x16c] sm:$0xf0]  ;;  %v9296_v5 = vld [vmem:[#allocation7 + $0x64] sm:$0xf]  ;;  %v8617_v50 = vld [vmem:[#allocation7 + $0x70] sm:$0xf0]  ;;  %v8764_v17 = vor.u32 %v9332_v36, %v8761_v11 }
 0xa9a   :  { %6653 = vmatpush.bf16.msra.mxu3 %v8652_v13  ;;  %v8599_v6 = vld [vmem:[#allocation7 + $0x40] sm:$0xf]  ;;  %v9294_v29 = vld [vmem:[#allocation7 + $0x4c] sm:$0xf0]  ;;  %v8744_v60 = vor.u32 %v9330_v23, %v8743_v31  ;;  %v8620_v16 = vor.u32 %v9296_v5, %v8617_v50  ;;  %v9328_v4 = vld [vmem:[#allocation7 + $0x164] sm:$0xf]  ;;  %v12261_v5 = vpack.c.bf16 %v12257_v34, %v12257_v34 }
 0xa9b   :  { %v8727_v58 = vld [vmem:[#allocation7 + $0x140] sm:$0xf]  ;;  %v8745_v61 = vld [vmem:[#allocation7 + $0x170] sm:$0xf0]  ;;  %v9326_v47 = vld [vmem:[#allocation7 + $0x14c] sm:$0xf0]  ;;  %v8600_v20 = vor.u32 %v9294_v29, %v8599_v6 }
 0xa9c   :  { %6628 = vmatpush.bf16.msrb.mxu1 %v8632_v35  ;;  %v9292_v1 = vld [vmem:[#allocation7 + $0x44] sm:$0xf]  ;;  %v8601_v51 = vld [vmem:[#allocation7 + $0x50] sm:$0xf0]  ;;  %v8748_v43 = vor.u32 %v9328_v4, %v8745_v61  ;;  %v8583_v55 = vld [vmem:[#allocation7 + $0x20] sm:$0xf]  ;;  %v8728_v19 = vor.u32 %v9326_v47, %v8727_v58 }
 0xa9d   :  { %6666 = vmatpush.bf16.msra.mxu0 %v8780_v24  ;;  %6641 = vmatpush.bf16.msra.mxu2 %v8760_v49  ;;  %v9290_v63 = vld [vmem:[#allocation7 + $0x2c] sm:$0xf0]  ;;  %v8604_v12 = vor.u32 %v9292_v1, %v8601_v51  ;;  %v8711_v28 = vld [vmem:[#allocation7 + $0x120] sm:$0xf]  ;;  %v9324_v0 = vld [vmem:[#allocation7 + $0x144] sm:$0xf] }
 0xa9e   :  { %6654 = vmatpush.bf16.msra.mxu3 %v8636_v40  ;;  %v8729_v21 = vld [vmem:[#allocation7 + $0x150] sm:$0xf0]  ;;  %v9322_v14 = vld [vmem:[#allocation7 + $0x12c] sm:$0xf0]  ;;  %v9288_v48 = vld [vmem:[#allocation7 + $0x24] sm:$0xf]  ;;  %v8584_v52 = vor.u32 %v9290_v63, %v8583_v55 }
 0xa9f   :  { %v8585_v18 = vld [vmem:[#allocation7 + $0x30] sm:$0xf0]  ;;  %v8732_v32 = vor.u32 %v9324_v0, %v8729_v21  ;;  %v8567_v41 = vld [vmem:[#allocation7] sm:$0xf]  ;;  %v9286_v53 = vld [vmem:[#allocation7 + $0xc] sm:$0xf0]  ;;  %v8712_v46 = vor.u32 %v9322_v14, %v8711_v28 }
 0xaa0   :  { %6629 = vmatpush.bf16.msrb.mxu1 %v8616_v26  ;;  %v8695_v59 = vld [vmem:[#allocation7 + $0x100] sm:$0xf]  ;;  %v8588_v45 = vor.u32 %v9288_v48, %v8585_v18  ;;  %v9318_v3 = vld [vmem:[#allocation7 + $0x10c] sm:$0xf0]  ;;  %v9320_v37 = vld [vmem:[#allocation7 + $0x124] sm:$0xf]  ;;  %v8568_v33 = vor.u32 %v9286_v53, %v8567_v41  ;;  %v12265_v26 = vpack.c.bf16 %v12255_v22, %v12255_v22 }
 0xaa1   :  { %6667 = vmatpush.bf16.msra.mxu0 %v8764_v17  ;;  %6642 = vmatpush.bf16.msra.mxu2 %v8744_v60  ;;  %v8713_v25 = vld [vmem:[#allocation7 + $0x130] sm:$0xf0]  ;;  %v9284_v38 = vld [vmem:[#allocation7 + $0x4] sm:$0xf]  ;;  %v8687_v39 = vld [vmem:[#allocation7 + $0xe8] sm:$0xf]  ;;  %v8696_v62 = vor.u32 %v9318_v3, %v8695_v59 }
 0xaa2   :  { %6655 = vmatpush.bf16.msra.mxu3 %v8620_v16  ;;  %v8569_v9 = vld [vmem:[#allocation7 + $0x10] sm:$0xf0]  ;;  %v9315_v44 = vld [vmem:[#allocation7 + $0xf4] sm:$0xf0]  ;;  %v8815_v15 = vld [vmem:[#allocation7 + $0x1e8] sm:$0xf]  ;;  %v8716_v7 = vor.u32 %v9320_v37, %v8713_v25 }
 0xaa3   :  { %v9347_v27 = vld [vmem:[#allocation7 + $0x1f4] sm:$0xf0]  ;;  %v9313_v8 = vld [vmem:[#allocation7 + $0xec] sm:$0xf]  ;;  %v8689_v13 = vld [vmem:[#allocation7 + $0xf8] sm:$0xf0]  ;;  %v8572_v54 = vor.u32 %v9284_v38, %v8569_v9  ;;  %v8688_v56 = vor.u32 %v9315_v44, %v8687_v39 }
 0xaa4   :  { %6630 = vmatpush.bf16.msrb.mxu1 %v8600_v20  ;;  %v9316_v10 = vld [vmem:[#allocation7 + $0x104] sm:$0xf]  ;;  %v8697_v2 = vld [vmem:[#allocation7 + $0x110] sm:$0xf0]  ;;  %v8816_v30 = vor.u32 %v9347_v27, %v8815_v15  ;;  %v8671_v35 = vld [vmem:[#allocation7 + $0xc8] sm:$0xf]  ;;  %v8692_v57 = vor.u32 %v9313_v8, %v8689_v13 }
 0xaa5   :  { %6668 = vmatpush.bf16.msra.mxu0 %v8748_v43  ;;  %6643 = vmatpush.bf16.msra.mxu2 %v8728_v19  ;;  %v9345_v24 = vld [vmem:[#allocation7 + $0x1ec] sm:$0xf]  ;;  %v8817_v42 = vld [vmem:[#allocation7 + $0x1f8] sm:$0xf0]  ;;  %v9311_v49 = vld [vmem:[#allocation7 + $0xd4] sm:$0xf0]  ;;  %v8700_v23 = vor.u32 %v9316_v10, %v8697_v2 }
 0xaa6   :  { %6656 = vmatpush.bf16.msra.mxu3 %v8604_v12  ;;  %v8799_v40 = vld [vmem:[#allocation7 + $0x1c8] sm:$0xf]  ;;  %v9343_v31 = vld [vmem:[#allocation7 + $0x1d4] sm:$0xf0]  ;;  %v9309_v36 = vld [vmem:[#allocation7 + $0xcc] sm:$0xf]  ;;  %v8820_v50 = vor.u32 %v9345_v24, %v8817_v42  ;;  %v8672_v17 = vor.u32 %v9311_v49, %v8671_v35 }
 0xaa7   :  { %v8673_v11 = vld [vmem:[#allocation7 + $0xd8] sm:$0xf0]  ;;  %v8800_v6 = vor.u32 %v9343_v31, %v8799_v40  ;;  %v8655_v29 = vld [vmem:[#allocation7 + $0xa8] sm:$0xf]  ;;  %v9341_v60 = vld [vmem:[#allocation7 + $0x1cc] sm:$0xf] }
 0xaa8   :  { %6631 = vmatpush.bf16.msrb.mxu1 %v8584_v52  ;;  %v8801_v16 = vld [vmem:[#allocation7 + $0x1d8] sm:$0xf0]  ;;  %v8676_v58 = vor.u32 %v9309_v36, %v8673_v11  ;;  %v9307_v4 = vld [vmem:[#allocation7 + $0xb4] sm:$0xf0]  ;;  %v8783_v61 = vld [vmem:[#allocation7 + $0x1a8] sm:$0xf] }
 0xaa9   :  { %6669 = vmatpush.bf16.msra.mxu0 %v8732_v32  ;;  %6644 = vmatpush.bf16.msra.mxu2 %v8712_v46  ;;  %v9339_v34 = vld [vmem:[#allocation7 + $0x1b4] sm:$0xf0]  ;;  %v9305_v47 = vld [vmem:[#allocation7 + $0xac] sm:$0xf]  ;;  %v8657_v22 = vld [vmem:[#allocation7 + $0xb8] sm:$0xf0]  ;;  %v8804_v1 = vor.u32 %v9341_v60, %v8801_v16  ;;  %v8656_v51 = vor.u32 %v9307_v4, %v8655_v29 }
 0xaaa   :  { %6657 = vmatpush.bf16.msra.mxu3 %v8588_v45  ;;  %v8784_v20 = vor.u32 %v9339_v34, %v8783_v61  ;;  %v8639_v43 = vld [vmem:[#allocation7 + $0x88] sm:$0xf]  ;;  %v9337_v55 = vld [vmem:[#allocation7 + $0x1ac] sm:$0xf]  ;;  %v8785_v63 = vld [vmem:[#allocation7 + $0x1b8] sm:$0xf0]  ;;  %v8660_v19 = vor.u32 %v9305_v47, %v8657_v22 }
 0xaab   :  { %v9303_v12 = vld [vmem:[#allocation7 + $0x94] sm:$0xf0]  ;;  %v8767_v28 = vld [vmem:[#allocation7 + $0x188] sm:$0xf]  ;;  %v9301_v21 = vld [vmem:[#allocation7 + $0x8c] sm:$0xf]  ;;  %v8788_v48 = vor.u32 %v9337_v55, %v8785_v63 }
 0xaac   :  { %6632 = vmatpush.bf16.msrb.mxu1 %v8568_v33  ;;  %v9335_v0 = vld [vmem:[#allocation7 + $0x194] sm:$0xf0]  ;;  %v8641_v14 = vld [vmem:[#allocation7 + $0x98] sm:$0xf0]  ;;  %v8640_v18 = vor.u32 %v9303_v12, %v8639_v43  ;;  %v8623_v32 = vld [vmem:[#allocation7 + $0x68] sm:$0xf] }
 0xaad   :  { %6670 = vmatpush.bf16.msra.mxu0 %v8716_v7  ;;  %6645 = vmatpush.bf16.msra.mxu2 %v8696_v62  ;;  %v8768_v52 = vor.u32 %v9335_v0, %v8767_v28  ;;  %v9333_v41 = vld [vmem:[#allocation7 + $0x18c] sm:$0xf]  ;;  %v8769_v53 = vld [vmem:[#allocation7 + $0x198] sm:$0xf0]  ;;  %v8644_v59 = vor.u32 %v9301_v21, %v8641_v14  ;;  %v9299_v46 = vld [vmem:[#allocation7 + $0x74] sm:$0xf0] }
 0xaae   :  { %6658 = vmatpush.bf16.msra.mxu3 %v8572_v54  ;;  %v8751_v45 = vld [vmem:[#allocation7 + $0x168] sm:$0xf]  ;;  %v9331_v3 = vld [vmem:[#allocation7 + $0x174] sm:$0xf0]  ;;  %v9297_v37 = vld [vmem:[#allocation7 + $0x6c] sm:$0xf]  ;;  %v8772_v38 = vor.u32 %v9333_v41, %v8769_v53  ;;  %v8624_v39 = vor.u32 %v9299_v46, %v8623_v32 }
 0xaaf   :  { %6633 = vmatmul.bf16.vlgmr.msrb.gmra.mxu1 %v12265_v26  ;;  %v8625_v25 = vld [vmem:[#allocation7 + $0x78] sm:$0xf0]  ;;  %v8607_v9 = vld [vmem:[#allocation7 + $0x48] sm:$0xf]  ;;  %v8752_v44 = vor.u32 %v9331_v3, %v8751_v45  ;;  %v9329_v15 = vld [vmem:[#allocation7 + $0x16c] sm:$0xf] }
 0xab0   :  { %6677 = vmatpush.bf16.msra.mxu1 %v8688_v56  ;;  %6646 = vmatmul.bf16.vlgmr.msra.gmra.mxu2 %v12261_v5  ;;  %v8753_v27 = vld [vmem:[#allocation7 + $0x178] sm:$0xf0]  ;;  %v8628_v33 = vor.u32 %v9297_v37, %v8625_v25  ;;  %v9295_v8 = vld [vmem:[#allocation7 + $0x54] sm:$0xf0]  ;;  %v8735_v13 = vld [vmem:[#allocation7 + $0x148] sm:$0xf] }
 0xab1   :  { %6690 = vmatpush.bf16.msrb.mxu2 %v8816_v30  ;;  %6671 = vmatpush.bf16.msra.mxu0 %v8700_v23  ;;  %v9327_v7 = vld [vmem:[#allocation7 + $0x154] sm:$0xf0]  ;;  %v9293_v62 = vld [vmem:[#allocation7 + $0x4c] sm:$0xf]  ;;  %v8609_v54 = vld [vmem:[#allocation7 + $0x58] sm:$0xf0]  ;;  %v8756_v10 = vor.u32 %v9329_v15, %v8753_v27  ;;  %v8608_v2 = vor.u32 %v9295_v8, %v8607_v9 }
 0xab2   :  { %6703 = vmatpush.bf16.msrb.mxu3 %v8692_v57  ;;  %v8736_v56 = vor.u32 %v9327_v7, %v8735_v13  ;;  %v8591_v30 = vld [vmem:[#allocation7 + $0x28] sm:$0xf]  ;;  %v9325_v35 = vld [vmem:[#allocation7 + $0x14c] sm:$0xf]  ;;  %v8737_v24 = vld [vmem:[#allocation7 + $0x158] sm:$0xf0]  ;;  %v8612_v42 = vor.u32 %v9293_v62, %v8609_v54 }
 0xab3   :  { %6659 = vmatmul.bf16.vlgmr.msra.gmra.mxu3 %v12265_v26  ;;  %v9291_v57 = vld [vmem:[#allocation7 + $0x34] sm:$0xf0]  ;;  %v8719_v49 = vld [vmem:[#allocation7 + $0x128] sm:$0xf]  ;;  %v9289_v31 = vld [vmem:[#allocation7 + $0x2c] sm:$0xf]  ;;  %v8740_v11 = vor.u32 %v9325_v35, %v8737_v24 }
 0xab4   :  { %6678 = vmatpush.bf16.msra.mxu1 %v8672_v17  ;;  %6672 = vmatmul.bf16.vlgmr.msra.gmra.mxu0 %v12261_v5  ;;  %v9323_v40 = vld [vmem:[#allocation7 + $0x134] sm:$0xf0]  ;;  %v8593_v36 = vld [vmem:[#allocation7 + $0x38] sm:$0xf0]  ;;  %v8592_v23 = vor.u32 %v9291_v57, %v8591_v30  ;;  %v8575_v17 = vld [vmem:[#allocation7 + $0x8] sm:$0xf] }
 0xab5   :  { %6716 = vmatpush.bf16.msrb.mxu0 %v8820_v50  ;;  %6691 = vmatpush.bf16.msrb.mxu2 %v8800_v6  ;;  %v8720_v50 = vor.u32 %v9323_v40, %v8719_v49  ;;  %v9321_v6 = vld [vmem:[#allocation7 + $0x12c] sm:$0xf]  ;;  %v8721_v29 = vld [vmem:[#allocation7 + $0x138] sm:$0xf0]  ;;  %v8596_v60 = vor.u32 %v9289_v31, %v8593_v36  ;;  %v9287_v16 = vld [vmem:[#allocation7 + $0x14] sm:$0xf0] }
 0xab6   :  { %6704 = vmatpush.bf16.msrb.mxu3 %v8676_v58  ;;  %v8703_v58 = vld [vmem:[#allocation7 + $0x108] sm:$0xf]  ;;  %v9319_v4 = vld [vmem:[#allocation7 + $0x114] sm:$0xf0]  ;;  %v9285_v61 = vld [vmem:[#allocation7 + $0xc] sm:$0xf]  ;;  %v8724_v47 = vor.u32 %v9321_v6, %v8721_v29  ;;  %v8576_v22 = vor.u32 %v9287_v16, %v8575_v17 }
 0xab7   :  { %v8577_v34 = vld [vmem:[#allocation7 + $0x18] sm:$0xf0]  ;;  %v9355_v55 = vld [vmem:[%s12392_s12 + $0x38] sm:$0xff]  ;;  %v9353_v0 = vld [vmem:[%s12392_s12 + $0x28] sm:$0xff]  ;;  %vm7068_vm2 = vcmask 25600  }
 0xab8   :  { %6679 = vmatpush.bf16.msra.mxu1 %v8656_v51  ;;  %v8580_v51 = vor.u32 %v9285_v61, %v8577_v34  ;;  %v8705_v43 = vld [vmem:[#allocation7 + $0x118] sm:$0xf0]  ;;  %v9363_v63 = vld [vmem:[%s12392_s12 + $0x78] sm:$0xff]  ;;  %v9361_v21 = vld [vmem:[%s12392_s12 + $0x68] sm:$0xff] }
 0xab9   :  { %6717 = vmatpush.bf16.msrb.mxu0 %v8804_v1  ;;  %6692 = vmatpush.bf16.msrb.mxu2 %v8784_v20  ;;  %v8704_v1 = vor.u32 %v9319_v4, %v8703_v58  ;;  %v9317_v20 = vld [vmem:[#allocation7 + $0x10c] sm:$0xf]  ;;  %v9354_v12 = vld [vmem:[%s12392_s12 + $0x30] sm:$0xff]  ;;  %v9371_v41 = vld [vmem:[%s12392_s12 + $0xb8] sm:$0xff] }
 0xaba   :  { %6705 = vmatpush.bf16.msrb.mxu3 %v8660_v19  ;;  %v8708_v19 = vor.u32 %v9317_v20, %v8705_v43  ;;  %v9362_v28 = vld [vmem:[%s12392_s12 + $0x70] sm:$0xff]  ;;  %v9352_v14 = vld [vmem:[%s12392_s12 + $0x20] sm:$0xff]  ;;  %v9379_v53 = vld [vmem:[%s12392_s12 + $0xf8] sm:$0xff] }
 0xabb   :  { %v9358_v32 = vld [vmem:[%s12392_s12 + $0x50] sm:$0xff]  ;;  %v9357_v46 = vld [vmem:[%s12392_s12 + $0x48] sm:$0xff]  ;;  %v9356_v37 = vld [vmem:[%s12392_s12 + $0x40] sm:$0xff] }
 0xabc   :  { %6680 = vmatpush.bf16.msra.mxu1 %v8640_v18  ;;  %v9350_v18 = vld [vmem:[%s12392_s12 + $0x10] sm:$0xff]  ;;  %v9369_v25 = vld [vmem:[%s12392_s12 + $0xa8] sm:$0xff]  ;;  %v9368_v9 = vld [vmem:[%s12392_s12 + $0xa0] sm:$0xff] }
 0xabd   :  { %6718 = vmatpush.bf16.msrb.mxu0 %v8788_v48  ;;  %6693 = vmatpush.bf16.msrb.mxu2 %v8768_v52  ;;  %v9351_v48 = vld [vmem:[%s12392_s12 + $0x18] sm:$0xff]  ;;  %v9349_v52 = vld [vmem:[%s12392_s12 + $0x8] sm:$0xff]  ;;  %v9370_v45 = vld [vmem:[%s12392_s12 + $0xb0] sm:$0xff] }
 0xabe   :  { %6706 = vmatpush.bf16.msrb.mxu3 %v8644_v59  ;;  %v9348_v59 = vld [vmem:[%s12392_s12] sm:$0xff]  ;;  %v9378_v3 = vld [vmem:[%s12392_s12 + $0xf0] sm:$0xff]  ;;  %v9375_v27 = vld [vmem:[%s12392_s12 + $0xd8] sm:$0xff] }
 0xabf   :  { %v6295_v15 = vld [vmem:[%s12391_s11] sm:$0xf]  ;;  %v9374_v8 = vld [vmem:[%s12392_s12 + $0xd0] sm:$0xff]  ;;  %v9365_v62 = vld [vmem:[%s12392_s12 + $0x88] sm:$0xff] }
 0xac0   :  { %6681 = vmatpush.bf16.msra.mxu1 %v8624_v39  ;;  %v9376_v39 = vld [vmem:[%s12392_s12 + $0xe0] sm:$0xff]  ;;  %v6297_v13 = vperm.slane %v6295_v15, 0  ;;  %v6300_v4 = vperm.slane %v6295_v15, 3 }
 0xac1   :  { %6719 = vmatpush.bf16.msrb.mxu0 %v8772_v38  ;;  %6694 = vmatpush.bf16.msrb.mxu2 %v8752_v44  ;;  %v9377_v38 = vld [vmem:[%s12392_s12 + $0xe8] sm:$0xff]  ;;  %v9367_v44 = vld [vmem:[%s12392_s12 + $0x98] sm:$0xff]  ;;  %v9364_v35 = vld [vmem:[%s12392_s12 + $0x80] sm:$0xff] }
 0xac2   :  { %6707 = vmatpush.bf16.msrb.mxu3 %v8628_v33  ;;  %v9366_v33 = vld [vmem:[%s12392_s12 + $0x90] sm:$0xff]  ;;  %v9372_v40 = vld [vmem:[%s12392_s12 + $0xc0] sm:$0xff] }
 0xac4   :  { %6682 = vmatpush.bf16.msra.mxu1 %v8608_v2  ;;  %v6298_v2 = vperm.slane %v6295_v15, 1 }
 0xac5   :  { %6720 = vmatpush.bf16.msrb.mxu0 %v8756_v10  ;;  %6695 = vmatpush.bf16.msrb.mxu2 %v8736_v56  ;;  %v9373_v56 = vld [vmem:[%s12392_s12 + $0xc8] sm:$0xff] }
 0xac6   :  { %6708 = vmatpush.bf16.msrb.mxu3 %v8612_v42 }
 0xac8   :  { %6683 = vmatpush.bf16.msra.mxu1 %v8592_v23 }
 0xac9   :  { %6721 = vmatpush.bf16.msrb.mxu0 %v8740_v11  ;;  %6696 = vmatpush.bf16.msrb.mxu2 %v8720_v50 }
 0xaca   :  { %6709 = vmatpush.bf16.msrb.mxu3 %v8596_v60  ;;  %v6299_v60 = vperm.slane %v6295_v15, 2 }
 0xacc   :  { %6684 = vmatpush.bf16.msra.mxu1 %v8576_v22 }
 0xacd   :  { %6722 = vmatpush.bf16.msrb.mxu0 %v8724_v47  ;;  %6697 = vmatpush.bf16.msrb.mxu2 %v8704_v1 }
 0xace   :  { %6710 = vmatpush.bf16.msrb.mxu3 %v8580_v51 }
 0xacf   :  { %6685 = vmatmul.bf16.vlgmr.msra.gmra.mxu1 %v12265_v26 }
 0xad0   :  { %6997 = vmatpush.bf16.msrb.mxu1 %v9355_v55  ;;  %6698 = vmatmul.bf16.vlgmr.msrb.gmra.mxu2 %v12261_v5 }
 0xad1   :  { %7010 = vmatpush.bf16.msra.mxu2 %v9363_v63  ;;  %6711 = vmatmul.bf16.vlgmr.msrb.gmra.mxu3 %v12265_v26  ;;  %v9360_v26 = vld [vmem:[%s12392_s12 + $0x60] sm:$0xff] }
 0xad2   :  { %6723 = vmatpush.bf16.msrb.mxu0 %v8708_v19  ;;  %7023 = vmatpush.bf16.msra.mxu3 %v9371_v41 }
 0xad4   :  { %6998 = vmatpush.bf16.msrb.mxu1 %v9354_v12 }
 0xad5   :  { %7011 = vmatpush.bf16.msra.mxu2 %v9362_v28  ;;  %6724 = vmatmul.bf16.vlgmr.msrb.gmra.mxu0 %v12261_v5  ;;  %v9359_v5 = vld [vmem:[%s12392_s12 + $0x58] sm:$0xff] }
 0xad6   :  { %7036 = vmatpush.bf16.msra.mxu0 %v9379_v53  ;;  %7024 = vmatpush.bf16.msra.mxu3 %v9370_v45 }
 0xad8   :  { %6999 = vmatpush.bf16.msrb.mxu1 %v9353_v0 }
 0xad9   :  { %7012 = vmatpush.bf16.msra.mxu2 %v9361_v21 }
 0xada   :  { %7037 = vmatpush.bf16.msra.mxu0 %v9378_v3  ;;  %7025 = vmatpush.bf16.msra.mxu3 %v9369_v25 }
 0xadc   :  { %7000 = vmatpush.bf16.msrb.mxu1 %v9352_v14 }
 0xadd   :  { %7013 = vmatpush.bf16.msra.mxu2 %v9360_v26 }
 0xade   :  { %7038 = vmatpush.bf16.msra.mxu0 %v9377_v38  ;;  %7026 = vmatpush.bf16.msra.mxu3 %v9368_v9 }
 0xae0   :  { %7001 = vmatpush.bf16.msrb.mxu1 %v9351_v48 }
 0xae1   :  { %7014 = vmatpush.bf16.msra.mxu2 %v9359_v5  ;;  %v9662_v5 = vld [vmem:[%s12393_s13] ss:$0 sm:$0xff] }
 0xae2   :  { %7039 = vmatpush.bf16.msra.mxu0 %v9376_v39  ;;  %7027 = vmatpush.bf16.msra.mxu3 %v9367_v44 }
 0xae4   :  { %7002 = vmatpush.bf16.msrb.mxu1 %v9350_v18 }
 0xae5   :  { %7015 = vmatpush.bf16.msra.mxu2 %v9358_v32 }
 0xae6   :  { %7040 = vmatpush.bf16.msra.mxu0 %v9375_v27  ;;  %7028 = vmatpush.bf16.msra.mxu3 %v9366_v33 }
 0xae8   :  { %7003 = vmatpush.bf16.msrb.mxu1 %v9349_v52 }
 0xae9   :  { %7016 = vmatpush.bf16.msra.mxu2 %v9357_v46 }
 0xaea   :  { %7041 = vmatpush.bf16.msra.mxu0 %v9374_v8  ;;  %7029 = vmatpush.bf16.msra.mxu3 %v9365_v62 }
 0xaec   :  { %7004 = vmatpush.bf16.msrb.mxu1 %v9348_v59 }
 0xaed   :  { %7017 = vmatpush.bf16.msra.mxu2 %v9356_v37 }
 0xaee   :  { %7042 = vmatpush.bf16.msra.mxu0 %v9373_v56  ;;  %7030 = vmatpush.bf16.msra.mxu3 %v9364_v35 }
 0xaf2   :  { %7043 = vmatpush.bf16.msra.mxu0 %v9372_v40 }
 0xb2c   :  { %v6634_v7 = vpop.f32.mrf.mxu1 }
 0xb2d   :  { %v6635_v54 = vadd.f32 %v6634_v7, %v6297_v13 }
 0xb31   :  { %v6673_v10 = vpop.f32.mrf.mxu0 }
 0xb33   :  { %v6647_v30 = vpop.f32.mrf.mxu2 }
 0xb34   :  { %v6648_v24 = vadd.f32 %v6647_v30, %v6635_v54  ;;  %v6636_v57 = vpop.f32.mrf.mxu1 }
 0xb36   :  { %v6660_v42 = vpop.f32.mrf.mxu3  ;;  %v6729_v31 = vmax.f32 %v6648_v24, 0.0 }
 0xb37   :  { %v6661_v49 = vadd.f32 %v6660_v42, %v6298_v2 }
 0xb38   :  { %v6733_v11 = vpack.c.bf16 %v6729_v31, %v6729_v31 }
 0xb39   :  { %v6674_v36 = vadd.f32 %v6673_v10, %v6661_v49  ;;  %v6675_v23 = vpop.f32.mrf.mxu0 }
 0xb3a   :  { %7005 = vmatmul.bf16.vlgmr.msrb.gmra.mxu1 %v6733_v11 }
 0xb3b   :  { %v6730_v50 = vmax.f32 %v6674_v36, 0.0  ;;  %v6649_v6 = vpop.f32.mrf.mxu2 }
 0xb3d   :  { %v6734_v17 = vpack.c.bf16 %v6730_v50, %v6730_v50 }
 0xb3e   :  { %v6662_v29 = vpop.f32.mrf.mxu3 }
 0xb3f   :  { %7018 = vmatmul.bf16.vlgmr.msra.gmra.mxu2 %v6734_v17 }
 0xb4c   :  { %v6686_v16 = vpop.f32.mrf.mxu1 }
 0xb4d   :  { %v6687_v58 = vadd.f32 %v6686_v16, %v6299_v60 }
 0xb52   :  { %v6725_v61 = vpop.f32.mrf.mxu0 }
 0xb53   :  { %v6699_v34 = vpop.f32.mrf.mxu2 }
 0xb54   :  { %v6700_v47 = vadd.f32 %v6699_v34, %v6687_v58  ;;  %v6712_v22 = vpop.f32.mrf.mxu3  ;;  %v6688_v51 = vpop.f32.mrf.mxu1 }
 0xb55   :  { %v6713_v1 = vadd.f32 %v6712_v22, %v6300_v4 }
 0xb56   :  { %v6731_v20 = vmax.f32 %v6700_v47, 0.0 }
 0xb57   :  { %v6726_v43 = vadd.f32 %v6725_v61, %v6713_v1 }
 0xb58   :  { %v6735_v55 = vpack.c.bf16 %v6731_v20, %v6731_v20 }
 0xb59   :  { %v6732_v63 = vmax.f32 %v6726_v43, 0.0 }
 0xb5a   :  { %v6727_v19 = vpop.f32.mrf.mxu0  ;;  %7031 = vmatmul.bf16.vlgmr.msra.gmra.mxu3 %v6735_v55 }
 0xb5b   :  { %v6736_v12 = vpack.c.bf16 %v6732_v63, %v6732_v63  ;;  %v6701_v28 = vpop.f32.mrf.mxu2 }
 0xb5c   :  { %v6714_v0 = vpop.f32.mrf.mxu3 }
 0xb5d   :  { %7044 = vmatmul.bf16.vlgmr.msra.gmra.mxu0 %v6736_v12 }
 0xbb7   :  { %v7006_v21 = vpop.f32.mrf.mxu1 }
 0xbb8   :  { %v7007_v18 = vadd.f32 %v9662_v5, %v7006_v21 }
 0xbbf   :  { %v7008_v14 = vpop.f32.mrf.mxu1 }
 0xbc2   :  { %v7019_v26 = vpop.f32.mrf.mxu2 }
 0xbc3   :  { %v7020_v32 = vadd.f32 %v7019_v26, %v7007_v18 }
 0xbca   :  { %v7021_v48 = vpop.f32.mrf.mxu2 }
 0xbda   :  { %v7045_v52 = vpop.f32.mrf.mxu0 }
 0xbdd   :  { %v7032_v41 = vpop.f32.mrf.mxu3 }
 0xbde   :  { %v7033_v53 = vadd.f32 %v7032_v41, %v7020_v32 }
 0xbe0   :  { %v7046_v59 = vadd.f32 %v7045_v52, %v7033_v53 }
 0xbe2   :  { %v7049_v46 = vsub.f32 0.0, %v7046_v59  ;;  %v7047_v45 = vpop.f32.mrf.mxu0 }
 0xbe4   :  { %v7050_v3 = vmul.f32 1.442695, %v7049_v46 }
 0xbe5   :  { %v7034_v37 = vpop.f32.mrf.mxu3 }
 0xbe6   :  { %9663 = vpow2.f32 %v7050_v3 }
 0xbec   :  { %v9664_v25 = vpop.eup %9663 }
 0xbed   :  { %v7052_v38 = vadd.f32 1.0, %v9664_v25 }
 0xbef   :  { %9665 = vrcp.f32 %v7052_v38  ;;  %v7064_v15 = vand.u32 2147483648, %v7052_v38  ;;  %v7062_v33 = vand.u32 2147483647, %v7052_v38  ;;  %vm7058_vm0 = vweird.f32 %v7052_v38 }
 0xbf1   :  { %v7065_v13 = vor.u32 1.1754944e-38, %v7064_v15  ;;  %vm7063_vm3 = vcmp.eq.f32.partialorder %v7062_v33, 8.507059e+37 }
 0xbf5   :  { %v9666_v9 = vpop.eup %9665 }
 0xbf6   :  { %v7054_v39 = vmul.f32 %v9666_v9, %v7052_v38  ;;  %vm7059_vm15 = vweird.f32 %v9666_v9 }
 0xbf7   :  { %vm7060_vm1 = vmor %vm7058_vm0, %vm7059_vm15 }
 0xbf8   :  { %v7055_v44 = vsub.f32 1.0, %v7054_v39 }
 0xbfa   :  { %v7056_v27 = vmul.f32 %v9666_v9, %v7055_v44 }
 0xbfc   :  { %v7057_v8 = vadd.f32 %v9666_v9, %v7056_v27 }
 0xbfe   :  { %v7061_v7 = vsel %vm7060_vm1, %v9666_v9, %v7057_v8 }
 0xbff   :  { %v7066_v62 = vsel %vm7063_vm3, %v7065_v13, %v7061_v7 }
 0xc00   :  { %7069 = vst.msk [vmem:[%s12397_s17] sm:$0x3] %vm7068_vm2, %v7066_v62 }
 0xc01   :  { %7074 = vsyncpa [#allocation10], 1 }
 0xc02   :  { %7075 = vsyncpa [#allocation12], 1 }
 0xc03   :  { %7076 = vsyncmov [#allocation8] }
 0xc06   :  { %s7077_s25 = vpop.sfrf %7076 }
 0xc07   :  { %p8949_p0 = scmp.ne.s32.totalorder %s7077_s25, 0 }
 0xc09   :  { %7081 = shalt.err (%p8949_p0)  }
 0xc0a   :  { %7083 = vsyncmov [#allocation8 + $0x1] }
 0xc0d   :  { %s7084_s26 = vpop.sfrf %7083 }
 0xc0e   :  { %p8950_p1 = scmp.ne.s32.totalorder %s7084_s26, 0 }
 0xc10   :  { %7088 = shalt.err (%p8950_p1)  }
 0xc11   :  { %7090 = vsyncmov [#allocation8 + $0x2] }
 0xc14   :  { %s7091_s4 = vpop.sfrf %7090 }
 0xc15   :  { %p8951_p2 = scmp.ne.s32.totalorder %s7091_s4, 0 }
 0xc17   :  { %7095 = shalt.err (%p8951_p2)  }

</bundles_post_ra>
